<compile_context>
chip_gen: v7x
topology: tpu7x:2x2x1
jax: 0.10.0
libtpu: 0.0.40
codegen_flags: <defaults>
</compile_context>

<pallas_src>
import jax
import jax.numpy as jnp
from jax.experimental import pallas as pl
from jax.experimental.pallas import tpu as pltpu

EPS = 1e-5
LANE = 128
DIMS = [28 * 28, 128, 64, 36, 9, 18, 36, 64, 128, 28 * 28]
N_LAYERS = len(DIMS) - 1
PAD_DIMS = [((d + LANE - 1) // LANE) * LANE for d in DIMS]   # [896,128,128,...,128,896]


# ----------------------------- fused Pallas kernel ----------------------------- #

def fused_autoencoder_kernel(*refs):
    """refs = (x, w0, b0, g0, beta0, ..., w7, b7, g7, beta7, w8, b8, out).

    Weights are bf16 [Pin, Pout]; bias/gamma/beta are f32 [1, Pout]; x/out are f32.
    All feature dims are lane-padded; padded columns remain exactly zero.
    """
    x_ref = refs[0]
    o_ref = refs[-1]
    p = refs[1:-1]

    h = x_ref[...]                                           # f32 [B, 896]
    idx = 0
    for li in range(N_LAYERS):
        w = p[idx][...]                                      # bf16 [Pin, Pout]
        b = p[idx + 1][...]                                  # f32  [1, Pout]
        idx += 2
        # Linear: bf16 operands, f32 MXU accumulate.
        y = jnp.dot(h.astype(jnp.bfloat16), w,
                    preferred_element_type=jnp.float32) + b
        if li < N_LAYERS - 1:
            g = p[idx][...]                                  # f32 [1, Pout] (0 on padding)
            beta = p[idx + 1][...]                           # f32 [1, Pout]
            idx += 2
            # BatchNorm1d (training mode): batch mean, biased variance, all f32.
            mean = jnp.mean(y, axis=0, keepdims=True)
            var = jnp.mean((y - mean) ** 2, axis=0, keepdims=True)
            # Fold affine into one scale/shift -> one FMA per element on the big tile.
            scale = g * jax.lax.rsqrt(var + EPS)             # [1, Pout]
            shift = beta - mean * scale                      # [1, Pout]
            h = jnp.maximum(y * scale + shift, 0.0)          # BN + ReLU
        else:
            h = jax.nn.sigmoid(y)                            # final Sigmoid
    o_ref[...] = h


# ------------------------------- call wrapper ---------------------------------- #

def autoencoder_forward(x, params):
    B = x.shape[0]
    xp = jnp.pad(x, ((0, 0), (0, PAD_DIMS[0] - DIMS[0])))     # 784 -> 896, zeros
    vmem = pl.BlockSpec(memory_space=pltpu.MemorySpace.VMEM)  # whole array in VMEM, no grid
    out = pl.pallas_call(
        fused_autoencoder_kernel,
        out_shape=jax.ShapeDtypeStruct((B, PAD_DIMS[-1]), jnp.float32),
        in_specs=[vmem] * (1 + len(params)),
        out_specs=vmem,
        compiler_params=pltpu.CompilerParams(vmem_limit_bytes=64 << 20),
    )(xp, *params)
    return out[:, :DIMS[-1]]                                  # drop lane padding


# ------------------------------ parameter init --------------------------------- #

def init_params(key):
    """PyTorch-default inits, zero-padded to lane multiples. Flat list in kernel order."""
    params = []
    keys = jax.random.split(key, 2 * N_LAYERS)
    for li in range(N_LAYERS):
        fin, fout = DIMS[li], DIMS[li + 1]
        pin, pout = PAD_DIMS[li], PAD_DIMS[li + 1]
        bound = 1.0 / (fin ** 0.5)                            # nn.Linear default range
        w = jax.random.uniform(keys[2 * li], (fin, fout), jnp.float32, -bound, bound)
        b = jax.random.uniform(keys[2 * li + 1], (1, fout), jnp.float32, -bound, bound)
        w_p = jnp.zeros((pin, pout), jnp.float32).at[:fin, :fout].set(w).astype(jnp.bfloat16)
        b_p = jnp.pad(b, ((0, 0), (0, pout - fout)))
        params += [w_p, b_p]
        if li < N_LAYERS - 1:                                 # BN after every layer but last
            g_p = jnp.pad(jnp.ones((1, fout), jnp.float32), ((0, 0), (0, pout - fout)))
            beta_p = jnp.zeros((1, pout), jnp.float32)
            params += [g_p, beta_p]
    return params


# --------------------------- pure-JAX reference -------------------------------- #

def reference_forward(x, params):
    """Standard (unfused) BN formulation; same bf16-weight matmul precision."""
    h = jnp.pad(x, ((0, 0), (0, PAD_DIMS[0] - DIMS[0])))
    idx = 0
    for li in range(N_LAYERS):
        w, b = params[idx], params[idx + 1]
        idx += 2
        y = jnp.dot(h.astype(jnp.bfloat16), w, preferred_element_type=jnp.float32) + b
        if li < N_LAYERS - 1:
            g, beta = params[idx], params[idx + 1]
            idx += 2
            mean = jnp.mean(y, axis=0, keepdims=True)
            var = jnp.mean((y - mean) ** 2, axis=0, keepdims=True)
            y = (y - mean) * jax.lax.rsqrt(var + EPS) * g + beta
            h = jnp.maximum(y, 0.0)
        else:
            h = jax.nn.sigmoid(y)
    return h[:, :DIMS[-1]]


# ------------------------------------ main -------------------------------------- #

if __name__ == "__main__":
    key = jax.random.PRNGKey(0)
    k_x, k_p = jax.random.split(key)

    B = 128                                  # fills MXU rows; BN stats over whole batch
    x = jax.random.uniform(k_x, (B, 28 * 28), jnp.float32)   # [batch, 784]
    params = init_params(k_p)

    fwd = jax.jit(autoencoder_forward)
    out = fwd(x, params)
    jax.block_until_ready(out)

    ref = reference_forward(x, params)

    assert out.shape == (B, 28 * 28)
    assert bool(jnp.all(jnp.isfinite(out)))
    assert bool(jnp.all((out >= 0.0) & (out <= 1.0)))        # sigmoid output range
    assert bool(jnp.max(jnp.abs(out - ref)) < 2e-2)          # matches pure-JAX reference

    print("KERNEL_OK")
</pallas_src>

<mosaic_0001>
module attributes {stable_mosaic.version = 11 : i64} {
  func.func @fused_autoencoder_kernel(%arg0: memref<128x896xf32, #tpu.memory_space<vmem>>, %arg1: memref<896x128xbf16, #tpu.memory_space<vmem>>, %arg2: memref<1x128xf32, #tpu.memory_space<vmem>>, %arg3: memref<1x128xf32, #tpu.memory_space<vmem>>, %arg4: memref<1x128xf32, #tpu.memory_space<vmem>>, %arg5: memref<128x128xbf16, #tpu.memory_space<vmem>>, %arg6: memref<1x128xf32, #tpu.memory_space<vmem>>, %arg7: memref<1x128xf32, #tpu.memory_space<vmem>>, %arg8: memref<1x128xf32, #tpu.memory_space<vmem>>, %arg9: memref<128x128xbf16, #tpu.memory_space<vmem>>, %arg10: memref<1x128xf32, #tpu.memory_space<vmem>>, %arg11: memref<1x128xf32, #tpu.memory_space<vmem>>, %arg12: memref<1x128xf32, #tpu.memory_space<vmem>>, %arg13: memref<128x128xbf16, #tpu.memory_space<vmem>>, %arg14: memref<1x128xf32, #tpu.memory_space<vmem>>, %arg15: memref<1x128xf32, #tpu.memory_space<vmem>>, %arg16: memref<1x128xf32, #tpu.memory_space<vmem>>, %arg17: memref<128x128xbf16, #tpu.memory_space<vmem>>, %arg18: memref<1x128xf32, #tpu.memory_space<vmem>>, %arg19: memref<1x128xf32, #tpu.memory_space<vmem>>, %arg20: memref<1x128xf32, #tpu.memory_space<vmem>>, %arg21: memref<128x128xbf16, #tpu.memory_space<vmem>>, %arg22: memref<1x128xf32, #tpu.memory_space<vmem>>, %arg23: memref<1x128xf32, #tpu.memory_space<vmem>>, %arg24: memref<1x128xf32, #tpu.memory_space<vmem>>, %arg25: memref<128x128xbf16, #tpu.memory_space<vmem>>, %arg26: memref<1x128xf32, #tpu.memory_space<vmem>>, %arg27: memref<1x128xf32, #tpu.memory_space<vmem>>, %arg28: memref<1x128xf32, #tpu.memory_space<vmem>>, %arg29: memref<128x128xbf16, #tpu.memory_space<vmem>>, %arg30: memref<1x128xf32, #tpu.memory_space<vmem>>, %arg31: memref<1x128xf32, #tpu.memory_space<vmem>>, %arg32: memref<1x128xf32, #tpu.memory_space<vmem>>, %arg33: memref<128x896xbf16, #tpu.memory_space<vmem>>, %arg34: memref<1x896xf32, #tpu.memory_space<vmem>>, %arg35: memref<128x896xf32, #tpu.memory_space<vmem>>) attributes {dimension_semantics = [], scalar_prefetch = 0 : i64, scratch_operands = 0 : i64, tpu.core_type = #tpu.core_type<tc>} {
    %c0 = arith.constant 0 : index
    %c0_0 = arith.constant 0 : index
    %0 = vector.load %arg0[%c0, %c0_0] : memref<128x896xf32, #tpu.memory_space<vmem>>, vector<128x896xf32>
    %c0_1 = arith.constant 0 : index
    %c0_2 = arith.constant 0 : index
    %1 = vector.load %arg1[%c0_1, %c0_2] : memref<896x128xbf16, #tpu.memory_space<vmem>>, vector<896x128xbf16>
    %c0_3 = arith.constant 0 : index
    %c0_4 = arith.constant 0 : index
    %2 = vector.load %arg2[%c0_3, %c0_4] : memref<1x128xf32, #tpu.memory_space<vmem>>, vector<1x128xf32>
    %3 = arith.truncf %0 : vector<128x896xf32> to vector<128x896xbf16>
    %cst = arith.constant dense<0.000000e+00> : vector<128x128xf32>
    %4 = tpu.matmul %3, %1, %cst {dimension_numbers = #tpu.dot_dimension_numbers<[1], [0], [0], [1], [0, 0, 1, 1], [], []>} : vector<128x896xbf16>, vector<896x128xbf16>, vector<128x128xf32> -> vector<128x128xf32>
    %5 = vector.broadcast %2 : vector<1x128xf32> to vector<128x128xf32>
    %6 = arith.addf %4, %5 : vector<128x128xf32>
    %c0_5 = arith.constant 0 : index
    %c0_6 = arith.constant 0 : index
    %7 = vector.load %arg3[%c0_5, %c0_6] : memref<1x128xf32, #tpu.memory_space<vmem>>, vector<1x128xf32>
    %c0_7 = arith.constant 0 : index
    %c0_8 = arith.constant 0 : index
    %8 = vector.load %arg4[%c0_7, %c0_8] : memref<1x128xf32, #tpu.memory_space<vmem>>, vector<1x128xf32>
    %cst_9 = arith.constant dense<0.000000e+00> : vector<128xf32>
    %9 = vector.multi_reduction <add>, %6, %cst_9 [0] : vector<128x128xf32> to vector<128xf32>
    %10 = vector.shape_cast %9 : vector<128xf32> to vector<1x128xf32>
    %cst_10 = arith.constant 1.280000e+02 : f32
    %11 = vector.broadcast %cst_10 : f32 to vector<1x128xf32>
    %12 = arith.divf %10, %11 : vector<1x128xf32>
    %13 = vector.broadcast %12 : vector<1x128xf32> to vector<128x128xf32>
    %14 = arith.subf %6, %13 : vector<128x128xf32>
    %15 = arith.mulf %14, %14 : vector<128x128xf32>
    %cst_11 = arith.constant dense<0.000000e+00> : vector<128xf32>
    %16 = vector.multi_reduction <add>, %15, %cst_11 [0] : vector<128x128xf32> to vector<128xf32>
    %17 = vector.shape_cast %16 : vector<128xf32> to vector<1x128xf32>
    %cst_12 = arith.constant 1.280000e+02 : f32
    %18 = vector.broadcast %cst_12 : f32 to vector<1x128xf32>
    %19 = arith.divf %17, %18 : vector<1x128xf32>
    %cst_13 = arith.constant 9.99999974E-6 : f32
    %20 = vector.broadcast %cst_13 : f32 to vector<1x128xf32>
    %21 = arith.addf %19, %20 : vector<1x128xf32>
    %22 = math.rsqrt %21 : vector<1x128xf32>
    %23 = arith.mulf %7, %22 : vector<1x128xf32>
    %24 = arith.mulf %12, %23 : vector<1x128xf32>
    %25 = arith.subf %8, %24 : vector<1x128xf32>
    %26 = vector.broadcast %23 : vector<1x128xf32> to vector<128x128xf32>
    %27 = arith.mulf %6, %26 : vector<128x128xf32>
    %28 = vector.broadcast %25 : vector<1x128xf32> to vector<128x128xf32>
    %29 = arith.addf %27, %28 : vector<128x128xf32>
    %cst_14 = arith.constant 0.000000e+00 : f32
    %30 = vector.broadcast %cst_14 : f32 to vector<128x128xf32>
    %31 = arith.maximumf %29, %30 : vector<128x128xf32>
    %c0_15 = arith.constant 0 : index
    %c0_16 = arith.constant 0 : index
    %32 = vector.load %arg5[%c0_15, %c0_16] : memref<128x128xbf16, #tpu.memory_space<vmem>>, vector<128x128xbf16>
    %c0_17 = arith.constant 0 : index
    %c0_18 = arith.constant 0 : index
    %33 = vector.load %arg6[%c0_17, %c0_18] : memref<1x128xf32, #tpu.memory_space<vmem>>, vector<1x128xf32>
    %34 = arith.truncf %31 : vector<128x128xf32> to vector<128x128xbf16>
    %cst_19 = arith.constant dense<0.000000e+00> : vector<128x128xf32>
    %35 = tpu.matmul %34, %32, %cst_19 {dimension_numbers = #tpu.dot_dimension_numbers<[1], [0], [0], [1], [0, 0, 1, 1], [], []>} : vector<128x128xbf16>, vector<128x128xbf16>, vector<128x128xf32> -> vector<128x128xf32>
    %36 = vector.broadcast %33 : vector<1x128xf32> to vector<128x128xf32>
    %37 = arith.addf %35, %36 : vector<128x128xf32>
    %c0_20 = arith.constant 0 : index
    %c0_21 = arith.constant 0 : index
    %38 = vector.load %arg7[%c0_20, %c0_21] : memref<1x128xf32, #tpu.memory_space<vmem>>, vector<1x128xf32>
    %c0_22 = arith.constant 0 : index
    %c0_23 = arith.constant 0 : index
    %39 = vector.load %arg8[%c0_22, %c0_23] : memref<1x128xf32, #tpu.memory_space<vmem>>, vector<1x128xf32>
    %cst_24 = arith.constant dense<0.000000e+00> : vector<128xf32>
    %40 = vector.multi_reduction <add>, %37, %cst_24 [0] : vector<128x128xf32> to vector<128xf32>
    %41 = vector.shape_cast %40 : vector<128xf32> to vector<1x128xf32>
    %cst_25 = arith.constant 1.280000e+02 : f32
    %42 = vector.broadcast %cst_25 : f32 to vector<1x128xf32>
    %43 = arith.divf %41, %42 : vector<1x128xf32>
    %44 = vector.broadcast %43 : vector<1x128xf32> to vector<128x128xf32>
    %45 = arith.subf %37, %44 : vector<128x128xf32>
    %46 = arith.mulf %45, %45 : vector<128x128xf32>
    %cst_26 = arith.constant dense<0.000000e+00> : vector<128xf32>
    %47 = vector.multi_reduction <add>, %46, %cst_26 [0] : vector<128x128xf32> to vector<128xf32>
    %48 = vector.shape_cast %47 : vector<128xf32> to vector<1x128xf32>
    %cst_27 = arith.constant 1.280000e+02 : f32
    %49 = vector.broadcast %cst_27 : f32 to vector<1x128xf32>
    %50 = arith.divf %48, %49 : vector<1x128xf32>
    %cst_28 = arith.constant 9.99999974E-6 : f32
    %51 = vector.broadcast %cst_28 : f32 to vector<1x128xf32>
    %52 = arith.addf %50, %51 : vector<1x128xf32>
    %53 = math.rsqrt %52 : vector<1x128xf32>
    %54 = arith.mulf %38, %53 : vector<1x128xf32>
    %55 = arith.mulf %43, %54 : vector<1x128xf32>
    %56 = arith.subf %39, %55 : vector<1x128xf32>
    %57 = vector.broadcast %54 : vector<1x128xf32> to vector<128x128xf32>
    %58 = arith.mulf %37, %57 : vector<128x128xf32>
    %59 = vector.broadcast %56 : vector<1x128xf32> to vector<128x128xf32>
    %60 = arith.addf %58, %59 : vector<128x128xf32>
    %cst_29 = arith.constant 0.000000e+00 : f32
    %61 = vector.broadcast %cst_29 : f32 to vector<128x128xf32>
    %62 = arith.maximumf %60, %61 : vector<128x128xf32>
    %c0_30 = arith.constant 0 : index
    %c0_31 = arith.constant 0 : index
    %63 = vector.load %arg9[%c0_30, %c0_31] : memref<128x128xbf16, #tpu.memory_space<vmem>>, vector<128x128xbf16>
    %c0_32 = arith.constant 0 : index
    %c0_33 = arith.constant 0 : index
    %64 = vector.load %arg10[%c0_32, %c0_33] : memref<1x128xf32, #tpu.memory_space<vmem>>, vector<1x128xf32>
    %65 = arith.truncf %62 : vector<128x128xf32> to vector<128x128xbf16>
    %cst_34 = arith.constant dense<0.000000e+00> : vector<128x128xf32>
    %66 = tpu.matmul %65, %63, %cst_34 {dimension_numbers = #tpu.dot_dimension_numbers<[1], [0], [0], [1], [0, 0, 1, 1], [], []>} : vector<128x128xbf16>, vector<128x128xbf16>, vector<128x128xf32> -> vector<128x128xf32>
    %67 = vector.broadcast %64 : vector<1x128xf32> to vector<128x128xf32>
    %68 = arith.addf %66, %67 : vector<128x128xf32>
    %c0_35 = arith.constant 0 : index
    %c0_36 = arith.constant 0 : index
    %69 = vector.load %arg11[%c0_35, %c0_36] : memref<1x128xf32, #tpu.memory_space<vmem>>, vector<1x128xf32>
    %c0_37 = arith.constant 0 : index
    %c0_38 = arith.constant 0 : index
    %70 = vector.load %arg12[%c0_37, %c0_38] : memref<1x128xf32, #tpu.memory_space<vmem>>, vector<1x128xf32>
    %cst_39 = arith.constant dense<0.000000e+00> : vector<128xf32>
    %71 = vector.multi_reduction <add>, %68, %cst_39 [0] : vector<128x128xf32> to vector<128xf32>
    %72 = vector.shape_cast %71 : vector<128xf32> to vector<1x128xf32>
    %cst_40 = arith.constant 1.280000e+02 : f32
    %73 = vector.broadcast %cst_40 : f32 to vector<1x128xf32>
    %74 = arith.divf %72, %73 : vector<1x128xf32>
    %75 = vector.broadcast %74 : vector<1x128xf32> to vector<128x128xf32>
    %76 = arith.subf %68, %75 : vector<128x128xf32>
    %77 = arith.mulf %76, %76 : vector<128x128xf32>
    %cst_41 = arith.constant dense<0.000000e+00> : vector<128xf32>
    %78 = vector.multi_reduction <add>, %77, %cst_41 [0] : vector<128x128xf32> to vector<128xf32>
    %79 = vector.shape_cast %78 : vector<128xf32> to vector<1x128xf32>
    %cst_42 = arith.constant 1.280000e+02 : f32
    %80 = vector.broadcast %cst_42 : f32 to vector<1x128xf32>
    %81 = arith.divf %79, %80 : vector<1x128xf32>
    %cst_43 = arith.constant 9.99999974E-6 : f32
    %82 = vector.broadcast %cst_43 : f32 to vector<1x128xf32>
    %83 = arith.addf %81, %82 : vector<1x128xf32>
    %84 = math.rsqrt %83 : vector<1x128xf32>
    %85 = arith.mulf %69, %84 : vector<1x128xf32>
    %86 = arith.mulf %74, %85 : vector<1x128xf32>
    %87 = arith.subf %70, %86 : vector<1x128xf32>
    %88 = vector.broadcast %85 : vector<1x128xf32> to vector<128x128xf32>
    %89 = arith.mulf %68, %88 : vector<128x128xf32>
    %90 = vector.broadcast %87 : vector<1x128xf32> to vector<128x128xf32>
    %91 = arith.addf %89, %90 : vector<128x128xf32>
    %cst_44 = arith.constant 0.000000e+00 : f32
    %92 = vector.broadcast %cst_44 : f32 to vector<128x128xf32>
    %93 = arith.maximumf %91, %92 : vector<128x128xf32>
    %c0_45 = arith.constant 0 : index
    %c0_46 = arith.constant 0 : index
    %94 = vector.load %arg13[%c0_45, %c0_46] : memref<128x128xbf16, #tpu.memory_space<vmem>>, vector<128x128xbf16>
    %c0_47 = arith.constant 0 : index
    %c0_48 = arith.constant 0 : index
    %95 = vector.load %arg14[%c0_47, %c0_48] : memref<1x128xf32, #tpu.memory_space<vmem>>, vector<1x128xf32>
    %96 = arith.truncf %93 : vector<128x128xf32> to vector<128x128xbf16>
    %cst_49 = arith.constant dense<0.000000e+00> : vector<128x128xf32>
    %97 = tpu.matmul %96, %94, %cst_49 {dimension_numbers = #tpu.dot_dimension_numbers<[1], [0], [0], [1], [0, 0, 1, 1], [], []>} : vector<128x128xbf16>, vector<128x128xbf16>, vector<128x128xf32> -> vector<128x128xf32>
    %98 = vector.broadcast %95 : vector<1x128xf32> to vector<128x128xf32>
    %99 = arith.addf %97, %98 : vector<128x128xf32>
    %c0_50 = arith.constant 0 : index
    %c0_51 = arith.constant 0 : index
    %100 = vector.load %arg15[%c0_50, %c0_51] : memref<1x128xf32, #tpu.memory_space<vmem>>, vector<1x128xf32>
    %c0_52 = arith.constant 0 : index
    %c0_53 = arith.constant 0 : index
    %101 = vector.load %arg16[%c0_52, %c0_53] : memref<1x128xf32, #tpu.memory_space<vmem>>, vector<1x128xf32>
    %cst_54 = arith.constant dense<0.000000e+00> : vector<128xf32>
    %102 = vector.multi_reduction <add>, %99, %cst_54 [0] : vector<128x128xf32> to vector<128xf32>
    %103 = vector.shape_cast %102 : vector<128xf32> to vector<1x128xf32>
    %cst_55 = arith.constant 1.280000e+02 : f32
    %104 = vector.broadcast %cst_55 : f32 to vector<1x128xf32>
    %105 = arith.divf %103, %104 : vector<1x128xf32>
    %106 = vector.broadcast %105 : vector<1x128xf32> to vector<128x128xf32>
    %107 = arith.subf %99, %106 : vector<128x128xf32>
    %108 = arith.mulf %107, %107 : vector<128x128xf32>
    %cst_56 = arith.constant dense<0.000000e+00> : vector<128xf32>
    %109 = vector.multi_reduction <add>, %108, %cst_56 [0] : vector<128x128xf32> to vector<128xf32>
    %110 = vector.shape_cast %109 : vector<128xf32> to vector<1x128xf32>
    %cst_57 = arith.constant 1.280000e+02 : f32
    %111 = vector.broadcast %cst_57 : f32 to vector<1x128xf32>
    %112 = arith.divf %110, %111 : vector<1x128xf32>
    %cst_58 = arith.constant 9.99999974E-6 : f32
    %113 = vector.broadcast %cst_58 : f32 to vector<1x128xf32>
    %114 = arith.addf %112, %113 : vector<1x128xf32>
    %115 = math.rsqrt %114 : vector<1x128xf32>
    %116 = arith.mulf %100, %115 : vector<1x128xf32>
    %117 = arith.mulf %105, %116 : vector<1x128xf32>
    %118 = arith.subf %101, %117 : vector<1x128xf32>
    %119 = vector.broadcast %116 : vector<1x128xf32> to vector<128x128xf32>
    %120 = arith.mulf %99, %119 : vector<128x128xf32>
    %121 = vector.broadcast %118 : vector<1x128xf32> to vector<128x128xf32>
    %122 = arith.addf %120, %121 : vector<128x128xf32>
    %cst_59 = arith.constant 0.000000e+00 : f32
    %123 = vector.broadcast %cst_59 : f32 to vector<128x128xf32>
    %124 = arith.maximumf %122, %123 : vector<128x128xf32>
    %c0_60 = arith.constant 0 : index
    %c0_61 = arith.constant 0 : index
    %125 = vector.load %arg17[%c0_60, %c0_61] : memref<128x128xbf16, #tpu.memory_space<vmem>>, vector<128x128xbf16>
    %c0_62 = arith.constant 0 : index
    %c0_63 = arith.constant 0 : index
    %126 = vector.load %arg18[%c0_62, %c0_63] : memref<1x128xf32, #tpu.memory_space<vmem>>, vector<1x128xf32>
    %127 = arith.truncf %124 : vector<128x128xf32> to vector<128x128xbf16>
    %cst_64 = arith.constant dense<0.000000e+00> : vector<128x128xf32>
    %128 = tpu.matmul %127, %125, %cst_64 {dimension_numbers = #tpu.dot_dimension_numbers<[1], [0], [0], [1], [0, 0, 1, 1], [], []>} : vector<128x128xbf16>, vector<128x128xbf16>, vector<128x128xf32> -> vector<128x128xf32>
    %129 = vector.broadcast %126 : vector<1x128xf32> to vector<128x128xf32>
    %130 = arith.addf %128, %129 : vector<128x128xf32>
    %c0_65 = arith.constant 0 : index
    %c0_66 = arith.constant 0 : index
    %131 = vector.load %arg19[%c0_65, %c0_66] : memref<1x128xf32, #tpu.memory_space<vmem>>, vector<1x128xf32>
    %c0_67 = arith.constant 0 : index
    %c0_68 = arith.constant 0 : index
    %132 = vector.load %arg20[%c0_67, %c0_68] : memref<1x128xf32, #tpu.memory_space<vmem>>, vector<1x128xf32>
    %cst_69 = arith.constant dense<0.000000e+00> : vector<128xf32>
    %133 = vector.multi_reduction <add>, %130, %cst_69 [0] : vector<128x128xf32> to vector<128xf32>
    %134 = vector.shape_cast %133 : vector<128xf32> to vector<1x128xf32>
    %cst_70 = arith.constant 1.280000e+02 : f32
    %135 = vector.broadcast %cst_70 : f32 to vector<1x128xf32>
    %136 = arith.divf %134, %135 : vector<1x128xf32>
    %137 = vector.broadcast %136 : vector<1x128xf32> to vector<128x128xf32>
    %138 = arith.subf %130, %137 : vector<128x128xf32>
    %139 = arith.mulf %138, %138 : vector<128x128xf32>
    %cst_71 = arith.constant dense<0.000000e+00> : vector<128xf32>
    %140 = vector.multi_reduction <add>, %139, %cst_71 [0] : vector<128x128xf32> to vector<128xf32>
    %141 = vector.shape_cast %140 : vector<128xf32> to vector<1x128xf32>
    %cst_72 = arith.constant 1.280000e+02 : f32
    %142 = vector.broadcast %cst_72 : f32 to vector<1x128xf32>
    %143 = arith.divf %141, %142 : vector<1x128xf32>
    %cst_73 = arith.constant 9.99999974E-6 : f32
    %144 = vector.broadcast %cst_73 : f32 to vector<1x128xf32>
    %145 = arith.addf %143, %144 : vector<1x128xf32>
    %146 = math.rsqrt %145 : vector<1x128xf32>
    %147 = arith.mulf %131, %146 : vector<1x128xf32>
    %148 = arith.mulf %136, %147 : vector<1x128xf32>
    %149 = arith.subf %132, %148 : vector<1x128xf32>
    %150 = vector.broadcast %147 : vector<1x128xf32> to vector<128x128xf32>
    %151 = arith.mulf %130, %150 : vector<128x128xf32>
    %152 = vector.broadcast %149 : vector<1x128xf32> to vector<128x128xf32>
    %153 = arith.addf %151, %152 : vector<128x128xf32>
    %cst_74 = arith.constant 0.000000e+00 : f32
    %154 = vector.broadcast %cst_74 : f32 to vector<128x128xf32>
    %155 = arith.maximumf %153, %154 : vector<128x128xf32>
    %c0_75 = arith.constant 0 : index
    %c0_76 = arith.constant 0 : index
    %156 = vector.load %arg21[%c0_75, %c0_76] : memref<128x128xbf16, #tpu.memory_space<vmem>>, vector<128x128xbf16>
    %c0_77 = arith.constant 0 : index
    %c0_78 = arith.constant 0 : index
    %157 = vector.load %arg22[%c0_77, %c0_78] : memref<1x128xf32, #tpu.memory_space<vmem>>, vector<1x128xf32>
    %158 = arith.truncf %155 : vector<128x128xf32> to vector<128x128xbf16>
    %cst_79 = arith.constant dense<0.000000e+00> : vector<128x128xf32>
    %159 = tpu.matmul %158, %156, %cst_79 {dimension_numbers = #tpu.dot_dimension_numbers<[1], [0], [0], [1], [0, 0, 1, 1], [], []>} : vector<128x128xbf16>, vector<128x128xbf16>, vector<128x128xf32> -> vector<128x128xf32>
    %160 = vector.broadcast %157 : vector<1x128xf32> to vector<128x128xf32>
    %161 = arith.addf %159, %160 : vector<128x128xf32>
    %c0_80 = arith.constant 0 : index
    %c0_81 = arith.constant 0 : index
    %162 = vector.load %arg23[%c0_80, %c0_81] : memref<1x128xf32, #tpu.memory_space<vmem>>, vector<1x128xf32>
    %c0_82 = arith.constant 0 : index
    %c0_83 = arith.constant 0 : index
    %163 = vector.load %arg24[%c0_82, %c0_83] : memref<1x128xf32, #tpu.memory_space<vmem>>, vector<1x128xf32>
    %cst_84 = arith.constant dense<0.000000e+00> : vector<128xf32>
    %164 = vector.multi_reduction <add>, %161, %cst_84 [0] : vector<128x128xf32> to vector<128xf32>
    %165 = vector.shape_cast %164 : vector<128xf32> to vector<1x128xf32>
    %cst_85 = arith.constant 1.280000e+02 : f32
    %166 = vector.broadcast %cst_85 : f32 to vector<1x128xf32>
    %167 = arith.divf %165, %166 : vector<1x128xf32>
    %168 = vector.broadcast %167 : vector<1x128xf32> to vector<128x128xf32>
    %169 = arith.subf %161, %168 : vector<128x128xf32>
    %170 = arith.mulf %169, %169 : vector<128x128xf32>
    %cst_86 = arith.constant dense<0.000000e+00> : vector<128xf32>
    %171 = vector.multi_reduction <add>, %170, %cst_86 [0] : vector<128x128xf32> to vector<128xf32>
    %172 = vector.shape_cast %171 : vector<128xf32> to vector<1x128xf32>
    %cst_87 = arith.constant 1.280000e+02 : f32
    %173 = vector.broadcast %cst_87 : f32 to vector<1x128xf32>
    %174 = arith.divf %172, %173 : vector<1x128xf32>
    %cst_88 = arith.constant 9.99999974E-6 : f32
    %175 = vector.broadcast %cst_88 : f32 to vector<1x128xf32>
    %176 = arith.addf %174, %175 : vector<1x128xf32>
    %177 = math.rsqrt %176 : vector<1x128xf32>
    %178 = arith.mulf %162, %177 : vector<1x128xf32>
    %179 = arith.mulf %167, %178 : vector<1x128xf32>
    %180 = arith.subf %163, %179 : vector<1x128xf32>
    %181 = vector.broadcast %178 : vector<1x128xf32> to vector<128x128xf32>
    %182 = arith.mulf %161, %181 : vector<128x128xf32>
    %183 = vector.broadcast %180 : vector<1x128xf32> to vector<128x128xf32>
    %184 = arith.addf %182, %183 : vector<128x128xf32>
    %cst_89 = arith.constant 0.000000e+00 : f32
    %185 = vector.broadcast %cst_89 : f32 to vector<128x128xf32>
    %186 = arith.maximumf %184, %185 : vector<128x128xf32>
    %c0_90 = arith.constant 0 : index
    %c0_91 = arith.constant 0 : index
    %187 = vector.load %arg25[%c0_90, %c0_91] : memref<128x128xbf16, #tpu.memory_space<vmem>>, vector<128x128xbf16>
    %c0_92 = arith.constant 0 : index
    %c0_93 = arith.constant 0 : index
    %188 = vector.load %arg26[%c0_92, %c0_93] : memref<1x128xf32, #tpu.memory_space<vmem>>, vector<1x128xf32>
    %189 = arith.truncf %186 : vector<128x128xf32> to vector<128x128xbf16>
    %cst_94 = arith.constant dense<0.000000e+00> : vector<128x128xf32>
    %190 = tpu.matmul %189, %187, %cst_94 {dimension_numbers = #tpu.dot_dimension_numbers<[1], [0], [0], [1], [0, 0, 1, 1], [], []>} : vector<128x128xbf16>, vector<128x128xbf16>, vector<128x128xf32> -> vector<128x128xf32>
    %191 = vector.broadcast %188 : vector<1x128xf32> to vector<128x128xf32>
    %192 = arith.addf %190, %191 : vector<128x128xf32>
    %c0_95 = arith.constant 0 : index
    %c0_96 = arith.constant 0 : index
    %193 = vector.load %arg27[%c0_95, %c0_96] : memref<1x128xf32, #tpu.memory_space<vmem>>, vector<1x128xf32>
    %c0_97 = arith.constant 0 : index
    %c0_98 = arith.constant 0 : index
    %194 = vector.load %arg28[%c0_97, %c0_98] : memref<1x128xf32, #tpu.memory_space<vmem>>, vector<1x128xf32>
    %cst_99 = arith.constant dense<0.000000e+00> : vector<128xf32>
    %195 = vector.multi_reduction <add>, %192, %cst_99 [0] : vector<128x128xf32> to vector<128xf32>
    %196 = vector.shape_cast %195 : vector<128xf32> to vector<1x128xf32>
    %cst_100 = arith.constant 1.280000e+02 : f32
    %197 = vector.broadcast %cst_100 : f32 to vector<1x128xf32>
    %198 = arith.divf %196, %197 : vector<1x128xf32>
    %199 = vector.broadcast %198 : vector<1x128xf32> to vector<128x128xf32>
    %200 = arith.subf %192, %199 : vector<128x128xf32>
    %201 = arith.mulf %200, %200 : vector<128x128xf32>
    %cst_101 = arith.constant dense<0.000000e+00> : vector<128xf32>
    %202 = vector.multi_reduction <add>, %201, %cst_101 [0] : vector<128x128xf32> to vector<128xf32>
    %203 = vector.shape_cast %202 : vector<128xf32> to vector<1x128xf32>
    %cst_102 = arith.constant 1.280000e+02 : f32
    %204 = vector.broadcast %cst_102 : f32 to vector<1x128xf32>
    %205 = arith.divf %203, %204 : vector<1x128xf32>
    %cst_103 = arith.constant 9.99999974E-6 : f32
    %206 = vector.broadcast %cst_103 : f32 to vector<1x128xf32>
    %207 = arith.addf %205, %206 : vector<1x128xf32>
    %208 = math.rsqrt %207 : vector<1x128xf32>
    %209 = arith.mulf %193, %208 : vector<1x128xf32>
    %210 = arith.mulf %198, %209 : vector<1x128xf32>
    %211 = arith.subf %194, %210 : vector<1x128xf32>
    %212 = vector.broadcast %209 : vector<1x128xf32> to vector<128x128xf32>
    %213 = arith.mulf %192, %212 : vector<128x128xf32>
    %214 = vector.broadcast %211 : vector<1x128xf32> to vector<128x128xf32>
    %215 = arith.addf %213, %214 : vector<128x128xf32>
    %cst_104 = arith.constant 0.000000e+00 : f32
    %216 = vector.broadcast %cst_104 : f32 to vector<128x128xf32>
    %217 = arith.maximumf %215, %216 : vector<128x128xf32>
    %c0_105 = arith.constant 0 : index
    %c0_106 = arith.constant 0 : index
    %218 = vector.load %arg29[%c0_105, %c0_106] : memref<128x128xbf16, #tpu.memory_space<vmem>>, vector<128x128xbf16>
    %c0_107 = arith.constant 0 : index
    %c0_108 = arith.constant 0 : index
    %219 = vector.load %arg30[%c0_107, %c0_108] : memref<1x128xf32, #tpu.memory_space<vmem>>, vector<1x128xf32>
    %220 = arith.truncf %217 : vector<128x128xf32> to vector<128x128xbf16>
    %cst_109 = arith.constant dense<0.000000e+00> : vector<128x128xf32>
    %221 = tpu.matmul %220, %218, %cst_109 {dimension_numbers = #tpu.dot_dimension_numbers<[1], [0], [0], [1], [0, 0, 1, 1], [], []>} : vector<128x128xbf16>, vector<128x128xbf16>, vector<128x128xf32> -> vector<128x128xf32>
    %222 = vector.broadcast %219 : vector<1x128xf32> to vector<128x128xf32>
    %223 = arith.addf %221, %222 : vector<128x128xf32>
    %c0_110 = arith.constant 0 : index
    %c0_111 = arith.constant 0 : index
    %224 = vector.load %arg31[%c0_110, %c0_111] : memref<1x128xf32, #tpu.memory_space<vmem>>, vector<1x128xf32>
    %c0_112 = arith.constant 0 : index
    %c0_113 = arith.constant 0 : index
    %225 = vector.load %arg32[%c0_112, %c0_113] : memref<1x128xf32, #tpu.memory_space<vmem>>, vector<1x128xf32>
    %cst_114 = arith.constant dense<0.000000e+00> : vector<128xf32>
    %226 = vector.multi_reduction <add>, %223, %cst_114 [0] : vector<128x128xf32> to vector<128xf32>
    %227 = vector.shape_cast %226 : vector<128xf32> to vector<1x128xf32>
    %cst_115 = arith.constant 1.280000e+02 : f32
    %228 = vector.broadcast %cst_115 : f32 to vector<1x128xf32>
    %229 = arith.divf %227, %228 : vector<1x128xf32>
    %230 = vector.broadcast %229 : vector<1x128xf32> to vector<128x128xf32>
    %231 = arith.subf %223, %230 : vector<128x128xf32>
    %232 = arith.mulf %231, %231 : vector<128x128xf32>
    %cst_116 = arith.constant dense<0.000000e+00> : vector<128xf32>
    %233 = vector.multi_reduction <add>, %232, %cst_116 [0] : vector<128x128xf32> to vector<128xf32>
    %234 = vector.shape_cast %233 : vector<128xf32> to vector<1x128xf32>
    %cst_117 = arith.constant 1.280000e+02 : f32
    %235 = vector.broadcast %cst_117 : f32 to vector<1x128xf32>
    %236 = arith.divf %234, %235 : vector<1x128xf32>
    %cst_118 = arith.constant 9.99999974E-6 : f32
    %237 = vector.broadcast %cst_118 : f32 to vector<1x128xf32>
    %238 = arith.addf %236, %237 : vector<1x128xf32>
    %239 = math.rsqrt %238 : vector<1x128xf32>
    %240 = arith.mulf %224, %239 : vector<1x128xf32>
    %241 = arith.mulf %229, %240 : vector<1x128xf32>
    %242 = arith.subf %225, %241 : vector<1x128xf32>
    %243 = vector.broadcast %240 : vector<1x128xf32> to vector<128x128xf32>
    %244 = arith.mulf %223, %243 : vector<128x128xf32>
    %245 = vector.broadcast %242 : vector<1x128xf32> to vector<128x128xf32>
    %246 = arith.addf %244, %245 : vector<128x128xf32>
    %cst_119 = arith.constant 0.000000e+00 : f32
    %247 = vector.broadcast %cst_119 : f32 to vector<128x128xf32>
    %248 = arith.maximumf %246, %247 : vector<128x128xf32>
    %c0_120 = arith.constant 0 : index
    %c0_121 = arith.constant 0 : index
    %249 = vector.load %arg33[%c0_120, %c0_121] : memref<128x896xbf16, #tpu.memory_space<vmem>>, vector<128x896xbf16>
    %c0_122 = arith.constant 0 : index
    %c0_123 = arith.constant 0 : index
    %250 = vector.load %arg34[%c0_122, %c0_123] : memref<1x896xf32, #tpu.memory_space<vmem>>, vector<1x896xf32>
    %251 = arith.truncf %248 : vector<128x128xf32> to vector<128x128xbf16>
    %cst_124 = arith.constant dense<0.000000e+00> : vector<128x896xf32>
    %252 = tpu.matmul %251, %249, %cst_124 {dimension_numbers = #tpu.dot_dimension_numbers<[1], [0], [0], [1], [0, 0, 1, 1], [], []>} : vector<128x128xbf16>, vector<128x896xbf16>, vector<128x896xf32> -> vector<128x896xf32>
    %253 = vector.broadcast %250 : vector<1x896xf32> to vector<128x896xf32>
    %254 = arith.addf %252, %253 : vector<128x896xf32>
    %255 = arith.negf %254 : vector<128x896xf32>
    %256 = math.exp %255 : vector<128x896xf32>
    %cst_125 = arith.constant 1.000000e+00 : f32
    %257 = vector.broadcast %cst_125 : f32 to vector<128x896xf32>
    %258 = arith.addf %257, %256 : vector<128x896xf32>
    %259 = arith.divf %257, %258 : vector<128x896xf32>
    %c0_126 = arith.constant 0 : index
    %c0_127 = arith.constant 0 : index
    %260 = vector.load %arg35[%c0_126, %c0_127] : memref<128x896xf32, #tpu.memory_space<vmem>>, vector<128x896xf32>
    tpu.vector_store %arg35[%c0_126, %c0_127], %259 {strides = array<i32>} : memref<128x896xf32, #tpu.memory_space<vmem>>, vector<128x896xf32>,
    return
  }
}

</mosaic_0001>

<bundles_post_ra>
// kernel: autoencoder_forward.1
= control target key start
LH: loop header
LB: loop body
LE: loop exit
PB: predicated region body
PF: predicated region fallthrough
CT: control target
= control target key end

     0   :  { %s8122_s6 = smov 1   ;;  %s8123_s10 = smov 2   ;;  %s9807_s0 = inlined_call_operand.smem [shape: u32[36], index: -1, kind: input, shape index: {}] }
   0x1   :  { %s8208_s5 = sld [smem:[%s9807_s0]]   ;;  %s8124_s14 = smov 3  }
   0x2   :  { %s8213_s9 = sld [smem:[%s9807_s0 + %s8122_s6]]   ;;  %s8125_s18 = smov 4  }
   0x3   :  { %s8218_s13 = sld [smem:[%s9807_s0 + %s8123_s10]]   ;;  %s8126_s22 = smov 5  }
   0x4   :  { %s8223_s17 = sld [smem:[%s9807_s0 + %s8124_s14]]   ;;  %s8127_s26 = smov 6  }
   0x5   :  { %s8228_s21 = sld [smem:[%s9807_s0 + %s8125_s18]]   ;;  %s8128_s30 = smov 7  }
   0x6   :  { %s8233_s25 = sld [smem:[%s9807_s0 + %s8126_s22]]   ;;  %s8129_s4 = smov 8  }
   0x7   :  { %9826 = sst [smem:[#allocation76_spill]] %s8208_s5  ;;  %s8130_s10 = smov 9  }
   0x8   :  { %s8238_s29 = sld [smem:[%s9807_s0 + %s8127_s26]]   ;;  %s8131_s15 = smov 10  }
   0x9   :  { %9827 = sst [smem:[#allocation77_spill]] %s8218_s13  ;;  %s8132_s20 = smov 11  }
   0xa   :  { %s8243_s3 = sld [smem:[%s9807_s0 + %s8128_s30]]   ;;  %s8133_s26 = smov 12  }
   0xb   :  { %9828 = sst [smem:[#allocation78_spill]] %s8228_s21  ;;  %s8134_s1 = smov 13  }
   0xc   :  { %s8248_s8 = sld [smem:[%s9807_s0 + %s8129_s4]]   ;;  %s8135_s7 = smov 14  }
   0xd   :  { %s8253_s14 = sld [smem:[%s9807_s0 + %s8130_s10]]   ;;  %s8137_s22 = smov 16  }
   0xe   :  { %9829 = sst [smem:[#allocation79_spill]] %s8238_s29  ;;  %s8138_s28 = smov 17  }
   0xf   :  { %s8258_s19 = sld [smem:[%s9807_s0 + %s8131_s15]]   ;;  %s8136_s15 = smov 15  }
  0x10   :  { %s8263_s24 = sld [smem:[%s9807_s0 + %s8132_s20]]  }
  0x11   :  { %s8268_s30 = sld [smem:[%s9807_s0 + %s8133_s26]]  }
  0x12   :  { %9830 = sst [smem:[#allocation80_spill]] %s8248_s8 }
  0x13   :  { %s8273_s6 = sld [smem:[%s9807_s0 + %s8134_s1]]  }
  0x14   :  { %s8278_s12 = sld [smem:[%s9807_s0 + %s8135_s7]]   ;;  %s8139_s7 = smov 18  }
  0x15   :  { %9831 = sst [smem:[#allocation81_spill]] %s8258_s19 }
  0x16   :  { %s8283_s20 = sld [smem:[%s9807_s0 + %s8136_s15]]   ;;  %s8140_s15 = smov 19  }
  0x17   :  { %9832 = sst [smem:[#allocation82_spill]] %s8268_s30 }
  0x18   :  { %s8288_s27 = sld [smem:[%s9807_s0 + %s8137_s22]]   ;;  %s8141_s22 = smov 20  }
  0x19   :  { %s8293_s4 = sld [smem:[%s9807_s0 + %s8138_s28]]   ;;  %s8142_s28 = smov 21  }
  0x1a   :  { %9833 = sst [smem:[#allocation83_spill]] %s8278_s12 }
  0x1b   :  { %s8298_s12 = sld [smem:[%s9807_s0 + %s8139_s7]]   ;;  %s8143_s7 = smov 22  }
  0x1c   :  { %s8303_s30 = sld [smem:[%s9807_s0 + %s8140_s15]]   ;;  %s8144_s15 = smov 23  }
  0x1d   :  { %s8313_s19 = sld [smem:[%s9807_s0 + %s8142_s28]]   ;;  %s8146_s28 = smov 25  }
  0x1e   :  { %9834 = sst [smem:[#allocation84_spill]] %s8288_s27 }
  0x1f   :  { %s8308_s27 = sld [smem:[%s9807_s0 + %s8141_s22]]   ;;  %s8145_s22 = smov 24  }
  0x20   :  { %s8323_s8 = sld [smem:[%s9807_s0 + %s8144_s15]]   ;;  %s8148_s15 = smov 27  }
  0x21   :  { %9835 = sst [smem:[#allocation85_spill]] %s8298_s12 }
  0x22   :  { %s8318_s12 = sld [smem:[%s9807_s0 + %s8143_s7]]   ;;  %s8147_s7 = smov 26  }
  0x23   :  { %s8333_s29 = sld [smem:[%s9807_s0 + %s8146_s28]]   ;;  %s8150_s28 = smov 29  }
  0x24   :  { %s8343_s21 = sld [smem:[%s9807_s0 + %s8148_s15]]   ;;  %s8152_s15 = smov 31  }
  0x25   :  { %9836 = sst [smem:[#allocation86_spill]] %s8308_s27 }
  0x26   :  { %s8328_s27 = sld [smem:[%s9807_s0 + %s8145_s22]]   ;;  %s8149_s22 = smov 28  }
  0x27   :  { %s8353_s13 = sld [smem:[%s9807_s0 + %s8150_s28]]   ;;  %s8154_s28 = smov 33  }
  0x28   :  { %9837 = sst [smem:[#allocation87_spill]] %s8318_s12 }
  0x29   :  { %s8338_s12 = sld [smem:[%s9807_s0 + %s8147_s7]]   ;;  %s8151_s7 = smov 30  }
  0x2a   :  { %s8363_s5 = sld [smem:[%s9807_s0 + %s8152_s15]]   ;;  %s8156_s15 = smov 35  }
  0x2c   :  { %9838 = sst [smem:[#allocation88_spill]] %s8328_s27 }
  0x2d   :  { %s8348_s27 = sld [smem:[%s9807_s0 + %s8149_s22]]   ;;  %s8153_s22 = smov 32  }
  0x2e   :  { %9841 = sst [smem:[#allocation91_spill]] %s8353_s13 }
  0x2f   :  { %9839 = sst [smem:[#allocation89_spill]] %s8338_s12 }
  0x30   :  { %s8358_s12 = sld [smem:[%s9807_s0 + %s8151_s7]]   ;;  %s8155_s7 = smov 34  }
  0x31   :  { %9843 = sst [smem:[#allocation93_spill]] %s8363_s5 }
  0x32   :  { %s8373_s13 = sld [smem:[%s9807_s0 + %s8154_s28]]  }
  0x33   :  { %9840 = sst [smem:[#allocation90_spill]] %s8348_s27 }
  0x34   :  { %s8368_s27 = sld [smem:[%s9807_s0 + %s8153_s22]]  }
  0x35   :  { %s8383_s5 = sld [smem:[%s9807_s0 + %s8156_s15]]  }
  0x36   :  { %9842 = sst [smem:[#allocation92_spill]] %s8358_s12 }
  0x37   :  { %s8378_s12 = sld [smem:[%s9807_s0 + %s8155_s7]]  }
  0x38   :  { %76 = vsyncpa [#allocation3], 0 }
  0x39   :  { %77 = vsyncpa [#allocation6], 0 }
  0x3a   :  { %78 = vsyncpa [#allocation9], 0 }
  0x3b   :  { %79 = vsyncpa [#allocation12], 0 }
  0x3c   :  { %80 = vsyncpa [#allocation15], 0 }
  0x3d   :  { %81 = vsyncpa [#allocation18], 0 }
  0x3e   :  { %82 = vsyncpa [#allocation21], 0 }
  0x3f   :  { %83 = vsyncpa [#allocation24], 0 }
  0x40   :  { %84 = vsyncpa [#allocation27], 0 }
  0x41   :  { %85 = vsyncpa [#allocation30], 0 }
  0x42   :  { %86 = vsyncpa [#allocation33], 0 }
  0x43   :  { %87 = vsyncpa [#allocation36], 0 }
  0x44   :  { %88 = vsyncpa [#allocation39], 0 }
  0x45   :  { %89 = vsyncpa [#allocation42], 0 }
  0x46   :  { %90 = vsyncpa [#allocation45], 0 }
  0x47   :  { %91 = vsyncpa [#allocation48], 0 }
  0x48   :  { %92 = vsyncpa [#allocation51], 0 }
  0x49   :  { %93 = vsyncpa [#allocation54], 0 }
  0x4a   :  { %94 = vsyncpa [#allocation4], 0  ;;  %s8157_s0 = smov [#allocation5]   ;;  %s7292_s23 = scalar_lea.hbm %s8213_s9, 7168 }
  0x4b   :  { %s112_s22 = sshll.u32 %s8157_s0, 4  ;;  %p7293_p0 = scmp.ne.s32.totalorder %s8213_s9, %s7292_s23  ;;  %s113_s22 = int_to_ptr.vmem [resolvable:$true] %s112_s22 }
  0x4c   :  { %p7296_p1 = scmp.lt.u32.totalorder %s7292_s23, %s8213_s9 }
  0x4e   :  { %p7298_p2 = pnand %p7296_p1, %p7293_p0 }
  0x50   :  { %7301 = shalt.err (!%p7298_p2)
}
  0x51   :  { %s7302_s26 = scalar_lea.vmem %s113_s22, 7168  ;;  %p7307_p4 = scmp.lt.s32.totalorder %s113_s22, %s113_s22 }
  0x52   :  { %p7303_p3 = scmp.ne.s32.totalorder %s113_s22, %s7302_s26  ;;  %p7308_p5 = scmp.lt.s32.totalorder %s7302_s26, %s7302_s26 }
  0x54   :  { %p7309_p6 = por %p7308_p5, %p7307_p4 }
  0x56   :  { %p7310_p7 = pnand %p7309_p6, %p7303_p3 }
  0x58   :  { %7313 = shalt.err (!%p7310_p7)
}
  0x59   :  { %s8158_s28 = smov 64   ;;  %s8159_s1 = smov 4  }
  0x5a   :  { %118 = dma.hbm_to_vmem [thread:$0]  %s8213_s9, 7168, %s113_s22, [#allocation6], %s8158_s28, %s8158_s28, %s8159_s1  }
  0x5b   :  { %s8160_s2 = smov [#allocation8]   ;;  %s8161_s10 = smov [#allocation11]  }
  0x5c   :  { %s135_s7 = sshll.u32 %s8160_s2, 4  ;;  %s154_s11 = sshll.u32 %s8161_s10, 4  ;;  %s136_s7 = int_to_ptr.vmem [resolvable:$true] %s135_s7  ;;  %s155_s11 = int_to_ptr.vmem [resolvable:$true] %s154_s11 }
  0x5d   :  { %s7314_s15 = scalar_lea.hbm %s8223_s17, 16 }
  0x5e   :  { %p7315_p8 = scmp.ne.s32.totalorder %s8223_s17, %s7314_s15  ;;  %p7318_p9 = scmp.lt.u32.totalorder %s7314_s15, %s8223_s17 }
  0x60   :  { %p7320_p10 = pnand %p7318_p9, %p7315_p8 }
  0x62   :  { %7323 = shalt.err (!%p7320_p10)
}
  0x63   :  { %s7324_s16 = scalar_lea.vmem %s136_s7, 16  ;;  %s7328_s18 = scalar_lea.vmem %s136_s7, 32 }
  0x64   :  { %p7325_p11 = scmp.ne.s32.totalorder %s136_s7, %s7324_s16  ;;  %p7329_p12 = scmp.lt.s32.totalorder %s136_s7, %s136_s7 }
  0x65   :  { %p7330_p13 = scmp.lt.s32.totalorder %s7328_s18, %s7324_s16 }
  0x67   :  { %p7331_p0 = por %p7330_p13, %p7329_p12 }
  0x69   :  { %p7332_p1 = pnand %p7331_p0, %p7325_p11 }
  0x6b   :  { %7335 = shalt.err (!%p7332_p1)
}
  0x6c   :  { %138 = dma.hbm_to_vmem [thread:$0]  %s8223_s17, 16, %s136_s7, [#allocation9]  }
  0x6d   :  { %s7336_s9 = scalar_lea.hbm %s8233_s25, 1024 }
  0x6e   :  { %p7337_p2 = scmp.ne.s32.totalorder %s8233_s25, %s7336_s9  ;;  %p7340_p3 = scmp.lt.u32.totalorder %s7336_s9, %s8233_s25 }
  0x70   :  { %p7342_p4 = pnand %p7340_p3, %p7337_p2 }
  0x72   :  { %7345 = shalt.err (!%p7342_p4)
}
  0x73   :  { %s7346_s0 = scalar_lea.vmem %s155_s11, 1024  ;;  %p7351_p6 = scmp.lt.s32.totalorder %s155_s11, %s155_s11 }
  0x74   :  { %p7347_p5 = scmp.ne.s32.totalorder %s155_s11, %s7346_s0  ;;  %p7352_p7 = scmp.lt.s32.totalorder %s7346_s0, %s7346_s0 }
  0x76   :  { %p7353_p8 = por %p7352_p7, %p7351_p6 }
  0x78   :  { %p7354_p9 = pnand %p7353_p8, %p7347_p5 }
  0x7a   :  { %7357 = shalt.err (!%p7354_p9)
}
  0x7b   :  { %160 = dma.hbm_to_vmem [thread:$0]  %s8233_s25, 1024, %s155_s11, [#allocation12], %s8158_s28, %s8158_s28, %s8159_s1  }
  0x7c   :  { %s8162_s17 = smov [#allocation14]   ;;  %s8163_s23 = smov [#allocation17]  }
  0x7d   :  { %s177_s22 = sshll.u32 %s8162_s17, 4  ;;  %s196_s26 = sshll.u32 %s8163_s23, 4  ;;  %s178_s22 = int_to_ptr.vmem [resolvable:$true] %s177_s22  ;;  %s197_s26 = int_to_ptr.vmem [resolvable:$true] %s196_s26 }
  0x7e   :  { %s7358_s2 = scalar_lea.hbm %s8243_s3, 16 }
  0x7f   :  { %p7359_p10 = scmp.ne.s32.totalorder %s8243_s3, %s7358_s2  ;;  %p7362_p11 = scmp.lt.u32.totalorder %s7358_s2, %s8243_s3 }
  0x81   :  { %p7364_p12 = pnand %p7362_p11, %p7359_p10 }
  0x83   :  { %7367 = shalt.err (!%p7364_p12)
}
  0x84   :  { %s7368_s7 = scalar_lea.vmem %s178_s22, 16  ;;  %s7372_s10 = scalar_lea.vmem %s178_s22, 32 }
  0x85   :  { %p7369_p13 = scmp.ne.s32.totalorder %s178_s22, %s7368_s7  ;;  %p7373_p0 = scmp.lt.s32.totalorder %s178_s22, %s178_s22 }
  0x86   :  { %p7374_p1 = scmp.lt.s32.totalorder %s7372_s10, %s7368_s7 }
  0x88   :  { %p7375_p2 = por %p7374_p1, %p7373_p0 }
  0x8a   :  { %p7376_p3 = pnand %p7375_p2, %p7369_p13 }
  0x8c   :  { %7379 = shalt.err (!%p7376_p3)
}
  0x8d   :  { %180 = dma.hbm_to_vmem [thread:$0]  %s8243_s3, 16, %s178_s22, [#allocation15]  }
  0x8e   :  { %s7380_s25 = scalar_lea.hbm %s8253_s14, 1024 }
  0x8f   :  { %p7381_p4 = scmp.ne.s32.totalorder %s8253_s14, %s7380_s25  ;;  %p7384_p5 = scmp.lt.u32.totalorder %s7380_s25, %s8253_s14 }
  0x91   :  { %p7386_p6 = pnand %p7384_p5, %p7381_p4 }
  0x93   :  { %7389 = shalt.err (!%p7386_p6)
}
  0x94   :  { %s7390_s11 = scalar_lea.vmem %s197_s26, 1024  ;;  %p7395_p8 = scmp.lt.s32.totalorder %s197_s26, %s197_s26 }
  0x95   :  { %p7391_p7 = scmp.ne.s32.totalorder %s197_s26, %s7390_s11  ;;  %p7396_p9 = scmp.lt.s32.totalorder %s7390_s11, %s7390_s11 }
  0x97   :  { %p7397_p10 = por %p7396_p9, %p7395_p8 }
  0x99   :  { %p7398_p11 = pnand %p7397_p10, %p7391_p7 }
  0x9b   :  { %7401 = shalt.err (!%p7398_p11)
}
  0x9c   :  { %202 = dma.hbm_to_vmem [thread:$0]  %s8253_s14, 1024, %s197_s26, [#allocation18], %s8158_s28, %s8158_s28, %s8159_s1  }
  0x9d   :  { %s8164_s3 = smov [#allocation20]   ;;  %s8165_s16 = smov [#allocation23]  }
  0x9e   :  { %s219_s15 = sshll.u32 %s8164_s3, 4  ;;  %s238_s18 = sshll.u32 %s8165_s16, 4  ;;  %s220_s15 = int_to_ptr.vmem [resolvable:$true] %s219_s15  ;;  %s239_s18 = int_to_ptr.vmem [resolvable:$true] %s238_s18 }
  0x9f   :  { %s7402_s9 = scalar_lea.hbm %s8263_s24, 16 }
  0xa0   :  { %p7403_p12 = scmp.ne.s32.totalorder %s8263_s24, %s7402_s9  ;;  %p7406_p13 = scmp.lt.u32.totalorder %s7402_s9, %s8263_s24 }
  0xa2   :  { %p7408_p0 = pnand %p7406_p13, %p7403_p12 }
  0xa4   :  { %7411 = shalt.err (!%p7408_p0)
}
  0xa5   :  { %s7412_s0 = scalar_lea.vmem %s220_s15, 16  ;;  %s7416_s17 = scalar_lea.vmem %s220_s15, 32 }
  0xa6   :  { %p7413_p1 = scmp.ne.s32.totalorder %s220_s15, %s7412_s0  ;;  %p7417_p2 = scmp.lt.s32.totalorder %s220_s15, %s220_s15 }
  0xa7   :  { %p7418_p3 = scmp.lt.s32.totalorder %s7416_s17, %s7412_s0 }
  0xa9   :  { %p7419_p4 = por %p7418_p3, %p7417_p2 }
  0xab   :  { %p7420_p5 = pnand %p7419_p4, %p7413_p1 }
  0xad   :  { %7423 = shalt.err (!%p7420_p5)
}
  0xae   :  { %222 = dma.hbm_to_vmem [thread:$0]  %s8263_s24, 16, %s220_s15, [#allocation21]  }
  0xaf   :  { %s7424_s14 = scalar_lea.hbm %s8273_s6, 1024 }
  0xb0   :  { %p7425_p6 = scmp.ne.s32.totalorder %s8273_s6, %s7424_s14  ;;  %p7428_p7 = scmp.lt.u32.totalorder %s7424_s14, %s8273_s6 }
  0xb2   :  { %p7430_p8 = pnand %p7428_p7, %p7425_p6 }
  0xb4   :  { %7433 = shalt.err (!%p7430_p8)
}
  0xb5   :  { %s7434_s22 = scalar_lea.vmem %s239_s18, 1024  ;;  %p7439_p10 = scmp.lt.s32.totalorder %s239_s18, %s239_s18 }
  0xb6   :  { %p7435_p9 = scmp.ne.s32.totalorder %s239_s18, %s7434_s22  ;;  %p7440_p11 = scmp.lt.s32.totalorder %s7434_s22, %s7434_s22 }
  0xb8   :  { %p7441_p12 = por %p7440_p11, %p7439_p10 }
  0xba   :  { %p7442_p13 = pnand %p7441_p12, %p7435_p9 }
  0xbc   :  { %7445 = shalt.err (!%p7442_p13)
}
  0xbd   :  { %244 = dma.hbm_to_vmem [thread:$0]  %s8273_s6, 1024, %s239_s18, [#allocation24], %s8158_s28, %s8158_s28, %s8159_s1  }
  0xbe   :  { %s8166_s24 = smov [#allocation26]   ;;  %s8167_s26 = smov [#allocation29]  }
  0xbf   :  { %s261_s23 = sshll.u32 %s8166_s24, 4  ;;  %s280_s2 = sshll.u32 %s8167_s26, 4  ;;  %s262_s23 = int_to_ptr.vmem [resolvable:$true] %s261_s23  ;;  %s281_s2 = int_to_ptr.vmem [resolvable:$true] %s280_s2 }
  0xc0   :  { %s7446_s7 = scalar_lea.hbm %s8283_s20, 16 }
  0xc1   :  { %p7447_p0 = scmp.ne.s32.totalorder %s8283_s20, %s7446_s7  ;;  %p7450_p1 = scmp.lt.u32.totalorder %s7446_s7, %s8283_s20 }
  0xc3   :  { %p7452_p2 = pnand %p7450_p1, %p7447_p0 }
  0xc5   :  { %7455 = shalt.err (!%p7452_p2)
}
  0xc6   :  { %s7456_s10 = scalar_lea.vmem %s262_s23, 16  ;;  %s7460_s25 = scalar_lea.vmem %s262_s23, 32 }
  0xc7   :  { %p7457_p3 = scmp.ne.s32.totalorder %s262_s23, %s7456_s10  ;;  %p7461_p4 = scmp.lt.s32.totalorder %s262_s23, %s262_s23 }
  0xc8   :  { %p7462_p5 = scmp.lt.s32.totalorder %s7460_s25, %s7456_s10 }
  0xca   :  { %p7463_p6 = por %p7462_p5, %p7461_p4 }
  0xcc   :  { %p7464_p7 = pnand %p7463_p6, %p7457_p3 }
  0xce   :  { %7467 = shalt.err (!%p7464_p7)
}
  0xcf   :  { %264 = dma.hbm_to_vmem [thread:$0]  %s8283_s20, 16, %s262_s23, [#allocation27]  }
  0xd0   :  { %s7468_s6 = scalar_lea.hbm %s8293_s4, 1024 }
  0xd1   :  { %p7469_p8 = scmp.ne.s32.totalorder %s8293_s4, %s7468_s6  ;;  %p7472_p9 = scmp.lt.u32.totalorder %s7468_s6, %s8293_s4 }
  0xd3   :  { %p7474_p10 = pnand %p7472_p9, %p7469_p8 }
  0xd5   :  { %7477 = shalt.err (!%p7474_p10)
}
  0xd6   :  { %s7478_s11 = scalar_lea.vmem %s281_s2, 1024  ;;  %p7483_p12 = scmp.lt.s32.totalorder %s281_s2, %s281_s2 }
  0xd7   :  { %p7479_p11 = scmp.ne.s32.totalorder %s281_s2, %s7478_s11  ;;  %p7484_p13 = scmp.lt.s32.totalorder %s7478_s11, %s7478_s11 }
  0xd9   :  { %p7485_p0 = por %p7484_p13, %p7483_p12 }
  0xdb   :  { %p7486_p1 = pnand %p7485_p0, %p7479_p11 }
  0xdd   :  { %7489 = shalt.err (!%p7486_p1)
}
  0xde   :  { %286 = dma.hbm_to_vmem [thread:$0]  %s8293_s4, 1024, %s281_s2, [#allocation30], %s8158_s28, %s8158_s28, %s8159_s1  }
  0xdf   :  { %s8168_s20 = smov [#allocation32]   ;;  %s8169_s15 = smov [#allocation35]  }
  0xe0   :  { %s303_s3 = sshll.u32 %s8168_s20, 4  ;;  %s322_s16 = sshll.u32 %s8169_s15, 4  ;;  %s304_s3 = int_to_ptr.vmem [resolvable:$true] %s303_s3  ;;  %s323_s16 = int_to_ptr.vmem [resolvable:$true] %s322_s16 }
  0xe1   :  { %s7490_s18 = scalar_lea.hbm %s8303_s30, 16 }
  0xe2   :  { %p7491_p2 = scmp.ne.s32.totalorder %s8303_s30, %s7490_s18  ;;  %p7494_p3 = scmp.lt.u32.totalorder %s7490_s18, %s8303_s30 }
  0xe4   :  { %p7496_p4 = pnand %p7494_p3, %p7491_p2 }
  0xe6   :  { %7499 = shalt.err (!%p7496_p4)
}
  0xe7   :  { %s7500_s9 = scalar_lea.vmem %s304_s3, 16  ;;  %s7504_s0 = scalar_lea.vmem %s304_s3, 32 }
  0xe8   :  { %p7501_p5 = scmp.ne.s32.totalorder %s304_s3, %s7500_s9  ;;  %p7505_p6 = scmp.lt.s32.totalorder %s304_s3, %s304_s3 }
  0xe9   :  { %p7506_p7 = scmp.lt.s32.totalorder %s7504_s0, %s7500_s9 }
  0xeb   :  { %p7507_p8 = por %p7506_p7, %p7505_p6 }
  0xed   :  { %p7508_p9 = pnand %p7507_p8, %p7501_p5 }
  0xef   :  { %7511 = shalt.err (!%p7508_p9)
}
  0xf0   :  { %306 = dma.hbm_to_vmem [thread:$0]  %s8303_s30, 16, %s304_s3, [#allocation33]  }
  0xf1   :  { %s7512_s4 = scalar_lea.hbm %s8313_s19, 1024 }
  0xf2   :  { %p7513_p10 = scmp.ne.s32.totalorder %s8313_s19, %s7512_s4  ;;  %p7516_p11 = scmp.lt.u32.totalorder %s7512_s4, %s8313_s19 }
  0xf4   :  { %p7518_p12 = pnand %p7516_p11, %p7513_p10 }
  0xf6   :  { %7521 = shalt.err (!%p7518_p12)
}
  0xf7   :  { %s7522_s17 = scalar_lea.vmem %s323_s16, 1024  ;;  %p7527_p0 = scmp.lt.s32.totalorder %s323_s16, %s323_s16 }
  0xf8   :  { %p7523_p13 = scmp.ne.s32.totalorder %s323_s16, %s7522_s17  ;;  %p7528_p1 = scmp.lt.s32.totalorder %s7522_s17, %s7522_s17 }
  0xfa   :  { %p7529_p2 = por %p7528_p1, %p7527_p0 }
  0xfc   :  { %p7530_p3 = pnand %p7529_p2, %p7523_p13 }
  0xfe   :  { %7533 = shalt.err (!%p7530_p3)
}
  0xff   :  { %328 = dma.hbm_to_vmem [thread:$0]  %s8313_s19, 1024, %s323_s16, [#allocation36], %s8158_s28, %s8158_s28, %s8159_s1  }
 0x100   :  { %s8170_s30 = smov [#allocation38]   ;;  %s8171_s22 = smov [#allocation41]  }
 0x101   :  { %s345_s14 = sshll.u32 %s8170_s30, 4  ;;  %s364_s24 = sshll.u32 %s8171_s22, 4  ;;  %s346_s14 = int_to_ptr.vmem [resolvable:$true] %s345_s14  ;;  %s365_s24 = int_to_ptr.vmem [resolvable:$true] %s364_s24 }
 0x102   :  { %s7534_s23 = scalar_lea.hbm %s8323_s8, 16 }
 0x103   :  { %p7535_p4 = scmp.ne.s32.totalorder %s8323_s8, %s7534_s23  ;;  %p7538_p5 = scmp.lt.u32.totalorder %s7534_s23, %s8323_s8 }
 0x105   :  { %p7540_p6 = pnand %p7538_p5, %p7535_p4 }
 0x107   :  { %7543 = shalt.err (!%p7540_p6)
}
 0x108   :  { %s7544_s26 = scalar_lea.vmem %s346_s14, 16  ;;  %s7548_s2 = scalar_lea.vmem %s346_s14, 32 }
 0x109   :  { %p7545_p7 = scmp.ne.s32.totalorder %s346_s14, %s7544_s26  ;;  %p7549_p8 = scmp.lt.s32.totalorder %s346_s14, %s346_s14 }
 0x10a   :  { %p7550_p9 = scmp.lt.s32.totalorder %s7548_s2, %s7544_s26 }
 0x10c   :  { %p7551_p10 = por %p7550_p9, %p7549_p8 }
 0x10e   :  { %p7552_p11 = pnand %p7551_p10, %p7545_p7 }
 0x110   :  { %7555 = shalt.err (!%p7552_p11)
}
 0x111   :  { %348 = dma.hbm_to_vmem [thread:$0]  %s8323_s8, 16, %s346_s14, [#allocation39]  }
 0x112   :  { %s7556_s19 = scalar_lea.hbm %s8333_s29, 1024 }
 0x113   :  { %p7557_p12 = scmp.ne.s32.totalorder %s8333_s29, %s7556_s19  ;;  %p7560_p13 = scmp.lt.u32.totalorder %s7556_s19, %s8333_s29 }
 0x115   :  { %p7562_p0 = pnand %p7560_p13, %p7557_p12 }
 0x117   :  { %7565 = shalt.err (!%p7562_p0)
}
 0x118   :  { %s7566_s7 = scalar_lea.vmem %s365_s24, 1024  ;;  %p7571_p2 = scmp.lt.s32.totalorder %s365_s24, %s365_s24 }
 0x119   :  { %p7567_p1 = scmp.ne.s32.totalorder %s365_s24, %s7566_s7  ;;  %p7572_p3 = scmp.lt.s32.totalorder %s7566_s7, %s7566_s7 }
 0x11b   :  { %p7573_p4 = por %p7572_p3, %p7571_p2 }
 0x11d   :  { %p7574_p5 = pnand %p7573_p4, %p7567_p1 }
 0x11f   :  { %7577 = shalt.err (!%p7574_p5)
}
 0x120   :  { %370 = dma.hbm_to_vmem [thread:$0]  %s8333_s29, 1024, %s365_s24, [#allocation42], %s8158_s28, %s8158_s28, %s8159_s1  }
 0x121   :  { %s8172_s8 = smov [#allocation44]   ;;  %s8173_s25 = smov [#allocation47]  }
 0x122   :  { %s387_s10 = sshll.u32 %s8172_s8, 4  ;;  %s406_s6 = sshll.u32 %s8173_s25, 4  ;;  %s388_s10 = int_to_ptr.vmem [resolvable:$true] %s387_s10  ;;  %s407_s6 = int_to_ptr.vmem [resolvable:$true] %s406_s6 }
 0x123   :  { %s7578_s11 = scalar_lea.hbm %s8343_s21, 16 }
 0x124   :  { %p7579_p6 = scmp.ne.s32.totalorder %s8343_s21, %s7578_s11  ;;  %p7582_p7 = scmp.lt.u32.totalorder %s7578_s11, %s8343_s21 }
 0x126   :  { %p7584_p8 = pnand %p7582_p7, %p7579_p6 }
 0x128   :  { %7587 = shalt.err (!%p7584_p8)
}
 0x129   :  { %s7588_s20 = scalar_lea.vmem %s388_s10, 16  ;;  %s7592_s3 = scalar_lea.vmem %s388_s10, 32 }
 0x12a   :  { %p7589_p9 = scmp.ne.s32.totalorder %s388_s10, %s7588_s20  ;;  %p7593_p10 = scmp.lt.s32.totalorder %s388_s10, %s388_s10 }
 0x12b   :  { %p7594_p11 = scmp.lt.s32.totalorder %s7592_s3, %s7588_s20 }
 0x12d   :  { %p7595_p12 = por %p7594_p11, %p7593_p10 }
 0x12f   :  { %p7596_p13 = pnand %p7595_p12, %p7589_p9 }
 0x131   :  { %7599 = shalt.err (!%p7596_p13)
}
 0x132   :  { %s9844_s29 = sld [smem:[#allocation91_spill]] }
 0x133   :  { %390 = dma.hbm_to_vmem [thread:$0]  %s8343_s21, 16, %s388_s10, [#allocation45]  }
 0x138   :  { %s7600_s15 = scalar_lea.hbm %s9844_s29, 1024 }
 0x139   :  { %p7601_p0 = scmp.ne.s32.totalorder %s9844_s29, %s7600_s15  ;;  %p7604_p1 = scmp.lt.u32.totalorder %s7600_s15, %s9844_s29 }
 0x13b   :  { %p7606_p2 = pnand %p7604_p1, %p7601_p0 }
 0x13d   :  { %7609 = shalt.err (!%p7606_p2)
}
 0x13e   :  { %s7610_s16 = scalar_lea.vmem %s407_s6, 1024  ;;  %p7615_p4 = scmp.lt.s32.totalorder %s407_s6, %s407_s6 }
 0x13f   :  { %p7611_p3 = scmp.ne.s32.totalorder %s407_s6, %s7610_s16  ;;  %p7616_p5 = scmp.lt.s32.totalorder %s7610_s16, %s7610_s16 }
 0x141   :  { %p7617_p6 = por %p7616_p5, %p7615_p4 }
 0x143   :  { %p7618_p7 = pnand %p7617_p6, %p7611_p3 }
 0x145   :  { %7621 = shalt.err (!%p7618_p7)
}
 0x146   :  { %s9845_s18 = sld [smem:[#allocation93_spill]]  ;;  %s8174_s21 = smov [#allocation50]  }
 0x147   :  { %412 = dma.hbm_to_vmem [thread:$0]  %s9844_s29, 1024, %s407_s6, [#allocation48], %s8158_s28, %s8158_s28, %s8159_s1  }
 0x148   :  { %s429_s9 = sshll.u32 %s8174_s21, 4  ;;  %s8175_s0 = smov [#allocation53]   ;;  %s430_s9 = int_to_ptr.vmem [resolvable:$true] %s429_s9 }
 0x149   :  { %s448_s4 = sshll.u32 %s8175_s0, 4  ;;  %s449_s4 = int_to_ptr.vmem [resolvable:$true] %s448_s4 }
 0x14c   :  { %s7622_s17 = scalar_lea.hbm %s9845_s18, 16 }
 0x14d   :  { %p7623_p8 = scmp.ne.s32.totalorder %s9845_s18, %s7622_s17  ;;  %p7626_p9 = scmp.lt.u32.totalorder %s7622_s17, %s9845_s18 }
 0x14f   :  { %p7628_p10 = pnand %p7626_p9, %p7623_p8 }
 0x151   :  { %7631 = shalt.err (!%p7628_p10)
}
 0x152   :  { %s7632_s30 = scalar_lea.vmem %s430_s9, 16  ;;  %s7636_s14 = scalar_lea.vmem %s430_s9, 32 }
 0x153   :  { %p7633_p11 = scmp.ne.s32.totalorder %s430_s9, %s7632_s30  ;;  %p7637_p12 = scmp.lt.s32.totalorder %s430_s9, %s430_s9 }
 0x154   :  { %p7638_p13 = scmp.lt.s32.totalorder %s7636_s14, %s7632_s30 }
 0x156   :  { %p7639_p0 = por %p7638_p13, %p7637_p12 }
 0x158   :  { %p7640_p1 = pnand %p7639_p0, %p7633_p11 }
 0x15a   :  { %7643 = shalt.err (!%p7640_p1)
}
 0x15b   :  { %432 = dma.hbm_to_vmem [thread:$0]  %s9845_s18, 16, %s430_s9, [#allocation51]  }
 0x15c   :  { %s7644_s28 = scalar_lea.hbm %s8373_s13, 7168 }
 0x15d   :  { %p7645_p2 = scmp.ne.s32.totalorder %s8373_s13, %s7644_s28  ;;  %p7648_p3 = scmp.lt.u32.totalorder %s7644_s28, %s8373_s13 }
 0x15f   :  { %p7650_p4 = pnand %p7648_p3, %p7645_p2 }
 0x161   :  { %7653 = shalt.err (!%p7650_p4)
}
 0x162   :  { %s7654_s1 = scalar_lea.vmem %s449_s4, 7168  ;;  %p7659_p6 = scmp.lt.s32.totalorder %s449_s4, %s449_s4 }
 0x163   :  { %p7655_p5 = scmp.ne.s32.totalorder %s449_s4, %s7654_s1  ;;  %p7660_p7 = scmp.lt.s32.totalorder %s7654_s1, %s7654_s1 }
 0x165   :  { %p7661_p8 = por %p7660_p7, %p7659_p6 }
 0x167   :  { %p7662_p9 = pnand %p7661_p8, %p7655_p5 }
 0x169   :  { %7665 = shalt.err (!%p7662_p9)
}
 0x16a   :  { %s8176_s22 = smov 448   ;;  %s9846_s24 = sld [smem:[#allocation76_spill]] }
 0x16b   :  { %s8177_s23 = smov 28   ;;  %s8178_s26 = smov [#allocation2]  }
 0x16c   :  { %454 = dma.hbm_to_vmem [thread:$0]  %s8373_s13, 7168, %s449_s4, [#allocation54], %s8176_s22, %s8176_s22, %s8177_s23  }
 0x16d   :  { %s100_s2 = sshll.u32 %s8178_s26, 4  ;;  %s101_s2 = int_to_ptr.vmem [resolvable:$true] %s100_s2 }
 0x170   :  { %s7666_s19 = scalar_lea.hbm %s9846_s24, 14336 }
 0x171   :  { %p7667_p10 = scmp.ne.s32.totalorder %s9846_s24, %s7666_s19  ;;  %p7670_p11 = scmp.lt.u32.totalorder %s7666_s19, %s9846_s24 }
 0x173   :  { %p7672_p12 = pnand %p7670_p11, %p7667_p10 }
 0x175   :  { %7675 = shalt.err (!%p7672_p12)
}
 0x176   :  { %s7676_s7 = scalar_lea.vmem %s101_s2, 14336  ;;  %p7681_p0 = scmp.lt.s32.totalorder %s101_s2, %s101_s2 }
 0x177   :  { %p7677_p13 = scmp.ne.s32.totalorder %s101_s2, %s7676_s7  ;;  %p7682_p1 = scmp.lt.s32.totalorder %s7676_s7, %s7676_s7 }
 0x179   :  { %p7683_p2 = por %p7682_p1, %p7681_p0 }
 0x17b   :  { %p7684_p3 = pnand %p7683_p2, %p7677_p13 }
 0x17d   :  { %7687 = shalt.err (!%p7684_p3)
}
 0x17e   :  { %s8179_s8 = smov 896   ;;  %s9847_s10 = sld [smem:[#allocation77_spill]] }
 0x17f   :  { %s8180_s13 = smov 56   ;;  %s8181_s25 = smov [#allocation7]  }
 0x180   :  { %106 = dma.hbm_to_vmem [thread:$0]  %s9846_s24, 14336, %s101_s2, [#allocation3], %s8179_s8, %s8179_s8, %s8180_s13  }
 0x181   :  { %s125_s6 = sshll.u32 %s8181_s25, 4  ;;  %s8182_s11 = smov [#allocation10]   ;;  %s126_s6 = int_to_ptr.vmem [resolvable:$true] %s125_s6 }
 0x182   :  { %s145_s20 = sshll.u32 %s8182_s11, 4  ;;  %s146_s20 = int_to_ptr.vmem [resolvable:$true] %s145_s20 }
 0x184   :  { %s7688_s3 = scalar_lea.hbm %s9847_s10, 16 }
 0x185   :  { %p7689_p4 = scmp.ne.s32.totalorder %s9847_s10, %s7688_s3  ;;  %p7692_p5 = scmp.lt.u32.totalorder %s7688_s3, %s9847_s10 }
 0x187   :  { %p7694_p6 = pnand %p7692_p5, %p7689_p4 }
 0x189   :  { %7697 = shalt.err (!%p7694_p6)
}
 0x18a   :  { %s7698_s29 = scalar_lea.vmem %s126_s6, 16  ;;  %s7702_s15 = scalar_lea.vmem %s126_s6, 32 }
 0x18b   :  { %p7699_p7 = scmp.ne.s32.totalorder %s126_s6, %s7698_s29  ;;  %p7703_p8 = scmp.lt.s32.totalorder %s126_s6, %s126_s6 }
 0x18c   :  { %p7704_p9 = scmp.lt.s32.totalorder %s7702_s15, %s7698_s29 }
 0x18e   :  { %p7705_p10 = por %p7704_p9, %p7703_p8 }
 0x190   :  { %p7706_p11 = pnand %p7705_p10, %p7699_p7 }
 0x192   :  { %7709 = shalt.err (!%p7706_p11)
}
 0x193   :  { %s9848_s16 = sld [smem:[#allocation78_spill]] }
 0x194   :  { %128 = dma.hbm_to_vmem [thread:$0]  %s9847_s10, 16, %s126_s6, [#allocation6]  }
 0x199   :  { %s7710_s18 = scalar_lea.hbm %s9848_s16, 16 }
 0x19a   :  { %p7711_p12 = scmp.ne.s32.totalorder %s9848_s16, %s7710_s18  ;;  %p7714_p13 = scmp.lt.u32.totalorder %s7710_s18, %s9848_s16 }
 0x19c   :  { %p7716_p0 = pnand %p7714_p13, %p7711_p12 }
 0x19e   :  { %7719 = shalt.err (!%p7716_p0)
}
 0x19f   :  { %s7720_s21 = scalar_lea.vmem %s146_s20, 16  ;;  %s7724_s9 = scalar_lea.vmem %s146_s20, 32 }
 0x1a0   :  { %p7721_p1 = scmp.ne.s32.totalorder %s146_s20, %s7720_s21  ;;  %p7725_p2 = scmp.lt.s32.totalorder %s146_s20, %s146_s20 }
 0x1a1   :  { %p7726_p3 = scmp.lt.s32.totalorder %s7724_s9, %s7720_s21 }
 0x1a3   :  { %p7727_p4 = por %p7726_p3, %p7725_p2 }
 0x1a5   :  { %p7728_p5 = pnand %p7727_p4, %p7721_p1 }
 0x1a7   :  { %7731 = shalt.err (!%p7728_p5)
}
 0x1a8   :  { %s9849_s0 = sld [smem:[#allocation79_spill]]  ;;  %s8183_s4 = smov [#allocation13]  }
 0x1a9   :  { %148 = dma.hbm_to_vmem [thread:$0]  %s9848_s16, 16, %s146_s20, [#allocation9]  }
 0x1aa   :  { %s167_s17 = sshll.u32 %s8183_s4, 4  ;;  %s8184_s30 = smov [#allocation16]   ;;  %s168_s17 = int_to_ptr.vmem [resolvable:$true] %s167_s17 }
 0x1ab   :  { %s187_s14 = sshll.u32 %s8184_s30, 4  ;;  %s188_s14 = int_to_ptr.vmem [resolvable:$true] %s187_s14 }
 0x1ae   :  { %s7732_s28 = scalar_lea.hbm %s9849_s0, 16 }
 0x1af   :  { %p7733_p6 = scmp.ne.s32.totalorder %s9849_s0, %s7732_s28  ;;  %p7736_p7 = scmp.lt.u32.totalorder %s7732_s28, %s9849_s0 }
 0x1b1   :  { %p7738_p8 = pnand %p7736_p7, %p7733_p6 }
 0x1b3   :  { %7741 = shalt.err (!%p7738_p8)
}
 0x1b4   :  { %s7742_s1 = scalar_lea.vmem %s168_s17, 16  ;;  %s7746_s22 = scalar_lea.vmem %s168_s17, 32 }
 0x1b5   :  { %p7743_p9 = scmp.ne.s32.totalorder %s168_s17, %s7742_s1  ;;  %p7747_p10 = scmp.lt.s32.totalorder %s168_s17, %s168_s17 }
 0x1b6   :  { %p7748_p11 = scmp.lt.s32.totalorder %s7746_s22, %s7742_s1 }
 0x1b8   :  { %p7749_p12 = por %p7748_p11, %p7747_p10 }
 0x1ba   :  { %p7750_p13 = pnand %p7749_p12, %p7743_p9 }
 0x1bc   :  { %7753 = shalt.err (!%p7750_p13)
}
 0x1bd   :  { %s9850_s24 = sld [smem:[#allocation80_spill]] }
 0x1be   :  { %170 = dma.hbm_to_vmem [thread:$0]  %s9849_s0, 16, %s168_s17, [#allocation12]  }
 0x1c3   :  { %s7754_s23 = scalar_lea.hbm %s9850_s24, 16 }
 0x1c4   :  { %p7755_p0 = scmp.ne.s32.totalorder %s9850_s24, %s7754_s23  ;;  %p7758_p1 = scmp.lt.u32.totalorder %s7754_s23, %s9850_s24 }
 0x1c6   :  { %p7760_p2 = pnand %p7758_p1, %p7755_p0 }
 0x1c8   :  { %7763 = shalt.err (!%p7760_p2)
}
 0x1c9   :  { %s7764_s26 = scalar_lea.vmem %s188_s14, 16  ;;  %s7768_s2 = scalar_lea.vmem %s188_s14, 32 }
 0x1ca   :  { %p7765_p3 = scmp.ne.s32.totalorder %s188_s14, %s7764_s26  ;;  %p7769_p4 = scmp.lt.s32.totalorder %s188_s14, %s188_s14 }
 0x1cb   :  { %p7770_p5 = scmp.lt.s32.totalorder %s7768_s2, %s7764_s26 }
 0x1cd   :  { %p7771_p6 = por %p7770_p5, %p7769_p4 }
 0x1cf   :  { %p7772_p7 = pnand %p7771_p6, %p7765_p3 }
 0x1d1   :  { %7775 = shalt.err (!%p7772_p7)
}
 0x1d2   :  { %s9851_s19 = sld [smem:[#allocation81_spill]]  ;;  %s8185_s7 = smov [#allocation19]  }
 0x1d3   :  { %190 = dma.hbm_to_vmem [thread:$0]  %s9850_s24, 16, %s188_s14, [#allocation15]  }
 0x1d4   :  { %s209_s10 = sshll.u32 %s8185_s7, 4  ;;  %s8186_s25 = smov [#allocation22]   ;;  %s210_s10 = int_to_ptr.vmem [resolvable:$true] %s209_s10 }
 0x1d5   :  { %s229_s6 = sshll.u32 %s8186_s25, 4  ;;  %s230_s6 = int_to_ptr.vmem [resolvable:$true] %s229_s6 }
 0x1d8   :  { %s7776_s11 = scalar_lea.hbm %s9851_s19, 16 }
 0x1d9   :  { %p7777_p8 = scmp.ne.s32.totalorder %s9851_s19, %s7776_s11  ;;  %p7780_p9 = scmp.lt.u32.totalorder %s7776_s11, %s9851_s19 }
 0x1db   :  { %p7782_p10 = pnand %p7780_p9, %p7777_p8 }
 0x1dd   :  { %7785 = shalt.err (!%p7782_p10)
}
 0x1de   :  { %s7786_s20 = scalar_lea.vmem %s210_s10, 16  ;;  %s7790_s3 = scalar_lea.vmem %s210_s10, 32 }
 0x1df   :  { %p7787_p11 = scmp.ne.s32.totalorder %s210_s10, %s7786_s20  ;;  %p7791_p12 = scmp.lt.s32.totalorder %s210_s10, %s210_s10 }
 0x1e0   :  { %p7792_p13 = scmp.lt.s32.totalorder %s7790_s3, %s7786_s20 }
 0x1e2   :  { %p7793_p0 = por %p7792_p13, %p7791_p12 }
 0x1e4   :  { %p7794_p1 = pnand %p7793_p0, %p7787_p11 }
 0x1e6   :  { %7797 = shalt.err (!%p7794_p1)
}
 0x1e7   :  { %s9852_s29 = sld [smem:[#allocation82_spill]] }
 0x1e8   :  { %212 = dma.hbm_to_vmem [thread:$0]  %s9851_s19, 16, %s210_s10, [#allocation18]  }
 0x1ed   :  { %s7798_s15 = scalar_lea.hbm %s9852_s29, 16 }
 0x1ee   :  { %p7799_p2 = scmp.ne.s32.totalorder %s9852_s29, %s7798_s15  ;;  %p7802_p3 = scmp.lt.u32.totalorder %s7798_s15, %s9852_s29 }
 0x1f0   :  { %p7804_p4 = pnand %p7802_p3, %p7799_p2 }
 0x1f2   :  { %7807 = shalt.err (!%p7804_p4)
}
 0x1f3   :  { %s7808_s16 = scalar_lea.vmem %s230_s6, 16  ;;  %s7812_s18 = scalar_lea.vmem %s230_s6, 32 }
 0x1f4   :  { %p7809_p5 = scmp.ne.s32.totalorder %s230_s6, %s7808_s16  ;;  %p7813_p6 = scmp.lt.s32.totalorder %s230_s6, %s230_s6 }
 0x1f5   :  { %p7814_p7 = scmp.lt.s32.totalorder %s7812_s18, %s7808_s16 }
 0x1f7   :  { %p7815_p8 = por %p7814_p7, %p7813_p6 }
 0x1f9   :  { %p7816_p9 = pnand %p7815_p8, %p7809_p5 }
 0x1fb   :  { %7819 = shalt.err (!%p7816_p9)
}
 0x1fc   :  { %s9853_s21 = sld [smem:[#allocation83_spill]]  ;;  %s8187_s9 = smov [#allocation25]  }
 0x1fd   :  { %232 = dma.hbm_to_vmem [thread:$0]  %s9852_s29, 16, %s230_s6, [#allocation21]  }
 0x1fe   :  { %s251_s0 = sshll.u32 %s8187_s9, 4  ;;  %s8188_s4 = smov [#allocation28]   ;;  %s252_s0 = int_to_ptr.vmem [resolvable:$true] %s251_s0 }
 0x1ff   :  { %s271_s17 = sshll.u32 %s8188_s4, 4  ;;  %s272_s17 = int_to_ptr.vmem [resolvable:$true] %s271_s17 }
 0x202   :  { %s7820_s30 = scalar_lea.hbm %s9853_s21, 16 }
 0x203   :  { %p7821_p10 = scmp.ne.s32.totalorder %s9853_s21, %s7820_s30  ;;  %p7824_p11 = scmp.lt.u32.totalorder %s7820_s30, %s9853_s21 }
 0x205   :  { %p7826_p12 = pnand %p7824_p11, %p7821_p10 }
 0x207   :  { %7829 = shalt.err (!%p7826_p12)
}
 0x208   :  { %s7830_s14 = scalar_lea.vmem %s252_s0, 16  ;;  %s7834_s28 = scalar_lea.vmem %s252_s0, 32 }
 0x209   :  { %p7831_p13 = scmp.ne.s32.totalorder %s252_s0, %s7830_s14  ;;  %p7835_p0 = scmp.lt.s32.totalorder %s252_s0, %s252_s0 }
 0x20a   :  { %p7836_p1 = scmp.lt.s32.totalorder %s7834_s28, %s7830_s14 }
 0x20c   :  { %p7837_p2 = por %p7836_p1, %p7835_p0 }
 0x20e   :  { %p7838_p3 = pnand %p7837_p2, %p7831_p13 }
 0x210   :  { %7841 = shalt.err (!%p7838_p3)
}
 0x211   :  { %s9854_s1 = sld [smem:[#allocation84_spill]] }
 0x212   :  { %254 = dma.hbm_to_vmem [thread:$0]  %s9853_s21, 16, %s252_s0, [#allocation24]  }
 0x217   :  { %s7842_s22 = scalar_lea.hbm %s9854_s1, 16 }
 0x218   :  { %p7843_p4 = scmp.ne.s32.totalorder %s9854_s1, %s7842_s22  ;;  %p7846_p5 = scmp.lt.u32.totalorder %s7842_s22, %s9854_s1 }
 0x21a   :  { %p7848_p6 = pnand %p7846_p5, %p7843_p4 }
 0x21c   :  { %7851 = shalt.err (!%p7848_p6)
}
 0x21d   :  { %s7852_s24 = scalar_lea.vmem %s272_s17, 16  ;;  %s7856_s23 = scalar_lea.vmem %s272_s17, 32 }
 0x21e   :  { %p7853_p7 = scmp.ne.s32.totalorder %s272_s17, %s7852_s24  ;;  %p7857_p8 = scmp.lt.s32.totalorder %s272_s17, %s272_s17 }
 0x21f   :  { %p7858_p9 = scmp.lt.s32.totalorder %s7856_s23, %s7852_s24 }
 0x221   :  { %p7859_p10 = por %p7858_p9, %p7857_p8 }
 0x223   :  { %p7860_p11 = pnand %p7859_p10, %p7853_p7 }
 0x225   :  { %7863 = shalt.err (!%p7860_p11)
}
 0x226   :  { %s9855_s26 = sld [smem:[#allocation85_spill]]  ;;  %s8189_s2 = smov [#allocation31]  }
 0x227   :  { %274 = dma.hbm_to_vmem [thread:$0]  %s9854_s1, 16, %s272_s17, [#allocation27]  }
 0x228   :  { %s293_s19 = sshll.u32 %s8189_s2, 4  ;;  %s8190_s7 = smov [#allocation34]   ;;  %s294_s19 = int_to_ptr.vmem [resolvable:$true] %s293_s19 }
 0x229   :  { %s313_s10 = sshll.u32 %s8190_s7, 4  ;;  %s314_s10 = int_to_ptr.vmem [resolvable:$true] %s313_s10 }
 0x22c   :  { %s7864_s25 = scalar_lea.hbm %s9855_s26, 16 }
 0x22d   :  { %p7865_p12 = scmp.ne.s32.totalorder %s9855_s26, %s7864_s25  ;;  %p7868_p13 = scmp.lt.u32.totalorder %s7864_s25, %s9855_s26 }
 0x22f   :  { %p7870_p0 = pnand %p7868_p13, %p7865_p12 }
 0x231   :  { %7873 = shalt.err (!%p7870_p0)
}
 0x232   :  { %s7874_s6 = scalar_lea.vmem %s294_s19, 16  ;;  %s7878_s11 = scalar_lea.vmem %s294_s19, 32 }
 0x233   :  { %p7875_p1 = scmp.ne.s32.totalorder %s294_s19, %s7874_s6  ;;  %p7879_p2 = scmp.lt.s32.totalorder %s294_s19, %s294_s19 }
 0x234   :  { %p7880_p3 = scmp.lt.s32.totalorder %s7878_s11, %s7874_s6 }
 0x236   :  { %p7881_p4 = por %p7880_p3, %p7879_p2 }
 0x238   :  { %p7882_p5 = pnand %p7881_p4, %p7875_p1 }
 0x23a   :  { %7885 = shalt.err (!%p7882_p5)
}
 0x23b   :  { %s9856_s20 = sld [smem:[#allocation86_spill]] }
 0x23c   :  { %296 = dma.hbm_to_vmem [thread:$0]  %s9855_s26, 16, %s294_s19, [#allocation30]  }
 0x241   :  { %s7886_s3 = scalar_lea.hbm %s9856_s20, 16 }
 0x242   :  { %p7887_p6 = scmp.ne.s32.totalorder %s9856_s20, %s7886_s3  ;;  %p7890_p7 = scmp.lt.u32.totalorder %s7886_s3, %s9856_s20 }
 0x244   :  { %p7892_p8 = pnand %p7890_p7, %p7887_p6 }
 0x246   :  { %7895 = shalt.err (!%p7892_p8)
}
 0x247   :  { %s7896_s29 = scalar_lea.vmem %s314_s10, 16  ;;  %s7900_s15 = scalar_lea.vmem %s314_s10, 32 }
 0x248   :  { %p7897_p9 = scmp.ne.s32.totalorder %s314_s10, %s7896_s29  ;;  %p7901_p10 = scmp.lt.s32.totalorder %s314_s10, %s314_s10 }
 0x249   :  { %p7902_p11 = scmp.lt.s32.totalorder %s7900_s15, %s7896_s29 }
 0x24b   :  { %p7903_p12 = por %p7902_p11, %p7901_p10 }
 0x24d   :  { %p7904_p13 = pnand %p7903_p12, %p7897_p9 }
 0x24f   :  { %7907 = shalt.err (!%p7904_p13)
}
 0x250   :  { %s9857_s16 = sld [smem:[#allocation87_spill]]  ;;  %s8191_s18 = smov [#allocation37]  }
 0x251   :  { %316 = dma.hbm_to_vmem [thread:$0]  %s9856_s20, 16, %s314_s10, [#allocation33]  }
 0x252   :  { %s335_s21 = sshll.u32 %s8191_s18, 4  ;;  %s8192_s9 = smov [#allocation40]   ;;  %s336_s21 = int_to_ptr.vmem [resolvable:$true] %s335_s21 }
 0x253   :  { %s355_s0 = sshll.u32 %s8192_s9, 4  ;;  %s356_s0 = int_to_ptr.vmem [resolvable:$true] %s355_s0 }
 0x256   :  { %s7908_s4 = scalar_lea.hbm %s9857_s16, 16 }
 0x257   :  { %p7909_p0 = scmp.ne.s32.totalorder %s9857_s16, %s7908_s4  ;;  %p7912_p1 = scmp.lt.u32.totalorder %s7908_s4, %s9857_s16 }
 0x259   :  { %p7914_p2 = pnand %p7912_p1, %p7909_p0 }
 0x25b   :  { %7917 = shalt.err (!%p7914_p2)
}
 0x25c   :  { %s7918_s17 = scalar_lea.vmem %s336_s21, 16  ;;  %s7922_s30 = scalar_lea.vmem %s336_s21, 32 }
 0x25d   :  { %p7919_p3 = scmp.ne.s32.totalorder %s336_s21, %s7918_s17  ;;  %p7923_p4 = scmp.lt.s32.totalorder %s336_s21, %s336_s21 }
 0x25e   :  { %p7924_p5 = scmp.lt.s32.totalorder %s7922_s30, %s7918_s17 }
 0x260   :  { %p7925_p6 = por %p7924_p5, %p7923_p4 }
 0x262   :  { %p7926_p7 = pnand %p7925_p6, %p7919_p3 }
 0x264   :  { %7929 = shalt.err (!%p7926_p7)
}
 0x265   :  { %s9858_s14 = sld [smem:[#allocation88_spill]] }
 0x266   :  { %338 = dma.hbm_to_vmem [thread:$0]  %s9857_s16, 16, %s336_s21, [#allocation36]  }
 0x26b   :  { %s7930_s28 = scalar_lea.hbm %s9858_s14, 16 }
 0x26c   :  { %p7931_p8 = scmp.ne.s32.totalorder %s9858_s14, %s7930_s28  ;;  %p7934_p9 = scmp.lt.u32.totalorder %s7930_s28, %s9858_s14 }
 0x26e   :  { %p7936_p10 = pnand %p7934_p9, %p7931_p8 }
 0x270   :  { %7939 = shalt.err (!%p7936_p10)
}
 0x271   :  { %s7940_s1 = scalar_lea.vmem %s356_s0, 16  ;;  %s7944_s22 = scalar_lea.vmem %s356_s0, 32 }
 0x272   :  { %p7941_p11 = scmp.ne.s32.totalorder %s356_s0, %s7940_s1  ;;  %p7945_p12 = scmp.lt.s32.totalorder %s356_s0, %s356_s0 }
 0x273   :  { %p7946_p13 = scmp.lt.s32.totalorder %s7944_s22, %s7940_s1 }
 0x275   :  { %p7947_p0 = por %p7946_p13, %p7945_p12 }
 0x277   :  { %p7948_p1 = pnand %p7947_p0, %p7941_p11 }
 0x279   :  { %7951 = shalt.err (!%p7948_p1)
}
 0x27a   :  { %s9859_s24 = sld [smem:[#allocation89_spill]]  ;;  %s8193_s23 = smov [#allocation43]  }
 0x27b   :  { %358 = dma.hbm_to_vmem [thread:$0]  %s9858_s14, 16, %s356_s0, [#allocation39]  }
 0x27c   :  { %s377_s26 = sshll.u32 %s8193_s23, 4  ;;  %s8194_s2 = smov [#allocation46]   ;;  %s378_s26 = int_to_ptr.vmem [resolvable:$true] %s377_s26 }
 0x27d   :  { %s397_s19 = sshll.u32 %s8194_s2, 4  ;;  %s398_s19 = int_to_ptr.vmem [resolvable:$true] %s397_s19 }
 0x280   :  { %s7952_s7 = scalar_lea.hbm %s9859_s24, 16 }
 0x281   :  { %p7953_p2 = scmp.ne.s32.totalorder %s9859_s24, %s7952_s7  ;;  %p7956_p3 = scmp.lt.u32.totalorder %s7952_s7, %s9859_s24 }
 0x283   :  { %p7958_p4 = pnand %p7956_p3, %p7953_p2 }
 0x285   :  { %7961 = shalt.err (!%p7958_p4)
}
 0x286   :  { %s7962_s10 = scalar_lea.vmem %s378_s26, 16  ;;  %s7966_s25 = scalar_lea.vmem %s378_s26, 32 }
 0x287   :  { %p7963_p5 = scmp.ne.s32.totalorder %s378_s26, %s7962_s10  ;;  %p7967_p6 = scmp.lt.s32.totalorder %s378_s26, %s378_s26 }
 0x288   :  { %p7968_p7 = scmp.lt.s32.totalorder %s7966_s25, %s7962_s10 }
 0x28a   :  { %p7969_p8 = por %p7968_p7, %p7967_p6 }
 0x28c   :  { %p7970_p9 = pnand %p7969_p8, %p7963_p5 }
 0x28e   :  { %7973 = shalt.err (!%p7970_p9)
}
 0x28f   :  { %s9860_s6 = sld [smem:[#allocation90_spill]] }
 0x290   :  { %380 = dma.hbm_to_vmem [thread:$0]  %s9859_s24, 16, %s378_s26, [#allocation42]  }
 0x295   :  { %s7974_s11 = scalar_lea.hbm %s9860_s6, 16 }
 0x296   :  { %p7975_p10 = scmp.ne.s32.totalorder %s9860_s6, %s7974_s11  ;;  %p7978_p11 = scmp.lt.u32.totalorder %s7974_s11, %s9860_s6 }
 0x298   :  { %p7980_p12 = pnand %p7978_p11, %p7975_p10 }
 0x29a   :  { %7983 = shalt.err (!%p7980_p12)
}
 0x29b   :  { %s7984_s20 = scalar_lea.vmem %s398_s19, 16  ;;  %s7988_s3 = scalar_lea.vmem %s398_s19, 32 }
 0x29c   :  { %p7985_p13 = scmp.ne.s32.totalorder %s398_s19, %s7984_s20  ;;  %p7989_p0 = scmp.lt.s32.totalorder %s398_s19, %s398_s19 }
 0x29d   :  { %p7990_p1 = scmp.lt.s32.totalorder %s7988_s3, %s7984_s20 }
 0x29f   :  { %p7991_p2 = por %p7990_p1, %p7989_p0 }
 0x2a1   :  { %p7992_p3 = pnand %p7991_p2, %p7985_p13 }
 0x2a3   :  { %7995 = shalt.err (!%p7992_p3)
}
 0x2a4   :  { %s9861_s29 = sld [smem:[#allocation92_spill]]  ;;  %s8195_s15 = smov [#allocation49]  }
 0x2a5   :  { %400 = dma.hbm_to_vmem [thread:$0]  %s9860_s6, 16, %s398_s19, [#allocation45]  }
 0x2a6   :  { %s419_s16 = sshll.u32 %s8195_s15, 4  ;;  %s8196_s18 = smov [#allocation52]   ;;  %s420_s16 = int_to_ptr.vmem [resolvable:$true] %s419_s16 }
 0x2a7   :  { %s439_s21 = sshll.u32 %s8196_s18, 4  ;;  %s440_s21 = int_to_ptr.vmem [resolvable:$true] %s439_s21 }
 0x2aa   :  { %s7996_s9 = scalar_lea.hbm %s9861_s29, 16 }
 0x2ab   :  { %p7997_p4 = scmp.ne.s32.totalorder %s9861_s29, %s7996_s9  ;;  %p8000_p5 = scmp.lt.u32.totalorder %s7996_s9, %s9861_s29 }
 0x2ad   :  { %p8002_p6 = pnand %p8000_p5, %p7997_p4 }
 0x2af   :  { %8005 = shalt.err (!%p8002_p6)
}
 0x2b0   :  { %s8006_s0 = scalar_lea.vmem %s420_s16, 16  ;;  %s8010_s4 = scalar_lea.vmem %s420_s16, 32 }
 0x2b1   :  { %p8007_p7 = scmp.ne.s32.totalorder %s420_s16, %s8006_s0  ;;  %p8011_p8 = scmp.lt.s32.totalorder %s420_s16, %s420_s16 }
 0x2b2   :  { %p8012_p9 = scmp.lt.s32.totalorder %s8010_s4, %s8006_s0 }
 0x2b4   :  { %p8013_p10 = por %p8012_p9, %p8011_p8 }
 0x2b6   :  { %p8014_p11 = pnand %p8013_p10, %p8007_p7 }
 0x2b8   :  { %8017 = shalt.err (!%p8014_p11)
}
 0x2b9   :  { %422 = dma.hbm_to_vmem [thread:$0]  %s9861_s29, 16, %s420_s16, [#allocation48]  }
 0x2ba   :  { %s8018_s17 = scalar_lea.hbm %s8368_s27, 16 }
 0x2bb   :  { %p8019_p12 = scmp.ne.s32.totalorder %s8368_s27, %s8018_s17  ;;  %p8022_p13 = scmp.lt.u32.totalorder %s8018_s17, %s8368_s27 }
 0x2bd   :  { %p8024_p0 = pnand %p8022_p13, %p8019_p12 }
 0x2bf   :  { %8027 = shalt.err (!%p8024_p0)
}
 0x2c0   :  { %s8028_s30 = scalar_lea.vmem %s440_s21, 16  ;;  %s8032_s14 = scalar_lea.vmem %s440_s21, 32 }
 0x2c1   :  { %p8029_p1 = scmp.ne.s32.totalorder %s440_s21, %s8028_s30  ;;  %p8033_p2 = scmp.lt.s32.totalorder %s440_s21, %s440_s21 }
 0x2c2   :  { %p8034_p3 = scmp.lt.s32.totalorder %s8032_s14, %s8028_s30 }
 0x2c4   :  { %p8035_p4 = por %p8034_p3, %p8033_p2 }
 0x2c6   :  { %p8036_p5 = pnand %p8035_p4, %p8029_p1 }
 0x2c8   :  { %8039 = shalt.err (!%p8036_p5)
}
 0x2c9   :  { %442 = dma.hbm_to_vmem [thread:$0]  %s8368_s27, 16, %s440_s21, [#allocation51]  }
 0x2ca   :  { %s8197_s28 = smov [#allocation55]   ;;  %s8040_s22 = scalar_lea.hbm %s8378_s12, 112 }
 0x2cb   :  { %s461_s1 = sshll.u32 %s8197_s28, 4  ;;  %p8041_p6 = scmp.ne.s32.totalorder %s8378_s12, %s8040_s22  ;;  %s462_s1 = int_to_ptr.vmem [resolvable:$true] %s461_s1 }
 0x2cc   :  { %p8044_p7 = scmp.lt.u32.totalorder %s8040_s22, %s8378_s12 }
 0x2ce   :  { %p8046_p8 = pnand %p8044_p7, %p8041_p6 }
 0x2d0   :  { %8049 = shalt.err (!%p8046_p8)
}
 0x2d1   :  { %s8050_s24 = scalar_lea.vmem %s462_s1, 112  ;;  %s8054_s23 = scalar_lea.vmem %s462_s1, 128 }
 0x2d2   :  { %p8051_p9 = scmp.ne.s32.totalorder %s462_s1, %s8050_s24  ;;  %p8055_p10 = scmp.lt.s32.totalorder %s462_s1, %s462_s1 }
 0x2d3   :  { %p8056_p11 = scmp.lt.s32.totalorder %s8054_s23, %s8050_s24 }
 0x2d5   :  { %p8057_p12 = por %p8056_p11, %p8055_p10 }
 0x2d7   :  { %p8058_p13 = pnand %p8057_p12, %p8051_p9 }
 0x2d9   :  { %8061 = shalt.err (!%p8058_p13)
}
 0x2da   :  { %464 = dma.hbm_to_vmem [thread:$0]  %s8378_s12, 112, %s462_s1, [#allocation54]  }
 0x2db   :  { %8084 = dma.done.wait [#allocation3], 14336  }
 0x2dc   :  { %8085 = vsyncadd [#allocation3], 4294952960 }
 0x2dd   :  { %8086 = dma.done.wait [#allocation6], 7184  }
 0x2de   :  { %8087 = vsyncadd [#allocation6], 4294960112 }
 0x2df   :  { %8088 = dma.done.wait [#allocation9], 32  }
 0x2e0   :  { %8089 = vsyncadd [#allocation9], 4294967264 }
 0x2e1   :  { %8090 = dma.done.wait [#allocation12], 1040  }
 0x2e2   :  { %8091 = vsyncadd [#allocation12], 4294966256 }
 0x2e3   :  { %8092 = dma.done.wait [#allocation15], 32  }
 0x2e4   :  { %8093 = vsyncadd [#allocation15], 4294967264 }
 0x2e5   :  { %8094 = dma.done.wait [#allocation18], 1040  }
 0x2e6   :  { %8095 = vsyncadd [#allocation18], 4294966256 }
 0x2e7   :  { %8096 = dma.done.wait [#allocation21], 32  }
 0x2e8   :  { %8097 = vsyncadd [#allocation21], 4294967264 }
 0x2e9   :  { %8098 = dma.done.wait [#allocation24], 1040  }
 0x2ea   :  { %8099 = vsyncadd [#allocation24], 4294966256 }
 0x2eb   :  { %8100 = dma.done.wait [#allocation27], 32  }
 0x2ec   :  { %8101 = vsyncadd [#allocation27], 4294967264 }
 0x2ed   :  { %8102 = dma.done.wait [#allocation30], 1040  }
 0x2ee   :  { %8103 = vsyncadd [#allocation30], 4294966256 }
 0x2ef   :  { %8104 = dma.done.wait [#allocation33], 32  }
 0x2f0   :  { %8105 = vsyncadd [#allocation33], 4294967264 }
 0x2f1   :  { %8106 = dma.done.wait [#allocation36], 1040  }
 0x2f2   :  { %8107 = vsyncadd [#allocation36], 4294966256 }
 0x2f3   :  { %8108 = dma.done.wait [#allocation39], 32  }
 0x2f4   :  { %8109 = vsyncadd [#allocation39], 4294967264 }
 0x2f5   :  { %8110 = dma.done.wait [#allocation42], 1040  }
 0x2f6   :  { %8111 = vsyncadd [#allocation42], 4294966256 }
 0x2f7   :  { %8112 = dma.done.wait [#allocation45], 32  }
 0x2f8   :  { %8113 = vsyncadd [#allocation45], 4294967264 }
 0x2f9   :  { %8114 = dma.done.wait [#allocation48], 1040  }
 0x2fa   :  { %8115 = vsyncadd [#allocation48], 4294966256 }
 0x2fb   :  { %8116 = dma.done.wait [#allocation51], 32  }
 0x2fc   :  { %8117 = vsyncadd [#allocation51], 4294967264 }
 0x2fd   :  { %8118 = dma.done.wait [#allocation54], 7280  }
 0x2fe   :  { %8119 = vsyncadd [#allocation54], 4294960016  ;;  %v6635_v0 = vld [vmem:[#allocation5 + $0x40] sm:$0xff]   ;;  %v6639_v4 = vld [vmem:[#allocation5 + $0x48] sm:$0xff]   ;;  %s8199_s12 = smov [#allocation56]  }
 0x2ff   :  { %v6636_v1 = vld [vmem:[#allocation5] sm:$0xff]   ;;  %5933 = vmatprep.subr.bf16.mxu0 %v6635_v0  ;;  %v6640_v5 = vld [vmem:[#allocation5 + $0x8] sm:$0xff]   ;;  %v6643_v8 = vld [vmem:[#allocation5 + $0x50] sm:$0xff]   ;;  %s5581_s27 = sshll.u32 %s8199_s12, 4  ;;  %s5582_s27 = int_to_ptr.vmem [resolvable:$true] %s5581_s27 }
 0x300   :  { %v6637_v2 = vld [vmem:[#allocation5 + $0xc0] sm:$0xff]   ;;  %5934 = vmatpush3.bf16.msra.mxu0 %v6636_v1  ;;  %v6641_v6 = vld [vmem:[#allocation5 + $0xc8] sm:$0xff]   ;;  %v6644_v9 = vld [vmem:[#allocation5 + $0x10] sm:$0xff]   ;;  %s8062_s26 = scalar_lea.vmem %s5582_s27, 14336  ;;  %p8067_p1 = scmp.lt.s32.totalorder %s5582_s27, %s5582_s27 }
 0x301   :  { %v6638_v3 = vld [vmem:[#allocation5 + $0x80] sm:$0xff]   ;;  %5997 = vmatprep.subr.bf16.mxu1 %v6637_v2  ;;  %5935 = vmatprep.subr.bf16.mxu0 %v6639_v4  ;;  %v6642_v7 = vld [vmem:[#allocation5 + $0x88] sm:$0xff]   ;;  %v6645_v10 = vld [vmem:[#allocation5 + $0xd0] sm:$0xff]   ;;  %p8063_p0 = scmp.ne.s32.totalorder %s5582_s27, %s8062_s26  ;;  %p8068_p2 = scmp.lt.s32.totalorder %s8062_s26, %s8062_s26 }
 0x302   :  { %5998 = vmatpush3.bf16.msra.mxu1 %v6638_v3  ;;  %v6646_v11 = vld [vmem:[#allocation5 + $0x90] sm:$0xff]   ;;  %v6647_v12 = vld [vmem:[#allocation5 + $0x58] sm:$0xff]   ;;  %v6651_v16 = vld [vmem:[#allocation5 + $0x60] sm:$0xff]  }
 0x303   :  { %5999 = vmatprep.subr.bf16.mxu1 %v6641_v6  ;;  %v6648_v13 = vld [vmem:[#allocation5 + $0x18] sm:$0xff]   ;;  %v6652_v17 = vld [vmem:[#allocation5 + $0x20] sm:$0xff]   ;;  %v6655_v20 = vld [vmem:[#allocation5 + $0x68] sm:$0xff]   ;;  %p8069_p3 = por %p8068_p2, %p8067_p1 }
 0x304   :  { %5936 = vmatpush3.bf16.msra.mxu0 %v6640_v5  ;;  %v6649_v14 = vld [vmem:[#allocation5 + $0xd8] sm:$0xff]   ;;  %v6653_v18 = vld [vmem:[#allocation5 + $0xe0] sm:$0xff]   ;;  %v6656_v21 = vld [vmem:[#allocation5 + $0x28] sm:$0xff]  }
 0x305   :  { %5937 = vmatprep.subr.bf16.mxu0 %v6643_v8  ;;  %v6650_v15 = vld [vmem:[#allocation5 + $0x98] sm:$0xff]   ;;  %v6654_v19 = vld [vmem:[#allocation5 + $0xa0] sm:$0xff]   ;;  %v6657_v22 = vld [vmem:[#allocation5 + $0xe8] sm:$0xff]   ;;  %p8070_p4 = pnand %p8069_p3, %p8063_p0 }
 0x306   :  { %6000 = vmatpush3.bf16.msra.mxu1 %v6642_v7  ;;  %v6658_v23 = vld [vmem:[#allocation5 + $0xa8] sm:$0xff]   ;;  %v6659_v24 = vld [vmem:[#allocation5 + $0x70] sm:$0xff]   ;;  %v6663_v28 = vld [vmem:[#allocation5 + $0x78] sm:$0xff]  }
 0x307   :  { %6001 = vmatprep.subr.bf16.mxu1 %v6645_v10  ;;  %v6660_v25 = vld [vmem:[#allocation5 + $0x30] sm:$0xff]   ;;  %v6664_v29 = vld [vmem:[#allocation5 + $0x38] sm:$0xff]   ;;  %v572_v31 = vld [vmem:[#allocation2 + $0x8] sm:$0xff] }
 0x308   :  { %5938 = vmatpush3.bf16.msra.mxu0 %v6644_v9  ;;  %v6661_v26 = vld [vmem:[#allocation5 + $0xf0] sm:$0xff]   ;;  %v6665_v30 = vld [vmem:[#allocation5 + $0xf8] sm:$0xff]   ;;  %v579_v32 = vld [vmem:[#allocation2 + $0x40] sm:$0xff] }
 0x309   :  { %5939 = vmatprep.subr.bf16.mxu0 %v6647_v12  ;;  %v6662_v27 = vld [vmem:[#allocation5 + $0xb0] sm:$0xff]   ;;  %v797_v33 = vpack.c.bf16 %v579_v32, %v572_v31  ;;  %v6666_v34 = vld [vmem:[#allocation5 + $0xb8] sm:$0xff]   ;;  %v571_v35 = vld [vmem:[#allocation2] sm:$0xff] }
 0x30a   :  { %6002 = vmatpush3.bf16.msra.mxu1 %v6646_v11  ;;  %v578_v36 = vld [vmem:[#allocation2 + $0x38] sm:$0xff]  ;;  %v6667_v38 = vld [vmem:[#allocation5 + $0x140] sm:$0xff]   ;;  %v581_v40 = vld [vmem:[#allocation2 + $0x50] sm:$0xff] }
 0x30b   :  { %6003 = vmatprep.subr.bf16.mxu1 %v6649_v14  ;;  %1226 = vmatprep.mubr.bf16.mxu0 %v797_v33  ;;  %v796_v37 = vpack.c.bf16 %v578_v36, %v571_v35  ;;  %v574_v39 = vld [vmem:[#allocation2 + $0x18] sm:$0xff]  ;;  %v6668_v42 = vld [vmem:[#allocation5 + $0x100] sm:$0xff]   ;;  %v573_v43 = vld [vmem:[#allocation2 + $0x10] sm:$0xff] }
 0x30c   :  { %5940 = vmatpush3.bf16.msra.mxu0 %v6648_v13  ;;  %v799_v41 = vpack.c.bf16 %v581_v40, %v574_v39  ;;  %v580_v44 = vld [vmem:[#allocation2 + $0x48] sm:$0xff]  ;;  %v586_v45 = vld [vmem:[#allocation2 + $0x78] sm:$0xff]  ;;  %v593_v47 = vld [vmem:[#allocation2 + $0xb0] sm:$0xff] }
 0x30d   :  { %5941 = vmatprep.subr.bf16.mxu0 %v6651_v16  ;;  %v798_v46 = vpack.c.bf16 %v580_v44, %v573_v43  ;;  %v585_v48 = vld [vmem:[#allocation2 + $0x70] sm:$0xff]  ;;  %v592_v49 = vld [vmem:[#allocation2 + $0xa8] sm:$0xff]  ;;  %v804_v50 = vpack.c.bf16 %v593_v47, %v586_v45  ;;  %v595_v53 = vld [vmem:[#allocation2 + $0xc0] sm:$0xff] }
 0x30e   :  { %6004 = vmatpush3.bf16.msra.mxu1 %v6650_v15  ;;  %1323 = vmatprep.mubr.bf16.mxu1 %v799_v41  ;;  %v6669_v51 = vld [vmem:[#allocation5 + $0x148] sm:$0xff]   ;;  %v803_v54 = vpack.c.bf16 %v592_v49, %v585_v48  ;;  %v587_v57 = vld [vmem:[#allocation2 + $0x80] sm:$0xff]  ;;  %v594_v58 = vld [vmem:[#allocation2 + $0xb8] sm:$0xff] }
 0x30f   :  { %6005 = vmatprep.subr.bf16.mxu1 %v6653_v18  ;;  %v588_v52 = vld [vmem:[#allocation2 + $0x88] sm:$0xff]  ;;  %v607_v60 = vld [vmem:[#allocation2 + $0x120] sm:$0xff]  ;;  %v805_v62 = vpack.c.bf16 %v594_v58, %v587_v57  ;;  %v6671_v63 = vld [vmem:[#allocation5 + $0x150] sm:$0xff]  }
 0x310   :  { %5942 = vmatpush3.bf16.msra.mxu0 %v6652_v17  ;;  %v806_v55 = vpack.c.bf16 %v595_v53, %v588_v52  ;;  %v6670_v56 = vld [vmem:[#allocation5 + $0x108] sm:$0xff]   ;;  %v602_v0 = vld [vmem:[#allocation2 + $0xf8] sm:$0xff]  ;;  %v609_v1 = vld [vmem:[#allocation2 + $0x130] sm:$0xff] }
 0x311   :  { %5943 = vmatprep.subr.bf16.mxu0 %v6655_v20  ;;  %v600_v59 = vld [vmem:[#allocation2 + $0xe8] sm:$0xff]  ;;  %v599_v2 = vld [vmem:[#allocation2 + $0xe0] sm:$0xff]  ;;  %v606_v3 = vld [vmem:[#allocation2 + $0x118] sm:$0xff]  ;;  %v813_v4 = vpack.c.bf16 %v609_v1, %v602_v0 }
 0x312   :  { %6006 = vmatpush3.bf16.msra.mxu1 %v6654_v19  ;;  %v811_v61 = vpack.c.bf16 %v607_v60, %v600_v59  ;;  %v6672_v5 = vld [vmem:[#allocation5 + $0x110] sm:$0xff]   ;;  %v614_v7 = vld [vmem:[#allocation2 + $0x158] sm:$0xff]  ;;  %v608_v9 = vld [vmem:[#allocation2 + $0x128] sm:$0xff]  ;;  %v810_v10 = vpack.c.bf16 %v606_v3, %v599_v2 }
 0x313   :  { %6007 = vmatprep.subr.bf16.mxu1 %v6657_v22  ;;  %v601_v6 = vld [vmem:[#allocation2 + $0xf0] sm:$0xff]  ;;  %v6673_v11 = vld [vmem:[#allocation5 + $0x158] sm:$0xff]   ;;  %v616_v12 = vld [vmem:[#allocation2 + $0x168] sm:$0xff] }
 0x314   :  { %5944 = vmatpush3.bf16.msra.mxu0 %v6656_v21  ;;  %v621_v8 = vld [vmem:[#allocation2 + $0x190] sm:$0xff]  ;;  %v623_v13 = vld [vmem:[#allocation2 + $0x1a0] sm:$0xff]  ;;  %v6674_v15 = vld [vmem:[#allocation5 + $0x118] sm:$0xff]   ;;  %v812_v16 = vpack.c.bf16 %v608_v9, %v601_v6 }
 0x315   :  { %5945 = vmatprep.subr.bf16.mxu0 %v6659_v24  ;;  %v818_v14 = vpack.c.bf16 %v621_v8, %v614_v7  ;;  %v613_v17 = vld [vmem:[#allocation2 + $0x150] sm:$0xff]  ;;  %v620_v18 = vld [vmem:[#allocation2 + $0x188] sm:$0xff]  ;;  %v820_v19 = vpack.c.bf16 %v623_v13, %v616_v12  ;;  %v6675_v20 = vld [vmem:[#allocation5 + $0x160] sm:$0xff]  }
 0x316   :  { %6008 = vmatpush3.bf16.msra.mxu1 %v6658_v23  ;;  %v6676_v21 = vld [vmem:[#allocation5 + $0x180] sm:$0xff]   ;;  %v628_v22 = vld [vmem:[#allocation2 + $0x1c8] sm:$0xff]  ;;  %v634_v35 = vld [vmem:[#allocation2 + $0x1f8] sm:$0xff] }
 0x317   :  { %6009 = vmatprep.subr.bf16.mxu1 %v6661_v26  ;;  %v635_v23 = vld [vmem:[#allocation2 + $0x200] sm:$0xff]  ;;  %v6678_v31 = vld [vmem:[#allocation5 + $0x168] sm:$0xff]   ;;  %v6681_v40 = vld [vmem:[#allocation5 + $0x190] sm:$0xff]  }
 0x318   :  { %5946 = vmatpush3.bf16.msra.mxu0 %v6660_v25  ;;  %v6677_v24 = vld [vmem:[#allocation5 + $0x120] sm:$0xff]   ;;  %v817_v25 = vpack.c.bf16 %v620_v18, %v613_v17  ;;  %v6680_v39 = vld [vmem:[#allocation5 + $0x128] sm:$0xff]   ;;  %v629_v41 = vld [vmem:[#allocation2 + $0x1d0] sm:$0xff] }
 0x319   :  { %5947 = vmatprep.subr.bf16.mxu0 %v6663_v28  ;;  %v615_v26 = vld [vmem:[#allocation2 + $0x160] sm:$0xff]  ;;  %v825_v28 = vpack.c.bf16 %v635_v23, %v628_v22  ;;  %v644_v43 = vld [vmem:[#allocation2 + $0x248] sm:$0xff]  ;;  %v6682_v47 = vld [vmem:[#allocation5 + $0x170] sm:$0xff]  }
 0x31a   :  { %6010 = vmatpush3.bf16.msra.mxu1 %v6662_v27  ;;  %v622_v27 = vld [vmem:[#allocation2 + $0x198] sm:$0xff]  ;;  %v627_v33 = vld [vmem:[#allocation2 + $0x1c0] sm:$0xff]  ;;  %v648_v53 = vld [vmem:[#allocation2 + $0x268] sm:$0xff] }
 0x31b   :  { %6011 = vmatprep.subr.bf16.mxu1 %v6665_v30  ;;  %v637_v30 = vld [vmem:[#allocation2 + $0x210] sm:$0xff]  ;;  %v819_v32 = vpack.c.bf16 %v622_v27, %v615_v26  ;;  %v824_v44 = vpack.c.bf16 %v634_v35, %v627_v33  ;;  %v651_v45 = vld [vmem:[#allocation2 + $0x280] sm:$0xff]  ;;  %v6683_v48 = vld [vmem:[#allocation5 + $0x198] sm:$0xff]  }
 0x31c   :  { %5948 = vmatpush3.bf16.msra.mxu0 %v6664_v29  ;;  %v630_v29 = vld [vmem:[#allocation2 + $0x1d8] sm:$0xff]  ;;  %v834_v52 = vpack.c.bf16 %v651_v45, %v644_v43  ;;  %v656_v57 = vld [vmem:[#allocation2 + $0x2a8] sm:$0xff]  ;;  %v663_v58 = vld [vmem:[#allocation2 + $0x2e0] sm:$0xff] }
 0x31d   :  { %6061 = vmatprep.subr.bf16.mxu0 %v6667_v38  ;;  %v827_v36 = vpack.c.bf16 %v637_v30, %v630_v29  ;;  %v649_v38 = vld [vmem:[#allocation2 + $0x270] sm:$0xff]  ;;  %v6686_v59 = vld [vmem:[#allocation5 + $0x178] sm:$0xff]   ;;  %v664_v12 = vld [vmem:[#allocation2 + $0x2e8] sm:$0xff] }
 0x31e   :  { %6012 = vmatpush3.bf16.msra.mxu1 %v6666_v34  ;;  %v6679_v34 = vld [vmem:[#allocation5 + $0x188] sm:$0xff]   ;;  %v665_v0 = vld [vmem:[#allocation2 + $0x2f0] sm:$0xff]  ;;  %v6688_v1 = vld [vmem:[#allocation5 + $0x138] sm:$0xff]  }
 0x31f   :  { %1227 = vmatmul.mubr.bf16.vlgmr.msra.gmra.mrb[0].mxu0 %v796_v37  ;;  %6269 = vmatprep.subr.bf16.mxu1 %v6676_v21  ;;  %v642_v37 = vld [vmem:[#allocation2 + $0x238] sm:$0xff]  ;;  %v677_v8 = vld [vmem:[#allocation2 + $0x350] sm:$0xff]  ;;  %v671_v23 = vld [vmem:[#allocation2 + $0x320] sm:$0xff] }
 0x320   :  { %6062 = vmatpush3.bf16.msra.mxu0 %v6668_v42  ;;  %1234 = vmatprep.mubr.bf16.mxu0 %v804_v50  ;;  %v636_v42 = vld [vmem:[#allocation2 + $0x208] sm:$0xff]  ;;  %v6684_v50 = vld [vmem:[#allocation5 + $0x130] sm:$0xff]   ;;  %v662_v6 = vld [vmem:[#allocation2 + $0x2d8] sm:$0xff] }
 0x321   :  { %1324 = vmatmul.mubr.bf16.vlgmr.msra.gmra.mrb[0].mxu1 %v798_v46  ;;  %6063 = vmatprep.subr.bf16.mxu0 %v6669_v51  ;;  %v832_v46 = vpack.c.bf16 %v649_v38, %v642_v37  ;;  %v826_v49 = vpack.c.bf16 %v636_v42, %v629_v41  ;;  %v641_v51 = vld [vmem:[#allocation2 + $0x230] sm:$0xff]  ;;  %v670_v7 = vld [vmem:[#allocation2 + $0x318] sm:$0xff]  ;;  %v584_v27 = vld [vmem:[#allocation2 + $0x68] sm:$0xff] }
 0x322   :  { %1331 = vmatprep.mubr.bf16.mxu1 %v806_v55  ;;  %6270 = vmatpush3.bf16.msra.mxu1 %v6676_v21  ;;  %v643_v55 = vld [vmem:[#allocation2 + $0x240] sm:$0xff]  ;;  %v831_v60 = vpack.c.bf16 %v648_v53, %v641_v51  ;;  %v6690_v9 = vld [vmem:[#allocation5 + $0x1b8] sm:$0xff]   ;;  %v846_v13 = vpack.c.bf16 %v677_v8, %v670_v7  ;;  %v669_v18 = vld [vmem:[#allocation2 + $0x310] sm:$0xff] }
 0x323   :  { %6271 = vmatprep.subr.bf16.mxu1 %v6679_v34  ;;  %v583_v21 = vld [vmem:[#allocation2 + $0x60] sm:$0xff]  ;;  %v577_v26 = vld [vmem:[#allocation2 + $0x30] sm:$0xff]  ;;  %v582_v30 = vld [vmem:[#allocation2 + $0x58] sm:$0xff] }
 0x324   :  { %6064 = vmatpush3.bf16.msra.mxu0 %v6670_v56  ;;  %v650_v56 = vld [vmem:[#allocation2 + $0x278] sm:$0xff]  ;;  %v575_v29 = vld [vmem:[#allocation2 + $0x20] sm:$0xff]  ;;  %v597_v33 = vld [vmem:[#allocation2 + $0xd0] sm:$0xff] }
 0x325   :  { %6065 = vmatprep.subr.bf16.mxu0 %v6671_v63  ;;  %v658_v63 = vld [vmem:[#allocation2 + $0x2b8] sm:$0xff]  ;;  %v833_v2 = vpack.c.bf16 %v650_v56, %v643_v55  ;;  %v612_v37 = vld [vmem:[#allocation2 + $0x148] sm:$0xff]  ;;  %v800_v38 = vpack.c.bf16 %v582_v30, %v575_v29  ;;  %v589_v41 = vld [vmem:[#allocation2 + $0x90] sm:$0xff] }
 0x326   :  { %6272 = vmatpush3.bf16.msra.mxu1 %v6679_v34  ;;  %v841_v3 = vpack.c.bf16 %v665_v0, %v658_v63  ;;  %v591_v34 = vld [vmem:[#allocation2 + $0xa0] sm:$0xff]  ;;  %v598_v35 = vld [vmem:[#allocation2 + $0xd8] sm:$0xff]  ;;  %v596_v42 = vld [vmem:[#allocation2 + $0xc8] sm:$0xff] }
 0x327   :  { %1235 = vmatmul.mubr.bf16.gmra.mrb[4].mxu0 %v803_v54  ;;  %6273 = vmatprep.subr.bf16.mxu1 %v6681_v40  ;;  %v6685_v54 = vld [vmem:[#allocation5 + $0x1a0] sm:$0xff]   ;;  %v604_v43 = vld [vmem:[#allocation2 + $0x108] sm:$0xff]  ;;  %v610_v53 = vld [vmem:[#allocation2 + $0x138] sm:$0xff] }
 0x328   :  { %1242 = vmatprep.mubr.bf16.mxu0 %v811_v61  ;;  %6066 = vmatpush3.bf16.msra.mxu0 %v6672_v5  ;;  %v6687_v61 = vld [vmem:[#allocation5 + $0x1a8] sm:$0xff]   ;;  %v655_v5 = vld [vmem:[#allocation2 + $0x2a0] sm:$0xff]  ;;  %v618_v55 = vld [vmem:[#allocation2 + $0x178] sm:$0xff] }
 0x329   :  { %1332 = vmatmul.mubr.bf16.gmra.mrb[4].mxu1 %v805_v62  ;;  %6067 = vmatprep.subr.bf16.mxu0 %v6673_v11  ;;  %v839_v62 = vpack.c.bf16 %v663_v58, %v656_v57  ;;  %v657_v11 = vld [vmem:[#allocation2 + $0x2b0] sm:$0xff]  ;;  %v647_v58 = vld [vmem:[#allocation2 + $0x260] sm:$0xff]  ;;  %v682_v7 = vld [vmem:[#allocation2 + $0x378] sm:$0xff] }
 0x32a   :  { %1339 = vmatprep.mubr.bf16.mxu1 %v813_v4  ;;  %6274 = vmatpush3.bf16.msra.mxu1 %v6681_v40  ;;  %v6689_v4 = vld [vmem:[#allocation5 + $0x1b0] sm:$0xff]   ;;  %v809_v40 = vpack.c.bf16 %v598_v35, %v591_v34  ;;  %v680_v30 = vld [vmem:[#allocation2 + $0x368] sm:$0xff] }
 0x32b   :  { %6275 = vmatprep.subr.bf16.mxu1 %v6683_v48  ;;  %v625_v56 = vld [vmem:[#allocation2 + $0x1b0] sm:$0xff] }
 0x32c   :  { %6068 = vmatpush3.bf16.msra.mxu0 %v6674_v15  ;;  %v679_v15 = vld [vmem:[#allocation2 + $0x360] sm:$0xff]  ;;  %v822_v63 = vpack.c.bf16 %v625_v56, %v618_v55  ;;  %v617_v0 = vld [vmem:[#allocation2 + $0x170] sm:$0xff] }
 0x32d   :  { %6069 = vmatprep.subr.bf16.mxu0 %v6675_v20  ;;  %v576_v20 = vld [vmem:[#allocation2 + $0x28] sm:$0xff]  ;;  %v673_v29 = vld [vmem:[#allocation2 + $0x330] sm:$0xff] }
 0x32e   :  { %6276 = vmatpush3.bf16.msra.mxu1 %v6683_v48  ;;  %v633_v48 = vld [vmem:[#allocation2 + $0x1f0] sm:$0xff] }
 0x32f   :  { %1243 = vmatmul.mubr.bf16.gmra.mrb[8].mxu0 %v810_v10  ;;  %6277 = vmatprep.subr.bf16.mxu1 %v6685_v54  ;;  %v838_v10 = vpack.c.bf16 %v662_v6, %v655_v5  ;;  %v675_v6 = vld [vmem:[#allocation2 + $0x340] sm:$0xff] }
 0x330   :  { %1250 = vmatprep.mubr.bf16.mxu0 %v818_v14  ;;  %6070 = vmatpush3.bf16.msra.mxu0 %v6677_v24  ;;  %v672_v14 = vld [vmem:[#allocation2 + $0x328] sm:$0xff]  ;;  %v678_v24 = vld [vmem:[#allocation2 + $0x358] sm:$0xff] }
 0x331   :  { %1340 = vmatmul.mubr.bf16.gmra.mrb[8].mxu1 %v812_v16  ;;  %6071 = vmatprep.subr.bf16.mxu0 %v6678_v31  ;;  %v840_v16 = vpack.c.bf16 %v664_v12, %v657_v11  ;;  %v848_v17 = vpack.c.bf16 %v679_v15, %v672_v14  ;;  %v802_v31 = vpack.c.bf16 %v584_v27, %v577_v26  ;;  %v638_v11 = vld [vmem:[#allocation2 + $0x218] sm:$0xff]  ;;  %v653_v14 = vld [vmem:[#allocation2 + $0x290] sm:$0xff] }
 0x332   :  { %1347 = vmatprep.mubr.bf16.mxu1 %v820_v19  ;;  %6278 = vmatpush3.bf16.msra.mxu1 %v6685_v54  ;;  %v676_v19 = vld [vmem:[#allocation2 + $0x348] sm:$0xff]  ;;  %v851_v12 = vpack.c.bf16 %v682_v7, %v675_v6  ;;  %v681_v26 = vld [vmem:[#allocation2 + $0x370] sm:$0xff] }
 0x333   :  { %6279 = vmatprep.subr.bf16.mxu1 %v6687_v61  ;;  %v845_v22 = vpack.c.bf16 %v676_v19, %v669_v18  ;;  %v652_v18 = vld [vmem:[#allocation2 + $0x288] sm:$0xff] }
 0x334   :  { %6072 = vmatpush3.bf16.msra.mxu0 %v6680_v39  ;;  %v660_v19 = vld [vmem:[#allocation2 + $0x2c8] sm:$0xff] }
 0x335   :  { %6073 = vmatprep.subr.bf16.mxu0 %v6682_v47  ;;  %v626_v47 = vld [vmem:[#allocation2 + $0x1b8] sm:$0xff] }
 0x336   :  { %6280 = vmatpush3.bf16.msra.mxu1 %v6687_v61  ;;  %v668_v61 = vld [vmem:[#allocation2 + $0x308] sm:$0xff] }
 0x337   :  { %1251 = vmatmul.mubr.bf16.gmra.mrb[12].mxu0 %v817_v25  ;;  %6281 = vmatprep.subr.bf16.mxu1 %v6689_v4  ;;  %v801_v25 = vpack.c.bf16 %v583_v21, %v576_v20  ;;  %v667_v20 = vld [vmem:[#allocation2 + $0x300] sm:$0xff] }
 0x338   :  { %1258 = vmatprep.mubr.bf16.mxu0 %v825_v28  ;;  %6074 = vmatpush3.bf16.msra.mxu0 %v6684_v50  ;;  %v847_v28 = vpack.c.bf16 %v678_v24, %v671_v23  ;;  %v807_v50 = vpack.c.bf16 %v596_v42, %v589_v41  ;;  %v659_v23 = vld [vmem:[#allocation2 + $0x2c0] sm:$0xff]  ;;  %v666_v24 = vld [vmem:[#allocation2 + $0x2f8] sm:$0xff] }
 0x339   :  { %1348 = vmatmul.mubr.bf16.gmra.mrb[12].mxu1 %v819_v32  ;;  %6075 = vmatprep.subr.bf16.mxu0 %v6686_v59  ;;  %v590_v32 = vld [vmem:[#allocation2 + $0x98] sm:$0xff]  ;;  %v842_v27 = vpack.c.bf16 %v666_v24, %v659_v23 }
 0x33a   :  { %1355 = vmatprep.mubr.bf16.mxu1 %v827_v36  ;;  %6282 = vmatpush3.bf16.msra.mxu1 %v6689_v4  ;;  %v605_v36 = vld [vmem:[#allocation2 + $0x110] sm:$0xff]  ;;  %v808_v39 = vpack.c.bf16 %v597_v33, %v590_v32  ;;  %v654_v59 = vld [vmem:[#allocation2 + $0x298] sm:$0xff]  ;;  %v639_v4 = vld [vmem:[#allocation2 + $0x220] sm:$0xff] }
 0x33b   :  { %6283 = vmatprep.subr.bf16.mxu1 %v6690_v9  ;;  %v816_v45 = vpack.c.bf16 %v612_v37, %v605_v36  ;;  %v8552_v33 = vld [vmem:[#allocation7] ss:$0 sm:$0xff] }
 0x33c   :  { %6076 = vmatpush3.bf16.msra.mxu0 %v6688_v1  ;;  %v624_v1 = vld [vmem:[#allocation2 + $0x1a8] sm:$0xff] }
 0x33d   :  { %v821_v8 = vpack.c.bf16 %v624_v1, %v617_v0 }
 0x33e   :  { %6284 = vmatpush3.bf16.msra.mxu1 %v6690_v9 }
 0x33f   :  { %1259 = vmatmul.mubr.bf16.gmra.mrb[16].mxu0 %v824_v44  ;;  %v611_v44 = vld [vmem:[#allocation2 + $0x140] sm:$0xff] }
 0x340   :  { %1266 = vmatprep.mubr.bf16.mxu0 %v832_v46  ;;  %v619_v46 = vld [vmem:[#allocation2 + $0x180] sm:$0xff]  ;;  %v815_v51 = vpack.c.bf16 %v611_v44, %v604_v43 }
 0x341   :  { %1356 = vmatmul.mubr.bf16.gmra.mrb[16].mxu1 %v826_v49  ;;  %v640_v49 = vld [vmem:[#allocation2 + $0x228] sm:$0xff]  ;;  %v823_v54 = vpack.c.bf16 %v626_v47, %v619_v46 }
 0x342   :  { %1363 = vmatprep.mubr.bf16.mxu1 %v834_v52  ;;  %v603_v52 = vld [vmem:[#allocation2 + $0x100] sm:$0xff]  ;;  %v830_v57 = vpack.c.bf16 %v640_v49, %v633_v48 }
 0x347   :  { %1267 = vmatmul.mubr.bf16.gmra.mrb[20].mxu0 %v831_v60  ;;  %v661_v60 = vld [vmem:[#allocation2 + $0x2d0] sm:$0xff] }
 0x348   :  { %1274 = vmatprep.mubr.bf16.mxu0 %v839_v62  ;;  %v814_v62 = vpack.c.bf16 %v610_v53, %v603_v52  ;;  %v844_v5 = vpack.c.bf16 %v668_v61, %v661_v60 }
 0x349   :  { %1364 = vmatmul.mubr.bf16.gmra.mrb[20].mxu1 %v833_v2  ;;  %v837_v2 = vpack.c.bf16 %v654_v59, %v647_v58 }
 0x34a   :  { %1371 = vmatprep.mubr.bf16.mxu1 %v841_v3  ;;  %v632_v3 = vld [vmem:[#allocation2 + $0x1e8] sm:$0xff] }
 0x34b   :  { %v829_v9 = vpack.c.bf16 %v639_v4, %v632_v3 }
 0x34f   :  { %1275 = vmatmul.mubr.bf16.gmra.mrb[24].mxu0 %v838_v10  ;;  %v631_v10 = vld [vmem:[#allocation2 + $0x1e0] sm:$0xff] }
 0x350   :  { %1282 = vmatprep.mubr.bf16.mxu0 %v846_v13  ;;  %v646_v13 = vld [vmem:[#allocation2 + $0x258] sm:$0xff]  ;;  %v828_v15 = vpack.c.bf16 %v638_v11, %v631_v10 }
 0x351   :  { %1372 = vmatmul.mubr.bf16.gmra.mrb[24].mxu1 %v840_v16  ;;  %v836_v16 = vpack.c.bf16 %v653_v14, %v646_v13 }
 0x352   :  { %1379 = vmatprep.mubr.bf16.mxu1 %v848_v17  ;;  %v645_v17 = vld [vmem:[#allocation2 + $0x250] sm:$0xff] }
 0x353   :  { %v835_v21 = vpack.c.bf16 %v652_v18, %v645_v17 }
 0x357   :  { %1283 = vmatmul.mubr.bf16.gmra.mrb[28].mxu0 %v845_v22  ;;  %v843_v22 = vpack.c.bf16 %v667_v20, %v660_v19 }
 0x358   :  { %1420 = vmatprep.mubr.bf16.mxu0 %v801_v25  ;;  %v674_v25 = vld [vmem:[#allocation2 + $0x338] sm:$0xff] }
 0x359   :  { %1380 = vmatmul.mubr.bf16.gmra.mrb[28].mxu1 %v847_v28  ;;  %v850_v28 = vpack.c.bf16 %v681_v26, %v674_v25 }
 0x35a   :  { %6285 = vmatprep.mubr.bf16.mxu1 %v802_v31  ;;  %v849_v31 = vpack.c.bf16 %v680_v30, %v673_v29 }
 0x35f   :  { %1421 = vmatmul.mubr.bf16.vlgmr.msra.gmra.mrb[32].mxu0 %v800_v38 }
 0x360   :  { %1428 = vmatprep.mubr.bf16.mxu0 %v808_v39 }
 0x361   :  { %6286 = vmatmul.mubr.bf16.vlgmr.msra.gmra.mrb[32].mxu1 %v809_v40 }
 0x362   :  { %6289 = vmatprep.mubr.bf16.mxu1 %v816_v45 }
 0x367   :  { %1429 = vmatmul.mubr.bf16.gmra.mrb[36].mxu0 %v807_v50 }
 0x368   :  { %1436 = vmatprep.mubr.bf16.mxu0 %v815_v51 }
 0x369   :  { %6290 = vmatmul.mubr.bf16.gmra.mrb[36].mxu1 %v823_v54 }
 0x36a   :  { %6293 = vmatprep.mubr.bf16.mxu1 %v830_v57 }
 0x36f   :  { %1437 = vmatmul.mubr.bf16.gmra.mrb[40].mxu0 %v814_v62 }
 0x370   :  { %1444 = vmatprep.mubr.bf16.mxu0 %v822_v63 }
 0x371   :  { %6294 = vmatmul.mubr.bf16.gmra.mrb[40].mxu1 %v837_v2 }
 0x372   :  { %6297 = vmatprep.mubr.bf16.mxu1 %v844_v5 }
 0x377   :  { %1445 = vmatmul.mubr.bf16.gmra.mrb[44].mxu0 %v821_v8 }
 0x378   :  { %1452 = vmatprep.mubr.bf16.mxu0 %v829_v9 }
 0x379   :  { %6298 = vmatmul.mubr.bf16.gmra.mrb[44].mxu1 %v851_v12 }
 0x37f   :  { %1453 = vmatmul.mubr.bf16.gmra.mrb[48].mxu0 %v828_v15 }
 0x380   :  { %1460 = vmatprep.mubr.bf16.mxu0 %v836_v16 }
 0x387   :  { %1461 = vmatmul.mubr.bf16.gmra.mrb[52].mxu0 %v835_v21 }
 0x388   :  { %1468 = vmatprep.mubr.bf16.mxu0 %v843_v22 }
 0x38f   :  { %1469 = vmatmul.mubr.bf16.gmra.mrb[56].mxu0 %v842_v27 }
 0x390   :  { %1476 = vmatprep.mubr.bf16.mxu0 %v850_v28 }
 0x397   :  { %1477 = vmatmul.mubr.bf16.gmra.mrb[60].mxu0 %v849_v31 }
 0x3f2   :  { %v5949_v32 = vpop.f32.mrb[0].mxu0 }
 0x3f3   :  { %v5950_v34 = vpop.f32.mrb[1].mxu0 }
 0x3f4   :  { %v5951_v35 = vadd.f32 %v5950_v34, %v5949_v32  ;;  %v5952_v36 = vpop.f32.mrb[2].mxu0  ;;  %v6013_v37 = vpop.f32.mrb[0].mxu1 }
 0x3f5   :  { %v5953_v38 = vpop.f32.mrb[3].mxu0  ;;  %v6014_v41 = vpop.f32.mrb[1].mxu1 }
 0x3f6   :  { %v1229_v39 = vadd.f32 %v5951_v35, %v8552_v33  ;;  %v5954_v40 = vadd.f32 %v5953_v38, %v5952_v36  ;;  %v6015_v42 = vadd.f32 %v6014_v41, %v6013_v37  ;;  %v6016_v43 = vpop.f32.mrb[2].mxu1 }
 0x3f7   :  { %v6017_v45 = vpop.f32.mrb[3].mxu1 }
 0x3f8   :  { %v1232_v44 = vadd.f32 %v5954_v40, %v8552_v33  ;;  %v8556_v46 = vadd.f32 %v6015_v42, %v1229_v39  ;;  %v6018_v47 = vadd.f32 %v6017_v45, %v6016_v43 }
 0x3fa   :  { %v5955_v48 = vpop.f32.mrb[4].mxu0  ;;  %v8558_v49 = vadd.f32 %v6018_v47, %v1232_v44 }
 0x3fb   :  { %v5956_v50 = vpop.f32.mrb[5].mxu0 }
 0x3fc   :  { %v5957_v51 = vadd.f32 %v5956_v50, %v5955_v48  ;;  %v5958_v52 = vpop.f32.mrb[6].mxu0  ;;  %v6019_v53 = vpop.f32.mrb[4].mxu1 }
 0x3fd   :  { %v5959_v54 = vpop.f32.mrb[7].mxu0  ;;  %v6020_v57 = vpop.f32.mrb[5].mxu1 }
 0x3fe   :  { %v1237_v55 = vadd.f32 %v5957_v51, %v8552_v33  ;;  %v5960_v56 = vadd.f32 %v5959_v54, %v5958_v52  ;;  %v6021_v58 = vadd.f32 %v6020_v57, %v6019_v53  ;;  %v6022_v59 = vpop.f32.mrb[6].mxu1 }
 0x3ff   :  { %v6023_v61 = vpop.f32.mrb[7].mxu1 }
 0x400   :  { %v1240_v60 = vadd.f32 %v5960_v56, %v8552_v33  ;;  %v8562_v62 = vadd.f32 %v6021_v58, %v1237_v55  ;;  %v6024_v63 = vadd.f32 %v6023_v61, %v6022_v59 }
 0x402   :  { %v5961_v0 = vpop.f32.mrb[8].mxu0  ;;  %v8564_v1 = vadd.f32 %v6024_v63, %v1240_v60 }
 0x403   :  { %v5962_v2 = vpop.f32.mrb[9].mxu0 }
 0x404   :  { %v5963_v3 = vadd.f32 %v5962_v2, %v5961_v0  ;;  %v5964_v4 = vpop.f32.mrb[10].mxu0  ;;  %v6025_v5 = vpop.f32.mrb[8].mxu1 }
 0x405   :  { %v5965_v6 = vpop.f32.mrb[11].mxu0  ;;  %v6026_v9 = vpop.f32.mrb[9].mxu1 }
 0x406   :  { %v1245_v7 = vadd.f32 %v5963_v3, %v8552_v33  ;;  %v5966_v8 = vadd.f32 %v5965_v6, %v5964_v4  ;;  %v6027_v10 = vadd.f32 %v6026_v9, %v6025_v5  ;;  %v6028_v11 = vpop.f32.mrb[10].mxu1 }
 0x407   :  { %v6029_v13 = vpop.f32.mrb[11].mxu1 }
 0x408   :  { %v1248_v12 = vadd.f32 %v5966_v8, %v8552_v33  ;;  %v8568_v14 = vadd.f32 %v6027_v10, %v1245_v7  ;;  %v6030_v15 = vadd.f32 %v6029_v13, %v6028_v11 }
 0x40a   :  { %v5967_v16 = vpop.f32.mrb[12].mxu0  ;;  %v8570_v17 = vadd.f32 %v6030_v15, %v1248_v12 }
 0x40b   :  { %v5968_v18 = vpop.f32.mrb[13].mxu0 }
 0x40c   :  { %v5969_v19 = vadd.f32 %v5968_v18, %v5967_v16  ;;  %v5970_v20 = vpop.f32.mrb[14].mxu0  ;;  %v6031_v21 = vpop.f32.mrb[12].mxu1 }
 0x40d   :  { %v5971_v22 = vpop.f32.mrb[15].mxu0  ;;  %v6032_v25 = vpop.f32.mrb[13].mxu1 }
 0x40e   :  { %v1253_v23 = vadd.f32 %v5969_v19, %v8552_v33  ;;  %v5972_v24 = vadd.f32 %v5971_v22, %v5970_v20  ;;  %v6033_v26 = vadd.f32 %v6032_v25, %v6031_v21  ;;  %v6034_v27 = vpop.f32.mrb[14].mxu1 }
 0x40f   :  { %v6035_v29 = vpop.f32.mrb[15].mxu1 }
 0x410   :  { %v1256_v28 = vadd.f32 %v5972_v24, %v8552_v33  ;;  %v8574_v30 = vadd.f32 %v6033_v26, %v1253_v23  ;;  %v6036_v31 = vadd.f32 %v6035_v29, %v6034_v27 }
 0x412   :  { %v5973_v32 = vpop.f32.mrb[16].mxu0  ;;  %v8576_v34 = vadd.f32 %v6036_v31, %v1256_v28 }
 0x413   :  { %v5974_v35 = vpop.f32.mrb[17].mxu0 }
 0x414   :  { %v5975_v36 = vadd.f32 %v5974_v35, %v5973_v32  ;;  %v5976_v37 = vpop.f32.mrb[18].mxu0  ;;  %v6037_v38 = vpop.f32.mrb[16].mxu1 }
 0x415   :  { %v5977_v39 = vpop.f32.mrb[19].mxu0  ;;  %v6038_v42 = vpop.f32.mrb[17].mxu1 }
 0x416   :  { %v1261_v40 = vadd.f32 %v5975_v36, %v8552_v33  ;;  %v5978_v41 = vadd.f32 %v5977_v39, %v5976_v37  ;;  %v6039_v43 = vadd.f32 %v6038_v42, %v6037_v38  ;;  %v6040_v44 = vpop.f32.mrb[18].mxu1 }
 0x417   :  { %v6041_v47 = vpop.f32.mrb[19].mxu1 }
 0x418   :  { %v1264_v45 = vadd.f32 %v5978_v41, %v8552_v33  ;;  %v8580_v48 = vadd.f32 %v6039_v43, %v1261_v40  ;;  %v6042_v50 = vadd.f32 %v6041_v47, %v6040_v44 }
 0x41a   :  { %v5979_v51 = vpop.f32.mrb[20].mxu0  ;;  %v8582_v52 = vadd.f32 %v6042_v50, %v1264_v45  ;;  %v6691_v45 = vld [vmem:[#allocation11] sm:$0xff]  }
 0x41b   :  { %v5980_v53 = vpop.f32.mrb[21].mxu0  ;;  %6301 = vmatprep.subr.bf16.mxu1 %v6691_v45 }
 0x41c   :  { %v5981_v54 = vadd.f32 %v5980_v53, %v5979_v51  ;;  %v5982_v55 = vpop.f32.mrb[22].mxu0  ;;  %v6043_v56 = vpop.f32.mrb[20].mxu1  ;;  %6302 = vmatpush3.bf16.msra.mxu1 %v6691_v45 }
 0x41d   :  { %v5983_v57 = vpop.f32.mrb[23].mxu0  ;;  %v6044_v60 = vpop.f32.mrb[21].mxu1 }
 0x41e   :  { %v1269_v58 = vadd.f32 %v5981_v54, %v8552_v33  ;;  %v5984_v59 = vadd.f32 %v5983_v57, %v5982_v55  ;;  %v6045_v61 = vadd.f32 %v6044_v60, %v6043_v56  ;;  %v6046_v63 = vpop.f32.mrb[22].mxu1  ;;  %v6692_v57 = vld [vmem:[#allocation11 + $0x8] sm:$0xff]  }
 0x41f   :  { %v6047_v2 = vpop.f32.mrb[23].mxu1  ;;  %6303 = vmatprep.subr.bf16.mxu1 %v6692_v57 }
 0x420   :  { %v1272_v0 = vadd.f32 %v5984_v59, %v8552_v33  ;;  %v8586_v3 = vadd.f32 %v6045_v61, %v1269_v58  ;;  %v6048_v4 = vadd.f32 %v6047_v2, %v6046_v63  ;;  %6304 = vmatpush3.bf16.msra.mxu1 %v6692_v57  ;;  %v6693_v2 = vld [vmem:[#allocation11 + $0x10] sm:$0xff]  }
 0x421   :  { %6305 = vmatprep.subr.bf16.mxu1 %v6693_v2 }
 0x422   :  { %v5985_v5 = vpop.f32.mrb[24].mxu0  ;;  %v8588_v6 = vadd.f32 %v6048_v4, %v1272_v0 }
 0x423   :  { %v5986_v7 = vpop.f32.mrb[25].mxu0 }
 0x424   :  { %v5987_v8 = vadd.f32 %v5986_v7, %v5985_v5  ;;  %v5988_v9 = vpop.f32.mrb[26].mxu0  ;;  %v6049_v10 = vpop.f32.mrb[24].mxu1  ;;  %6306 = vmatpush3.bf16.msra.mxu1 %v6693_v2 }
 0x425   :  { %v5989_v11 = vpop.f32.mrb[27].mxu0  ;;  %v6050_v15 = vpop.f32.mrb[25].mxu1 }
 0x426   :  { %v1277_v12 = vadd.f32 %v5987_v8, %v8552_v33  ;;  %v5990_v13 = vadd.f32 %v5989_v11, %v5988_v9  ;;  %v6051_v16 = vadd.f32 %v6050_v15, %v6049_v10  ;;  %v6052_v18 = vpop.f32.mrb[26].mxu1 }
 0x427   :  { %v6053_v20 = vpop.f32.mrb[27].mxu1 }
 0x428   :  { %v1280_v19 = vadd.f32 %v5990_v13, %v8552_v33  ;;  %v8592_v21 = vadd.f32 %v6051_v16, %v1277_v12  ;;  %v6054_v22 = vadd.f32 %v6053_v20, %v6052_v18  ;;  %v6695_v20 = vld [vmem:[#allocation11 + $0x20] sm:$0xff]  }
 0x42a   :  { %v5991_v23 = vpop.f32.mrb[28].mxu0  ;;  %v8594_v24 = vadd.f32 %v6054_v22, %v1280_v19 }
 0x42b   :  { %v5992_v25 = vpop.f32.mrb[29].mxu0 }
 0x42c   :  { %v5993_v26 = vadd.f32 %v5992_v25, %v5991_v23  ;;  %v5994_v27 = vpop.f32.mrb[30].mxu0  ;;  %v6055_v28 = vpop.f32.mrb[28].mxu1 }
 0x42d   :  { %v5995_v29 = vpop.f32.mrb[31].mxu0  ;;  %v6056_v35 = vpop.f32.mrb[29].mxu1 }
 0x42e   :  { %v1285_v31 = vadd.f32 %v5993_v26, %v8552_v33  ;;  %v5996_v32 = vadd.f32 %v5995_v29, %v5994_v27  ;;  %v6057_v36 = vadd.f32 %v6056_v35, %v6055_v28  ;;  %v6058_v37 = vpop.f32.mrb[30].mxu1 }
 0x42f   :  { %v6059_v39 = vpop.f32.mrb[31].mxu1 }
 0x430   :  { %v1288_v38 = vadd.f32 %v5996_v32, %v8552_v33  ;;  %v8598_v40 = vadd.f32 %v6057_v36, %v1285_v31  ;;  %v6060_v41 = vadd.f32 %v6059_v39, %v6058_v37  ;;  %v6697_v39 = vld [vmem:[#allocation11 + $0x30] sm:$0xff]  }
 0x432   :  { %v6077_v42 = vpop.f32.mrb[32].mxu0  ;;  %v8600_v43 = vadd.f32 %v6060_v41, %v1288_v38  ;;  %v6698_v41 = vld [vmem:[#allocation11 + $0x38] sm:$0xff]  }
 0x433   :  { %v6078_v44 = vpop.f32.mrb[33].mxu0 }
 0x434   :  { %v6079_v47 = vadd.f32 %v6078_v44, %v6077_v42  ;;  %v6080_v50 = vpop.f32.mrb[34].mxu0  ;;  %v6287_v53 = vpop.f32.mrb[32].mxu1 }
 0x435   :  { %v6081_v51 = vpop.f32.mrb[35].mxu0  ;;  %v1519_v56 = vpop.f32.mrb[33].mxu1 }
 0x436   :  { %v6082_v54 = vadd.f32 %v6081_v51, %v6080_v50  ;;  %v1423_v55 = vadd.f32 %v6079_v47, %v8556_v46  ;;  %v6288_v33 = vpop.f32.mrb[34].mxu1 }
 0x437   :  { %v1522_v60 = vpop.f32.mrb[35].mxu1 }
 0x438   :  { %v8603_v58 = vadd.f32 %v1519_v56, %v1423_v55  ;;  %v1426_v59 = vadd.f32 %v6082_v54, %v8558_v49  ;;  %v6694_v49 = vld [vmem:[#allocation11 + $0x18] sm:$0xff]  }
 0x439   :  { %6307 = vmatprep.subr.bf16.mxu1 %v6694_v49 }
 0x43a   :  { %v8606_v61 = vadd.f32 %v1522_v60, %v1426_v59  ;;  %v6083_v63 = vpop.f32.mrb[36].mxu0  ;;  %6308 = vmatpush3.bf16.msra.mxu1 %v6694_v49 }
 0x43b   :  { %v6084_v0 = vpop.f32.mrb[37].mxu0  ;;  %6309 = vmatprep.subr.bf16.mxu1 %v6695_v20 }
 0x43c   :  { %v6085_v4 = vadd.f32 %v6084_v0, %v6083_v63  ;;  %v6086_v5 = vpop.f32.mrb[38].mxu0  ;;  %v6291_v46 = vpop.f32.mrb[36].mxu1 }
 0x43d   :  { %v6087_v7 = vpop.f32.mrb[39].mxu0  ;;  %v1535_v10 = vpop.f32.mrb[37].mxu1 }
 0x43e   :  { %v1431_v8 = vadd.f32 %v6085_v4, %v8562_v62  ;;  %v6088_v9 = vadd.f32 %v6087_v7, %v6086_v5  ;;  %v6292_v11 = vpop.f32.mrb[38].mxu1  ;;  %6310 = vmatpush3.bf16.msra.mxu1 %v6695_v20 }
 0x43f   :  { %v1538_v15 = vpop.f32.mrb[39].mxu1 }
 0x440   :  { %v8609_v12 = vadd.f32 %v6287_v53, %v1431_v8  ;;  %v1434_v13 = vadd.f32 %v6088_v9, %v8564_v1  ;;  %v6696_v1 = vld [vmem:[#allocation11 + $0x28] sm:$0xff]  }
 0x441   :  { %6311 = vmatprep.subr.bf16.mxu1 %v6696_v1 }
 0x442   :  { %v8612_v16 = vadd.f32 %v6288_v33, %v1434_v13  ;;  %v6089_v18 = vpop.f32.mrb[40].mxu0  ;;  %6312 = vmatpush3.bf16.msra.mxu1 %v6696_v1 }
 0x443   :  { %v6090_v19 = vpop.f32.mrb[41].mxu0  ;;  %6313 = vmatprep.subr.bf16.mxu1 %v6697_v39 }
 0x444   :  { %v6091_v22 = vadd.f32 %v6090_v19, %v6089_v18  ;;  %v6092_v23 = vpop.f32.mrb[42].mxu0  ;;  %v6295_v25 = vpop.f32.mrb[40].mxu1 }
 0x445   :  { %v6093_v62 = vpop.f32.mrb[43].mxu0  ;;  %v1551_v28 = vpop.f32.mrb[41].mxu1 }
 0x446   :  { %v6094_v26 = vadd.f32 %v6093_v62, %v6092_v23  ;;  %v1439_v27 = vadd.f32 %v6091_v22, %v8568_v14  ;;  %v6296_v29 = vpop.f32.mrb[42].mxu1  ;;  %v1584_v14 = vadd.f32 %v8606_v61, %v8603_v58  ;;  %6314 = vmatpush3.bf16.msra.mxu1 %v6697_v39 }
 0x447   :  { %v1554_v35 = vpop.f32.mrb[43].mxu1  ;;  %6315 = vmatprep.subr.bf16.mxu1 %v6698_v41 }
 0x448   :  { %v8615_v31 = vadd.f32 %v1535_v10, %v1439_v27  ;;  %v1442_v32 = vadd.f32 %v6094_v26, %v8570_v17  ;;  %v1585_v50 = vadd.f32 %v1584_v14, %v8609_v12 }
 0x44a   :  { %v8618_v36 = vadd.f32 %v1538_v15, %v1442_v32  ;;  %v6095_v37 = vpop.f32.mrb[44].mxu0  ;;  %v1586_v57 = vadd.f32 %v1585_v50, %v8612_v16  ;;  %6316 = vmatpush3.bf16.msra.mxu1 %v6698_v41 }
 0x44b   :  { %v6096_v38 = vpop.f32.mrb[45].mxu0 }
 0x44c   :  { %v6097_v42 = vadd.f32 %v6096_v38, %v6095_v37  ;;  %v6098_v44 = vpop.f32.mrb[46].mxu0  ;;  %v6299_v47 = vpop.f32.mrb[44].mxu1  ;;  %v1587_v0 = vadd.f32 %v1586_v57, %v8615_v31 }
 0x44d   :  { %v6099_v45 = vpop.f32.mrb[47].mxu0  ;;  %v1567_v53 = vpop.f32.mrb[45].mxu1 }
 0x44e   :  { %v1447_v17 = vadd.f32 %v6097_v42, %v8574_v30  ;;  %v6100_v51 = vadd.f32 %v6099_v45, %v6098_v44  ;;  %v6300_v54 = vpop.f32.mrb[46].mxu1 }
 0x44f   :  { %v1570_v33 = vpop.f32.mrb[47].mxu1 }
 0x450   :  { %v8624_v55 = vadd.f32 %v6291_v46, %v1447_v17  ;;  %v1450_v56 = vadd.f32 %v6100_v51, %v8576_v34  ;;  %v1588_v46 = vadd.f32 %v1587_v0, %v8618_v36 }
 0x452   :  { %v8628_v59 = vadd.f32 %v6292_v11, %v1450_v56  ;;  %v6101_v60 = vpop.f32.mrb[48].mxu0  ;;  %v1589_v9 = vadd.f32 %v1588_v46, %v8624_v55 }
 0x453   :  { %v6102_v63 = vpop.f32.mrb[49].mxu0 }
 0x454   :  { %v6103_v30 = vadd.f32 %v6102_v63, %v6101_v60  ;;  %v6104_v2 = vpop.f32.mrb[50].mxu0  ;;  %v1590_v19 = vadd.f32 %v1589_v9, %v8628_v59 }
 0x455   :  { %v6105_v4 = vpop.f32.mrb[51].mxu0 }
 0x456   :  { %v6106_v5 = vadd.f32 %v6105_v4, %v6104_v2  ;;  %v1455_v7 = vadd.f32 %v6103_v30, %v8580_v48 }
 0x458   :  { %v8633_v8 = vadd.f32 %v1551_v28, %v1455_v7  ;;  %v1458_v34 = vadd.f32 %v6106_v5, %v8582_v52 }
 0x45a   :  { %v8637_v10 = vadd.f32 %v1554_v35, %v1458_v34  ;;  %v6107_v11 = vpop.f32.mrb[52].mxu0  ;;  %v1591_v22 = vadd.f32 %v1590_v19, %v8633_v8 }
 0x45b   :  { %v6108_v49 = vpop.f32.mrb[53].mxu0 }
 0x45c   :  { %v6109_v13 = vadd.f32 %v6108_v49, %v6107_v11  ;;  %v6110_v15 = vpop.f32.mrb[54].mxu0  ;;  %v1592_v28 = vadd.f32 %v1591_v22, %v8637_v10 }
 0x45d   :  { %v6111_v18 = vpop.f32.mrb[55].mxu0 }
 0x45e   :  { %v1463_v20 = vadd.f32 %v6109_v13, %v8586_v3  ;;  %v6112_v48 = vadd.f32 %v6111_v18, %v6110_v15 }
 0x460   :  { %v8642_v23 = vadd.f32 %v6295_v25, %v1463_v20  ;;  %v1466_v52 = vadd.f32 %v6112_v48, %v8588_v6 }
 0x462   :  { %v8645_v62 = vadd.f32 %v6296_v29, %v1466_v52  ;;  %v6113_v26 = vpop.f32.mrb[56].mxu0  ;;  %v1593_v3 = vadd.f32 %v1592_v28, %v8642_v23 }
 0x463   :  { %v6114_v27 = vpop.f32.mrb[57].mxu0 }
 0x464   :  { %v6115_v1 = vadd.f32 %v6114_v27, %v6113_v26  ;;  %v6116_v32 = vpop.f32.mrb[58].mxu0  ;;  %v1594_v6 = vadd.f32 %v1593_v3, %v8645_v62 }
 0x465   :  { %v6117_v35 = vpop.f32.mrb[59].mxu0 }
 0x466   :  { %v6118_v37 = vadd.f32 %v6117_v35, %v6116_v32  ;;  %v1471_v38 = vadd.f32 %v6115_v1, %v8592_v21 }
 0x468   :  { %v8650_v39 = vadd.f32 %v1567_v53, %v1471_v38  ;;  %v1474_v25 = vadd.f32 %v6118_v37, %v8594_v24 }
 0x46a   :  { %v8654_v29 = vadd.f32 %v1570_v33, %v1474_v25  ;;  %v6119_v41 = vpop.f32.mrb[60].mxu0  ;;  %v1595_v42 = vadd.f32 %v1594_v6, %v8650_v39 }
 0x46b   :  { %v6120_v14 = vpop.f32.mrb[61].mxu0 }
 0x46c   :  { %v6121_v44 = vadd.f32 %v6120_v14, %v6119_v41  ;;  %v6122_v45 = vpop.f32.mrb[62].mxu0  ;;  %v1596_v51 = vadd.f32 %v1595_v42, %v8654_v29 }
 0x46d   :  { %v6123_v50 = vpop.f32.mrb[63].mxu0 }
 0x46e   :  { %v1479_v17 = vadd.f32 %v6121_v44, %v8598_v40  ;;  %v6124_v21 = vadd.f32 %v6123_v50, %v6122_v45 }
 0x470   :  { %v8659_v53 = vadd.f32 %v6299_v47, %v1479_v17  ;;  %v1482_v24 = vadd.f32 %v6124_v21, %v8600_v43 }
 0x472   :  { %v1597_v56 = vadd.f32 %v1596_v51, %v8659_v53  ;;  %v8663_v33 = vadd.f32 %v6300_v54, %v1482_v24 }
 0x474   :  { %v1598_v57 = vadd.f32 %v1597_v56, %v8663_v33 }
 0x476   :  { %v1599_v60 = vrot.slane %v1598_v57, 4 }
 0x478   :  { %v1600_v63 = vadd.f32 %v1599_v60, %v1598_v57 }
 0x47a   :  { %v1601_v0 = vrot.slane %v1600_v63, 2 }
 0x47c   :  { %v1602_v30 = vadd.f32 %v1601_v0, %v1600_v63 }
 0x47e   :  { %v1603_v2 = vrot.slane %v1602_v30, 1 }
 0x480   :  { %v1604_v4 = vadd.f32 %v1603_v2, %v1602_v30 }
 0x482   :  { %v8666_v40 = vmul.f32 0.0078125, %v1604_v4 }
 0x484   :  { %v1607_v47 = vsub.f32 %v8603_v58, %v8666_v40  ;;  %v1608_v43 = vsub.f32 %v8606_v61, %v8666_v40  ;;  %v1609_v54 = vsub.f32 %v8609_v12, %v8666_v40  ;;  %v1610_v46 = vsub.f32 %v8612_v16, %v8666_v40 }
 0x485   :  { %v1611_v34 = vsub.f32 %v8615_v31, %v8666_v40  ;;  %v1612_v49 = vsub.f32 %v8618_v36, %v8666_v40  ;;  %v1613_v18 = vsub.f32 %v8624_v55, %v8666_v40  ;;  %v1614_v48 = vsub.f32 %v8628_v59, %v8666_v40 }
 0x486   :  { %v1623_v5 = vmul.f32 %v1607_v47, %v1607_v47  ;;  %v1624_v7 = vmul.f32 %v1608_v43, %v1608_v43  ;;  %v1625_v9 = vmul.f32 %v1609_v54, %v1609_v54  ;;  %v1626_v13 = vmul.f32 %v1610_v46, %v1610_v46 }
 0x487   :  { %v1627_v19 = vmul.f32 %v1611_v34, %v1611_v34  ;;  %v1628_v22 = vmul.f32 %v1612_v49, %v1612_v49  ;;  %v1615_v26 = vsub.f32 %v8633_v8, %v8666_v40  ;;  %v1629_v27 = vmul.f32 %v1613_v18, %v1613_v18 }
 0x488   :  { %v1639_v11 = vadd.f32 %v1624_v7, %v1623_v5  ;;  %v1616_v1 = vsub.f32 %v8637_v10, %v8666_v40  ;;  %v1630_v32 = vmul.f32 %v1614_v48, %v1614_v48  ;;  %v1617_v37 = vsub.f32 %v8642_v23, %v8666_v40 }
 0x489   :  { %v1631_v38 = vmul.f32 %v1615_v26, %v1615_v26  ;;  %v1618_v25 = vsub.f32 %v8645_v62, %v8666_v40  ;;  %v1619_v14 = vsub.f32 %v8650_v39, %v8666_v40  ;;  %v1620_v45 = vsub.f32 %v8654_v29, %v8666_v40 }
 0x48a   :  { %v1640_v15 = vadd.f32 %v1639_v11, %v1625_v9  ;;  %v1632_v6 = vmul.f32 %v1616_v1, %v1616_v1  ;;  %v1633_v42 = vmul.f32 %v1617_v37, %v1617_v37  ;;  %v1621_v21 = vsub.f32 %v8659_v53, %v8666_v40 }
 0x48b   :  { %v1634_v50 = vmul.f32 %v1618_v25, %v1618_v25  ;;  %v1635_v51 = vmul.f32 %v1619_v14, %v1619_v14  ;;  %v1622_v56 = vsub.f32 %v8663_v33, %v8666_v40  ;;  %v1636_v57 = vmul.f32 %v1620_v45, %v1620_v45 }
 0x48c   :  { %v1641_v20 = vadd.f32 %v1640_v15, %v1626_v13  ;;  %v1637_v63 = vmul.f32 %v1621_v21, %v1621_v21  ;;  %v1667_v11 = vlaneseq  ;;  %v1582_v13 = vld [vmem:[#allocation8] sm:$0x1] }
 0x48d   :  { %v1638_v30 = vmul.f32 %v1622_v56, %v1622_v56 }
 0x48e   :  { %v1642_v52 = vadd.f32 %v1641_v20, %v1627_v19  ;;  %v8700_v49 = vshrl.u32 %v1667_v11, 7  ;;  %v1583_v20 = vld [vmem:[#allocation10] sm:$0x1] }
 0x490   :  { %v1643_v28 = vadd.f32 %v1642_v52, %v1628_v22  ;;  %v8703_v15 = vsub.s32 0, %v8700_v49 }
 0x492   :  { %v1644_v35 = vadd.f32 %v1643_v28, %v1629_v27 }
 0x494   :  { %v1645_v3 = vadd.f32 %v1644_v35, %v1630_v32 }
 0x496   :  { %v1646_v41 = vadd.f32 %v1645_v3, %v1631_v38 }
 0x498   :  { %v1647_v44 = vadd.f32 %v1646_v41, %v1632_v6 }
 0x49a   :  { %v1648_v17 = vadd.f32 %v1647_v44, %v1633_v42 }
 0x49c   :  { %v1649_v24 = vadd.f32 %v1648_v17, %v1634_v50 }
 0x49e   :  { %v1650_v60 = vadd.f32 %v1649_v24, %v1635_v51 }
 0x4a0   :  { %v1651_v0 = vadd.f32 %v1650_v60, %v1636_v57 }
 0x4a2   :  { %v1652_v2 = vadd.f32 %v1651_v0, %v1637_v63 }
 0x4a4   :  { %v1653_v4 = vadd.f32 %v1652_v2, %v1638_v30 }
 0x4a6   :  { %v1654_v47 = vrot.slane %v1653_v4, 4 }
 0x4a8   :  { %v1655_v43 = vadd.f32 %v1654_v47, %v1653_v4 }
 0x4aa   :  { %v1656_v54 = vrot.slane %v1655_v43, 2 }
 0x4ac   :  { %v1657_v5 = vadd.f32 %v1656_v54, %v1655_v43 }
 0x4ae   :  { %v1658_v7 = vrot.slane %v1657_v5, 1 }
 0x4b0   :  { %v1659_v46 = vadd.f32 %v1658_v7, %v1657_v5 }
 0x4b2   :  { %v1660_v34 = vmul.f32 0.0078125, %v1659_v46 }
 0x4b4   :  { %v1661_v9 = vadd.f32 1e-05, %v1660_v34 }
 0x4b6   :  { %6827 = vrsqrt.f32 %v1661_v9 }
 0x4c0   :  { %v6828_v18 = vpop.eup %6827 }
 0x4c1   :  { %v1663_v19 = vmul.f32 %v6828_v18, %v1582_v13 }
 0x4c3   :  { %v1664_v48 = vmul.f32 %v1663_v19, %v8666_v40  ;;  %v1670_v22 = vrot.slane %v1663_v19, %v8703_v15 }
 0x4c5   :  { %v1665_v52 = vsub.f32 %v1583_v20, %v1664_v48  ;;  %v1672_v26 = vmul.f32 %v1670_v22, %v8603_v58  ;;  %v1673_v28 = vmul.f32 %v1670_v22, %v8606_v61  ;;  %v1674_v1 = vmul.f32 %v1670_v22, %v8609_v12  ;;  %v6699_v48 = vld [vmem:[#allocation17] sm:$0xff]  }
 0x4c6   :  { %v1675_v32 = vmul.f32 %v1670_v22, %v8612_v16  ;;  %v1676_v35 = vmul.f32 %v1670_v22, %v8615_v31  ;;  %v1677_v37 = vmul.f32 %v1670_v22, %v8618_v36  ;;  %v1678_v12 = vmul.f32 %v1670_v22, %v8624_v55  ;;  %6333 = vmatprep.subr.bf16.mxu0 %v6699_v48 }
 0x4c7   :  { %v1692_v27 = vrot.slane %v1665_v52, %v8703_v15  ;;  %v1679_v16 = vmul.f32 %v1670_v22, %v8628_v59  ;;  %v1680_v36 = vmul.f32 %v1670_v22, %v8633_v8  ;;  %v1681_v17 = vmul.f32 %v1670_v22, %v8637_v10  ;;  %6334 = vmatpush3.bf16.msra.mxu0 %v6699_v48  ;;  %v6700_v52 = vld [vmem:[#allocation17 + $0x8] sm:$0xff]  }
 0x4c8   :  { %v1682_v59 = vmul.f32 %v1670_v22, %v8642_v23  ;;  %v1683_v30 = vmul.f32 %v1670_v22, %v8645_v62  ;;  %v1684_v8 = vmul.f32 %v1670_v22, %v8650_v39  ;;  %v1685_v10 = vmul.f32 %v1670_v22, %v8654_v29  ;;  %6335 = vmatprep.subr.bf16.mxu0 %v6700_v52 }
 0x4c9   :  { %v1694_v38 = vadd.f32 %v1692_v27, %v1672_v26  ;;  %v1695_v3 = vadd.f32 %v1692_v27, %v1673_v28  ;;  %v1696_v40 = vadd.f32 %v1692_v27, %v1674_v1  ;;  %v1697_v25 = vadd.f32 %v1692_v27, %v1675_v32  ;;  %v6701_v26 = vld [vmem:[#allocation17 + $0x10] sm:$0xff]   ;;  %v6706_v28 = vld [vmem:[#allocation17 + $0x38] sm:$0xff]  }
 0x4ca   :  { %v1698_v6 = vadd.f32 %v1692_v27, %v1676_v35  ;;  %v1699_v41 = vadd.f32 %v1692_v27, %v1677_v37  ;;  %v1700_v21 = vadd.f32 %v1692_v27, %v1678_v12  ;;  %v1701_v51 = vadd.f32 %v1692_v27, %v1679_v16  ;;  %v5702_v32 = vld [vmem:[#allocation13] ss:$0 sm:$0xff] }
 0x4cb   :  { %v1710_v14 = vmax.f32 %v1694_v38, 0.0  ;;  %v1711_v58 = vmax.f32 %v1695_v3, 0.0  ;;  %v1712_v42 = vmax.f32 %v1696_v40, 0.0  ;;  %v1713_v44 = vmax.f32 %v1697_v25, 0.0  ;;  %6336 = vmatpush3.bf16.msra.mxu0 %v6700_v52 }
 0x4cc   :  { %v1714_v45 = vmax.f32 %v1698_v6, 0.0  ;;  %v1715_v61 = vmax.f32 %v1699_v41, 0.0  ;;  %v1702_v56 = vadd.f32 %v1692_v27, %v1680_v36  ;;  %v1703_v57 = vadd.f32 %v1692_v27, %v1681_v17  ;;  %6337 = vmatprep.subr.bf16.mxu0 %v6701_v26 }
 0x4cd   :  { %v1743_v50 = vpack.c.bf16 %v1711_v58, %v1710_v14  ;;  %v1744_v31 = vpack.c.bf16 %v1713_v44, %v1712_v42  ;;  %v1716_v60 = vmax.f32 %v1700_v21, 0.0  ;;  %v1717_v63 = vmax.f32 %v1701_v51, 0.0 }
 0x4ce   :  { %v1745_v24 = vpack.c.bf16 %v1715_v61, %v1714_v45  ;;  %v1718_v0 = vmax.f32 %v1702_v56, 0.0  ;;  %v1719_v55 = vmax.f32 %v1703_v57, 0.0  ;;  %v1704_v4 = vadd.f32 %v1692_v27, %v1682_v59 }
 0x4cf   :  { %6317 = vmatprep.mubr.bf16.mxu1 %v1743_v50  ;;  %v1746_v2 = vpack.c.bf16 %v1717_v63, %v1716_v60  ;;  %v1705_v47 = vadd.f32 %v1692_v27, %v1683_v30  ;;  %v1706_v54 = vadd.f32 %v1692_v27, %v1684_v8  ;;  %v1707_v5 = vadd.f32 %v1692_v27, %v1685_v10 }
 0x4d0   :  { %6318 = vmatmul.mubr.bf16.vlgmr.msra.gmra.mrb[48].mxu1 %v1744_v31  ;;  %v1747_v43 = vpack.c.bf16 %v1719_v55, %v1718_v0  ;;  %v1720_v7 = vmax.f32 %v1704_v4, 0.0  ;;  %v1686_v23 = vmul.f32 %v1670_v22, %v8659_v53  ;;  %v1687_v62 = vmul.f32 %v1670_v22, %v8663_v33  ;;  %6338 = vmatpush3.bf16.msra.mxu0 %v6701_v26  ;;  %v6702_v53 = vld [vmem:[#allocation17 + $0x18] sm:$0xff]   ;;  %v6703_v33 = vld [vmem:[#allocation17 + $0x20] sm:$0xff]   ;;  %v6704_v22 = vld [vmem:[#allocation17 + $0x28] sm:$0xff]  }
 0x4d1   :  { %6321 = vmatprep.mubr.bf16.mxu1 %v1745_v24  ;;  %v1721_v46 = vmax.f32 %v1705_v47, 0.0  ;;  %v1722_v34 = vmax.f32 %v1706_v54, 0.0  ;;  %v1723_v9 = vmax.f32 %v1707_v5, 0.0  ;;  %6339 = vmatprep.subr.bf16.mxu0 %v6702_v53 }
 0x4d2   :  { %v1708_v39 = vadd.f32 %v1692_v27, %v1686_v23  ;;  %v1709_v13 = vadd.f32 %v1692_v27, %v1687_v62  ;;  %v6705_v27 = vld [vmem:[#allocation17 + $0x30] sm:$0xff]  }
 0x4d3   :  { %v1748_v11 = vpack.c.bf16 %v1721_v46, %v1720_v7  ;;  %v1749_v29 = vpack.c.bf16 %v1723_v9, %v1722_v34 }
 0x4d4   :  { %v1724_v18 = vmax.f32 %v1708_v39, 0.0  ;;  %v1725_v19 = vmax.f32 %v1709_v13, 0.0  ;;  %6340 = vmatpush3.bf16.msra.mxu0 %v6702_v53 }
 0x4d5   :  { %6341 = vmatprep.subr.bf16.mxu0 %v6703_v33 }
 0x4d6   :  { %v1750_v20 = vpack.c.bf16 %v1725_v19, %v1724_v18 }
 0x4d8   :  { %6322 = vmatmul.mubr.bf16.gmra.mrb[52].mxu1 %v1746_v2  ;;  %6342 = vmatpush3.bf16.msra.mxu0 %v6703_v33 }
 0x4d9   :  { %6325 = vmatprep.mubr.bf16.mxu1 %v1747_v43  ;;  %6343 = vmatprep.subr.bf16.mxu0 %v6704_v22 }
 0x4dc   :  { %6344 = vmatpush3.bf16.msra.mxu0 %v6704_v22 }
 0x4dd   :  { %6345 = vmatprep.subr.bf16.mxu0 %v6705_v27 }
 0x4e0   :  { %6326 = vmatmul.mubr.bf16.gmra.mrb[56].mxu1 %v1748_v11  ;;  %6346 = vmatpush3.bf16.msra.mxu0 %v6705_v27 }
 0x4e1   :  { %6329 = vmatprep.mubr.bf16.mxu1 %v1749_v29  ;;  %6347 = vmatprep.subr.bf16.mxu0 %v6706_v28 }
 0x4e4   :  { %6348 = vmatpush3.bf16.msra.mxu0 %v6706_v28 }
 0x4e8   :  { %6330 = vmatmul.mubr.bf16.gmra.mrb[60].mxu1 %v1750_v20 }
 0x5a3   :  { %v6319_v1 = vpop.f32.mrb[48].mxu1 }
 0x5a4   :  { %v1839_v35 = vpop.f32.mrb[49].mxu1  ;;  %v8728_v25 = vadd.f32 %v6319_v1, %v5702_v32 }
 0x5a5   :  { %v6320_v37 = vpop.f32.mrb[50].mxu1  ;;  %v8724_v3 = vadd.f32 %v5702_v32, %v1839_v35 }
 0x5a6   :  { %v1842_v38 = vpop.f32.mrb[51].mxu1  ;;  %v8732_v41 = vadd.f32 %v6320_v37, %v5702_v32 }
 0x5a7   :  { %v8726_v40 = vadd.f32 %v5702_v32, %v1842_v38 }
 0x5a9   :  { %v1904_v6 = vadd.f32 %v8726_v40, %v8724_v3 }
 0x5ab   :  { %v1905_v14 = vadd.f32 %v1904_v6, %v8728_v25  ;;  %v6323_v58 = vpop.f32.mrb[52].mxu1 }
 0x5ac   :  { %v1855_v42 = vpop.f32.mrb[53].mxu1  ;;  %v8741_v31 = vadd.f32 %v6323_v58, %v5702_v32 }
 0x5ad   :  { %v8735_v44 = vadd.f32 %v5702_v32, %v1855_v42  ;;  %v1906_v45 = vadd.f32 %v1905_v14, %v8732_v41  ;;  %v6324_v61 = vpop.f32.mrb[54].mxu1 }
 0x5ae   :  { %v1858_v12 = vpop.f32.mrb[55].mxu1  ;;  %v8744_v17 = vadd.f32 %v6324_v61, %v5702_v32 }
 0x5af   :  { %v1907_v16 = vadd.f32 %v1906_v45, %v8735_v44  ;;  %v8739_v50 = vadd.f32 %v5702_v32, %v1858_v12 }
 0x5b1   :  { %v1908_v36 = vadd.f32 %v1907_v16, %v8739_v50 }
 0x5b3   :  { %v1909_v21 = vadd.f32 %v1908_v36, %v8741_v31  ;;  %v6327_v51 = vpop.f32.mrb[56].mxu1 }
 0x5b4   :  { %v1871_v24 = vpop.f32.mrb[57].mxu1  ;;  %v8753_v59 = vadd.f32 %v6327_v51, %v5702_v32 }
 0x5b5   :  { %v8747_v56 = vadd.f32 %v5702_v32, %v1871_v24  ;;  %v1910_v57 = vadd.f32 %v1909_v21, %v8744_v17  ;;  %v6328_v60 = vpop.f32.mrb[58].mxu1 }
 0x5b6   :  { %v1874_v63 = vpop.f32.mrb[59].mxu1  ;;  %v8756_v8 = vadd.f32 %v6328_v60, %v5702_v32 }
 0x5b7   :  { %v1911_v0 = vadd.f32 %v1910_v57, %v8747_v56  ;;  %v8751_v55 = vadd.f32 %v5702_v32, %v1874_v63 }
 0x5b9   :  { %v1912_v30 = vadd.f32 %v1911_v0, %v8751_v55 }
 0x5bb   :  { %v1913_v10 = vadd.f32 %v1912_v30, %v8753_v59  ;;  %v6331_v2 = vpop.f32.mrb[60].mxu1 }
 0x5bc   :  { %v1887_v4 = vpop.f32.mrb[61].mxu1  ;;  %v8765_v34 = vadd.f32 %v6331_v2, %v5702_v32 }
 0x5bd   :  { %v8759_v47 = vadd.f32 %v5702_v32, %v1887_v4  ;;  %v1914_v43 = vadd.f32 %v1913_v10, %v8756_v8  ;;  %v6332_v54 = vpop.f32.mrb[62].mxu1 }
 0x5be   :  { %v1890_v5 = vpop.f32.mrb[63].mxu1  ;;  %v8768_v23 = vadd.f32 %v6332_v54, %v5702_v32 }
 0x5bf   :  { %v1915_v7 = vadd.f32 %v1914_v43, %v8759_v47  ;;  %v8763_v46 = vadd.f32 %v5702_v32, %v1890_v5 }
 0x5c1   :  { %v1916_v9 = vadd.f32 %v1915_v7, %v8763_v46 }
 0x5c3   :  { %v1917_v62 = vadd.f32 %v1916_v9, %v8765_v34 }
 0x5c5   :  { %v1918_v11 = vadd.f32 %v1917_v62, %v8768_v23 }
 0x5c7   :  { %v1919_v39 = vrot.slane %v1918_v11, 4 }
 0x5c9   :  { %v1920_v13 = vadd.f32 %v1919_v39, %v1918_v11 }
 0x5cb   :  { %v1921_v29 = vrot.slane %v1920_v13, 2 }
 0x5cd   :  { %v1922_v18 = vadd.f32 %v1921_v29, %v1920_v13 }
 0x5cf   :  { %v1923_v19 = vrot.slane %v1922_v18, 1 }
 0x5d1   :  { %v1924_v20 = vadd.f32 %v1923_v19, %v1922_v18 }
 0x5d3   :  { %v1925_v48 = vmul.f32 0.0078125, %v1924_v20 }
 0x5d5   :  { %v1926_v52 = vsub.f32 %v8724_v3, %v1925_v48  ;;  %v1927_v26 = vsub.f32 %v8726_v40, %v1925_v48  ;;  %v1928_v53 = vsub.f32 %v8728_v25, %v1925_v48  ;;  %v1929_v27 = vsub.f32 %v8732_v41, %v1925_v48 }
 0x5d6   :  { %v1930_v28 = vsub.f32 %v8735_v44, %v1925_v48  ;;  %v1931_v35 = vsub.f32 %v8739_v50, %v1925_v48  ;;  %v1932_v6 = vsub.f32 %v8741_v31, %v1925_v48  ;;  %v1933_v42 = vsub.f32 %v8744_v17, %v1925_v48 }
 0x5d7   :  { %v1942_v33 = vmul.f32 %v1926_v52, %v1926_v52  ;;  %v1943_v22 = vmul.f32 %v1927_v26, %v1927_v26  ;;  %v1944_v1 = vmul.f32 %v1928_v53, %v1928_v53  ;;  %v1945_v37 = vmul.f32 %v1929_v27, %v1929_v27 }
 0x5d8   :  { %v1946_v14 = vmul.f32 %v1930_v28, %v1930_v28  ;;  %v1947_v45 = vmul.f32 %v1931_v35, %v1931_v35  ;;  %v1934_v12 = vsub.f32 %v8747_v56, %v1925_v48  ;;  %v1948_v16 = vmul.f32 %v1932_v6, %v1932_v6 }
 0x5d9   :  { %v1958_v32 = vadd.f32 %v1943_v22, %v1942_v33  ;;  %v1935_v21 = vsub.f32 %v8751_v55, %v1925_v48  ;;  %v1949_v51 = vmul.f32 %v1933_v42, %v1933_v42  ;;  %v1936_v57 = vsub.f32 %v8753_v59, %v1925_v48 }
 0x5da   :  { %v1950_v60 = vmul.f32 %v1934_v12, %v1934_v12  ;;  %v1937_v0 = vsub.f32 %v8756_v8, %v1925_v48  ;;  %v1938_v2 = vsub.f32 %v8759_v47, %v1925_v48  ;;  %v1939_v54 = vsub.f32 %v8763_v46, %v1925_v48 }
 0x5db   :  { %v1959_v38 = vadd.f32 %v1958_v32, %v1944_v1  ;;  %v1951_v30 = vmul.f32 %v1935_v21, %v1935_v21  ;;  %v1952_v4 = vmul.f32 %v1936_v57, %v1936_v57  ;;  %v1940_v9 = vsub.f32 %v8765_v34, %v1925_v48 }
 0x5dc   :  { %v1953_v5 = vmul.f32 %v1937_v0, %v1937_v0  ;;  %v1954_v62 = vmul.f32 %v1938_v2, %v1938_v2  ;;  %v1941_v39 = vsub.f32 %v8768_v23, %v1925_v48  ;;  %v1955_v13 = vmul.f32 %v1939_v54, %v1939_v54 }
 0x5dd   :  { %v1960_v58 = vadd.f32 %v1959_v38, %v1945_v37  ;;  %v1956_v18 = vmul.f32 %v1940_v9, %v1940_v9  ;;  %v1902_v37 = vld [vmem:[#allocation14] sm:$0x1] }
 0x5de   :  { %v1957_v20 = vmul.f32 %v1941_v39, %v1941_v39 }
 0x5df   :  { %v1961_v61 = vadd.f32 %v1960_v58, %v1946_v14  ;;  %v1903_v14 = vld [vmem:[#allocation16] sm:$0x1] }
 0x5e1   :  { %v1962_v36 = vadd.f32 %v1961_v61, %v1947_v45 }
 0x5e3   :  { %v1963_v24 = vadd.f32 %v1962_v36, %v1948_v16 }
 0x5e5   :  { %v1964_v63 = vadd.f32 %v1963_v24, %v1949_v51 }
 0x5e7   :  { %v1965_v10 = vadd.f32 %v1964_v63, %v1950_v60 }
 0x5e9   :  { %v1966_v43 = vadd.f32 %v1965_v10, %v1951_v30 }
 0x5eb   :  { %v1967_v7 = vadd.f32 %v1966_v43, %v1952_v4 }
 0x5ed   :  { %v1968_v11 = vadd.f32 %v1967_v7, %v1953_v5 }
 0x5ef   :  { %v1969_v29 = vadd.f32 %v1968_v11, %v1954_v62 }
 0x5f1   :  { %v1970_v19 = vadd.f32 %v1969_v29, %v1955_v13 }
 0x5f3   :  { %v1971_v52 = vadd.f32 %v1970_v19, %v1956_v18 }
 0x5f5   :  { %v1972_v26 = vadd.f32 %v1971_v52, %v1957_v20 }
 0x5f7   :  { %v1973_v53 = vrot.slane %v1972_v26, 4 }
 0x5f9   :  { %v1974_v33 = vadd.f32 %v1973_v53, %v1972_v26 }
 0x5fb   :  { %v1975_v22 = vrot.slane %v1974_v33, 2 }
 0x5fd   :  { %v1976_v27 = vadd.f32 %v1975_v22, %v1974_v33 }
 0x5ff   :  { %v1977_v28 = vrot.slane %v1976_v27, 1 }
 0x601   :  { %v1978_v1 = vadd.f32 %v1977_v28, %v1976_v27 }
 0x603   :  { %v1979_v32 = vmul.f32 0.0078125, %v1978_v1 }
 0x605   :  { %v1980_v35 = vadd.f32 1e-05, %v1979_v32 }
 0x607   :  { %6829 = vrsqrt.f32 %v1980_v35 }
 0x611   :  { %v6830_v38 = vpop.eup %6829 }
 0x612   :  { %v1982_v6 = vmul.f32 %v6830_v38, %v1902_v37 }
 0x614   :  { %v1983_v58 = vmul.f32 %v1982_v6, %v1925_v48  ;;  %v1989_v42 = vrot.slane %v1982_v6, %v8703_v15 }
 0x616   :  { %v1984_v45 = vsub.f32 %v1903_v14, %v1983_v58  ;;  %v1991_v61 = vmul.f32 %v1989_v42, %v8724_v3  ;;  %v1992_v16 = vmul.f32 %v1989_v42, %v8726_v40  ;;  %v1993_v36 = vmul.f32 %v1989_v42, %v8728_v25  ;;  %v6707_v58 = vld [vmem:[#allocation23] sm:$0xff]  }
 0x617   :  { %v1994_v21 = vmul.f32 %v1989_v42, %v8732_v41  ;;  %v1995_v51 = vmul.f32 %v1989_v42, %v8735_v44  ;;  %v1996_v24 = vmul.f32 %v1989_v42, %v8739_v50  ;;  %v1997_v25 = vmul.f32 %v1989_v42, %v8741_v31  ;;  %6365 = vmatprep.subr.bf16.mxu1 %v6707_v58 }
 0x618   :  { %v2011_v12 = vrot.slane %v1984_v45, %v8703_v15  ;;  %v1998_v41 = vmul.f32 %v1989_v42, %v8744_v17  ;;  %v1999_v50 = vmul.f32 %v1989_v42, %v8747_v56  ;;  %v2000_v5 = vmul.f32 %v1989_v42, %v8751_v55  ;;  %6366 = vmatpush3.bf16.msra.mxu1 %v6707_v58  ;;  %v6708_v45 = vld [vmem:[#allocation23 + $0x8] sm:$0xff]  }
 0x619   :  { %v2001_v17 = vmul.f32 %v1989_v42, %v8753_v59  ;;  %v2002_v19 = vmul.f32 %v1989_v42, %v8756_v8  ;;  %v2004_v56 = vmul.f32 %v1989_v42, %v8763_v46  ;;  %v2003_v55 = vmul.f32 %v1989_v42, %v8759_v47  ;;  %6367 = vmatprep.subr.bf16.mxu1 %v6708_v45 }
 0x61a   :  { %v2013_v57 = vadd.f32 %v2011_v12, %v1991_v61  ;;  %v2014_v60 = vadd.f32 %v2011_v12, %v1992_v16  ;;  %v2015_v48 = vadd.f32 %v2011_v12, %v1993_v36  ;;  %v2016_v63 = vadd.f32 %v2011_v12, %v1994_v21  ;;  %v6709_v61 = vld [vmem:[#allocation23 + $0x10] sm:$0xff]   ;;  %v6714_v16 = vld [vmem:[#allocation23 + $0x38] sm:$0xff]  }
 0x61b   :  { %v2017_v0 = vadd.f32 %v2011_v12, %v1995_v51  ;;  %v2018_v30 = vadd.f32 %v2011_v12, %v1996_v24  ;;  %v2019_v7 = vadd.f32 %v2011_v12, %v1997_v25  ;;  %v2020_v9 = vadd.f32 %v2011_v12, %v1998_v41  ;;  %v5711_v21 = vld [vmem:[#allocation19] ss:$0 sm:$0xff] }
 0x61c   :  { %v2029_v10 = vmax.f32 %v2013_v57, 0.0  ;;  %v2030_v3 = vmax.f32 %v2014_v60, 0.0  ;;  %v2031_v2 = vmax.f32 %v2015_v48, 0.0  ;;  %v2032_v4 = vmax.f32 %v2016_v63, 0.0  ;;  %6368 = vmatpush3.bf16.msra.mxu1 %v6708_v45 }
 0x61d   :  { %v2033_v43 = vmax.f32 %v2017_v0, 0.0  ;;  %v2034_v40 = vmax.f32 %v2018_v30, 0.0  ;;  %v2021_v11 = vadd.f32 %v2011_v12, %v1999_v50  ;;  %v2022_v39 = vadd.f32 %v2011_v12, %v2000_v5  ;;  %6369 = vmatprep.subr.bf16.mxu1 %v6709_v61 }
 0x61e   :  { %v2062_v54 = vpack.c.bf16 %v2030_v3, %v2029_v10  ;;  %v2063_v44 = vpack.c.bf16 %v2032_v4, %v2031_v2  ;;  %v2035_v13 = vmax.f32 %v2019_v7, 0.0  ;;  %v2036_v29 = vmax.f32 %v2020_v9, 0.0 }
 0x61f   :  { %v2064_v62 = vpack.c.bf16 %v2034_v40, %v2033_v43  ;;  %v2037_v18 = vmax.f32 %v2021_v11, 0.0  ;;  %v2038_v31 = vmax.f32 %v2022_v39, 0.0  ;;  %v2023_v52 = vadd.f32 %v2011_v12, %v2001_v17 }
 0x620   :  { %6349 = vmatprep.mubr.bf16.mxu0 %v2062_v54  ;;  %v2065_v20 = vpack.c.bf16 %v2036_v29, %v2035_v13  ;;  %v2024_v26 = vadd.f32 %v2011_v12, %v2002_v19  ;;  %v2025_v33 = vadd.f32 %v2011_v12, %v2003_v55  ;;  %v2026_v22 = vadd.f32 %v2011_v12, %v2004_v56 }
 0x621   :  { %6350 = vmatmul.mubr.bf16.vlgmr.msra.gmra.mrb[64].mxu0 %v2063_v44  ;;  %v2066_v53 = vpack.c.bf16 %v2038_v31, %v2037_v18  ;;  %v2039_v27 = vmax.f32 %v2023_v52, 0.0  ;;  %v2005_v59 = vmul.f32 %v1989_v42, %v8765_v34  ;;  %v2006_v8 = vmul.f32 %v1989_v42, %v8768_v23  ;;  %6370 = vmatpush3.bf16.msra.mxu1 %v6709_v61  ;;  %v6710_v34 = vld [vmem:[#allocation23 + $0x18] sm:$0xff]   ;;  %v6711_v23 = vld [vmem:[#allocation23 + $0x20] sm:$0xff]   ;;  %v6712_v42 = vld [vmem:[#allocation23 + $0x28] sm:$0xff]  }
 0x622   :  { %6353 = vmatprep.mubr.bf16.mxu0 %v2064_v62  ;;  %v2040_v28 = vmax.f32 %v2024_v26, 0.0  ;;  %v2041_v1 = vmax.f32 %v2025_v33, 0.0  ;;  %v2042_v32 = vmax.f32 %v2026_v22, 0.0  ;;  %6371 = vmatprep.subr.bf16.mxu1 %v6710_v34 }
 0x623   :  { %v2027_v46 = vadd.f32 %v2011_v12, %v2005_v59  ;;  %v2028_v37 = vadd.f32 %v2011_v12, %v2006_v8  ;;  %v6713_v12 = vld [vmem:[#allocation23 + $0x30] sm:$0xff]  }
 0x624   :  { %v2067_v35 = vpack.c.bf16 %v2040_v28, %v2039_v27  ;;  %v2068_v47 = vpack.c.bf16 %v2042_v32, %v2041_v1 }
 0x625   :  { %v2043_v38 = vmax.f32 %v2027_v46, 0.0  ;;  %v2044_v6 = vmax.f32 %v2028_v37, 0.0  ;;  %6372 = vmatpush3.bf16.msra.mxu1 %v6710_v34 }
 0x626   :  { %6373 = vmatprep.subr.bf16.mxu1 %v6711_v23 }
 0x627   :  { %v2069_v14 = vpack.c.bf16 %v2044_v6, %v2043_v38 }
 0x629   :  { %6354 = vmatmul.mubr.bf16.gmra.mrb[68].mxu0 %v2065_v20  ;;  %6374 = vmatpush3.bf16.msra.mxu1 %v6711_v23 }
 0x62a   :  { %6357 = vmatprep.mubr.bf16.mxu0 %v2066_v53  ;;  %6375 = vmatprep.subr.bf16.mxu1 %v6712_v42 }
 0x62d   :  { %6376 = vmatpush3.bf16.msra.mxu1 %v6712_v42 }
 0x62e   :  { %6377 = vmatprep.subr.bf16.mxu1 %v6713_v12 }
 0x631   :  { %6358 = vmatmul.mubr.bf16.gmra.mrb[72].mxu0 %v2067_v35  ;;  %6378 = vmatpush3.bf16.msra.mxu1 %v6713_v12 }
 0x632   :  { %6361 = vmatprep.mubr.bf16.mxu0 %v2068_v47  ;;  %6379 = vmatprep.subr.bf16.mxu1 %v6714_v16 }
 0x635   :  { %6380 = vmatpush3.bf16.msra.mxu1 %v6714_v16 }
 0x639   :  { %6362 = vmatmul.mubr.bf16.gmra.mrb[76].mxu0 %v2069_v14 }
 0x6f4   :  { %v6351_v36 = vpop.f32.mrb[64].mxu0 }
 0x6f5   :  { %v2158_v51 = vpop.f32.mrb[65].mxu0  ;;  %v8810_v63 = vadd.f32 %v6351_v36, %v5711_v21 }
 0x6f6   :  { %v6352_v24 = vpop.f32.mrb[66].mxu0  ;;  %v8806_v60 = vadd.f32 %v5711_v21, %v2158_v51 }
 0x6f7   :  { %v2161_v57 = vpop.f32.mrb[67].mxu0  ;;  %v8814_v30 = vadd.f32 %v6352_v24, %v5711_v21 }
 0x6f8   :  { %v8808_v48 = vadd.f32 %v5711_v21, %v2161_v57 }
 0x6fa   :  { %v2223_v0 = vadd.f32 %v8808_v48, %v8806_v60 }
 0x6fc   :  { %v2224_v10 = vadd.f32 %v2223_v0, %v8810_v63  ;;  %v6355_v3 = vpop.f32.mrb[68].mxu0 }
 0x6fd   :  { %v2174_v2 = vpop.f32.mrb[69].mxu0  ;;  %v8823_v44 = vadd.f32 %v6355_v3, %v5711_v21 }
 0x6fe   :  { %v8817_v4 = vadd.f32 %v5711_v21, %v2174_v2  ;;  %v2225_v43 = vadd.f32 %v2224_v10, %v8814_v30  ;;  %v6356_v40 = vpop.f32.mrb[70].mxu0 }
 0x6ff   :  { %v2177_v25 = vpop.f32.mrb[71].mxu0  ;;  %v8826_v5 = vadd.f32 %v6356_v40, %v5711_v21 }
 0x700   :  { %v2226_v41 = vadd.f32 %v2225_v43, %v8817_v4  ;;  %v8821_v54 = vadd.f32 %v5711_v21, %v2177_v25 }
 0x702   :  { %v2227_v50 = vadd.f32 %v2226_v41, %v8821_v54 }
 0x704   :  { %v2228_v7 = vadd.f32 %v2227_v50, %v8823_v44  ;;  %v6359_v9 = vpop.f32.mrb[72].mxu0 }
 0x705   :  { %v2190_v62 = vpop.f32.mrb[73].mxu0  ;;  %v8835_v17 = vadd.f32 %v6359_v9, %v5711_v21 }
 0x706   :  { %v8829_v11 = vadd.f32 %v5711_v21, %v2190_v62  ;;  %v2229_v39 = vadd.f32 %v2228_v7, %v8826_v5  ;;  %v6360_v13 = vpop.f32.mrb[74].mxu0 }
 0x707   :  { %v2193_v29 = vpop.f32.mrb[75].mxu0  ;;  %v8838_v56 = vadd.f32 %v6360_v13, %v5711_v21 }
 0x708   :  { %v2230_v18 = vadd.f32 %v2229_v39, %v8829_v11  ;;  %v8833_v31 = vadd.f32 %v5711_v21, %v2193_v29 }
 0x70a   :  { %v2231_v19 = vadd.f32 %v2230_v18, %v8833_v31 }
 0x70c   :  { %v2232_v55 = vadd.f32 %v2231_v19, %v8835_v17  ;;  %v6363_v20 = vpop.f32.mrb[76].mxu0 }
 0x70d   :  { %v2206_v52 = vpop.f32.mrb[77].mxu0  ;;  %v8847_v1 = vadd.f32 %v6363_v20, %v5711_v21 }
 0x70e   :  { %v8841_v26 = vadd.f32 %v5711_v21, %v2206_v52  ;;  %v2233_v53 = vadd.f32 %v2232_v55, %v8838_v56  ;;  %v6364_v33 = vpop.f32.mrb[78].mxu0 }
 0x70f   :  { %v2209_v22 = vpop.f32.mrb[79].mxu0  ;;  %v8850_v59 = vadd.f32 %v6364_v33, %v5711_v21 }
 0x710   :  { %v2234_v27 = vadd.f32 %v2233_v53, %v8841_v26  ;;  %v8845_v28 = vadd.f32 %v5711_v21, %v2209_v22 }
 0x712   :  { %v2235_v32 = vadd.f32 %v2234_v27, %v8845_v28 }
 0x714   :  { %v2236_v8 = vadd.f32 %v2235_v32, %v8847_v1 }
 0x716   :  { %v2237_v35 = vadd.f32 %v2236_v8, %v8850_v59 }
 0x718   :  { %v2238_v46 = vrot.slane %v2237_v35, 4 }
 0x71a   :  { %v2239_v37 = vadd.f32 %v2238_v46, %v2237_v35 }
 0x71c   :  { %v2240_v47 = vrot.slane %v2239_v37, 2 }
 0x71e   :  { %v2241_v38 = vadd.f32 %v2240_v47, %v2239_v37 }
 0x720   :  { %v2242_v6 = vrot.slane %v2241_v38, 1 }
 0x722   :  { %v2243_v14 = vadd.f32 %v2242_v6, %v2241_v38 }
 0x724   :  { %v2244_v58 = vmul.f32 0.0078125, %v2243_v14 }
 0x726   :  { %v2245_v45 = vsub.f32 %v8806_v60, %v2244_v58  ;;  %v2246_v61 = vsub.f32 %v8808_v48, %v2244_v58  ;;  %v2247_v34 = vsub.f32 %v8810_v63, %v2244_v58  ;;  %v2248_v12 = vsub.f32 %v8814_v30, %v2244_v58 }
 0x727   :  { %v2249_v16 = vsub.f32 %v8817_v4, %v2244_v58  ;;  %v2250_v51 = vsub.f32 %v8821_v54, %v2244_v58  ;;  %v2251_v0 = vsub.f32 %v8823_v44, %v2244_v58  ;;  %v2252_v2 = vsub.f32 %v8826_v5, %v2244_v58 }
 0x728   :  { %v2261_v23 = vmul.f32 %v2245_v45, %v2245_v45  ;;  %v2262_v42 = vmul.f32 %v2246_v61, %v2246_v61  ;;  %v2263_v36 = vmul.f32 %v2247_v34, %v2247_v34  ;;  %v2264_v24 = vmul.f32 %v2248_v12, %v2248_v12 }
 0x729   :  { %v2265_v10 = vmul.f32 %v2249_v16, %v2249_v16  ;;  %v2266_v43 = vmul.f32 %v2250_v51, %v2250_v51  ;;  %v2253_v25 = vsub.f32 %v8829_v11, %v2244_v58  ;;  %v2267_v41 = vmul.f32 %v2251_v0, %v2251_v0 }
 0x72a   :  { %v2277_v21 = vadd.f32 %v2262_v42, %v2261_v23  ;;  %v2254_v7 = vsub.f32 %v8833_v31, %v2244_v58  ;;  %v2268_v9 = vmul.f32 %v2252_v2, %v2252_v2  ;;  %v2255_v39 = vsub.f32 %v8835_v17, %v2244_v58 }
 0x72b   :  { %v2269_v13 = vmul.f32 %v2253_v25, %v2253_v25  ;;  %v2256_v18 = vsub.f32 %v8838_v56, %v2244_v58  ;;  %v2257_v20 = vsub.f32 %v8841_v26, %v2244_v58  ;;  %v2258_v33 = vsub.f32 %v8845_v28, %v2244_v58 }
 0x72c   :  { %v2278_v57 = vadd.f32 %v2277_v21, %v2263_v36  ;;  %v2270_v19 = vmul.f32 %v2254_v7, %v2254_v7  ;;  %v2271_v52 = vmul.f32 %v2255_v39, %v2255_v39  ;;  %v2259_v32 = vsub.f32 %v8847_v1, %v2244_v58 }
 0x72d   :  { %v2272_v22 = vmul.f32 %v2256_v18, %v2256_v18  ;;  %v2273_v8 = vmul.f32 %v2257_v20, %v2257_v20  ;;  %v2260_v46 = vsub.f32 %v8850_v59, %v2244_v58  ;;  %v2274_v37 = vmul.f32 %v2258_v33, %v2258_v33 }
 0x72e   :  { %v2279_v3 = vadd.f32 %v2278_v57, %v2264_v24  ;;  %v2275_v38 = vmul.f32 %v2259_v32, %v2259_v32  ;;  %v2221_v24 = vld [vmem:[#allocation20] sm:$0x1] }
 0x72f   :  { %v2276_v14 = vmul.f32 %v2260_v46, %v2260_v46 }
 0x730   :  { %v2280_v40 = vadd.f32 %v2279_v3, %v2265_v10  ;;  %v2222_v10 = vld [vmem:[#allocation22] sm:$0x1] }
 0x732   :  { %v2281_v50 = vadd.f32 %v2280_v40, %v2266_v43 }
 0x734   :  { %v2282_v62 = vadd.f32 %v2281_v50, %v2267_v41 }
 0x736   :  { %v2283_v29 = vadd.f32 %v2282_v62, %v2268_v9 }
 0x738   :  { %v2284_v55 = vadd.f32 %v2283_v29, %v2269_v13 }
 0x73a   :  { %v2285_v53 = vadd.f32 %v2284_v55, %v2270_v19 }
 0x73c   :  { %v2286_v27 = vadd.f32 %v2285_v53, %v2271_v52 }
 0x73e   :  { %v2287_v35 = vadd.f32 %v2286_v27, %v2272_v22 }
 0x740   :  { %v2288_v47 = vadd.f32 %v2287_v35, %v2273_v8 }
 0x742   :  { %v2289_v6 = vadd.f32 %v2288_v47, %v2274_v37 }
 0x744   :  { %v2290_v45 = vadd.f32 %v2289_v6, %v2275_v38 }
 0x746   :  { %v2291_v61 = vadd.f32 %v2290_v45, %v2276_v14 }
 0x748   :  { %v2292_v34 = vrot.slane %v2291_v61, 4 }
 0x74a   :  { %v2293_v23 = vadd.f32 %v2292_v34, %v2291_v61 }
 0x74c   :  { %v2294_v42 = vrot.slane %v2293_v23, 2 }
 0x74e   :  { %v2295_v12 = vadd.f32 %v2294_v42, %v2293_v23 }
 0x750   :  { %v2296_v16 = vrot.slane %v2295_v12, 1 }
 0x752   :  { %v2297_v36 = vadd.f32 %v2296_v16, %v2295_v12 }
 0x754   :  { %v2298_v21 = vmul.f32 0.0078125, %v2297_v36 }
 0x756   :  { %v2299_v51 = vadd.f32 1e-05, %v2298_v21 }
 0x758   :  { %6831 = vrsqrt.f32 %v2299_v51 }
 0x762   :  { %v6832_v57 = vpop.eup %6831 }
 0x763   :  { %v2301_v0 = vmul.f32 %v6832_v57, %v2221_v24 }
 0x765   :  { %v2302_v3 = vmul.f32 %v2301_v0, %v2244_v58  ;;  %v2308_v2 = vrot.slane %v2301_v0, %v8703_v15 }
 0x767   :  { %v2303_v43 = vsub.f32 %v2222_v10, %v2302_v3  ;;  %v2310_v40 = vmul.f32 %v2308_v2, %v8806_v60  ;;  %v2311_v41 = vmul.f32 %v2308_v2, %v8808_v48  ;;  %v2312_v50 = vmul.f32 %v2308_v2, %v8810_v63  ;;  %v6715_v3 = vld [vmem:[#allocation29] sm:$0xff]  }
 0x768   :  { %v2313_v7 = vmul.f32 %v2308_v2, %v8814_v30  ;;  %v2314_v9 = vmul.f32 %v2308_v2, %v8817_v4  ;;  %v2315_v62 = vmul.f32 %v2308_v2, %v8821_v54  ;;  %v2316_v63 = vmul.f32 %v2308_v2, %v8823_v44  ;;  %6397 = vmatprep.subr.bf16.mxu0 %v6715_v3 }
 0x769   :  { %v2330_v25 = vrot.slane %v2303_v43, %v8703_v15  ;;  %v2317_v30 = vmul.f32 %v2308_v2, %v8826_v5  ;;  %v2318_v54 = vmul.f32 %v2308_v2, %v8829_v11  ;;  %v2319_v22 = vmul.f32 %v2308_v2, %v8833_v31  ;;  %6398 = vmatpush3.bf16.msra.mxu0 %v6715_v3  ;;  %v6716_v43 = vld [vmem:[#allocation29 + $0x8] sm:$0xff]  }
 0x76a   :  { %v2320_v5 = vmul.f32 %v2308_v2, %v8835_v17  ;;  %v2321_v6 = vmul.f32 %v2308_v2, %v8838_v56  ;;  %v2323_v11 = vmul.f32 %v2308_v2, %v8845_v28  ;;  %v2322_v31 = vmul.f32 %v2308_v2, %v8841_v26  ;;  %6399 = vmatprep.subr.bf16.mxu0 %v6716_v43 }
 0x76b   :  { %v2332_v39 = vadd.f32 %v2330_v25, %v2310_v40  ;;  %v2333_v13 = vadd.f32 %v2330_v25, %v2311_v41  ;;  %v2334_v58 = vadd.f32 %v2330_v25, %v2312_v50  ;;  %v2335_v29 = vadd.f32 %v2330_v25, %v2313_v7  ;;  %v6717_v40 = vld [vmem:[#allocation29 + $0x10] sm:$0xff]   ;;  %v6722_v41 = vld [vmem:[#allocation29 + $0x38] sm:$0xff]  }
 0x76c   :  { %v2336_v18 = vadd.f32 %v2330_v25, %v2314_v9  ;;  %v2337_v19 = vadd.f32 %v2330_v25, %v2315_v62  ;;  %v2338_v27 = vadd.f32 %v2330_v25, %v2316_v63  ;;  %v2339_v32 = vadd.f32 %v2330_v25, %v2317_v30  ;;  %v5720_v7 = vld [vmem:[#allocation25] ss:$0 sm:$0xff] }
 0x76d   :  { %v2348_v55 = vmax.f32 %v2332_v39, 0.0  ;;  %v2349_v60 = vmax.f32 %v2333_v13, 0.0  ;;  %v2350_v20 = vmax.f32 %v2334_v58, 0.0  ;;  %v2351_v52 = vmax.f32 %v2335_v29, 0.0  ;;  %6400 = vmatpush3.bf16.msra.mxu0 %v6716_v43 }
 0x76e   :  { %v2352_v53 = vmax.f32 %v2336_v18, 0.0  ;;  %v2353_v48 = vmax.f32 %v2337_v19, 0.0  ;;  %v2340_v35 = vadd.f32 %v2330_v25, %v2318_v54  ;;  %v2341_v46 = vadd.f32 %v2330_v25, %v2319_v22  ;;  %6401 = vmatprep.subr.bf16.mxu0 %v6717_v40 }
 0x76f   :  { %v2381_v33 = vpack.c.bf16 %v2349_v60, %v2348_v55  ;;  %v2382_v4 = vpack.c.bf16 %v2351_v52, %v2350_v20  ;;  %v2354_v37 = vmax.f32 %v2338_v27, 0.0  ;;  %v2355_v47 = vmax.f32 %v2339_v32, 0.0 }
 0x770   :  { %v2383_v8 = vpack.c.bf16 %v2353_v48, %v2352_v53  ;;  %v2356_v38 = vmax.f32 %v2340_v35, 0.0  ;;  %v2357_v44 = vmax.f32 %v2341_v46, 0.0  ;;  %v2342_v45 = vadd.f32 %v2330_v25, %v2320_v5 }
 0x771   :  { %6381 = vmatprep.mubr.bf16.mxu1 %v2381_v33  ;;  %v2384_v14 = vpack.c.bf16 %v2355_v47, %v2354_v37  ;;  %v2343_v61 = vadd.f32 %v2330_v25, %v2321_v6  ;;  %v2344_v23 = vadd.f32 %v2330_v25, %v2322_v31  ;;  %v2345_v42 = vadd.f32 %v2330_v25, %v2323_v11 }
 0x772   :  { %6382 = vmatmul.mubr.bf16.vlgmr.msra.gmra.mrb[64].mxu1 %v2382_v4  ;;  %v2385_v34 = vpack.c.bf16 %v2357_v44, %v2356_v38  ;;  %v2358_v12 = vmax.f32 %v2342_v45, 0.0  ;;  %v2324_v17 = vmul.f32 %v2308_v2, %v8847_v1  ;;  %v2325_v56 = vmul.f32 %v2308_v2, %v8850_v59  ;;  %6402 = vmatpush3.bf16.msra.mxu0 %v6717_v40  ;;  %v6718_v1 = vld [vmem:[#allocation29 + $0x18] sm:$0xff]   ;;  %v6719_v59 = vld [vmem:[#allocation29 + $0x20] sm:$0xff]   ;;  %v6720_v2 = vld [vmem:[#allocation29 + $0x28] sm:$0xff]  }
 0x773   :  { %6385 = vmatprep.mubr.bf16.mxu1 %v2383_v8  ;;  %v2359_v16 = vmax.f32 %v2343_v61, 0.0  ;;  %v2360_v36 = vmax.f32 %v2344_v23, 0.0  ;;  %v2361_v21 = vmax.f32 %v2345_v42, 0.0  ;;  %6403 = vmatprep.subr.bf16.mxu0 %v6718_v1 }
 0x774   :  { %v2346_v28 = vadd.f32 %v2330_v25, %v2324_v17  ;;  %v2347_v24 = vadd.f32 %v2330_v25, %v2325_v56  ;;  %v6721_v25 = vld [vmem:[#allocation29 + $0x30] sm:$0xff]  }
 0x775   :  { %v2386_v51 = vpack.c.bf16 %v2359_v16, %v2358_v12  ;;  %v2387_v26 = vpack.c.bf16 %v2361_v21, %v2360_v36 }
 0x776   :  { %v2362_v57 = vmax.f32 %v2346_v28, 0.0  ;;  %v2363_v0 = vmax.f32 %v2347_v24, 0.0  ;;  %6404 = vmatpush3.bf16.msra.mxu0 %v6718_v1 }
 0x777   :  { %6405 = vmatprep.subr.bf16.mxu0 %v6719_v59 }
 0x778   :  { %v2388_v10 = vpack.c.bf16 %v2363_v0, %v2362_v57 }
 0x77a   :  { %6386 = vmatmul.mubr.bf16.gmra.mrb[68].mxu1 %v2384_v14  ;;  %6406 = vmatpush3.bf16.msra.mxu0 %v6719_v59 }
 0x77b   :  { %6389 = vmatprep.mubr.bf16.mxu1 %v2385_v34  ;;  %6407 = vmatprep.subr.bf16.mxu0 %v6720_v2 }
 0x77e   :  { %6408 = vmatpush3.bf16.msra.mxu0 %v6720_v2 }
 0x77f   :  { %6409 = vmatprep.subr.bf16.mxu0 %v6721_v25 }
 0x782   :  { %6390 = vmatmul.mubr.bf16.gmra.mrb[72].mxu1 %v2386_v51  ;;  %6410 = vmatpush3.bf16.msra.mxu0 %v6721_v25 }
 0x783   :  { %6393 = vmatprep.mubr.bf16.mxu1 %v2387_v26  ;;  %6411 = vmatprep.subr.bf16.mxu0 %v6722_v41 }
 0x786   :  { %6412 = vmatpush3.bf16.msra.mxu0 %v6722_v41 }
 0x78a   :  { %6394 = vmatmul.mubr.bf16.gmra.mrb[76].mxu1 %v2388_v10 }
 0x845   :  { %v6383_v50 = vpop.f32.mrb[64].mxu1 }
 0x846   :  { %v2477_v9 = vpop.f32.mrb[65].mxu1  ;;  %v8892_v29 = vadd.f32 %v6383_v50, %v5720_v7 }
 0x847   :  { %v6384_v62 = vpop.f32.mrb[66].mxu1  ;;  %v8888_v13 = vadd.f32 %v5720_v7, %v2477_v9 }
 0x848   :  { %v2480_v39 = vpop.f32.mrb[67].mxu1  ;;  %v8896_v19 = vadd.f32 %v6384_v62, %v5720_v7 }
 0x849   :  { %v8890_v58 = vadd.f32 %v5720_v7, %v2480_v39 }
 0x84b   :  { %v2542_v18 = vadd.f32 %v8890_v58, %v8888_v13 }
 0x84d   :  { %v2543_v55 = vadd.f32 %v2542_v18, %v8892_v29  ;;  %v6387_v60 = vpop.f32.mrb[68].mxu1 }
 0x84e   :  { %v2493_v20 = vpop.f32.mrb[69].mxu1  ;;  %v8905_v4 = vadd.f32 %v6387_v60, %v5720_v7 }
 0x84f   :  { %v8899_v52 = vadd.f32 %v5720_v7, %v2493_v20  ;;  %v2544_v53 = vadd.f32 %v2543_v55, %v8896_v19  ;;  %v6388_v48 = vpop.f32.mrb[70].mxu1 }
 0x850   :  { %v2496_v63 = vpop.f32.mrb[71].mxu1  ;;  %v8908_v22 = vadd.f32 %v6388_v48, %v5720_v7 }
 0x851   :  { %v2545_v30 = vadd.f32 %v2544_v53, %v8899_v52  ;;  %v8903_v33 = vadd.f32 %v5720_v7, %v2496_v63 }
 0x853   :  { %v2546_v54 = vadd.f32 %v2545_v30, %v8903_v33 }
 0x855   :  { %v2547_v27 = vadd.f32 %v2546_v54, %v8905_v4  ;;  %v6391_v32 = vpop.f32.mrb[72].mxu1 }
 0x856   :  { %v2509_v8 = vpop.f32.mrb[73].mxu1  ;;  %v8917_v5 = vadd.f32 %v6391_v32, %v5720_v7 }
 0x857   :  { %v8911_v35 = vadd.f32 %v5720_v7, %v2509_v8  ;;  %v2548_v46 = vadd.f32 %v2547_v27, %v8908_v22  ;;  %v6392_v37 = vpop.f32.mrb[74].mxu1 }
 0x858   :  { %v2512_v47 = vpop.f32.mrb[75].mxu1  ;;  %v8920_v11 = vadd.f32 %v6392_v37, %v5720_v7 }
 0x859   :  { %v2549_v38 = vadd.f32 %v2548_v46, %v8911_v35  ;;  %v8915_v44 = vadd.f32 %v5720_v7, %v2512_v47 }
 0x85b   :  { %v2550_v6 = vadd.f32 %v2549_v38, %v8915_v44 }
 0x85d   :  { %v2551_v31 = vadd.f32 %v2550_v6, %v8917_v5  ;;  %v6395_v14 = vpop.f32.mrb[76].mxu1 }
 0x85e   :  { %v2525_v45 = vpop.f32.mrb[77].mxu1  ;;  %v8929_v36 = vadd.f32 %v6395_v14, %v5720_v7 }
 0x85f   :  { %v8923_v61 = vadd.f32 %v5720_v7, %v2525_v45  ;;  %v2552_v34 = vadd.f32 %v2551_v31, %v8920_v11  ;;  %v6396_v23 = vpop.f32.mrb[78].mxu1 }
 0x860   :  { %v2528_v42 = vpop.f32.mrb[79].mxu1  ;;  %v8932_v17 = vadd.f32 %v6396_v23, %v5720_v7 }
 0x861   :  { %v2553_v12 = vadd.f32 %v2552_v34, %v8923_v61  ;;  %v8927_v16 = vadd.f32 %v5720_v7, %v2528_v42 }
 0x863   :  { %v2554_v21 = vadd.f32 %v2553_v12, %v8927_v16 }
 0x865   :  { %v2555_v56 = vadd.f32 %v2554_v21, %v8929_v36 }
 0x867   :  { %v2556_v51 = vadd.f32 %v2555_v56, %v8932_v17 }
 0x869   :  { %v2557_v28 = vrot.slane %v2556_v51, 4 }
 0x86b   :  { %v2558_v24 = vadd.f32 %v2557_v28, %v2556_v51 }
 0x86d   :  { %v2559_v26 = vrot.slane %v2558_v24, 2 }
 0x86f   :  { %v2560_v57 = vadd.f32 %v2559_v26, %v2558_v24 }
 0x871   :  { %v2561_v0 = vrot.slane %v2560_v57, 1 }
 0x873   :  { %v2562_v10 = vadd.f32 %v2561_v0, %v2560_v57 }
 0x875   :  { %v2563_v3 = vmul.f32 0.0078125, %v2562_v10 }
 0x877   :  { %v2564_v43 = vsub.f32 %v8888_v13, %v2563_v3  ;;  %v2565_v40 = vsub.f32 %v8890_v58, %v2563_v3  ;;  %v2566_v1 = vsub.f32 %v8892_v29, %v2563_v3  ;;  %v2567_v25 = vsub.f32 %v8896_v19, %v2563_v3 }
 0x878   :  { %v2568_v41 = vsub.f32 %v8899_v52, %v2563_v3  ;;  %v2569_v9 = vsub.f32 %v8903_v33, %v2563_v3  ;;  %v2570_v18 = vsub.f32 %v8905_v4, %v2563_v3  ;;  %v2571_v20 = vsub.f32 %v8908_v22, %v2563_v3 }
 0x879   :  { %v2580_v59 = vmul.f32 %v2564_v43, %v2564_v43  ;;  %v2581_v2 = vmul.f32 %v2565_v40, %v2565_v40  ;;  %v2582_v50 = vmul.f32 %v2566_v1, %v2566_v1  ;;  %v2583_v62 = vmul.f32 %v2567_v25, %v2567_v25 }
 0x87a   :  { %v2584_v55 = vmul.f32 %v2568_v41, %v2568_v41  ;;  %v2585_v53 = vmul.f32 %v2569_v9, %v2569_v9  ;;  %v2572_v63 = vsub.f32 %v8911_v35, %v2563_v3  ;;  %v2586_v30 = vmul.f32 %v2570_v18, %v2570_v18 }
 0x87b   :  { %v2596_v7 = vadd.f32 %v2581_v2, %v2580_v59  ;;  %v2573_v27 = vsub.f32 %v8915_v44, %v2563_v3  ;;  %v2587_v32 = vmul.f32 %v2571_v20, %v2571_v20  ;;  %v2574_v46 = vsub.f32 %v8917_v5, %v2563_v3 }
 0x87c   :  { %v2588_v37 = vmul.f32 %v2572_v63, %v2572_v63  ;;  %v2575_v38 = vsub.f32 %v8920_v11, %v2563_v3  ;;  %v2576_v14 = vsub.f32 %v8923_v61, %v2563_v3  ;;  %v2577_v23 = vsub.f32 %v8927_v16, %v2563_v3 }
 0x87d   :  { %v2597_v39 = vadd.f32 %v2596_v7, %v2582_v50  ;;  %v2589_v6 = vmul.f32 %v2573_v27, %v2573_v27  ;;  %v2590_v45 = vmul.f32 %v2574_v46, %v2574_v46  ;;  %v2578_v21 = vsub.f32 %v8929_v36, %v2563_v3 }
 0x87e   :  { %v2591_v42 = vmul.f32 %v2575_v38, %v2575_v38  ;;  %v2592_v56 = vmul.f32 %v2576_v14, %v2576_v14  ;;  %v2579_v28 = vsub.f32 %v8932_v17, %v2563_v3  ;;  %v2593_v24 = vmul.f32 %v2577_v23, %v2577_v23 }
 0x87f   :  { %v2598_v60 = vadd.f32 %v2597_v39, %v2583_v62  ;;  %v2594_v57 = vmul.f32 %v2578_v21, %v2578_v21  ;;  %v2540_v62 = vld [vmem:[#allocation26] sm:$0x1] }
 0x880   :  { %v2595_v10 = vmul.f32 %v2579_v28, %v2579_v28 }
 0x881   :  { %v2599_v48 = vadd.f32 %v2598_v60, %v2584_v55  ;;  %v2541_v55 = vld [vmem:[#allocation28] sm:$0x1] }
 0x883   :  { %v2600_v54 = vadd.f32 %v2599_v48, %v2585_v53 }
 0x885   :  { %v2601_v8 = vadd.f32 %v2600_v54, %v2586_v30 }
 0x887   :  { %v2602_v47 = vadd.f32 %v2601_v8, %v2587_v32 }
 0x889   :  { %v2603_v31 = vadd.f32 %v2602_v47, %v2588_v37 }
 0x88b   :  { %v2604_v34 = vadd.f32 %v2603_v31, %v2589_v6 }
 0x88d   :  { %v2605_v12 = vadd.f32 %v2604_v34, %v2590_v45 }
 0x88f   :  { %v2606_v51 = vadd.f32 %v2605_v12, %v2591_v42 }
 0x891   :  { %v2607_v26 = vadd.f32 %v2606_v51, %v2592_v56 }
 0x893   :  { %v2608_v0 = vadd.f32 %v2607_v26, %v2593_v24 }
 0x895   :  { %v2609_v43 = vadd.f32 %v2608_v0, %v2594_v57 }
 0x897   :  { %v2610_v40 = vadd.f32 %v2609_v43, %v2595_v10 }
 0x899   :  { %v2611_v1 = vrot.slane %v2610_v40, 4 }
 0x89b   :  { %v2612_v59 = vadd.f32 %v2611_v1, %v2610_v40 }
 0x89d   :  { %v2613_v2 = vrot.slane %v2612_v59, 2 }
 0x89f   :  { %v2614_v25 = vadd.f32 %v2613_v2, %v2612_v59 }
 0x8a1   :  { %v2615_v41 = vrot.slane %v2614_v25, 1 }
 0x8a3   :  { %v2616_v50 = vadd.f32 %v2615_v41, %v2614_v25 }
 0x8a5   :  { %v2617_v7 = vmul.f32 0.0078125, %v2616_v50 }
 0x8a7   :  { %v2618_v9 = vadd.f32 1e-05, %v2617_v7 }
 0x8a9   :  { %6833 = vrsqrt.f32 %v2618_v9 }
 0x8b3   :  { %v6834_v39 = vpop.eup %6833 }
 0x8b4   :  { %v2620_v18 = vmul.f32 %v6834_v39, %v2540_v62 }
 0x8b6   :  { %v2621_v60 = vmul.f32 %v2620_v18, %v2563_v3  ;;  %v2627_v20 = vrot.slane %v2620_v18, %v8703_v15 }
 0x8b8   :  { %v2622_v53 = vsub.f32 %v2541_v55, %v2621_v60  ;;  %v2629_v48 = vmul.f32 %v2627_v20, %v8888_v13  ;;  %v2630_v30 = vmul.f32 %v2627_v20, %v8890_v58  ;;  %v2631_v54 = vmul.f32 %v2627_v20, %v8892_v29  ;;  %v6723_v60 = vld [vmem:[#allocation35] sm:$0xff]  }
 0x8b9   :  { %v2632_v27 = vmul.f32 %v2627_v20, %v8896_v19  ;;  %v2633_v32 = vmul.f32 %v2627_v20, %v8899_v52  ;;  %v2634_v8 = vmul.f32 %v2627_v20, %v8903_v33  ;;  %v2635_v29 = vmul.f32 %v2627_v20, %v8905_v4  ;;  %6429 = vmatprep.subr.bf16.mxu1 %v6723_v60 }
 0x8ba   :  { %v2649_v63 = vrot.slane %v2622_v53, %v8703_v15  ;;  %v2636_v19 = vmul.f32 %v2627_v20, %v8908_v22  ;;  %v2637_v33 = vmul.f32 %v2627_v20, %v8911_v35  ;;  %v2638_v42 = vmul.f32 %v2627_v20, %v8915_v44  ;;  %6430 = vmatpush3.bf16.msra.mxu1 %v6723_v60  ;;  %v6724_v53 = vld [vmem:[#allocation35 + $0x8] sm:$0xff]  }
 0x8bb   :  { %v2639_v22 = vmul.f32 %v2627_v20, %v8917_v5  ;;  %v2640_v0 = vmul.f32 %v2627_v20, %v8920_v11  ;;  %v2642_v35 = vmul.f32 %v2627_v20, %v8927_v16  ;;  %v2641_v44 = vmul.f32 %v2627_v20, %v8923_v61  ;;  %6431 = vmatprep.subr.bf16.mxu1 %v6724_v53 }
 0x8bc   :  { %v2651_v46 = vadd.f32 %v2649_v63, %v2629_v48  ;;  %v2652_v37 = vadd.f32 %v2649_v63, %v2630_v30  ;;  %v2653_v3 = vadd.f32 %v2649_v63, %v2631_v54  ;;  %v2654_v47 = vadd.f32 %v2649_v63, %v2632_v27  ;;  %v6725_v48 = vld [vmem:[#allocation35 + $0x10] sm:$0xff]   ;;  %v6730_v30 = vld [vmem:[#allocation35 + $0x38] sm:$0xff]  }
 0x8bd   :  { %v2655_v38 = vadd.f32 %v2649_v63, %v2633_v32  ;;  %v2656_v6 = vadd.f32 %v2649_v63, %v2634_v8  ;;  %v2657_v12 = vadd.f32 %v2649_v63, %v2635_v29  ;;  %v2658_v21 = vadd.f32 %v2649_v63, %v2636_v19  ;;  %v5729_v27 = vld [vmem:[#allocation31] ss:$0 sm:$0xff] }
 0x8be   :  { %v2667_v31 = vmax.f32 %v2651_v46, 0.0  ;;  %v2668_v13 = vmax.f32 %v2652_v37, 0.0  ;;  %v2669_v14 = vmax.f32 %v2653_v3, 0.0  ;;  %v2670_v45 = vmax.f32 %v2654_v47, 0.0  ;;  %6432 = vmatpush3.bf16.msra.mxu1 %v6724_v53 }
 0x8bf   :  { %v2671_v34 = vmax.f32 %v2655_v38, 0.0  ;;  %v2672_v58 = vmax.f32 %v2656_v6, 0.0  ;;  %v2659_v51 = vadd.f32 %v2649_v63, %v2637_v33  ;;  %v2660_v28 = vadd.f32 %v2649_v63, %v2638_v42  ;;  %6433 = vmatprep.subr.bf16.mxu1 %v6725_v48 }
 0x8c0   :  { %v2700_v23 = vpack.c.bf16 %v2668_v13, %v2667_v31  ;;  %v2701_v52 = vpack.c.bf16 %v2670_v45, %v2669_v14  ;;  %v2673_v24 = vmax.f32 %v2657_v12, 0.0  ;;  %v2674_v26 = vmax.f32 %v2658_v21, 0.0 }
 0x8c1   :  { %v2702_v56 = vpack.c.bf16 %v2672_v58, %v2671_v34  ;;  %v2675_v57 = vmax.f32 %v2659_v51, 0.0  ;;  %v2676_v4 = vmax.f32 %v2660_v28, 0.0  ;;  %v2661_v43 = vadd.f32 %v2649_v63, %v2639_v22 }
 0x8c2   :  { %6413 = vmatprep.mubr.bf16.mxu0 %v2700_v23  ;;  %v2703_v10 = vpack.c.bf16 %v2674_v26, %v2673_v24  ;;  %v2662_v40 = vadd.f32 %v2649_v63, %v2640_v0  ;;  %v2663_v59 = vadd.f32 %v2649_v63, %v2641_v44  ;;  %v2664_v2 = vadd.f32 %v2649_v63, %v2642_v35 }
 0x8c3   :  { %6414 = vmatmul.mubr.bf16.vlgmr.msra.gmra.mrb[80].mxu0 %v2701_v52  ;;  %v2704_v1 = vpack.c.bf16 %v2676_v4, %v2675_v57  ;;  %v2677_v25 = vmax.f32 %v2661_v43, 0.0  ;;  %v2643_v5 = vmul.f32 %v2627_v20, %v8929_v36  ;;  %v2644_v11 = vmul.f32 %v2627_v20, %v8932_v17  ;;  %6434 = vmatpush3.bf16.msra.mxu1 %v6725_v48  ;;  %v6726_v36 = vld [vmem:[#allocation35 + $0x18] sm:$0xff]   ;;  %v6727_v17 = vld [vmem:[#allocation35 + $0x20] sm:$0xff]   ;;  %v6728_v20 = vld [vmem:[#allocation35 + $0x28] sm:$0xff]  }
 0x8c4   :  { %6417 = vmatprep.mubr.bf16.mxu0 %v2702_v56  ;;  %v2678_v41 = vmax.f32 %v2662_v40, 0.0  ;;  %v2679_v50 = vmax.f32 %v2663_v59, 0.0  ;;  %v2680_v7 = vmax.f32 %v2664_v2, 0.0  ;;  %6435 = vmatprep.subr.bf16.mxu1 %v6726_v36 }
 0x8c5   :  { %v2665_v16 = vadd.f32 %v2649_v63, %v2643_v5  ;;  %v2666_v62 = vadd.f32 %v2649_v63, %v2644_v11  ;;  %v6729_v63 = vld [vmem:[#allocation35 + $0x30] sm:$0xff]  }
 0x8c6   :  { %v2705_v9 = vpack.c.bf16 %v2678_v41, %v2677_v25  ;;  %v2706_v61 = vpack.c.bf16 %v2680_v7, %v2679_v50 }
 0x8c7   :  { %v2681_v39 = vmax.f32 %v2665_v16, 0.0  ;;  %v2682_v18 = vmax.f32 %v2666_v62, 0.0  ;;  %6436 = vmatpush3.bf16.msra.mxu1 %v6726_v36 }
 0x8c8   :  { %6437 = vmatprep.subr.bf16.mxu1 %v6727_v17 }
 0x8c9   :  { %v2707_v55 = vpack.c.bf16 %v2682_v18, %v2681_v39 }
 0x8cb   :  { %6418 = vmatmul.mubr.bf16.gmra.mrb[84].mxu0 %v2703_v10  ;;  %6438 = vmatpush3.bf16.msra.mxu1 %v6727_v17 }
 0x8cc   :  { %6421 = vmatprep.mubr.bf16.mxu0 %v2704_v1  ;;  %6439 = vmatprep.subr.bf16.mxu1 %v6728_v20 }
 0x8cf   :  { %6440 = vmatpush3.bf16.msra.mxu1 %v6728_v20 }
 0x8d0   :  { %6441 = vmatprep.subr.bf16.mxu1 %v6729_v63 }
 0x8d3   :  { %6422 = vmatmul.mubr.bf16.gmra.mrb[88].mxu0 %v2705_v9  ;;  %6442 = vmatpush3.bf16.msra.mxu1 %v6729_v63 }
 0x8d4   :  { %6425 = vmatprep.mubr.bf16.mxu0 %v2706_v61  ;;  %6443 = vmatprep.subr.bf16.mxu1 %v6730_v30 }
 0x8d7   :  { %6444 = vmatpush3.bf16.msra.mxu1 %v6730_v30 }
 0x8db   :  { %6426 = vmatmul.mubr.bf16.gmra.mrb[92].mxu0 %v2707_v55 }
 0x996   :  { %v6415_v54 = vpop.f32.mrb[80].mxu0 }
 0x997   :  { %v2796_v32 = vpop.f32.mrb[81].mxu0  ;;  %v8974_v47 = vadd.f32 %v6415_v54, %v5729_v27 }
 0x998   :  { %v6416_v8 = vpop.f32.mrb[82].mxu0  ;;  %v8970_v37 = vadd.f32 %v5729_v27, %v2796_v32 }
 0x999   :  { %v2799_v46 = vpop.f32.mrb[83].mxu0  ;;  %v8978_v6 = vadd.f32 %v6416_v8, %v5729_v27 }
 0x99a   :  { %v8972_v3 = vadd.f32 %v5729_v27, %v2799_v46 }
 0x99c   :  { %v2861_v38 = vadd.f32 %v8972_v3, %v8970_v37 }
 0x99e   :  { %v2862_v31 = vadd.f32 %v2861_v38, %v8974_v47  ;;  %v6419_v13 = vpop.f32.mrb[84].mxu0 }
 0x99f   :  { %v2812_v14 = vpop.f32.mrb[85].mxu0  ;;  %v8987_v52 = vadd.f32 %v6419_v13, %v5729_v27 }
 0x9a0   :  { %v8981_v45 = vadd.f32 %v5729_v27, %v2812_v14  ;;  %v2863_v34 = vadd.f32 %v2862_v31, %v8978_v6  ;;  %v6420_v58 = vpop.f32.mrb[86].mxu0 }
 0x9a1   :  { %v2815_v29 = vpop.f32.mrb[87].mxu0  ;;  %v8990_v42 = vadd.f32 %v6420_v58, %v5729_v27 }
 0x9a2   :  { %v2864_v19 = vadd.f32 %v2863_v34, %v8981_v45  ;;  %v8985_v23 = vadd.f32 %v5729_v27, %v2815_v29 }
 0x9a4   :  { %v2865_v33 = vadd.f32 %v2864_v19, %v8985_v23 }
 0x9a6   :  { %v2866_v12 = vadd.f32 %v2865_v33, %v8987_v52  ;;  %v6423_v21 = vpop.f32.mrb[88].mxu0 }
 0x9a7   :  { %v2828_v56 = vpop.f32.mrb[89].mxu0  ;;  %v8999_v22 = vadd.f32 %v6423_v21, %v5729_v27 }
 0x9a8   :  { %v8993_v51 = vadd.f32 %v5729_v27, %v2828_v56  ;;  %v2867_v28 = vadd.f32 %v2866_v12, %v8990_v42  ;;  %v6424_v24 = vpop.f32.mrb[90].mxu0 }
 0x9a9   :  { %v2831_v26 = vpop.f32.mrb[91].mxu0  ;;  %v9002_v35 = vadd.f32 %v6424_v24, %v5729_v27 }
 0x9aa   :  { %v2868_v57 = vadd.f32 %v2867_v28, %v8993_v51  ;;  %v8997_v4 = vadd.f32 %v5729_v27, %v2831_v26 }
 0x9ac   :  { %v2869_v0 = vadd.f32 %v2868_v57, %v8997_v4 }
 0x9ae   :  { %v2870_v44 = vadd.f32 %v2869_v0, %v8999_v22  ;;  %v6427_v10 = vpop.f32.mrb[92].mxu0 }
 0x9af   :  { %v2844_v43 = vpop.f32.mrb[93].mxu0  ;;  %v9011_v50 = vadd.f32 %v6427_v10, %v5729_v27 }
 0x9b0   :  { %v9005_v40 = vadd.f32 %v5729_v27, %v2844_v43  ;;  %v2871_v1 = vadd.f32 %v2870_v44, %v9002_v35  ;;  %v6428_v59 = vpop.f32.mrb[94].mxu0 }
 0x9b1   :  { %v2847_v2 = vpop.f32.mrb[95].mxu0  ;;  %v9014_v5 = vadd.f32 %v6428_v59, %v5729_v27 }
 0x9b2   :  { %v2872_v25 = vadd.f32 %v2871_v1, %v9005_v40  ;;  %v9009_v41 = vadd.f32 %v5729_v27, %v2847_v2 }
 0x9b4   :  { %v2873_v7 = vadd.f32 %v2872_v25, %v9009_v41 }
 0x9b6   :  { %v2874_v11 = vadd.f32 %v2873_v7, %v9011_v50 }
 0x9b8   :  { %v2875_v9 = vadd.f32 %v2874_v11, %v9014_v5 }
 0x9ba   :  { %v2876_v16 = vrot.slane %v2875_v9, 4 }
 0x9bc   :  { %v2877_v62 = vadd.f32 %v2876_v16, %v2875_v9 }
 0x9be   :  { %v2878_v61 = vrot.slane %v2877_v62, 2 }
 0x9c0   :  { %v2879_v39 = vadd.f32 %v2878_v61, %v2877_v62 }
 0x9c2   :  { %v2880_v18 = vrot.slane %v2879_v39, 1 }
 0x9c4   :  { %v2881_v55 = vadd.f32 %v2880_v18, %v2879_v39 }
 0x9c6   :  { %v2882_v60 = vmul.f32 0.0078125, %v2881_v55 }
 0x9c8   :  { %v2883_v53 = vsub.f32 %v8970_v37, %v2882_v60  ;;  %v2884_v48 = vsub.f32 %v8972_v3, %v2882_v60  ;;  %v2885_v36 = vsub.f32 %v8974_v47, %v2882_v60  ;;  %v2886_v63 = vsub.f32 %v8978_v6, %v2882_v60 }
 0x9c9   :  { %v2887_v30 = vsub.f32 %v8981_v45, %v2882_v60  ;;  %v2888_v32 = vsub.f32 %v8985_v23, %v2882_v60  ;;  %v2889_v38 = vsub.f32 %v8987_v52, %v2882_v60  ;;  %v2890_v14 = vsub.f32 %v8990_v42, %v2882_v60 }
 0x9ca   :  { %v2899_v17 = vmul.f32 %v2883_v53, %v2883_v53  ;;  %v2900_v20 = vmul.f32 %v2884_v48, %v2884_v48  ;;  %v2901_v54 = vmul.f32 %v2885_v36, %v2885_v36  ;;  %v2902_v8 = vmul.f32 %v2886_v63, %v2886_v63 }
 0x9cb   :  { %v2903_v31 = vmul.f32 %v2887_v30, %v2887_v30  ;;  %v2904_v34 = vmul.f32 %v2888_v32, %v2888_v32  ;;  %v2891_v29 = vsub.f32 %v8993_v51, %v2882_v60  ;;  %v2905_v19 = vmul.f32 %v2889_v38, %v2889_v38 }
 0x9cc   :  { %v2915_v27 = vadd.f32 %v2900_v20, %v2899_v17  ;;  %v2892_v12 = vsub.f32 %v8997_v4, %v2882_v60  ;;  %v2906_v21 = vmul.f32 %v2890_v14, %v2890_v14  ;;  %v2893_v28 = vsub.f32 %v8999_v22, %v2882_v60 }
 0x9cd   :  { %v2907_v24 = vmul.f32 %v2891_v29, %v2891_v29  ;;  %v2894_v57 = vsub.f32 %v9002_v35, %v2882_v60  ;;  %v2895_v10 = vsub.f32 %v9005_v40, %v2882_v60  ;;  %v2896_v59 = vsub.f32 %v9009_v41, %v2882_v60 }
 0x9ce   :  { %v2916_v46 = vadd.f32 %v2915_v27, %v2901_v54  ;;  %v2908_v0 = vmul.f32 %v2892_v12, %v2892_v12  ;;  %v2909_v43 = vmul.f32 %v2893_v28, %v2893_v28  ;;  %v2897_v7 = vsub.f32 %v9011_v50, %v2882_v60 }
 0x9cf   :  { %v2910_v2 = vmul.f32 %v2894_v57, %v2894_v57  ;;  %v2911_v11 = vmul.f32 %v2895_v10, %v2895_v10  ;;  %v2898_v16 = vsub.f32 %v9014_v5, %v2882_v60  ;;  %v2912_v62 = vmul.f32 %v2896_v59, %v2896_v59 }
 0x9d0   :  { %v2917_v13 = vadd.f32 %v2916_v46, %v2902_v8  ;;  %v2913_v39 = vmul.f32 %v2897_v7, %v2897_v7  ;;  %v2859_v8 = vld [vmem:[#allocation32] sm:$0x1] }
 0x9d1   :  { %v2914_v55 = vmul.f32 %v2898_v16, %v2898_v16 }
 0x9d2   :  { %v2918_v58 = vadd.f32 %v2917_v13, %v2903_v31  ;;  %v2860_v31 = vld [vmem:[#allocation34] sm:$0x1] }
 0x9d4   :  { %v2919_v33 = vadd.f32 %v2918_v58, %v2904_v34 }
 0x9d6   :  { %v2920_v56 = vadd.f32 %v2919_v33, %v2905_v19 }
 0x9d8   :  { %v2921_v26 = vadd.f32 %v2920_v56, %v2906_v21 }
 0x9da   :  { %v2922_v44 = vadd.f32 %v2921_v26, %v2907_v24 }
 0x9dc   :  { %v2923_v1 = vadd.f32 %v2922_v44, %v2908_v0 }
 0x9de   :  { %v2924_v25 = vadd.f32 %v2923_v1, %v2909_v43 }
 0x9e0   :  { %v2925_v9 = vadd.f32 %v2924_v25, %v2910_v2 }
 0x9e2   :  { %v2926_v61 = vadd.f32 %v2925_v9, %v2911_v11 }
 0x9e4   :  { %v2927_v18 = vadd.f32 %v2926_v61, %v2912_v62 }
 0x9e6   :  { %v2928_v53 = vadd.f32 %v2927_v18, %v2913_v39 }
 0x9e8   :  { %v2929_v48 = vadd.f32 %v2928_v53, %v2914_v55 }
 0x9ea   :  { %v2930_v36 = vrot.slane %v2929_v48, 4 }
 0x9ec   :  { %v2931_v17 = vadd.f32 %v2930_v36, %v2929_v48 }
 0x9ee   :  { %v2932_v20 = vrot.slane %v2931_v17, 2 }
 0x9f0   :  { %v2933_v63 = vadd.f32 %v2932_v20, %v2931_v17 }
 0x9f2   :  { %v2934_v30 = vrot.slane %v2933_v63, 1 }
 0x9f4   :  { %v2935_v54 = vadd.f32 %v2934_v30, %v2933_v63 }
 0x9f6   :  { %v2936_v27 = vmul.f32 0.0078125, %v2935_v54 }
 0x9f8   :  { %v2937_v32 = vadd.f32 1e-05, %v2936_v27 }
 0x9fa   :  { %6835 = vrsqrt.f32 %v2937_v32 }
 0xa04   :  { %v6836_v46 = vpop.eup %6835 }
 0xa05   :  { %v2939_v38 = vmul.f32 %v6836_v46, %v2859_v8 }
 0xa07   :  { %v2940_v13 = vmul.f32 %v2939_v38, %v2882_v60  ;;  %v2946_v14 = vrot.slane %v2939_v38, %v8703_v15 }
 0xa09   :  { %v2941_v34 = vsub.f32 %v2860_v31, %v2940_v13  ;;  %v2948_v58 = vmul.f32 %v2946_v14, %v8970_v37  ;;  %v2949_v19 = vmul.f32 %v2946_v14, %v8972_v3  ;;  %v2950_v33 = vmul.f32 %v2946_v14, %v8974_v47  ;;  %v6731_v13 = vld [vmem:[#allocation41] sm:$0xff]  }
 0xa0a   :  { %v2951_v12 = vmul.f32 %v2946_v14, %v8978_v6  ;;  %v2952_v21 = vmul.f32 %v2946_v14, %v8981_v45  ;;  %v2953_v56 = vmul.f32 %v2946_v14, %v8985_v23  ;;  %v2954_v47 = vmul.f32 %v2946_v14, %v8987_v52  ;;  %6461 = vmatprep.subr.bf16.mxu0 %v6731_v13 }
 0xa0b   :  { %v2968_v29 = vrot.slane %v2941_v34, %v8703_v15  ;;  %v2955_v6 = vmul.f32 %v2946_v14, %v8990_v42  ;;  %v2956_v23 = vmul.f32 %v2946_v14, %v8993_v51  ;;  %v2957_v2 = vmul.f32 %v2946_v14, %v8997_v4  ;;  %6462 = vmatpush3.bf16.msra.mxu0 %v6731_v13  ;;  %v6732_v34 = vld [vmem:[#allocation41 + $0x8] sm:$0xff]  }
 0xa0c   :  { %v2958_v42 = vmul.f32 %v2946_v14, %v8999_v22  ;;  %v2959_v18 = vmul.f32 %v2946_v14, %v9002_v35  ;;  %v2961_v51 = vmul.f32 %v2946_v14, %v9009_v41  ;;  %v2960_v4 = vmul.f32 %v2946_v14, %v9005_v40  ;;  %6463 = vmatprep.subr.bf16.mxu0 %v6732_v34 }
 0xa0d   :  { %v2970_v28 = vadd.f32 %v2968_v29, %v2948_v58  ;;  %v2971_v24 = vadd.f32 %v2968_v29, %v2949_v19  ;;  %v2972_v60 = vadd.f32 %v2968_v29, %v2950_v33  ;;  %v2973_v26 = vadd.f32 %v2968_v29, %v2951_v12  ;;  %v6733_v58 = vld [vmem:[#allocation41 + $0x10] sm:$0xff]   ;;  %v6738_v19 = vld [vmem:[#allocation41 + $0x38] sm:$0xff]  }
 0xa0e   :  { %v2974_v57 = vadd.f32 %v2968_v29, %v2952_v21  ;;  %v2975_v0 = vadd.f32 %v2968_v29, %v2953_v56  ;;  %v2976_v25 = vadd.f32 %v2968_v29, %v2954_v47  ;;  %v2977_v7 = vadd.f32 %v2968_v29, %v2955_v6  ;;  %v5738_v12 = vld [vmem:[#allocation37] ss:$0 sm:$0xff] }
 0xa0f   :  { %v2986_v44 = vmax.f32 %v2970_v28, 0.0  ;;  %v2987_v37 = vmax.f32 %v2971_v24, 0.0  ;;  %v2988_v10 = vmax.f32 %v2972_v60, 0.0  ;;  %v2989_v43 = vmax.f32 %v2973_v26, 0.0  ;;  %6464 = vmatpush3.bf16.msra.mxu0 %v6732_v34 }
 0xa10   :  { %v2990_v1 = vmax.f32 %v2974_v57, 0.0  ;;  %v2991_v3 = vmax.f32 %v2975_v0, 0.0  ;;  %v2978_v9 = vadd.f32 %v2968_v29, %v2956_v23  ;;  %v2979_v16 = vadd.f32 %v2968_v29, %v2957_v2  ;;  %6465 = vmatprep.subr.bf16.mxu0 %v6733_v58 }
 0xa11   :  { %v3019_v59 = vpack.c.bf16 %v2987_v37, %v2986_v44  ;;  %v3020_v45 = vpack.c.bf16 %v2989_v43, %v2988_v10  ;;  %v2992_v62 = vmax.f32 %v2976_v25, 0.0  ;;  %v2993_v61 = vmax.f32 %v2977_v7, 0.0 }
 0xa12   :  { %v3021_v11 = vpack.c.bf16 %v2991_v3, %v2990_v1  ;;  %v2994_v39 = vmax.f32 %v2978_v9, 0.0  ;;  %v2995_v52 = vmax.f32 %v2979_v16, 0.0  ;;  %v2980_v53 = vadd.f32 %v2968_v29, %v2958_v42 }
 0xa13   :  { %6445 = vmatprep.mubr.bf16.mxu1 %v3019_v59  ;;  %v3022_v55 = vpack.c.bf16 %v2993_v61, %v2992_v62  ;;  %v2981_v48 = vadd.f32 %v2968_v29, %v2959_v18  ;;  %v2982_v17 = vadd.f32 %v2968_v29, %v2960_v4  ;;  %v2983_v20 = vadd.f32 %v2968_v29, %v2961_v51 }
 0xa14   :  { %6446 = vmatmul.mubr.bf16.vlgmr.msra.gmra.mrb[80].mxu1 %v3020_v45  ;;  %v3023_v36 = vpack.c.bf16 %v2995_v52, %v2994_v39  ;;  %v2996_v63 = vmax.f32 %v2980_v53, 0.0  ;;  %v2962_v22 = vmul.f32 %v2946_v14, %v9011_v50  ;;  %v2963_v35 = vmul.f32 %v2946_v14, %v9014_v5  ;;  %6466 = vmatpush3.bf16.msra.mxu0 %v6733_v58  ;;  %v6734_v50 = vld [vmem:[#allocation41 + $0x18] sm:$0xff]   ;;  %v6735_v5 = vld [vmem:[#allocation41 + $0x20] sm:$0xff]   ;;  %v6736_v14 = vld [vmem:[#allocation41 + $0x28] sm:$0xff]  }
 0xa15   :  { %6449 = vmatprep.mubr.bf16.mxu1 %v3021_v11  ;;  %v2997_v30 = vmax.f32 %v2981_v48, 0.0  ;;  %v2998_v54 = vmax.f32 %v2982_v17, 0.0  ;;  %v2999_v27 = vmax.f32 %v2983_v20, 0.0  ;;  %6467 = vmatprep.subr.bf16.mxu0 %v6734_v50 }
 0xa16   :  { %v2984_v41 = vadd.f32 %v2968_v29, %v2962_v22  ;;  %v2985_v8 = vadd.f32 %v2968_v29, %v2963_v35  ;;  %v6737_v29 = vld [vmem:[#allocation41 + $0x30] sm:$0xff]  }
 0xa17   :  { %v3024_v32 = vpack.c.bf16 %v2997_v30, %v2996_v63  ;;  %v3025_v40 = vpack.c.bf16 %v2999_v27, %v2998_v54 }
 0xa18   :  { %v3000_v46 = vmax.f32 %v2984_v41, 0.0  ;;  %v3001_v38 = vmax.f32 %v2985_v8, 0.0  ;;  %6468 = vmatpush3.bf16.msra.mxu0 %v6734_v50 }
 0xa19   :  { %6469 = vmatprep.subr.bf16.mxu0 %v6735_v5 }
 0xa1a   :  { %v3026_v31 = vpack.c.bf16 %v3001_v38, %v3000_v46 }
 0xa1c   :  { %6450 = vmatmul.mubr.bf16.gmra.mrb[84].mxu1 %v3022_v55  ;;  %6470 = vmatpush3.bf16.msra.mxu0 %v6735_v5 }
 0xa1d   :  { %6453 = vmatprep.mubr.bf16.mxu1 %v3023_v36  ;;  %6471 = vmatprep.subr.bf16.mxu0 %v6736_v14 }
 0xa20   :  { %6472 = vmatpush3.bf16.msra.mxu0 %v6736_v14 }
 0xa21   :  { %6473 = vmatprep.subr.bf16.mxu0 %v6737_v29 }
 0xa24   :  { %6454 = vmatmul.mubr.bf16.gmra.mrb[88].mxu1 %v3024_v32  ;;  %6474 = vmatpush3.bf16.msra.mxu0 %v6737_v29 }
 0xa25   :  { %6457 = vmatprep.mubr.bf16.mxu1 %v3025_v40  ;;  %6475 = vmatprep.subr.bf16.mxu0 %v6738_v19 }
 0xa28   :  { %6476 = vmatpush3.bf16.msra.mxu0 %v6738_v19 }
 0xa2c   :  { %6458 = vmatmul.mubr.bf16.gmra.mrb[92].mxu1 %v3026_v31 }
 0xae7   :  { %v6447_v33 = vpop.f32.mrb[80].mxu1 }
 0xae8   :  { %v3115_v21 = vpop.f32.mrb[81].mxu1  ;;  %v9056_v26 = vadd.f32 %v6447_v33, %v5738_v12 }
 0xae9   :  { %v6448_v56 = vpop.f32.mrb[82].mxu1  ;;  %v9052_v24 = vadd.f32 %v5738_v12, %v3115_v21 }
 0xaea   :  { %v3118_v28 = vpop.f32.mrb[83].mxu1  ;;  %v9060_v0 = vadd.f32 %v6448_v56, %v5738_v12 }
 0xaeb   :  { %v9054_v60 = vadd.f32 %v5738_v12, %v3118_v28 }
 0xaed   :  { %v3180_v57 = vadd.f32 %v9054_v60, %v9052_v24 }
 0xaef   :  { %v3181_v44 = vadd.f32 %v3180_v57, %v9056_v26  ;;  %v6451_v37 = vpop.f32.mrb[84].mxu1 }
 0xaf0   :  { %v3131_v10 = vpop.f32.mrb[85].mxu1  ;;  %v9069_v45 = vadd.f32 %v6451_v37, %v5738_v12 }
 0xaf1   :  { %v9063_v43 = vadd.f32 %v5738_v12, %v3131_v10  ;;  %v3182_v1 = vadd.f32 %v3181_v44, %v9060_v0  ;;  %v6452_v3 = vpop.f32.mrb[86].mxu1 }
 0xaf2   :  { %v3134_v47 = vpop.f32.mrb[87].mxu1  ;;  %v9072_v2 = vadd.f32 %v6452_v3, %v5738_v12 }
 0xaf3   :  { %v3183_v6 = vadd.f32 %v3182_v1, %v9063_v43  ;;  %v9067_v59 = vadd.f32 %v5738_v12, %v3134_v47 }
 0xaf5   :  { %v3184_v23 = vadd.f32 %v3183_v6, %v9067_v59 }
 0xaf7   :  { %v3185_v25 = vadd.f32 %v3184_v23, %v9069_v45  ;;  %v6455_v7 = vpop.f32.mrb[88].mxu1 }
 0xaf8   :  { %v3147_v11 = vpop.f32.mrb[89].mxu1  ;;  %v9081_v42 = vadd.f32 %v6455_v7, %v5738_v12 }
 0xaf9   :  { %v9075_v9 = vadd.f32 %v5738_v12, %v3147_v11  ;;  %v3186_v16 = vadd.f32 %v3185_v25, %v9072_v2  ;;  %v6456_v62 = vpop.f32.mrb[90].mxu1 }
 0xafa   :  { %v3150_v61 = vpop.f32.mrb[91].mxu1  ;;  %v9084_v51 = vadd.f32 %v6456_v62, %v5738_v12 }
 0xafb   :  { %v3187_v39 = vadd.f32 %v3186_v16, %v9075_v9  ;;  %v9079_v52 = vadd.f32 %v5738_v12, %v3150_v61 }
 0xafd   :  { %v3188_v18 = vadd.f32 %v3187_v39, %v9079_v52 }
 0xaff   :  { %v3189_v4 = vadd.f32 %v3188_v18, %v9081_v42  ;;  %v6459_v55 = vpop.f32.mrb[92].mxu1 }
 0xb00   :  { %v3163_v53 = vpop.f32.mrb[93].mxu1  ;;  %v9093_v54 = vadd.f32 %v6459_v55, %v5738_v12 }
 0xb01   :  { %v9087_v48 = vadd.f32 %v5738_v12, %v3163_v53  ;;  %v3190_v36 = vadd.f32 %v3189_v4, %v9084_v51  ;;  %v6460_v17 = vpop.f32.mrb[94].mxu1 }
 0xb02   :  { %v3166_v20 = vpop.f32.mrb[95].mxu1  ;;  %v9096_v22 = vadd.f32 %v6460_v17, %v5738_v12 }
 0xb03   :  { %v3191_v63 = vadd.f32 %v3190_v36, %v9087_v48  ;;  %v9091_v30 = vadd.f32 %v5738_v12, %v3166_v20 }
 0xb05   :  { %v3192_v27 = vadd.f32 %v3191_v63, %v9091_v30 }
 0xb07   :  { %v3193_v35 = vadd.f32 %v3192_v27, %v9093_v54 }
 0xb09   :  { %v3194_v32 = vadd.f32 %v3193_v35, %v9096_v22 }
 0xb0b   :  { %v3195_v41 = vrot.slane %v3194_v32, 4 }
 0xb0d   :  { %v3196_v8 = vadd.f32 %v3195_v41, %v3194_v32 }
 0xb0f   :  { %v3197_v40 = vrot.slane %v3196_v8, 2 }
 0xb11   :  { %v3198_v46 = vadd.f32 %v3197_v40, %v3196_v8 }
 0xb13   :  { %v3199_v38 = vrot.slane %v3198_v46, 1 }
 0xb15   :  { %v3200_v31 = vadd.f32 %v3199_v38, %v3198_v46 }
 0xb17   :  { %v3201_v13 = vmul.f32 0.0078125, %v3200_v31 }
 0xb19   :  { %v3202_v34 = vsub.f32 %v9052_v24, %v3201_v13  ;;  %v3203_v58 = vsub.f32 %v9054_v60, %v3201_v13  ;;  %v3204_v50 = vsub.f32 %v9056_v26, %v3201_v13  ;;  %v3205_v29 = vsub.f32 %v9060_v0, %v3201_v13 }
 0xb1a   :  { %v3206_v19 = vsub.f32 %v9063_v43, %v3201_v13  ;;  %v3207_v21 = vsub.f32 %v9067_v59, %v3201_v13  ;;  %v3208_v57 = vsub.f32 %v9069_v45, %v3201_v13  ;;  %v3209_v10 = vsub.f32 %v9072_v2, %v3201_v13 }
 0xb1b   :  { %v3218_v5 = vmul.f32 %v3202_v34, %v3202_v34  ;;  %v3219_v14 = vmul.f32 %v3203_v58, %v3203_v58  ;;  %v3220_v33 = vmul.f32 %v3204_v50, %v3204_v50  ;;  %v3221_v56 = vmul.f32 %v3205_v29, %v3205_v29 }
 0xb1c   :  { %v3222_v44 = vmul.f32 %v3206_v19, %v3206_v19  ;;  %v3223_v1 = vmul.f32 %v3207_v21, %v3207_v21  ;;  %v3210_v47 = vsub.f32 %v9075_v9, %v3201_v13  ;;  %v3224_v6 = vmul.f32 %v3208_v57, %v3208_v57 }
 0xb1d   :  { %v3234_v12 = vadd.f32 %v3219_v14, %v3218_v5  ;;  %v3211_v25 = vsub.f32 %v9079_v52, %v3201_v13  ;;  %v3225_v7 = vmul.f32 %v3209_v10, %v3209_v10  ;;  %v3212_v16 = vsub.f32 %v9081_v42, %v3201_v13 }
 0xb1e   :  { %v3226_v62 = vmul.f32 %v3210_v47, %v3210_v47  ;;  %v3213_v39 = vsub.f32 %v9084_v51, %v3201_v13  ;;  %v3214_v55 = vsub.f32 %v9087_v48, %v3201_v13  ;;  %v3215_v17 = vsub.f32 %v9091_v30, %v3201_v13 }
 0xb1f   :  { %v3235_v28 = vadd.f32 %v3234_v12, %v3220_v33  ;;  %v3227_v18 = vmul.f32 %v3211_v25, %v3211_v25  ;;  %v3228_v53 = vmul.f32 %v3212_v16, %v3212_v16  ;;  %v3216_v27 = vsub.f32 %v9093_v54, %v3201_v13 }
 0xb20   :  { %v3229_v20 = vmul.f32 %v3213_v39, %v3213_v39  ;;  %v3230_v35 = vmul.f32 %v3214_v55, %v3214_v55  ;;  %v3217_v41 = vsub.f32 %v9096_v22, %v3201_v13  ;;  %v3231_v8 = vmul.f32 %v3215_v17, %v3215_v17 }
 0xb21   :  { %v3236_v37 = vadd.f32 %v3235_v28, %v3221_v56  ;;  %v3232_v46 = vmul.f32 %v3216_v27, %v3216_v27  ;;  %v3178_v56 = vld [vmem:[#allocation38] sm:$0x1] }
 0xb22   :  { %v3233_v31 = vmul.f32 %v3217_v41, %v3217_v41 }
 0xb23   :  { %v3237_v3 = vadd.f32 %v3236_v37, %v3222_v44  ;;  %v3179_v44 = vld [vmem:[#allocation40] sm:$0x1] }
 0xb25   :  { %v3238_v23 = vadd.f32 %v3237_v3, %v3223_v1 }
 0xb27   :  { %v3239_v11 = vadd.f32 %v3238_v23, %v3224_v6 }
 0xb29   :  { %v3240_v61 = vadd.f32 %v3239_v11, %v3225_v7 }
 0xb2b   :  { %v3241_v4 = vadd.f32 %v3240_v61, %v3226_v62 }
 0xb2d   :  { %v3242_v36 = vadd.f32 %v3241_v4, %v3227_v18 }
 0xb2f   :  { %v3243_v63 = vadd.f32 %v3242_v36, %v3228_v53 }
 0xb31   :  { %v3244_v32 = vadd.f32 %v3243_v63, %v3229_v20 }
 0xb33   :  { %v3245_v40 = vadd.f32 %v3244_v32, %v3230_v35 }
 0xb35   :  { %v3246_v38 = vadd.f32 %v3245_v40, %v3231_v8 }
 0xb37   :  { %v3247_v34 = vadd.f32 %v3246_v38, %v3232_v46 }
 0xb39   :  { %v3248_v58 = vadd.f32 %v3247_v34, %v3233_v31 }
 0xb3b   :  { %v3249_v50 = vrot.slane %v3248_v58, 4 }
 0xb3d   :  { %v3250_v5 = vadd.f32 %v3249_v50, %v3248_v58 }
 0xb3f   :  { %v3251_v14 = vrot.slane %v3250_v5, 2 }
 0xb41   :  { %v3252_v29 = vadd.f32 %v3251_v14, %v3250_v5 }
 0xb43   :  { %v3253_v19 = vrot.slane %v3252_v29, 1 }
 0xb45   :  { %v3254_v33 = vadd.f32 %v3253_v19, %v3252_v29 }
 0xb47   :  { %v3255_v12 = vmul.f32 0.0078125, %v3254_v33 }
 0xb49   :  { %v3256_v21 = vadd.f32 1e-05, %v3255_v12 }
 0xb4b   :  { %6837 = vrsqrt.f32 %v3256_v21 }
 0xb55   :  { %v6838_v28 = vpop.eup %6837 }
 0xb56   :  { %v3258_v57 = vmul.f32 %v6838_v28, %v3178_v56 }
 0xb58   :  { %v3259_v37 = vmul.f32 %v3258_v57, %v3201_v13  ;;  %v3265_v10 = vrot.slane %v3258_v57, %v8703_v15 }
 0xb5a   :  { %v3260_v1 = vsub.f32 %v3179_v44, %v3259_v37  ;;  %v3267_v3 = vmul.f32 %v3265_v10, %v9052_v24  ;;  %v3268_v6 = vmul.f32 %v3265_v10, %v9054_v60  ;;  %v3269_v23 = vmul.f32 %v3265_v10, %v9056_v26  ;;  %v6739_v37 = vld [vmem:[#allocation47] sm:$0xff]  }
 0xb5b   :  { %v3270_v25 = vmul.f32 %v3265_v10, %v9060_v0  ;;  %v3271_v7 = vmul.f32 %v3265_v10, %v9063_v43  ;;  %v3272_v11 = vmul.f32 %v3265_v10, %v9067_v59  ;;  %v3273_v26 = vmul.f32 %v3265_v10, %v9069_v45  ;;  %6493 = vmatprep.subr.bf16.mxu1 %v6739_v37 }
 0xb5c   :  { %v3287_v47 = vrot.slane %v3260_v1, %v8703_v15  ;;  %v3274_v0 = vmul.f32 %v3265_v10, %v9072_v2  ;;  %v3275_v59 = vmul.f32 %v3265_v10, %v9075_v9  ;;  %v3276_v20 = vmul.f32 %v3265_v10, %v9079_v52  ;;  %6494 = vmatpush3.bf16.msra.mxu1 %v6739_v37  ;;  %v6740_v1 = vld [vmem:[#allocation47 + $0x8] sm:$0xff]  }
 0xb5d   :  { %v3277_v2 = vmul.f32 %v3265_v10, %v9081_v42  ;;  %v3278_v38 = vmul.f32 %v3265_v10, %v9084_v51  ;;  %v3280_v9 = vmul.f32 %v3265_v10, %v9091_v30  ;;  %v3279_v52 = vmul.f32 %v3265_v10, %v9087_v48  ;;  %6495 = vmatprep.subr.bf16.mxu1 %v6740_v1 }
 0xb5e   :  { %v3289_v16 = vadd.f32 %v3287_v47, %v3267_v3  ;;  %v3290_v62 = vadd.f32 %v3287_v47, %v3268_v6  ;;  %v3291_v13 = vadd.f32 %v3287_v47, %v3269_v23  ;;  %v3292_v61 = vadd.f32 %v3287_v47, %v3270_v25  ;;  %v6741_v3 = vld [vmem:[#allocation47 + $0x10] sm:$0xff]   ;;  %v6746_v6 = vld [vmem:[#allocation47 + $0x38] sm:$0xff]  }
 0xb5f   :  { %v3293_v39 = vadd.f32 %v3287_v47, %v3271_v7  ;;  %v3294_v18 = vadd.f32 %v3287_v47, %v3272_v11  ;;  %v3295_v63 = vadd.f32 %v3287_v47, %v3273_v26  ;;  %v3296_v27 = vadd.f32 %v3287_v47, %v3274_v0  ;;  %v5747_v25 = vld [vmem:[#allocation43] ss:$0 sm:$0xff] }
 0xb60   :  { %v3305_v4 = vmax.f32 %v3289_v16, 0.0  ;;  %v3306_v24 = vmax.f32 %v3290_v62, 0.0  ;;  %v3307_v55 = vmax.f32 %v3291_v13, 0.0  ;;  %v3308_v53 = vmax.f32 %v3292_v61, 0.0  ;;  %6496 = vmatpush3.bf16.msra.mxu1 %v6740_v1 }
 0xb61   :  { %v3309_v36 = vmax.f32 %v3293_v39, 0.0  ;;  %v3310_v60 = vmax.f32 %v3294_v18, 0.0  ;;  %v3297_v32 = vadd.f32 %v3287_v47, %v3275_v59  ;;  %v3298_v41 = vadd.f32 %v3287_v47, %v3276_v20  ;;  %6497 = vmatprep.subr.bf16.mxu1 %v6741_v3 }
 0xb62   :  { %v3338_v17 = vpack.c.bf16 %v3306_v24, %v3305_v4  ;;  %v3339_v43 = vpack.c.bf16 %v3308_v53, %v3307_v55  ;;  %v3311_v8 = vmax.f32 %v3295_v63, 0.0  ;;  %v3312_v40 = vmax.f32 %v3296_v27, 0.0 }
 0xb63   :  { %v3340_v35 = vpack.c.bf16 %v3310_v60, %v3309_v36  ;;  %v3313_v46 = vmax.f32 %v3297_v32, 0.0  ;;  %v3314_v45 = vmax.f32 %v3298_v41, 0.0  ;;  %v3299_v34 = vadd.f32 %v3287_v47, %v3277_v2 }
 0xb64   :  { %6477 = vmatprep.mubr.bf16.mxu0 %v3338_v17  ;;  %v3341_v31 = vpack.c.bf16 %v3312_v40, %v3311_v8  ;;  %v3300_v58 = vadd.f32 %v3287_v47, %v3278_v38  ;;  %v3301_v5 = vadd.f32 %v3287_v47, %v3279_v52  ;;  %v3302_v14 = vadd.f32 %v3287_v47, %v3280_v9 }
 0xb65   :  { %6478 = vmatmul.mubr.bf16.vlgmr.msra.gmra.mrb[96].mxu0 %v3339_v43  ;;  %v3342_v50 = vpack.c.bf16 %v3314_v45, %v3313_v46  ;;  %v3315_v29 = vmax.f32 %v3299_v34, 0.0  ;;  %v3281_v42 = vmul.f32 %v3265_v10, %v9093_v54  ;;  %v3282_v51 = vmul.f32 %v3265_v10, %v9096_v22  ;;  %6498 = vmatpush3.bf16.msra.mxu1 %v6741_v3  ;;  %v6742_v54 = vld [vmem:[#allocation47 + $0x18] sm:$0xff]   ;;  %v6743_v22 = vld [vmem:[#allocation47 + $0x20] sm:$0xff]   ;;  %v6744_v10 = vld [vmem:[#allocation47 + $0x28] sm:$0xff]  }
 0xb66   :  { %6481 = vmatprep.mubr.bf16.mxu0 %v3340_v35  ;;  %v3316_v19 = vmax.f32 %v3300_v58, 0.0  ;;  %v3317_v33 = vmax.f32 %v3301_v5, 0.0  ;;  %v3318_v12 = vmax.f32 %v3302_v14, 0.0  ;;  %6499 = vmatprep.subr.bf16.mxu1 %v6742_v54 }
 0xb67   :  { %v3303_v30 = vadd.f32 %v3287_v47, %v3281_v42  ;;  %v3304_v56 = vadd.f32 %v3287_v47, %v3282_v51  ;;  %v6745_v47 = vld [vmem:[#allocation47 + $0x30] sm:$0xff]  }
 0xb68   :  { %v3343_v21 = vpack.c.bf16 %v3316_v19, %v3315_v29  ;;  %v3344_v48 = vpack.c.bf16 %v3318_v12, %v3317_v33 }
 0xb69   :  { %v3319_v28 = vmax.f32 %v3303_v30, 0.0  ;;  %v3320_v57 = vmax.f32 %v3304_v56, 0.0  ;;  %6500 = vmatpush3.bf16.msra.mxu1 %v6742_v54 }
 0xb6a   :  { %6501 = vmatprep.subr.bf16.mxu1 %v6743_v22 }
 0xb6b   :  { %v3345_v44 = vpack.c.bf16 %v3320_v57, %v3319_v28 }
 0xb6d   :  { %6482 = vmatmul.mubr.bf16.gmra.mrb[100].mxu0 %v3341_v31  ;;  %6502 = vmatpush3.bf16.msra.mxu1 %v6743_v22 }
 0xb6e   :  { %6485 = vmatprep.mubr.bf16.mxu0 %v3342_v50  ;;  %6503 = vmatprep.subr.bf16.mxu1 %v6744_v10 }
 0xb71   :  { %6504 = vmatpush3.bf16.msra.mxu1 %v6744_v10 }
 0xb72   :  { %6505 = vmatprep.subr.bf16.mxu1 %v6745_v47 }
 0xb75   :  { %6486 = vmatmul.mubr.bf16.gmra.mrb[104].mxu0 %v3343_v21  ;;  %6506 = vmatpush3.bf16.msra.mxu1 %v6745_v47 }
 0xb76   :  { %6489 = vmatprep.mubr.bf16.mxu0 %v3344_v48  ;;  %6507 = vmatprep.subr.bf16.mxu1 %v6746_v6 }
 0xb79   :  { %6508 = vmatpush3.bf16.msra.mxu1 %v6746_v6 }
 0xb7d   :  { %6490 = vmatmul.mubr.bf16.gmra.mrb[108].mxu0 %v3345_v44 }
 0xc38   :  { %v6479_v23 = vpop.f32.mrb[96].mxu0 }
 0xc39   :  { %v3434_v7 = vpop.f32.mrb[97].mxu0  ;;  %v9138_v61 = vadd.f32 %v6479_v23, %v5747_v25 }
 0xc3a   :  { %v6480_v11 = vpop.f32.mrb[98].mxu0  ;;  %v9134_v62 = vadd.f32 %v5747_v25, %v3434_v7 }
 0xc3b   :  { %v3437_v16 = vpop.f32.mrb[99].mxu0  ;;  %v9142_v18 = vadd.f32 %v6480_v11, %v5747_v25 }
 0xc3c   :  { %v9136_v13 = vadd.f32 %v5747_v25, %v3437_v16 }
 0xc3e   :  { %v3499_v39 = vadd.f32 %v9136_v13, %v9134_v62 }
 0xc40   :  { %v3500_v4 = vadd.f32 %v3499_v39, %v9138_v61  ;;  %v6483_v24 = vpop.f32.mrb[100].mxu0 }
 0xc41   :  { %v3450_v55 = vpop.f32.mrb[101].mxu0  ;;  %v9151_v43 = vadd.f32 %v6483_v24, %v5747_v25 }
 0xc42   :  { %v9145_v53 = vadd.f32 %v5747_v25, %v3450_v55  ;;  %v3501_v36 = vadd.f32 %v3500_v4, %v9142_v18  ;;  %v6484_v60 = vpop.f32.mrb[102].mxu0 }
 0xc43   :  { %v3453_v26 = vpop.f32.mrb[103].mxu0  ;;  %v9154_v20 = vadd.f32 %v6484_v60, %v5747_v25 }
 0xc44   :  { %v3502_v0 = vadd.f32 %v3501_v36, %v9145_v53  ;;  %v9149_v17 = vadd.f32 %v5747_v25, %v3453_v26 }
 0xc46   :  { %v3503_v59 = vadd.f32 %v3502_v0, %v9149_v17 }
 0xc48   :  { %v3504_v63 = vadd.f32 %v3503_v59, %v9151_v43  ;;  %v6487_v27 = vpop.f32.mrb[104].mxu0 }
 0xc49   :  { %v3466_v35 = vpop.f32.mrb[105].mxu0  ;;  %v9163_v2 = vadd.f32 %v6487_v27, %v5747_v25 }
 0xc4a   :  { %v9157_v32 = vadd.f32 %v5747_v25, %v3466_v35  ;;  %v3505_v41 = vadd.f32 %v3504_v63, %v9154_v20  ;;  %v6488_v8 = vpop.f32.mrb[106].mxu0 }
 0xc4b   :  { %v3469_v40 = vpop.f32.mrb[107].mxu0  ;;  %v9166_v9 = vadd.f32 %v6488_v8, %v5747_v25 }
 0xc4c   :  { %v3506_v46 = vadd.f32 %v3505_v41, %v9157_v32  ;;  %v9161_v45 = vadd.f32 %v5747_v25, %v3469_v40 }
 0xc4e   :  { %v3507_v38 = vadd.f32 %v3506_v46, %v9161_v45 }
 0xc50   :  { %v3508_v52 = vadd.f32 %v3507_v38, %v9163_v2  ;;  %v6491_v31 = vpop.f32.mrb[108].mxu0 }
 0xc51   :  { %v3482_v34 = vpop.f32.mrb[109].mxu0  ;;  %v9175_v33 = vadd.f32 %v6491_v31, %v5747_v25 }
 0xc52   :  { %v9169_v58 = vadd.f32 %v5747_v25, %v3482_v34  ;;  %v3509_v50 = vadd.f32 %v3508_v52, %v9166_v9  ;;  %v6492_v5 = vpop.f32.mrb[110].mxu0 }
 0xc53   :  { %v3485_v14 = vpop.f32.mrb[111].mxu0  ;;  %v9178_v42 = vadd.f32 %v6492_v5, %v5747_v25 }
 0xc54   :  { %v3510_v29 = vadd.f32 %v3509_v50, %v9169_v58  ;;  %v9173_v19 = vadd.f32 %v5747_v25, %v3485_v14 }
 0xc56   :  { %v3511_v12 = vadd.f32 %v3510_v29, %v9173_v19 }
 0xc58   :  { %v3512_v51 = vadd.f32 %v3511_v12, %v9175_v33 }
 0xc5a   :  { %v3513_v21 = vadd.f32 %v3512_v51, %v9178_v42 }
 0xc5c   :  { %v3514_v30 = vrot.slane %v3513_v21, 4 }
 0xc5e   :  { %v3515_v56 = vadd.f32 %v3514_v30, %v3513_v21 }
 0xc60   :  { %v3516_v48 = vrot.slane %v3515_v56, 2 }
 0xc62   :  { %v3517_v28 = vadd.f32 %v3516_v48, %v3515_v56 }
 0xc64   :  { %v3518_v57 = vrot.slane %v3517_v28, 1 }
 0xc66   :  { %v3519_v44 = vadd.f32 %v3518_v57, %v3517_v28 }
 0xc68   :  { %v3520_v37 = vmul.f32 0.0078125, %v3519_v44 }
 0xc6a   :  { %v3521_v1 = vsub.f32 %v9134_v62, %v3520_v37  ;;  %v3522_v3 = vsub.f32 %v9136_v13, %v3520_v37  ;;  %v3523_v54 = vsub.f32 %v9138_v61, %v3520_v37  ;;  %v3524_v47 = vsub.f32 %v9142_v18, %v3520_v37 }
 0xc6b   :  { %v3525_v6 = vsub.f32 %v9145_v53, %v3520_v37  ;;  %v3526_v7 = vsub.f32 %v9149_v17, %v3520_v37  ;;  %v3527_v39 = vsub.f32 %v9151_v43, %v3520_v37  ;;  %v3528_v55 = vsub.f32 %v9154_v20, %v3520_v37 }
 0xc6c   :  { %v3537_v22 = vmul.f32 %v3521_v1, %v3521_v1  ;;  %v3538_v10 = vmul.f32 %v3522_v3, %v3522_v3  ;;  %v3539_v23 = vmul.f32 %v3523_v54, %v3523_v54  ;;  %v3540_v11 = vmul.f32 %v3524_v47, %v3524_v47 }
 0xc6d   :  { %v3541_v4 = vmul.f32 %v3525_v6, %v3525_v6  ;;  %v3542_v36 = vmul.f32 %v3526_v7, %v3526_v7  ;;  %v3529_v26 = vsub.f32 %v9157_v32, %v3520_v37  ;;  %v3543_v0 = vmul.f32 %v3527_v39, %v3527_v39 }
 0xc6e   :  { %v3553_v25 = vadd.f32 %v3538_v10, %v3537_v22  ;;  %v3530_v63 = vsub.f32 %v9161_v45, %v3520_v37  ;;  %v3544_v27 = vmul.f32 %v3528_v55, %v3528_v55  ;;  %v3531_v41 = vsub.f32 %v9163_v2, %v3520_v37 }
 0xc6f   :  { %v3545_v8 = vmul.f32 %v3529_v26, %v3529_v26  ;;  %v3532_v46 = vsub.f32 %v9166_v9, %v3520_v37  ;;  %v3533_v31 = vsub.f32 %v9169_v58, %v3520_v37  ;;  %v3534_v5 = vsub.f32 %v9173_v19, %v3520_v37 }
 0xc70   :  { %v3554_v16 = vadd.f32 %v3553_v25, %v3539_v23  ;;  %v3546_v38 = vmul.f32 %v3530_v63, %v3530_v63  ;;  %v3547_v34 = vmul.f32 %v3531_v41, %v3531_v41  ;;  %v3535_v12 = vsub.f32 %v9175_v33, %v3520_v37 }
 0xc71   :  { %v3548_v14 = vmul.f32 %v3532_v46, %v3532_v46  ;;  %v3549_v51 = vmul.f32 %v3533_v31, %v3533_v31  ;;  %v3536_v30 = vsub.f32 %v9178_v42, %v3520_v37  ;;  %v3550_v56 = vmul.f32 %v3534_v5, %v3534_v5 }
 0xc72   :  { %v3555_v24 = vadd.f32 %v3554_v16, %v3540_v11  ;;  %v3551_v28 = vmul.f32 %v3535_v12, %v3535_v12  ;;  %v3497_v11 = vld [vmem:[#allocation44] sm:$0x1] }
 0xc73   :  { %v3552_v44 = vmul.f32 %v3536_v30, %v3536_v30 }
 0xc74   :  { %v3556_v60 = vadd.f32 %v3555_v24, %v3541_v4  ;;  %v3498_v4 = vld [vmem:[#allocation46] sm:$0x1] }
 0xc76   :  { %v3557_v59 = vadd.f32 %v3556_v60, %v3542_v36 }
 0xc78   :  { %v3558_v35 = vadd.f32 %v3557_v59, %v3543_v0 }
 0xc7a   :  { %v3559_v40 = vadd.f32 %v3558_v35, %v3544_v27 }
 0xc7c   :  { %v3560_v52 = vadd.f32 %v3559_v40, %v3545_v8 }
 0xc7e   :  { %v3561_v50 = vadd.f32 %v3560_v52, %v3546_v38 }
 0xc80   :  { %v3562_v29 = vadd.f32 %v3561_v50, %v3547_v34 }
 0xc82   :  { %v3563_v21 = vadd.f32 %v3562_v29, %v3548_v14 }
 0xc84   :  { %v3564_v48 = vadd.f32 %v3563_v21, %v3549_v51 }
 0xc86   :  { %v3565_v57 = vadd.f32 %v3564_v48, %v3550_v56 }
 0xc88   :  { %v3566_v1 = vadd.f32 %v3565_v57, %v3551_v28 }
 0xc8a   :  { %v3567_v3 = vadd.f32 %v3566_v1, %v3552_v44 }
 0xc8c   :  { %v3568_v54 = vrot.slane %v3567_v3, 4 }
 0xc8e   :  { %v3569_v22 = vadd.f32 %v3568_v54, %v3567_v3 }
 0xc90   :  { %v3570_v10 = vrot.slane %v3569_v22, 2 }
 0xc92   :  { %v3571_v47 = vadd.f32 %v3570_v10, %v3569_v22 }
 0xc94   :  { %v3572_v6 = vrot.slane %v3571_v47, 1 }
 0xc96   :  { %v3573_v23 = vadd.f32 %v3572_v6, %v3571_v47 }
 0xc98   :  { %v3574_v25 = vmul.f32 0.0078125, %v3573_v23 }
 0xc9a   :  { %v3575_v7 = vadd.f32 1e-05, %v3574_v25 }
 0xc9c   :  { %6839 = vrsqrt.f32 %v3575_v7 }
 0xca6   :  { %v6840_v16 = vpop.eup %6839 }
 0xca7   :  { %v3577_v39 = vmul.f32 %v6840_v16, %v3497_v11 }
 0xca9   :  { %v3578_v24 = vmul.f32 %v3577_v39, %v3520_v37  ;;  %v3584_v55 = vrot.slane %v3577_v39, %v8703_v15 }
 0xcab   :  { %v3579_v36 = vsub.f32 %v3498_v4, %v3578_v24  ;;  %v3586_v60 = vmul.f32 %v3584_v55, %v9134_v62  ;;  %v3587_v0 = vmul.f32 %v3584_v55, %v9136_v13  ;;  %v3588_v59 = vmul.f32 %v3584_v55, %v9138_v61  ;;  %v6749_v24 = vld [vmem:[#allocation53 + $0x4] ss:$28 sps:$4 sm:$0xff]  }
 0xcac   :  { %v3589_v63 = vmul.f32 %v3584_v55, %v9142_v18  ;;  %v3590_v27 = vmul.f32 %v3584_v55, %v9145_v53  ;;  %v3591_v35 = vmul.f32 %v3584_v55, %v9149_v17  ;;  %v3592_v61 = vmul.f32 %v3584_v55, %v9151_v43  ;;  %4356 = vmatprep.subr.bf16.mxu0 %v6749_v24 }
 0xcad   :  { %v3606_v26 = vrot.slane %v3579_v36, %v8703_v15  ;;  %v3593_v18 = vmul.f32 %v3584_v55, %v9154_v20  ;;  %v3594_v17 = vmul.f32 %v3584_v55, %v9157_v32  ;;  %v3595_v14 = vmul.f32 %v3584_v55, %v9161_v45  ;;  %v6752_v36 = vld [vmem:[#allocation53 + $0xc] ss:$28 sps:$4 sm:$0xff]  }
 0xcae   :  { %v3596_v20 = vmul.f32 %v3584_v55, %v9163_v2  ;;  %v3597_v57 = vmul.f32 %v3584_v55, %v9166_v9  ;;  %v3599_v32 = vmul.f32 %v3584_v55, %v9173_v19  ;;  %v3598_v45 = vmul.f32 %v3584_v55, %v9169_v58  ;;  %4469 = vmatprep.subr.bf16.mxu1 %v6752_v36 }
 0xcaf   :  { %v3608_v41 = vadd.f32 %v3606_v26, %v3586_v60  ;;  %v3609_v8 = vadd.f32 %v3606_v26, %v3587_v0  ;;  %v3610_v37 = vadd.f32 %v3606_v26, %v3588_v59  ;;  %v3611_v40 = vadd.f32 %v3606_v26, %v3589_v63  ;;  %v6747_v60 = vld [vmem:[#allocation53] ss:$28 sps:$4 sm:$0xff]   ;;  %v6750_v0 = vld [vmem:[#allocation53 + $0x8] ss:$28 sps:$4 sm:$0xff]  }
 0xcb0   :  { %v3612_v46 = vadd.f32 %v3606_v26, %v3590_v27  ;;  %v3613_v38 = vadd.f32 %v3606_v26, %v3591_v35  ;;  %v3614_v29 = vadd.f32 %v3606_v26, %v3592_v61  ;;  %v3615_v12 = vadd.f32 %v3606_v26, %v3593_v18  ;;  %4357 = vmatpush1.bf16.msra.mxu0 %v6747_v60  ;;  %v6756_v59 = vld [vmem:[#allocation53 + $0x40] ss:$28 sps:$4 sm:$0xff]   ;;  %v6759_v27 = vld [vmem:[#allocation53 + $0x70] ss:$28 sps:$4 sm:$0xff]   ;;  %v6762_v35 = vld [vmem:[#allocation53 + $0x78] ss:$28 sps:$4 sm:$0xff]  }
 0xcb1   :  { %v3624_v52 = vmax.f32 %v3608_v41, 0.0  ;;  %v3625_v62 = vmax.f32 %v3609_v8, 0.0  ;;  %v3626_v31 = vmax.f32 %v3610_v37, 0.0  ;;  %v3627_v34 = vmax.f32 %v3611_v40, 0.0  ;;  %v6764_v63 = vld [vmem:[#allocation53 + $0x7c] ss:$28 sps:$4 sm:$0xff]  }
 0xcb2   :  { %v3628_v50 = vmax.f32 %v3612_v46, 0.0  ;;  %v3629_v13 = vmax.f32 %v3613_v38, 0.0  ;;  %v3616_v21 = vadd.f32 %v3606_v26, %v3594_v17  ;;  %v3617_v30 = vadd.f32 %v3606_v26, %v3595_v14  ;;  %v6767_v41 = vld [vmem:[#allocation53 + $0xac] ss:$28 sps:$4 sm:$0xff]   ;;  %v6770_v8 = vld [vmem:[#allocation53 + $0xb4] ss:$28 sps:$4 sm:$0xff]  }
 0xcb3   :  { %v3657_v5 = vpack.c.bf16 %v3625_v62, %v3624_v52  ;;  %v3658_v53 = vpack.c.bf16 %v3627_v34, %v3626_v31  ;;  %v3630_v56 = vmax.f32 %v3614_v29, 0.0  ;;  %v3631_v48 = vmax.f32 %v3615_v12, 0.0  ;;  %v6765_v37 = vld [vmem:[#allocation53 + $0xa8] ss:$28 sps:$4 sm:$0xff]   ;;  %v6768_v40 = vld [vmem:[#allocation53 + $0xb0] ss:$28 sps:$4 sm:$0xff]  }
 0xcb4   :  { %v3659_v51 = vpack.c.bf16 %v3629_v13, %v3628_v50  ;;  %v3632_v28 = vmax.f32 %v3616_v21, 0.0  ;;  %v3633_v43 = vmax.f32 %v3617_v30, 0.0  ;;  %v3618_v1 = vadd.f32 %v3606_v26, %v3596_v20  ;;  %v6773_v46 = vld [vmem:[#allocation53 + $0xe4] ss:$28 sps:$4 sm:$0xff]   ;;  %v6776_v38 = vld [vmem:[#allocation53 + $0xec] ss:$28 sps:$4 sm:$0xff]  }
 0xcb5   :  { %6509 = vmatprep.mubr.bf16.mxu1 %v3657_v5  ;;  %v3660_v44 = vpack.c.bf16 %v3631_v48, %v3630_v56  ;;  %v3619_v3 = vadd.f32 %v3606_v26, %v3597_v57  ;;  %v3620_v22 = vadd.f32 %v3606_v26, %v3598_v45  ;;  %v3621_v10 = vadd.f32 %v3606_v26, %v3599_v32  ;;  %v6771_v52 = vld [vmem:[#allocation53 + $0xe0] ss:$28 sps:$4 sm:$0xff]   ;;  %v6774_v62 = vld [vmem:[#allocation53 + $0xe8] ss:$28 sps:$4 sm:$0xff]   ;;  %v6777_v50 = vld [vmem:[#allocation53 + $0x118] ss:$28 sps:$4 sm:$0xff]  }
 0xcb6   :  { %6510 = vmatmul.mubr.bf16.vlgmr.msra.gmra.mrb[96].mxu1 %v3658_v53  ;;  %v3661_v54 = vpack.c.bf16 %v3633_v43, %v3632_v28  ;;  %v3634_v47 = vmax.f32 %v3618_v1, 0.0  ;;  %v3600_v2 = vmul.f32 %v3584_v55, %v9175_v33  ;;  %v3601_v9 = vmul.f32 %v3584_v55, %v9178_v42  ;;  %v6755_v33 = vld [vmem:[#allocation53 + $0x3c] ss:$28 sps:$4 sm:$0xff]   ;;  %v6758_v42 = vld [vmem:[#allocation53 + $0x44] ss:$28 sps:$4 sm:$0xff]  }
 0xcb7   :  { %6513 = vmatprep.mubr.bf16.mxu1 %v3659_v51  ;;  %v3635_v6 = vmax.f32 %v3619_v3, 0.0  ;;  %v3636_v23 = vmax.f32 %v3620_v22, 0.0  ;;  %v3637_v25 = vmax.f32 %v3621_v10, 0.0  ;;  %4470 = vmatpush1.bf16.msra.mxu1 %v6750_v0  ;;  %v6753_v55 = vld [vmem:[#allocation53 + $0x38] ss:$28 sps:$4 sm:$0xff]   ;;  %v8198_v51 = vmov 0  }
 0xcb8   :  { %v3622_v19 = vadd.f32 %v3606_v26, %v3600_v2  ;;  %v3623_v11 = vadd.f32 %v3606_v26, %v3601_v9  ;;  %4358 = vmatprep.subr.bf16.mxu0 %v6755_v33  ;;  %4471 = vmatprep.subr.bf16.mxu1 %v6758_v42  ;;  %v6761_v26 = vld [vmem:[#allocation53 + $0x74] ss:$28 sps:$4 sm:$0xff]   ;;  %v6779_v31 = vld [vmem:[#allocation53 + $0x11c] ss:$28 sps:$4 sm:$0xff]   ;;  %v6782_v34 = vld [vmem:[#allocation53 + $0x124] ss:$28 sps:$4 sm:$0xff]  }
 0xcb9   :  { %v3662_v7 = vpack.c.bf16 %v3635_v6, %v3634_v47  ;;  %v3663_v58 = vpack.c.bf16 %v3637_v25, %v3636_v23  ;;  %4359 = vmatpush1.bf16.msra.mxu0 %v6753_v55  ;;  %v6780_v13 = vld [vmem:[#allocation53 + $0x120] ss:$28 sps:$4 sm:$0xff]   ;;  %v6783_v61 = vld [vmem:[#allocation53 + $0x150] ss:$28 sps:$4 sm:$0xff]   ;;  %v6786_v5 = vld [vmem:[#allocation53 + $0x158] ss:$28 sps:$4 sm:$0xff]   ;;  %4388 = vmatprep.mubr.bf16.mxu0 %v8198_v51 }
 0xcba   :  { %v3638_v16 = vmax.f32 %v3622_v19, 0.0  ;;  %v3639_v39 = vmax.f32 %v3623_v11, 0.0  ;;  %4360 = vmatprep.subr.bf16.mxu0 %v6761_v26  ;;  %v6785_v18 = vld [vmem:[#allocation53 + $0x154] ss:$28 sps:$4 sm:$0xff]   ;;  %v6788_v53 = vld [vmem:[#allocation53 + $0x15c] ss:$28 sps:$4 sm:$0xff]  }
 0xcbb   :  { %4472 = vmatpush1.bf16.msra.mxu1 %v6756_v59  ;;  %v6791_v17 = vld [vmem:[#allocation53 + $0x18c] ss:$28 sps:$4 sm:$0xff]   ;;  %v6794_v14 = vld [vmem:[#allocation53 + $0x194] ss:$28 sps:$4 sm:$0xff]   ;;  %v5756_v12 = vld [vmem:[#allocation49] ss:$0 sm:$0xff] }
 0xcbc   :  { %v3664_v4 = vpack.c.bf16 %v3639_v39, %v3638_v16  ;;  %4473 = vmatprep.subr.bf16.mxu1 %v6764_v63  ;;  %v6789_v30 = vld [vmem:[#allocation53 + $0x188] ss:$28 sps:$4 sm:$0xff]   ;;  %v6792_v56 = vld [vmem:[#allocation53 + $0x190] ss:$28 sps:$4 sm:$0xff]  }
 0xcbd   :  { %4361 = vmatpush1.bf16.msra.mxu0 %v6759_v27  ;;  %v6797_v28 = vld [vmem:[#allocation53 + $0x14] ss:$28 sps:$4 sm:$0xff]  }
 0xcbe   :  { %6514 = vmatmul.mubr.bf16.gmra.mrb[100].mxu1 %v3660_v44  ;;  %4362 = vmatprep.subr.bf16.mxu0 %v6767_v41 }
 0xcbf   :  { %6517 = vmatprep.mubr.bf16.mxu1 %v3661_v54  ;;  %4474 = vmatpush1.bf16.msra.mxu1 %v6762_v35 }
 0xcc0   :  { %4475 = vmatprep.subr.bf16.mxu1 %v6770_v8 }
 0xcc1   :  { %4363 = vmatpush1.bf16.msra.mxu0 %v6765_v37 }
 0xcc2   :  { %4364 = vmatprep.subr.bf16.mxu0 %v6773_v46 }
 0xcc3   :  { %4476 = vmatpush1.bf16.msra.mxu1 %v6768_v40 }
 0xcc4   :  { %4477 = vmatprep.subr.bf16.mxu1 %v6776_v38 }
 0xcc5   :  { %4365 = vmatpush1.bf16.msra.mxu0 %v6771_v52 }
 0xcc6   :  { %6518 = vmatmul.mubr.bf16.gmra.mrb[104].mxu1 %v3662_v7  ;;  %4366 = vmatprep.subr.bf16.mxu0 %v6779_v31 }
 0xcc7   :  { %6521 = vmatprep.mubr.bf16.mxu1 %v3663_v58  ;;  %4478 = vmatpush1.bf16.msra.mxu1 %v6774_v62  ;;  %v9265_v62 = vld [vmem:[#allocation53 + $0x18] ss:$28 sps:$4 sm:$0xff]  }
 0xcc8   :  { %4479 = vmatprep.subr.bf16.mxu1 %v6782_v34 }
 0xcc9   :  { %4367 = vmatpush1.bf16.msra.mxu0 %v6777_v50 }
 0xcca   :  { %4368 = vmatprep.subr.bf16.mxu0 %v6785_v18 }
 0xccb   :  { %4480 = vmatpush1.bf16.msra.mxu1 %v6780_v13 }
 0xccc   :  { %4481 = vmatprep.subr.bf16.mxu1 %v6788_v53 }
 0xccd   :  { %4369 = vmatpush1.bf16.msra.mxu0 %v6783_v61 }
 0xcce   :  { %6522 = vmatmul.mubr.bf16.gmra.mrb[108].mxu1 %v3664_v4  ;;  %4370 = vmatprep.subr.bf16.mxu0 %v6791_v17 }
 0xccf   :  { %4482 = vmatpush1.bf16.msra.mxu1 %v6786_v5  ;;  %4501 = vmatprep.mubr.bf16.mxu1 %v8198_v51 }
 0xcd0   :  { %4483 = vmatprep.subr.bf16.mxu1 %v6794_v14 }
 0xcd1   :  { %4371 = vmatpush1.bf16.msra.mxu0 %v6789_v30 }
 0xcd2   :  { %4582 = vmatprep.subr.bf16.mxu0 %v6797_v28 }
 0xcd3   :  { %4484 = vmatpush1.bf16.msra.mxu1 %v6792_v56 }
 0xcd4   :  { %6525 = vmatprep.subr.bf16.mxu1 %v9265_v62 }
 0xd89   :  { %v6511_v29 = vpop.f32.mrb[96].mxu1 }
 0xd8a   :  { %v3753_v21 = vpop.f32.mrb[97].mxu1  ;;  %v9222_v32 = vadd.f32 %v6511_v29, %v5756_v12 }
 0xd8b   :  { %v6512_v48 = vpop.f32.mrb[98].mxu1  ;;  %v9218_v20 = vadd.f32 %v5756_v12, %v3753_v21 }
 0xd8c   :  { %v3756_v43 = vpop.f32.mrb[99].mxu1  ;;  %v9226_v44 = vadd.f32 %v6512_v48, %v5756_v12 }
 0xd8d   :  { %v9220_v57 = vadd.f32 %v5756_v12, %v3756_v43 }
 0xd8f   :  { %v3818_v45 = vadd.f32 %v9220_v57, %v9218_v20 }
 0xd91   :  { %v3819_v1 = vadd.f32 %v3818_v45, %v9222_v32  ;;  %v6515_v3 = vpop.f32.mrb[100].mxu1 }
 0xd92   :  { %v3769_v54 = vpop.f32.mrb[101].mxu1  ;;  %v9235_v2 = vadd.f32 %v6515_v3, %v5756_v12 }
 0xd93   :  { %v9229_v22 = vadd.f32 %v5756_v12, %v3769_v54  ;;  %v3820_v10 = vadd.f32 %v3819_v1, %v9226_v44  ;;  %v6516_v47 = vpop.f32.mrb[102].mxu1 }
 0xd94   :  { %v3772_v6 = vpop.f32.mrb[103].mxu1  ;;  %v9238_v7 = vadd.f32 %v6516_v47, %v5756_v12 }
 0xd95   :  { %v3821_v23 = vadd.f32 %v3820_v10, %v9229_v22  ;;  %v9233_v25 = vadd.f32 %v5756_v12, %v3772_v6 }
 0xd97   :  { %v3822_v9 = vadd.f32 %v3821_v23, %v9233_v25 }
 0xd99   :  { %v3823_v19 = vadd.f32 %v3822_v9, %v9235_v2  ;;  %v6519_v11 = vpop.f32.mrb[104].mxu1 }
 0xd9a   :  { %v3785_v58 = vpop.f32.mrb[105].mxu1  ;;  %v9247_v0 = vadd.f32 %v6519_v11, %v5756_v12 }
 0xd9b   :  { %v9241_v16 = vadd.f32 %v5756_v12, %v3785_v58  ;;  %v3824_v39 = vadd.f32 %v3823_v19, %v9238_v7  ;;  %v6520_v4 = vpop.f32.mrb[106].mxu1 }
 0xd9c   :  { %v3788_v24 = vpop.f32.mrb[107].mxu1  ;;  %v9250_v42 = vadd.f32 %v6520_v4, %v5756_v12 }
 0xd9d   :  { %v3825_v36 = vadd.f32 %v3824_v39, %v9241_v16  ;;  %v9245_v60 = vadd.f32 %v5756_v12, %v3788_v24 }
 0xd9f   :  { %v3826_v33 = vadd.f32 %v3825_v36, %v9245_v60 }
 0xda1   :  { %v3827_v55 = vadd.f32 %v3826_v33, %v9247_v0  ;;  %v6523_v59 = vpop.f32.mrb[108].mxu1 }
 0xda2   :  { %v3801_v26 = vpop.f32.mrb[109].mxu1  ;;  %v9259_v40 = vadd.f32 %v6523_v59, %v5756_v12 }
 0xda3   :  { %v9253_v63 = vadd.f32 %v5756_v12, %v3801_v26  ;;  %v3828_v27 = vadd.f32 %v3827_v55, %v9250_v42  ;;  %v6524_v35 = vpop.f32.mrb[110].mxu1 }
 0xda4   :  { %v3804_v41 = vpop.f32.mrb[111].mxu1  ;;  %v9262_v38 = vadd.f32 %v6524_v35, %v5756_v12 }
 0xda5   :  { %v3829_v8 = vadd.f32 %v3828_v27, %v9253_v63  ;;  %v9257_v37 = vadd.f32 %v5756_v12, %v3804_v41 }
 0xda7   :  { %v3830_v46 = vadd.f32 %v3829_v8, %v9257_v37 }
 0xda9   :  { %v3831_v52 = vadd.f32 %v3830_v46, %v9259_v40 }
 0xdab   :  { %v3832_v31 = vadd.f32 %v3831_v52, %v9262_v38 }
 0xdad   :  { %v3833_v34 = vrot.slane %v3832_v31, 4 }
 0xdaf   :  { %v3834_v50 = vadd.f32 %v3833_v34, %v3832_v31 }
 0xdb1   :  { %v3835_v13 = vrot.slane %v3834_v50, 2 }
 0xdb3   :  { %v3836_v61 = vadd.f32 %v3835_v13, %v3834_v50 }
 0xdb5   :  { %v3837_v18 = vrot.slane %v3836_v61, 1 }
 0xdb7   :  { %v3838_v5 = vadd.f32 %v3837_v18, %v3836_v61 }
 0xdb9   :  { %v3839_v53 = vmul.f32 0.0078125, %v3838_v5 }
 0xdbb   :  { %v3840_v17 = vsub.f32 %v9218_v20, %v3839_v53  ;;  %v3841_v14 = vsub.f32 %v9220_v57, %v3839_v53  ;;  %v3842_v29 = vsub.f32 %v9222_v32, %v3839_v53  ;;  %v3843_v30 = vsub.f32 %v9226_v44, %v3839_v53 }
 0xdbc   :  { %v3844_v56 = vsub.f32 %v9229_v22, %v3839_v53  ;;  %v3845_v43 = vsub.f32 %v9233_v25, %v3839_v53  ;;  %v3846_v3 = vsub.f32 %v9235_v2, %v3839_v53  ;;  %v3847_v47 = vsub.f32 %v9238_v7, %v3839_v53 }
 0xdbd   :  { %v3856_v12 = vmul.f32 %v3840_v17, %v3840_v17  ;;  %v3857_v21 = vmul.f32 %v3841_v14, %v3841_v14  ;;  %v3858_v48 = vmul.f32 %v3842_v29, %v3842_v29  ;;  %v3859_v45 = vmul.f32 %v3843_v30, %v3843_v30 }
 0xdbe   :  { %v3860_v54 = vmul.f32 %v3844_v56, %v3844_v56  ;;  %v3861_v6 = vmul.f32 %v3845_v43, %v3845_v43  ;;  %v3848_v9 = vsub.f32 %v9241_v16, %v3839_v53  ;;  %v3862_v19 = vmul.f32 %v3846_v3, %v3846_v3  ;;  %v3816_v3 = vld [vmem:[#allocation50] sm:$0x1] }
 0xdbf   :  { %v3872_v28 = vadd.f32 %v3857_v21, %v3856_v12  ;;  %v3849_v58 = vsub.f32 %v9245_v60, %v3839_v53  ;;  %v3863_v39 = vmul.f32 %v3847_v47, %v3847_v47  ;;  %v3850_v24 = vsub.f32 %v9247_v0, %v3839_v53  ;;  %v3817_v47 = vld [vmem:[#allocation52] sm:$0x1] }
 0xdc0   :  { %v3864_v36 = vmul.f32 %v3848_v9, %v3848_v9  ;;  %v3851_v55 = vsub.f32 %v9250_v42, %v3839_v53  ;;  %v3852_v27 = vsub.f32 %v9253_v63, %v3839_v53  ;;  %v3853_v8 = vsub.f32 %v9257_v37, %v3839_v53 }
 0xdc1   :  { %v3873_v1 = vadd.f32 %v3872_v28, %v3858_v48  ;;  %v3865_v59 = vmul.f32 %v3849_v58, %v3849_v58  ;;  %v3866_v35 = vmul.f32 %v3850_v24, %v3850_v24  ;;  %v3854_v31 = vsub.f32 %v9259_v40, %v3839_v53 }
 0xdc2   :  { %v3867_v46 = vmul.f32 %v3851_v55, %v3851_v55  ;;  %v3868_v34 = vmul.f32 %v3852_v27, %v3852_v27  ;;  %v3855_v13 = vsub.f32 %v9262_v38, %v3839_v53  ;;  %v3869_v61 = vmul.f32 %v3853_v8, %v3853_v8  ;;  %v6795_v55 = vld [vmem:[#allocation53 + $0x10] ss:$28 sps:$4 sm:$0xff]  }
 0xdc3   :  { %v3874_v10 = vadd.f32 %v3873_v1, %v3859_v45  ;;  %v3870_v5 = vmul.f32 %v3854_v31, %v3854_v31  ;;  %v6811_v27 = vld [vmem:[#allocation53 + $0x50] ss:$28 sps:$4 sm:$0xff]  }
 0xdc4   :  { %v3871_v14 = vmul.f32 %v3855_v13, %v3855_v13  ;;  %v6815_v13 = vld [vmem:[#allocation53 + $0x88] ss:$28 sps:$4 sm:$0xff]  }
 0xdc5   :  { %v3875_v23 = vadd.f32 %v3874_v10, %v3860_v54 }
 0xdc7   :  { %v3876_v11 = vadd.f32 %v3875_v23, %v3861_v6 }
 0xdc9   :  { %v3877_v4 = vadd.f32 %v3876_v11, %v3862_v19 }
 0xdcb   :  { %v3878_v33 = vadd.f32 %v3877_v4, %v3863_v39 }
 0xdcd   :  { %v3879_v26 = vadd.f32 %v3878_v33, %v3864_v36 }
 0xdcf   :  { %v3880_v41 = vadd.f32 %v3879_v26, %v3865_v59 }
 0xdd1   :  { %v3881_v52 = vadd.f32 %v3880_v41, %v3866_v35  ;;  %v6803_v41 = vld [vmem:[#allocation53 + $0x84] ss:$28 sps:$4 sm:$0xff]  }
 0xdd3   :  { %v3882_v50 = vadd.f32 %v3881_v52, %v3867_v46 }
 0xdd5   :  { %v3883_v18 = vadd.f32 %v3882_v50, %v3868_v34  ;;  %v6801_v50 = vld [vmem:[#allocation53 + $0x80] ss:$28 sps:$4 sm:$0xff]  }
 0xdd7   :  { %v3884_v17 = vadd.f32 %v3883_v18, %v3869_v61  ;;  %v6806_v61 = vld [vmem:[#allocation53 + $0xbc] ss:$28 sps:$4 sm:$0xff]  }
 0xdd8   :  { %v6804_v18 = vld [vmem:[#allocation53 + $0xb8] ss:$28 sps:$4 sm:$0xff]  }
 0xdd9   :  { %v3885_v29 = vadd.f32 %v3884_v17, %v3870_v5  ;;  %v6809_v5 = vld [vmem:[#allocation53 + $0xf4] ss:$28 sps:$4 sm:$0xff]  }
 0xddb   :  { %v3886_v12 = vadd.f32 %v3885_v29, %v3871_v14 }
 0xddd   :  { %v3887_v21 = vrot.slane %v3886_v12, 4 }
 0xddf   :  { %v3888_v30 = vadd.f32 %v3887_v21, %v3886_v12 }
 0xde1   :  { %v3889_v56 = vrot.slane %v3888_v30, 2 }
 0xde3   :  { %v3890_v48 = vadd.f32 %v3889_v56, %v3888_v30  ;;  %v6807_v30 = vld [vmem:[#allocation53 + $0xf0] ss:$28 sps:$4 sm:$0xff]   ;;  %v6820_v56 = vld [vmem:[#allocation53 + $0xf8] ss:$28 sps:$4 sm:$0xff]  }
 0xde5   :  { %v3891_v28 = vrot.slane %v3890_v48, 1 }
 0xde7   :  { %v3892_v43 = vadd.f32 %v3891_v28, %v3890_v48  ;;  %v6814_v48 = vld [vmem:[#allocation53 + $0x12c] ss:$28 sps:$4 sm:$0xff]  }
 0xde9   :  { %v3893_v45 = vmul.f32 0.0078125, %v3892_v43  ;;  %v6812_v43 = vld [vmem:[#allocation53 + $0x128] ss:$28 sps:$4 sm:$0xff]  }
 0xdeb   :  { %v3894_v1 = vadd.f32 1e-05, %v3893_v45  ;;  %v6819_v45 = vld [vmem:[#allocation53 + $0x164] ss:$28 sps:$4 sm:$0xff]  }
 0xded   :  { %6841 = vrsqrt.f32 %v3894_v1 }
 0xdf7   :  { %v6842_v54 = vpop.eup %6841 }
 0xdf8   :  { %v3896_v10 = vmul.f32 %v6842_v54, %v3816_v3 }
 0xdfa   :  { %v3897_v6 = vmul.f32 %v3896_v10, %v3839_v53  ;;  %v9286_v23 = vrot.slane %v3896_v10, %v8703_v15 }
 0xdfc   :  { %v3898_v9 = vsub.f32 %v3817_v47, %v3897_v6  ;;  %v3905_v11 = vmul.f32 %v9286_v23, %v9218_v20  ;;  %v3906_v58 = vmul.f32 %v9286_v23, %v9220_v57  ;;  %v3907_v53 = vmul.f32 %v9286_v23, %v9222_v32  ;;  %v6800_v57 = vld [vmem:[#allocation53 + $0x4c] ss:$28 sps:$4 sm:$0xff]   ;;  %v6817_v6 = vld [vmem:[#allocation53 + $0x160] ss:$28 sps:$4 sm:$0xff]  }
 0xdfd   :  { %v3908_v33 = vmul.f32 %v9286_v23, %v9226_v44  ;;  %v6798_v32 = vld [vmem:[#allocation53 + $0x48] ss:$28 sps:$4 sm:$0xff]   ;;  %v3909_v8 = vmul.f32 %v9286_v23, %v9229_v22  ;;  %v3910_v46 = vmul.f32 %v9286_v23, %v9233_v25  ;;  %v6816_v22 = vld [vmem:[#allocation53 + $0xc0] ss:$28 sps:$4 sm:$0xff]   ;;  %v3911_v17 = vmul.f32 %v9286_v23, %v9235_v2  ;;  %v6821_v2 = vld [vmem:[#allocation53 + $0x130] ss:$28 sps:$4 sm:$0xff]  }
 0xdfe   :  { %v9289_v19 = vrot.slane %v3898_v9, %v8703_v15  ;;  %v3912_v14 = vmul.f32 %v9286_v23, %v9238_v7  ;;  %v3913_v1 = vmul.f32 %v9286_v23, %v9241_v16  ;;  %v3914_v3 = vmul.f32 %v9286_v23, %v9245_v60  ;;  %v6825_v9 = vld [vmem:[#allocation53 + $0x168] ss:$28 sps:$4 sm:$0xff]   ;;  %v6826_v16 = vld [vmem:[#allocation53 + $0x1a0] ss:$28 sps:$4 sm:$0xff]  }
 0xe00   :  { %v3927_v39 = vadd.f32 %v9289_v19, %v3905_v11  ;;  %v3928_v4 = vadd.f32 %v9289_v19, %v3906_v58  ;;  %v3929_v20 = vadd.f32 %v9289_v19, %v3907_v53  ;;  %v3930_v26 = vadd.f32 %v9289_v19, %v3908_v33  ;;  %v6824_v11 = vld [vmem:[#allocation53 + $0x19c] ss:$28 sps:$4 sm:$0xff]  }
 0xe01   :  { %v3931_v31 = vadd.f32 %v9289_v19, %v3909_v8  ;;  %v3932_v34 = vadd.f32 %v9289_v19, %v3910_v46  ;;  %v3933_v12 = vadd.f32 %v9289_v19, %v3911_v17  ;;  %v3934_v21 = vadd.f32 %v9289_v19, %v3912_v14 }
 0xe02   :  { %v3943_v24 = vmax.f32 %v3927_v39, 0.0  ;;  %v3944_v36 = vmax.f32 %v3928_v4, 0.0  ;;  %v3945_v44 = vmax.f32 %v3929_v20, 0.0  ;;  %v3946_v35 = vmax.f32 %v3930_v26, 0.0  ;;  %v6822_v39 = vld [vmem:[#allocation53 + $0x198] ss:$28 sps:$4 sm:$0xff]  }
 0xe03   :  { %v3947_v25 = vmax.f32 %v3931_v31, 0.0  ;;  %v3949_v7 = vmax.f32 %v3933_v12, 0.0  ;;  %v3950_v28 = vmax.f32 %v3934_v21, 0.0  ;;  %v3935_v10 = vadd.f32 %v9289_v19, %v3913_v1 }
 0xe04   :  { %v9301_v59 = vpack.c.bf16 %v3944_v36, %v3943_v24  ;;  %v9314_v52 = vpack.c.bf16 %v3946_v35, %v3945_v44  ;;  %v3936_v47 = vadd.f32 %v9289_v19, %v3914_v3  ;;  %v3915_v4 = vmul.f32 %v9286_v23, %v9247_v0 }
 0xe05   :  { %v9338_v54 = vpack.c.bf16 %v3950_v28, %v3949_v7  ;;  %v3951_v60 = vmax.f32 %v3935_v10, 0.0  ;;  %v3916_v24 = vmul.f32 %v9286_v23, %v9250_v42  ;;  %v3918_v0 = vmul.f32 %v9286_v23, %v9257_v37 }
 0xe06   :  { %4389 = vmatmul.mubr.bf16.vlgmr.msra.gmra.mrb[112].mxu0 %v9301_v59  ;;  %4502 = vmatmul.mubr.bf16.vlgmr.msra.gmra.mrb[112].mxu1 %v9301_v59  ;;  %v3952_v58 = vmax.f32 %v3936_v47, 0.0  ;;  %v3937_v53 = vadd.f32 %v9289_v19, %v3915_v4  ;;  %v3917_v42 = vmul.f32 %v9286_v23, %v9253_v63  ;;  %v3919_v35 = vmul.f32 %v9286_v23, %v9259_v40 }
 0xe07   :  { %4583 = vmatpush1.bf16.msra.mxu0 %v6795_v55  ;;  %4398 = vmatprep.mubr.bf16.mxu0 %v8198_v51  ;;  %v3938_v33 = vadd.f32 %v9289_v19, %v3916_v24  ;;  %v3940_v26 = vadd.f32 %v9289_v19, %v3918_v0  ;;  %v3920_v37 = vmul.f32 %v9286_v23, %v9262_v38  ;;  %v4043_v40 = vsub.s32 2, %v8700_v49  ;;  %v9387_v38 = vld [vmem:[#allocation55] sm:$0xff] }
 0xe08   :  { %4511 = vmatprep.mubr.bf16.mxu1 %v8198_v51  ;;  %4584 = vmatprep.subr.bf16.mxu0 %v6800_v57  ;;  %v4028_v36 = vpack.c.bf16 %v3952_v58, %v3951_v60  ;;  %v3953_v55 = vmax.f32 %v3937_v53, 0.0  ;;  %v4039_v23 = vsub.s32 1, %v8700_v49 }
 0xe09   :  { %6526 = vmatpush3.bf16.msra.mxu1 %v9265_v62  ;;  %v3948_v62 = vmax.f32 %v3932_v34, 0.0  ;;  %v3954_v20 = vmax.f32 %v3938_v33, 0.0  ;;  %v3942_v8 = vadd.f32 %v9289_v19, %v3920_v37 }
 0xe0a   :  { %6527 = vmatprep.subr.bf16.mxu1 %v6811_v27 }
 0xe0b   :  { %4585 = vmatpush1.bf16.msra.mxu0 %v6798_v32  ;;  %v9326_v29 = vpack.c.bf16 %v3948_v62, %v3947_v25  ;;  %v4029_v57 = vpack.c.bf16 %v3954_v20, %v3953_v55  ;;  %v3956_v32 = vmax.f32 %v3940_v26, 0.0  ;;  %v3958_v31 = vmax.f32 %v3942_v8, 0.0 }
 0xe0c   :  { %4586 = vmatprep.subr.bf16.mxu0 %v6803_v41  ;;  %v3941_v41 = vadd.f32 %v9289_v19, %v3919_v35 }
 0xe0d   :  { %6528 = vmatpush3.bf16.msra.mxu1 %v6811_v27  ;;  %v3939_v27 = vadd.f32 %v9289_v19, %v3917_v42  ;;  %v4047_v19 = vsub.s32 3, %v8700_v49 }
 0xe0e   :  { %4399 = vmatmul.mubr.bf16.gmra.mrb[116].mxu0 %v9314_v52  ;;  %4512 = vmatmul.mubr.bf16.gmra.mrb[116].mxu1 %v9314_v52  ;;  %v3957_v46 = vmax.f32 %v3941_v41, 0.0 }
 0xe0f   :  { %4408 = vmatprep.mubr.bf16.mxu0 %v8198_v51  ;;  %4521 = vmatprep.mubr.bf16.mxu1 %v8198_v51  ;;  %v3955_v44 = vmax.f32 %v3939_v27, 0.0 }
 0xe10   :  { %4587 = vmatpush1.bf16.msra.mxu0 %v6801_v50  ;;  %6529 = vmatprep.subr.bf16.mxu1 %v6815_v13  ;;  %v4031_v34 = vpack.c.bf16 %v3958_v31, %v3957_v46  ;;  %v9399_v50 = vrot.slane %v9387_v38, %v4039_v23 }
 0xe11   :  { %4588 = vmatprep.subr.bf16.mxu0 %v6806_v61  ;;  %6530 = vmatpush3.bf16.msra.mxu1 %v6815_v13  ;;  %v4030_v63 = vpack.c.bf16 %v3956_v32, %v3955_v44 }
 0xe12   :  { %6531 = vmatprep.subr.bf16.mxu1 %v6816_v22 }
 0xe14   :  { %4589 = vmatpush1.bf16.msra.mxu0 %v6804_v18 }
 0xe15   :  { %4590 = vmatprep.subr.bf16.mxu0 %v6809_v5  ;;  %6532 = vmatpush3.bf16.msra.mxu1 %v6816_v22 }
 0xe16   :  { %4409 = vmatmul.mubr.bf16.gmra.mrb[120].mxu0 %v9326_v29  ;;  %4522 = vmatmul.mubr.bf16.gmra.mrb[120].mxu1 %v9326_v29 }
 0xe17   :  { %4418 = vmatprep.mubr.bf16.mxu0 %v8198_v51  ;;  %4531 = vmatprep.mubr.bf16.mxu1 %v8198_v51 }
 0xe18   :  { %4591 = vmatpush1.bf16.msra.mxu0 %v6807_v30  ;;  %6533 = vmatprep.subr.bf16.mxu1 %v6820_v56 }
 0xe19   :  { %4592 = vmatprep.subr.bf16.mxu0 %v6814_v48  ;;  %6534 = vmatpush3.bf16.msra.mxu1 %v6820_v56 }
 0xe1a   :  { %6535 = vmatprep.subr.bf16.mxu1 %v6821_v2 }
 0xe1c   :  { %4593 = vmatpush1.bf16.msra.mxu0 %v6812_v43 }
 0xe1d   :  { %4594 = vmatprep.subr.bf16.mxu0 %v6819_v45  ;;  %6536 = vmatpush3.bf16.msra.mxu1 %v6821_v2 }
 0xe1e   :  { %4419 = vmatmul.mubr.bf16.gmra.mrb[124].mxu0 %v9338_v54  ;;  %4532 = vmatmul.mubr.bf16.gmra.mrb[124].mxu1 %v9338_v54 }
 0xe1f   :  { %4428 = vmatprep.mubr.bf16.mxu0 %v8198_v51  ;;  %4541 = vmatprep.mubr.bf16.mxu1 %v8198_v51 }
 0xe20   :  { %4595 = vmatpush1.bf16.msra.mxu0 %v6817_v6  ;;  %6537 = vmatprep.subr.bf16.mxu1 %v6825_v9 }
 0xe21   :  { %4596 = vmatprep.subr.bf16.mxu0 %v6824_v11  ;;  %6538 = vmatpush3.bf16.msra.mxu1 %v6825_v9 }
 0xe22   :  { %6539 = vmatprep.subr.bf16.mxu1 %v6826_v16 }
 0xe24   :  { %4597 = vmatpush1.bf16.msra.mxu0 %v6822_v39 }
 0xe25   :  { %6540 = vmatpush3.bf16.msra.mxu1 %v6826_v16 }
 0xe26   :  { %4429 = vmatmul.mubr.bf16.gmra.mrb[128].mxu0 %v4028_v36  ;;  %4542 = vmatmul.mubr.bf16.gmra.mrb[128].mxu1 %v4028_v36 }
 0xe27   :  { %4438 = vmatprep.mubr.bf16.mxu0 %v8198_v51  ;;  %4551 = vmatprep.mubr.bf16.mxu1 %v8198_v51 }
 0xe2e   :  { %4439 = vmatmul.mubr.bf16.gmra.mrb[132].mxu0 %v4029_v57  ;;  %4552 = vmatmul.mubr.bf16.gmra.mrb[132].mxu1 %v4029_v57 }
 0xe2f   :  { %4448 = vmatprep.mubr.bf16.mxu0 %v8198_v51  ;;  %4561 = vmatprep.mubr.bf16.mxu1 %v8198_v51 }
 0xe36   :  { %4449 = vmatmul.mubr.bf16.gmra.mrb[136].mxu0 %v4030_v63  ;;  %4562 = vmatmul.mubr.bf16.gmra.mrb[136].mxu1 %v4030_v63 }
 0xe37   :  { %4458 = vmatprep.mubr.bf16.mxu0 %v8198_v51  ;;  %4571 = vmatprep.mubr.bf16.mxu1 %v8198_v51 }
 0xe3e   :  { %4459 = vmatmul.mubr.bf16.gmra.mrb[140].mxu0 %v4031_v34  ;;  %4572 = vmatmul.mubr.bf16.gmra.mrb[140].mxu1 %v4031_v34 }
 0xe3f   :  { %6541 = vmatprep.mubr.bf16.mxu1 %v9301_v59  ;;  %4614 = vmatprep.mubr.bf16.mxu0 %v8198_v51 }
 0xe46   :  { %4615 = vmatmul.mubr.bf16.vlgmr.msra.gmra.mrb[144].mxu0 %v9301_v59  ;;  %6542 = vmatmul.mubr.bf16.vlgmr.msra.gmra.mrb[144].mxu1 %v9314_v52  ;;  %v9393_v59 = vrot.slane %v9387_v38, %v8703_v15 }
 0xe47   :  { %6545 = vmatprep.mubr.bf16.mxu1 %v9326_v29  ;;  %4624 = vmatprep.mubr.bf16.mxu0 %v8198_v51 }
 0xe4e   :  { %4625 = vmatmul.mubr.bf16.gmra.mrb[148].mxu0 %v9314_v52  ;;  %6546 = vmatmul.mubr.bf16.gmra.mrb[148].mxu1 %v9338_v54  ;;  %v9396_v52 = vrot.slane %v9387_v38, %v4043_v40 }
 0xe4f   :  { %6549 = vmatprep.mubr.bf16.mxu1 %v4028_v36  ;;  %4634 = vmatprep.mubr.bf16.mxu0 %v8198_v51 }
 0xe56   :  { %4635 = vmatmul.mubr.bf16.gmra.mrb[152].mxu0 %v9326_v29  ;;  %6550 = vmatmul.mubr.bf16.gmra.mrb[152].mxu1 %v4029_v57 }
 0xe57   :  { %6553 = vmatprep.mubr.bf16.mxu1 %v4030_v63  ;;  %4644 = vmatprep.mubr.bf16.mxu0 %v8198_v51 }
 0xe5e   :  { %4645 = vmatmul.mubr.bf16.gmra.mrb[156].mxu0 %v9338_v54  ;;  %6554 = vmatmul.mubr.bf16.gmra.mrb[156].mxu1 %v4031_v34 }
 0xe5f   :  { %4654 = vmatprep.mubr.bf16.mxu0 %v8198_v51 }
 0xe66   :  { %4655 = vmatmul.mubr.bf16.gmra.mrb[160].mxu0 %v4028_v36 }
 0xe67   :  { %4664 = vmatprep.mubr.bf16.mxu0 %v8198_v51 }
 0xe6e   :  { %4665 = vmatmul.mubr.bf16.gmra.mrb[164].mxu0 %v4029_v57 }
 0xe6f   :  { %4674 = vmatprep.mubr.bf16.mxu0 %v8198_v51 }
 0xe76   :  { %4675 = vmatmul.mubr.bf16.gmra.mrb[168].mxu0 %v4030_v63 }
 0xe77   :  { %4684 = vmatprep.mubr.bf16.mxu0 %v8198_v51  ;;  %v9402_v51 = vrot.slane %v9387_v38, %v4047_v19 }
 0xe7e   :  { %4685 = vmatmul.mubr.bf16.gmra.mrb[172].mxu0 %v4031_v34 }
 0xed9   :  { %v4390_v13 = vpop.f32.mrb[112].mxu0  ;;  %v4503_v61 = vpop.f32.mrb[112].mxu1 }
 0xeda   :  { %v4391_v22 = vadd.f32 %v4390_v13, %v9393_v59  ;;  %v4504_v25 = vadd.f32 %v4503_v61, %v9396_v52  ;;  %v4392_v62 = vpop.f32.mrb[113].mxu0  ;;  %v4505_v18 = vpop.f32.mrb[113].mxu1 }
 0xedb   :  { %v4393_v15 = vadd.f32 %v4392_v62, %v9399_v50  ;;  %v4506_v5 = vadd.f32 %v4505_v18, %v9402_v51  ;;  %v4394_v17 = vpop.f32.mrb[114].mxu0  ;;  %v4507_v14 = vpop.f32.mrb[114].mxu1 }
 0xedc   :  { %v5821_v29 = vmul.f32 -1.442695, %v4391_v22  ;;  %v5823_v12 = vmul.f32 -1.442695, %v4504_v25  ;;  %v4395_v21 = vadd.f32 %v4394_v17, %v9393_v59  ;;  %v4508_v30 = vadd.f32 %v4507_v14, %v9396_v52  ;;  %v4396_v56 = vpop.f32.mrb[115].mxu0  ;;  %v4509_v48 = vpop.f32.mrb[115].mxu1 }
 0xedd   :  { %v5822_v2 = vmul.f32 -1.442695, %v4393_v15  ;;  %v5824_v7 = vmul.f32 -1.442695, %v4506_v5  ;;  %v4397_v28 = vadd.f32 %v4396_v56, %v9399_v50  ;;  %v4510_v43 = vadd.f32 %v4509_v48, %v9402_v51 }
 0xede   :  { %6843 = vpow2.f32 %v5821_v29  ;;  %v5828_v45 = vmul.f32 -1.442695, %v4395_v21  ;;  %v5830_v1 = vmul.f32 -1.442695, %v4508_v30 }
 0xedf   :  { %6845 = vpow2.f32 %v5823_v12  ;;  %v5829_v3 = vmul.f32 -1.442695, %v4397_v28  ;;  %v5831_v54 = vmul.f32 -1.442695, %v4510_v43 }
 0xee0   :  { %6847 = vpow2.f32 %v5822_v2 }
 0xee1   :  { %6849 = vpow2.f32 %v5824_v7  ;;  %v4400_v10 = vpop.f32.mrb[116].mxu0  ;;  %v4513_v47 = vpop.f32.mrb[116].mxu1 }
 0xee2   :  { %6851 = vpow2.f32 %v5828_v45  ;;  %v4401_v6 = vadd.f32 %v4400_v10, %v9393_v59  ;;  %v4514_v9 = vadd.f32 %v4513_v47, %v9396_v52  ;;  %v4402_v11 = vpop.f32.mrb[117].mxu0  ;;  %v4515_v16 = vpop.f32.mrb[117].mxu1 }
 0xee3   :  { %6853 = vpow2.f32 %v5830_v1  ;;  %v4403_v60 = vadd.f32 %v4402_v11, %v9399_v50  ;;  %v4516_v58 = vadd.f32 %v4515_v16, %v9402_v51  ;;  %v4404_v39 = vpop.f32.mrb[118].mxu0  ;;  %v4517_v4 = vpop.f32.mrb[118].mxu1 }
 0xee4   :  { %6855 = vpow2.f32 %v5829_v3  ;;  %v5835_v24 = vmul.f32 -1.442695, %v4401_v6  ;;  %v5837_v36 = vmul.f32 -1.442695, %v4514_v9  ;;  %v4405_v53 = vadd.f32 %v4404_v39, %v9393_v59  ;;  %v4406_v33 = vpop.f32.mrb[119].mxu0  ;;  %v4519_v55 = vpop.f32.mrb[119].mxu1 }
 0xee5   :  { %6857 = vpow2.f32 %v5831_v54  ;;  %v5836_v20 = vmul.f32 -1.442695, %v4403_v60  ;;  %v5838_v0 = vmul.f32 -1.442695, %v4516_v58  ;;  %v4518_v14 = vadd.f32 %v4517_v4, %v9396_v52 }
 0xee6   :  { %6859 = vpow2.f32 %v5835_v24  ;;  %v5842_v42 = vmul.f32 -1.442695, %v4405_v53  ;;  %v4407_v21 = vadd.f32 %v4406_v33, %v9399_v50  ;;  %v4520_v2 = vadd.f32 %v4519_v55, %v9402_v51 }
 0xee7   :  { %6861 = vpow2.f32 %v5837_v36  ;;  %v5844_v6 = vmul.f32 -1.442695, %v4518_v14 }
 0xee8   :  { %v6844_v26 = vpop.eup %6843  ;;  %6863 = vpow2.f32 %v5836_v20  ;;  %v5843_v39 = vmul.f32 -1.442695, %v4407_v21  ;;  %v5845_v53 = vmul.f32 -1.442695, %v4520_v2 }
 0xee9   :  { %v6846_v57 = vpop.eup %6845  ;;  %v5128_v27 = vadd.f32 1.0, %v6844_v26  ;;  %6865 = vpow2.f32 %v5838_v0  ;;  %v4410_v32 = vpop.f32.mrb[120].mxu0 }
 0xeea   :  { %v4523_v44 = vpop.f32.mrb[120].mxu1  ;;  %v6848_v35 = vpop.eup %6847  ;;  %v5130_v37 = vadd.f32 1.0, %v6846_v57  ;;  %6867 = vpow2.f32 %v5842_v42  ;;  %v4411_v1 = vadd.f32 %v4410_v32, %v9393_v59 }
 0xeeb   :  { %v4412_v63 = vpop.f32.mrb[121].mxu0  ;;  %v4525_v41 = vpop.f32.mrb[121].mxu1  ;;  %6869 = vrcp.f32 %v5128_v27  ;;  %v5129_v46 = vadd.f32 1.0, %v6848_v35  ;;  %v4524_v9 = vadd.f32 %v4523_v44, %v9396_v52 }
 0xeec   :  { %v6850_v8 = vpop.eup %6849  ;;  %v4414_v31 = vpop.f32.mrb[122].mxu0  ;;  %6871 = vrcp.f32 %v5130_v37  ;;  %v4413_v4 = vadd.f32 %v4412_v63, %v9399_v50  ;;  %v4526_v33 = vadd.f32 %v4525_v41, %v9402_v51  ;;  %v5849_v20 = vmul.f32 -1.442695, %v4411_v1 }
 0xeed   :  { %v9417_v34 = vpop.f32.mrb[122].mxu1  ;;  %v6852_v40 = vpop.eup %6851  ;;  %v5131_v23 = vadd.f32 1.0, %v6850_v8  ;;  %6873 = vrcp.f32 %v5129_v46  ;;  %v4415_v0 = vadd.f32 %v4414_v31, %v9393_v59  ;;  %v5851_v26 = vmul.f32 -1.442695, %v4524_v9 }
 0xeee   :  { %v9419_v19 = vpop.f32.mrb[123].mxu0  ;;  %v6854_v13 = vpop.eup %6853  ;;  %v5135_v61 = vadd.f32 1.0, %v6852_v40  ;;  %v4528_v57 = vadd.f32 %v9417_v34, %v9396_v52  ;;  %v5850_v32 = vmul.f32 -1.442695, %v4413_v4  ;;  %v5852_v41 = vmul.f32 -1.442695, %v4526_v33 }
 0xeef   :  { %v9421_v22 = vpop.f32.mrb[123].mxu1  ;;  %v6856_v25 = vpop.eup %6855  ;;  %6875 = vrcp.f32 %v5131_v23  ;;  %v5137_v62 = vadd.f32 1.0, %v6854_v13  ;;  %v4417_v44 = vadd.f32 %v9419_v19, %v9399_v50  ;;  %v5856_v40 = vmul.f32 -1.442695, %v4415_v0 }
 0xef0   :  { %v6858_v18 = vpop.eup %6857  ;;  %6877 = vrcp.f32 %v5135_v61  ;;  %v5136_v15 = vadd.f32 1.0, %v6856_v25  ;;  %v4530_v8 = vadd.f32 %v9421_v22, %v9402_v51  ;;  %v5858_v25 = vmul.f32 -1.442695, %v4528_v57 }
 0xef1   :  { %v6860_v5 = vpop.eup %6859  ;;  %6879 = vrcp.f32 %v5137_v62  ;;  %v5138_v17 = vadd.f32 1.0, %v6858_v18  ;;  %v4420_v30 = vpop.f32.mrb[124].mxu0 }
 0xef2   :  { %v6862_v29 = vpop.eup %6861  ;;  %6881 = vrcp.f32 %v5136_v15  ;;  %v5142_v12 = vadd.f32 1.0, %v6860_v5  ;;  %v4533_v7 = vpop.f32.mrb[124].mxu1  ;;  %v4421_v23 = vadd.f32 %v4420_v30, %v9393_v59  ;;  %v5857_v5 = vmul.f32 -1.442695, %v4417_v44 }
 0xef3   :  { %v6864_v56 = vpop.eup %6863  ;;  %6883 = vrcp.f32 %v5138_v17  ;;  %v5144_v48 = vadd.f32 1.0, %v6862_v29  ;;  %v9426_v28 = vpop.f32.mrb[125].mxu0  ;;  %v4534_v22 = vadd.f32 %v4533_v7, %v9396_v52  ;;  %v5859_v14 = vmul.f32 -1.442695, %v4530_v8 }
 0xef4   :  { %v6866_v43 = vpop.eup %6865  ;;  %6885 = vrcp.f32 %v5142_v12  ;;  %v5143_v45 = vadd.f32 1.0, %v6864_v56  ;;  %v9429_v3 = vpop.f32.mrb[125].mxu1  ;;  %v5863_v21 = vmul.f32 -1.442695, %v4421_v23  ;;  %v4423_v33 = vadd.f32 %v9426_v28, %v9399_v50 }
 0xef5   :  { %v9431_v54 = vpop.f32.mrb[126].mxu0  ;;  %v6868_v10 = vpop.eup %6867  ;;  %6887 = vrcp.f32 %v5144_v48  ;;  %v5145_v47 = vadd.f32 1.0, %v6866_v43  ;;  %v5865_v56 = vmul.f32 -1.442695, %v4534_v22 }
 0xef6   :  { %v9434_v11 = vpop.f32.mrb[126].mxu1  ;;  %v9436_v16 = vpop.f32.mrb[127].mxu0  ;;  %6889 = vrcp.f32 %v5143_v45  ;;  %v5149_v58 = vadd.f32 1.0, %v6868_v10  ;;  %v4425_v22 = vadd.f32 %v9431_v54, %v9393_v59 }
 0xef7   :  { %v6870_v60 = vpop.eup %6869  ;;  %v9439_v24 = vpop.f32.mrb[127].mxu1  ;;  %6891 = vrcp.f32 %v5145_v47 }
 0xef8   :  { %v6872_v36 = vpop.eup %6871  ;;  %5464 = vst [vmem:[#allocation56] sm:$0xff] %v6870_v60  ;;  %6893 = vrcp.f32 %v5149_v58 }
 0xef9   :  { %v6874_v55 = vpop.eup %6873  ;;  %5466 = vst [vmem:[#allocation56 + $0x10] sm:$0xff] %v6872_v36  ;;  %6895 = vpow2.f32 %v5844_v6  ;;  %v9447_v35 = vpop.f32.mrb[128].mxu0 }
 0xefa   :  { %v6876_v42 = vpop.eup %6875  ;;  %5465 = vst [vmem:[#allocation56 + $0x8] sm:$0xff] %v6874_v55  ;;  %6897 = vpow2.f32 %v5843_v39  ;;  %v9449_v37 = vpop.f32.mrb[128].mxu1 }
 0xefb   :  { %v6878_v27 = vpop.eup %6877  ;;  %5467 = vst [vmem:[#allocation56 + $0x18] sm:$0xff] %v6876_v42  ;;  %6899 = vpow2.f32 %v5845_v53  ;;  %v9453_v46 = vpop.f32.mrb[129].mxu0  ;;  %v4536_v42 = vadd.f32 %v9429_v3, %v9402_v51 }
 0xefc   :  { %v6880_v63 = vpop.eup %6879  ;;  %5471 = vst [vmem:[#allocation56 + $0x38] sm:$0xff] %v6878_v27  ;;  %v9455_v31 = vpop.f32.mrb[129].mxu1  ;;  %6901 = vpow2.f32 %v5849_v20 }
 0xefd   :  { %v6882_v34 = vpop.eup %6881  ;;  %5473 = vst [vmem:[#allocation56 + $0x48] sm:$0xff] %v6880_v63  ;;  %v9458_v19 = vpop.f32.mrb[130].mxu0  ;;  %6903 = vpow2.f32 %v5851_v26 }
 0xefe   :  { %v9460_v13 = vpop.f32.mrb[130].mxu1  ;;  %v6884_v61 = vpop.eup %6883  ;;  %5472 = vst [vmem:[#allocation56 + $0x40] sm:$0xff] %v6882_v34  ;;  %6905 = vpow2.f32 %v5850_v32 }
 0xeff   :  { %v9463_v62 = vpop.f32.mrb[131].mxu0  ;;  %v4549_v18 = vpop.f32.mrb[131].mxu1  ;;  %5474 = vst [vmem:[#allocation56 + $0x50] sm:$0xff] %v6884_v61  ;;  %6907 = vpow2.f32 %v5852_v41 }
 0xf00   :  { %v6886_v15 = vpop.eup %6885  ;;  %v9466_v29 = vadd.f32 %v4549_v18, %v9402_v51  ;;  %6909 = vpow2.f32 %v5856_v40  ;;  %v5864_v40 = vmul.f32 -1.442695, %v4423_v33 }
 0xf01   :  { %v6888_v17 = vpop.eup %6887  ;;  %5478 = vst [vmem:[#allocation56 + $0x70] sm:$0xff] %v6886_v15  ;;  %6911 = vpow2.f32 %v5858_v25  ;;  %v4440_v2 = vpop.f32.mrb[132].mxu0  ;;  %v9496_v25 = vmul.f32 -1.442695, %v4536_v42 }
 0xf02   :  { %v6890_v12 = vpop.eup %6889  ;;  %5480 = vst [vmem:[#allocation56 + $0x80] sm:$0xff] %v6888_v17  ;;  %6913 = vpow2.f32 %v5857_v5  ;;  %v4553_v7 = vpop.f32.mrb[132].mxu1  ;;  %v9469_v45 = vadd.f32 %v4440_v2, %v9393_v59  ;;  %v4538_v17 = vadd.f32 %v9434_v11, %v9396_v52  ;;  %v4427_v11 = vadd.f32 %v9436_v16, %v9399_v50 }
 0xf03   :  { %v6892_v30 = vpop.eup %6891  ;;  %5479 = vst [vmem:[#allocation56 + $0x78] sm:$0xff] %v6890_v12  ;;  %6915 = vpow2.f32 %v5859_v14  ;;  %v9472_v1 = vadd.f32 %v4553_v7, %v9396_v52  ;;  %v4442_v10 = vpop.f32.mrb[133].mxu0 }
 0xf04   :  { %v6894_v48 = vpop.eup %6893  ;;  %5481 = vst [vmem:[#allocation56 + $0x88] sm:$0xff] %v6892_v30  ;;  %v4555_v47 = vpop.f32.mrb[133].mxu1  ;;  %6917 = vpow2.f32 %v5863_v21  ;;  %v9475_v60 = vadd.f32 %v4442_v10, %v9399_v50 }
 0xf05   :  { %v6896_v43 = vpop.eup %6895  ;;  %5485 = vst [vmem:[#allocation56 + $0xa8] sm:$0xff] %v6894_v48  ;;  %v9478_v58 = vadd.f32 %v4555_v47, %v9402_v51  ;;  %v4444_v39 = vpop.f32.mrb[134].mxu0  ;;  %6919 = vpow2.f32 %v5865_v56 }
 0xf06   :  { %v6898_v6 = vpop.eup %6897  ;;  %v5151_v9 = vadd.f32 1.0, %v6896_v43  ;;  %v4557_v4 = vpop.f32.mrb[134].mxu1  ;;  %v9485_v32 = vadd.f32 %v4444_v39, %v9393_v59 }
 0xf07   :  { %v6900_v36 = vpop.eup %6899  ;;  %v5150_v53 = vadd.f32 1.0, %v6898_v6  ;;  %v4446_v55 = vpop.f32.mrb[135].mxu0  ;;  %v9488_v44 = vadd.f32 %v4557_v4, %v9396_v52 }
 0xf08   :  { %v6902_v20 = vpop.eup %6901  ;;  %6921 = vrcp.f32 %v5151_v9  ;;  %v5152_v0 = vadd.f32 1.0, %v6900_v36  ;;  %v4559_v26 = vpop.f32.mrb[135].mxu1  ;;  %v9491_v41 = vadd.f32 %v4446_v55, %v9399_v50  ;;  %v5870_v36 = vmul.f32 -1.442695, %v4425_v22 }
 0xf09   :  { %v6904_v57 = vpop.eup %6903  ;;  %6923 = vrcp.f32 %v5150_v53  ;;  %v5156_v27 = vadd.f32 1.0, %v6902_v20  ;;  %v9494_v8 = vadd.f32 %v4559_v26, %v9402_v51  ;;  %v4450_v18 = vpop.f32.mrb[136].mxu0  ;;  %v4540_v53 = vadd.f32 %v9439_v24, %v9402_v51 }
 0xf0a   :  { %v6906_v63 = vpop.eup %6905  ;;  %6925 = vrcp.f32 %v5152_v0  ;;  %v5158_v28 = vadd.f32 1.0, %v6904_v57  ;;  %v9503_v14 = vadd.f32 %v4450_v18, %v9393_v59  ;;  %v4563_v12 = vpop.f32.mrb[136].mxu1  ;;  %v4431_v0 = vadd.f32 %v9447_v35, %v9393_v59 }
 0xf0b   :  { %v6908_v3 = vpop.eup %6907  ;;  %6927 = vrcp.f32 %v5156_v27  ;;  %v5157_v34 = vadd.f32 1.0, %v6906_v63  ;;  %v4452_v21 = vpop.f32.mrb[137].mxu0  ;;  %v9506_v48 = vadd.f32 %v4563_v12, %v9396_v52  ;;  %v5872_v63 = vmul.f32 -1.442695, %v4538_v17 }
 0xf0c   :  { %v6910_v23 = vpop.eup %6909  ;;  %6929 = vrcp.f32 %v5158_v28  ;;  %v5159_v61 = vadd.f32 1.0, %v6908_v3  ;;  %v9509_v54 = vadd.f32 %v4452_v21, %v9399_v50  ;;  %v4565_v2 = vpop.f32.mrb[137].mxu1  ;;  %v4544_v28 = vadd.f32 %v9449_v37, %v9396_v52 }
 0xf0d   :  { %v6912_v15 = vpop.eup %6911  ;;  %6931 = vrcp.f32 %v5157_v34  ;;  %v5163_v5 = vadd.f32 1.0, %v6910_v23  ;;  %v4454_v7 = vpop.f32.mrb[138].mxu0  ;;  %v9514_v47 = vadd.f32 %v4565_v2, %v9402_v51  ;;  %v5871_v34 = vmul.f32 -1.442695, %v4427_v11 }
 0xf0e   :  { %v6914_v30 = vpop.eup %6913  ;;  %6933 = vrcp.f32 %v5159_v61  ;;  %v5165_v56 = vadd.f32 1.0, %v6912_v15  ;;  %v4567_v6 = vpop.f32.mrb[138].mxu1  ;;  %v9521_v16 = vadd.f32 %v4454_v7, %v9393_v59  ;;  %v5873_v23 = vmul.f32 -1.442695, %v4540_v53 }
 0xf0f   :  { %v6916_v43 = vpop.eup %6915  ;;  %6935 = vrcp.f32 %v5163_v5  ;;  %v5164_v10 = vadd.f32 1.0, %v6914_v30  ;;  %v4456_v9 = vpop.f32.mrb[139].mxu0  ;;  %v9524_v57 = vadd.f32 %v4567_v6, %v9396_v52  ;;  %v4433_v61 = vadd.f32 %v9453_v46, %v9399_v50 }
 0xf10   :  { %v6918_v39 = vpop.eup %6917  ;;  %6937 = vrcp.f32 %v5165_v56  ;;  %v5166_v4 = vadd.f32 1.0, %v6916_v43  ;;  %v4569_v33 = vpop.f32.mrb[139].mxu1  ;;  %v9527_v27 = vadd.f32 %v4456_v9, %v9399_v50  ;;  %v4546_v5 = vadd.f32 %v9455_v31, %v9402_v51 }
 0xf11   :  { %v6920_v55 = vpop.eup %6919  ;;  %6939 = vrcp.f32 %v5164_v10  ;;  %v5170_v20 = vadd.f32 1.0, %v6918_v39  ;;  %v9532_v35 = vadd.f32 %v4569_v33, %v9402_v51  ;;  %v4460_v22 = vpop.f32.mrb[140].mxu0  ;;  %v5877_v46 = vmul.f32 -1.442695, %v4431_v0 }
 0xf12   :  { %v6922_v42 = vpop.eup %6921  ;;  %6941 = vrcp.f32 %v5166_v4  ;;  %v5172_v26 = vadd.f32 1.0, %v6920_v55  ;;  %v4573_v18 = vpop.f32.mrb[140].mxu1  ;;  %v9539_v37 = vadd.f32 %v4460_v22, %v9393_v59  ;;  %v5879_v43 = vmul.f32 -1.442695, %v4544_v28 }
 0xf13   :  { %v6924_v24 = vpop.eup %6923  ;;  %5487 = vst [vmem:[#allocation56 + $0xb8] sm:$0xff] %v6922_v42  ;;  %6943 = vrcp.f32 %v5170_v20  ;;  %v9542_v17 = vadd.f32 %v4573_v18, %v9396_v52  ;;  %v4462_v12 = vpop.f32.mrb[141].mxu0  ;;  %v4435_v10 = vadd.f32 %v9458_v19, %v9393_v59  ;;  %v5878_v39 = vmul.f32 -1.442695, %v4433_v61 }
 0xf14   :  { %v6926_v3 = vpop.eup %6925  ;;  %5486 = vst [vmem:[#allocation56 + $0xb0] sm:$0xff] %v6924_v24  ;;  %6945 = vrcp.f32 %v5172_v26  ;;  %v4575_v21 = vpop.f32.mrb[141].mxu1  ;;  %v9546_v56 = vadd.f32 %v4462_v12, %v9399_v50  ;;  %v4548_v4 = vadd.f32 %v9460_v13, %v9396_v52  ;;  %v4437_v19 = vadd.f32 %v9463_v62, %v9399_v50 }
 0xf15   :  { %v6928_v15 = vpop.eup %6927  ;;  %5488 = vst [vmem:[#allocation56 + $0xc0] sm:$0xff] %v6926_v3  ;;  %6947 = vpow2.f32 %v5864_v40  ;;  %v9549_v40 = vadd.f32 %v4575_v21, %v9402_v51  ;;  %v4464_v31 = vpop.f32.mrb[142].mxu0  ;;  %v5880_v20 = vmul.f32 -1.442695, %v4546_v5 }
 0xf16   :  { %v6930_v30 = vpop.eup %6929  ;;  %5492 = vst [vmem:[#allocation56 + $0xe0] sm:$0xff] %v6928_v15  ;;  %6949 = vpow2.f32 %v9496_v25  ;;  %v4577_v2 = vpop.f32.mrb[142].mxu1  ;;  %v9554_v11 = vadd.f32 %v4464_v31, %v9393_v59  ;;  %v5886_v42 = vmul.f32 -1.442695, %v4548_v4 }
 0xf17   :  { %v6932_v7 = vpop.eup %6931  ;;  %5494 = vst [vmem:[#allocation56 + $0xf0] sm:$0xff] %v6930_v30  ;;  %6951 = vpow2.f32 %v5870_v36  ;;  %v4466_v25 = vpop.f32.mrb[143].mxu0  ;;  %v9559_v53 = vadd.f32 %v4577_v2, %v9396_v52  ;;  %v5884_v52 = vmul.f32 -1.442695, %v4435_v10 }
 0xf18   :  { %v4579_v6 = vpop.f32.mrb[143].mxu1  ;;  %v6934_v9 = vpop.eup %6933  ;;  %5493 = vst [vmem:[#allocation56 + $0xe8] sm:$0xff] %v6932_v7  ;;  %6953 = vpow2.f32 %v5872_v63  ;;  %v9564_v59 = vadd.f32 %v4466_v25, %v9399_v50 }
 0xf19   :  { %v6936_v36 = vpop.eup %6935  ;;  %5495 = vst [vmem:[#allocation56 + $0xf8] sm:$0xff] %v6934_v9  ;;  %6955 = vpow2.f32 %v5871_v34  ;;  %v9567_v33 = vadd.f32 %v4579_v6, %v9402_v51  ;;  %v9569_v26 = vpop.f32.mrb[144].mxu0  ;;  %v5885_v51 = vmul.f32 -1.442695, %v4437_v19 }
 0xf1a   :  { %v6938_v55 = vpop.eup %6937  ;;  %5499 = vst [vmem:[#allocation56 + $0x118] sm:$0xff] %v6936_v36  ;;  %6957 = vpow2.f32 %v5873_v23  ;;  %v9571_v62 = vpop.f32.mrb[144].mxu1 }
 0xf1b   :  { %v6940_v13 = vpop.eup %6939  ;;  %5501 = vst [vmem:[#allocation56 + $0x128] sm:$0xff] %v6938_v55  ;;  %6959 = vpow2.f32 %v5877_v46  ;;  %v9573_v24 = vpop.f32.mrb[145].mxu0 }
 0xf1c   :  { %v6942_v0 = vpop.eup %6941  ;;  %5500 = vst [vmem:[#allocation56 + $0x120] sm:$0xff] %v6940_v13  ;;  %6961 = vpow2.f32 %v5879_v43  ;;  %v9575_v63 = vpop.f32.mrb[145].mxu1 }
 0xf1d   :  { %v6944_v50 = vpop.eup %6943  ;;  %5502 = vst [vmem:[#allocation56 + $0x130] sm:$0xff] %v6942_v0  ;;  %6963 = vpow2.f32 %v5878_v39  ;;  %v9577_v3 = vpop.f32.mrb[146].mxu0 }
 0xf1e   :  { %v6946_v28 = vpop.eup %6945  ;;  %5506 = vst [vmem:[#allocation56 + $0x150] sm:$0xff] %v6944_v50  ;;  %6965 = vpow2.f32 %v5880_v20  ;;  %v9579_v34 = vpop.f32.mrb[146].mxu1 }
 0xf1f   :  { %v6948_v23 = vpop.eup %6947  ;;  %5508 = vst [vmem:[#allocation56 + $0x160] sm:$0xff] %v6946_v28  ;;  %6967 = vpow2.f32 %v5884_v52  ;;  %v9581_v61 = vpop.f32.mrb[147].mxu0 }
 0xf20   :  { %v9583_v22 = vpop.f32.mrb[147].mxu1  ;;  %v6950_v18 = vpop.eup %6949  ;;  %v5171_v15 = vadd.f32 1.0, %v6948_v23  ;;  %6969 = vpow2.f32 %v5886_v42 }
 0xf21   :  { %v6952_v5 = vpop.eup %6951  ;;  %v5173_v12 = vadd.f32 1.0, %v6950_v18  ;;  %6971 = vpow2.f32 %v5885_v51  ;;  %v9585_v43 = vpop.f32.mrb[148].mxu0 }
 0xf22   :  { %v6954_v21 = vpop.eup %6953  ;;  %6973 = vrcp.f32 %v5171_v15  ;;  %v5177_v30 = vadd.f32 1.0, %v6952_v5  ;;  %v9587_v6 = vpop.f32.mrb[148].mxu1 }
 0xf23   :  { %v6956_v46 = vpop.eup %6955  ;;  %6975 = vrcp.f32 %v5173_v12  ;;  %v5179_v31 = vadd.f32 1.0, %v6954_v21  ;;  %v9589_v9 = vpop.f32.mrb[149].mxu0  ;;  %v5887_v12 = vmul.f32 -1.442695, %v9466_v29  ;;  %v5892_v29 = vmul.f32 -1.442695, %v9475_v60 }
 0xf24   :  { %v6958_v2 = vpop.eup %6957  ;;  %6977 = vrcp.f32 %v5177_v30  ;;  %v5178_v7 = vadd.f32 1.0, %v6956_v46  ;;  %v9591_v36 = vpop.f32.mrb[149].mxu1  ;;  %v5891_v46 = vmul.f32 -1.442695, %v9469_v45 }
 0xf25   :  { %v6960_v10 = vpop.eup %6959  ;;  %6979 = vrcp.f32 %v5179_v31  ;;  %v5180_v25 = vadd.f32 1.0, %v6958_v2  ;;  %v9593_v19 = vpop.f32.mrb[150].mxu0 }
 0xf26   :  { %v6962_v39 = vpop.eup %6961  ;;  %6981 = vrcp.f32 %v5178_v7  ;;  %v5184_v4 = vadd.f32 1.0, %v6960_v10  ;;  %v9595_v13 = vpop.f32.mrb[150].mxu1  ;;  %v5893_v7 = vmul.f32 -1.442695, %v9472_v1 }
 0xf27   :  { %v6964_v55 = vpop.eup %6963  ;;  %6983 = vrcp.f32 %v5180_v25  ;;  %v5186_v20 = vadd.f32 1.0, %v6962_v39  ;;  %v9597_v52 = vpop.f32.mrb[151].mxu0 }
 0xf28   :  { %v6966_v0 = vpop.eup %6965  ;;  %6985 = vrcp.f32 %v5184_v4  ;;  %v5185_v42 = vadd.f32 1.0, %v6964_v55  ;;  %v9599_v50 = vpop.f32.mrb[151].mxu1 }
 0xf29   :  { %v6968_v51 = vpop.eup %6967  ;;  %6987 = vrcp.f32 %v5186_v20  ;;  %v5187_v28 = vadd.f32 1.0, %v6966_v0  ;;  %v9603_v31 = vpop.f32.mrb[152].mxu0  ;;  %v5894_v20 = vmul.f32 -1.442695, %v9478_v58  ;;  %v5899_v58 = vmul.f32 -1.442695, %v9491_v41 }
 0xf2a   :  { %v6970_v23 = vpop.eup %6969  ;;  %6989 = vrcp.f32 %v5185_v42  ;;  %v5191_v18 = vadd.f32 1.0, %v6968_v51  ;;  %v9606_v10 = vpop.f32.mrb[152].mxu1  ;;  %v5898_v51 = vmul.f32 -1.442695, %v9485_v32 }
 0xf2b   :  { %v6972_v15 = vpop.eup %6971  ;;  %6991 = vrcp.f32 %v5187_v28  ;;  %v5193_v5 = vadd.f32 1.0, %v6970_v23  ;;  %v9608_v25 = vpop.f32.mrb[153].mxu0  ;;  %v5900_v23 = vmul.f32 -1.442695, %v9488_v44 }
 0xf2c   :  { %v6974_v21 = vpop.eup %6973  ;;  %6993 = vrcp.f32 %v5191_v18  ;;  %v5192_v30 = vadd.f32 1.0, %v6972_v15  ;;  %v9611_v4 = vpop.f32.mrb[153].mxu1  ;;  %v4051_v18 = vsub.s32 4, %v8700_v49 }
 0xf2d   :  { %v6976_v2 = vpop.eup %6975  ;;  %5507 = vst [vmem:[#allocation56 + $0x158] sm:$0xff] %v6974_v21  ;;  %6995 = vrcp.f32 %v5193_v5  ;;  %v9613_v55 = vpop.f32.mrb[154].mxu0  ;;  %v5905_v21 = vmul.f32 -1.442695, %v9503_v14  ;;  %v5906_v14 = vmul.f32 -1.442695, %v9509_v54 }
 0xf2e   :  { %v6978_v39 = vpop.eup %6977  ;;  %5509 = vst [vmem:[#allocation56 + $0x168] sm:$0xff] %v6976_v2  ;;  %6997 = vrcp.f32 %v5192_v30  ;;  %v9616_v0 = vpop.f32.mrb[154].mxu1  ;;  %v5907_v2 = vmul.f32 -1.442695, %v9506_v48  ;;  %v9634_v41 = vrot.slane %v9387_v38, %v4051_v18  ;;  %v5908_v48 = vmul.f32 -1.442695, %v9514_v47 }
 0xf2f   :  { %v6980_v45 = vpop.eup %6979  ;;  %5513 = vst [vmem:[#allocation56 + $0x188] sm:$0xff] %v6978_v39  ;;  %6999 = vpow2.f32 %v5887_v12  ;;  %v9618_v1 = vpop.f32.mrb[155].mxu0  ;;  %v5901_v12 = vmul.f32 -1.442695, %v9494_v8 }
 0xf30   :  { %v6982_v42 = vpop.eup %6981  ;;  %5515 = vst [vmem:[#allocation56 + $0x198] sm:$0xff] %v6980_v45  ;;  %7001 = vpow2.f32 %v5891_v46  ;;  %v9621_v28 = vpop.f32.mrb[155].mxu1 }
 0xf31   :  { %v6984_v60 = vpop.eup %6983  ;;  %5514 = vst [vmem:[#allocation56 + $0x190] sm:$0xff] %v6982_v42  ;;  %7003 = vpow2.f32 %v5893_v7  ;;  %v9628_v30 = vpop.f32.mrb[156].mxu0 }
 0xf32   :  { %v6986_v15 = vpop.eup %6985  ;;  %5516 = vst [vmem:[#allocation56 + $0x1a0] sm:$0xff] %v6984_v60  ;;  %7005 = vpow2.f32 %v5892_v29  ;;  %v9630_v44 = vpop.f32.mrb[156].mxu1 }
 0xf33   :  { %v6988_v5 = vpop.eup %6987  ;;  %5520 = vst [vmem:[#allocation56 + $0x1c0] sm:$0xff] %v6986_v15  ;;  %7007 = vpow2.f32 %v5894_v20  ;;  %v9636_v7 = vpop.f32.mrb[157].mxu0 }
 0xf34   :  { %v6990_v32 = vpop.eup %6989  ;;  %5522 = vst [vmem:[#allocation56 + $0x1d0] sm:$0xff] %v6988_v5  ;;  %7009 = vpow2.f32 %v5898_v51  ;;  %v9638_v8 = vpop.f32.mrb[157].mxu1 }
 0xf35   :  { %v6992_v46 = vpop.eup %6991  ;;  %5521 = vst [vmem:[#allocation56 + $0x1c8] sm:$0xff] %v6990_v32  ;;  %7011 = vpow2.f32 %v5900_v23  ;;  %v4650_v29 = vpop.f32.mrb[158].mxu0 }
 0xf36   :  { %v6994_v39 = vpop.eup %6993  ;;  %5523 = vst [vmem:[#allocation56 + $0x1d8] sm:$0xff] %v6992_v46  ;;  %7013 = vpow2.f32 %v5899_v58  ;;  %v9641_v45 = vpop.f32.mrb[158].mxu1  ;;  %v9645_v38 = vadd.f32 %v4650_v29, %v9634_v41 }
 0xf37   :  { %v6996_v20 = vpop.eup %6995  ;;  %5527 = vst [vmem:[#allocation56 + $0x1f8] sm:$0xff] %v6994_v39  ;;  %7015 = vpow2.f32 %v5901_v12  ;;  %v9647_v42 = vpop.f32.mrb[159].mxu0 }
 0xf38   :  { %v9649_v51 = vpop.f32.mrb[159].mxu1  ;;  %v6998_v60 = vpop.eup %6997  ;;  %5529 = vst [vmem:[#allocation56 + $0x208] sm:$0xff] %v6996_v20  ;;  %7017 = vpow2.f32 %v5905_v21 }
 0xf39   :  { %v7000_v23 = vpop.eup %6999  ;;  %5528 = vst [vmem:[#allocation56 + $0x200] sm:$0xff] %v6998_v60  ;;  %7019 = vpow2.f32 %v5907_v2  ;;  %v4656_v12 = vpop.f32.mrb[160].mxu0 }
 0xf3a   :  { %v7002_v54 = vpop.eup %7001  ;;  %v5194_v18 = vadd.f32 1.0, %v7000_v23  ;;  %7021 = vpow2.f32 %v5906_v14  ;;  %v9652_v39 = vadd.f32 %v4656_v12, %v9634_v41  ;;  %v9654_v21 = vpop.f32.mrb[161].mxu0 }
 0xf3b   :  { %v7004_v15 = vpop.eup %7003  ;;  %v5198_v58 = vadd.f32 1.0, %v7002_v54  ;;  %7023 = vpow2.f32 %v5908_v48  ;;  %v4660_v20 = vpop.f32.mrb[162].mxu0 }
 0xf3c   :  { %v7006_v47 = vpop.eup %7005  ;;  %7025 = vrcp.f32 %v5194_v18  ;;  %v5200_v5 = vadd.f32 1.0, %v7004_v15  ;;  %9862 = vst [vmem:[#allocation94_spill] sm:$0xff] %v9652_v39  ;;  %v9657_v48 = vadd.f32 %v4660_v20, %v9634_v41  ;;  %v9659_v23 = vpop.f32.mrb[163].mxu0 }
 0xf3d   :  { %v7008_v32 = vpop.eup %7007  ;;  %7027 = vrcp.f32 %v5198_v58  ;;  %v5199_v46 = vadd.f32 1.0, %v7006_v47  ;;  %9864 = vst [vmem:[#allocation96_spill] sm:$0xff] %v9659_v23 }
 0xf3e   :  { %v7010_v29 = vpop.eup %7009  ;;  %7029 = vrcp.f32 %v5200_v5  ;;  %v5201_v2 = vadd.f32 1.0, %v7008_v32  ;;  %9863 = vst [vmem:[#allocation95_spill] sm:$0xff] %v9657_v48  ;;  %v4055_v5 = vsub.s32 5, %v8700_v49 }
 0xf3f   :  { %v7012_v14 = vpop.eup %7011  ;;  %7031 = vrcp.f32 %v5199_v46  ;;  %v5205_v60 = vadd.f32 1.0, %v7010_v29 }
 0xf40   :  { %v7014_v54 = vpop.eup %7013  ;;  %7033 = vrcp.f32 %v5201_v2  ;;  %v5207_v18 = vadd.f32 1.0, %v7012_v14  ;;  %v5912_v2 = vmul.f32 -1.442695, %v9521_v16  ;;  %v5913_v16 = vmul.f32 -1.442695, %v9527_v27 }
 0xf41   :  { %v7016_v15 = vpop.eup %7015  ;;  %7035 = vrcp.f32 %v5205_v60  ;;  %v5206_v58 = vadd.f32 1.0, %v7014_v54  ;;  %v4666_v48 = vpop.f32.mrb[164].mxu0  ;;  %v5921_v27 = vmul.f32 -1.442695, %v9542_v17 }
 0xf42   :  { %v7018_v47 = vpop.eup %7017  ;;  %7037 = vrcp.f32 %v5207_v18  ;;  %v5208_v12 = vadd.f32 1.0, %v7016_v15  ;;  %v9664_v14 = vadd.f32 %v4666_v48, %v9634_v41  ;;  %v9666_v60 = vpop.f32.mrb[165].mxu0  ;;  %v5914_v15 = vmul.f32 -1.442695, %v9524_v57 }
 0xf43   :  { %v7020_v32 = vpop.eup %7019  ;;  %7039 = vrcp.f32 %v5206_v58  ;;  %v5212_v46 = vadd.f32 1.0, %v7018_v47  ;;  %v9669_v58 = vld [vmem:[#allocation55] sm:$0xff]  ;;  %v5915_v57 = vmul.f32 -1.442695, %v9532_v35  ;;  %v5922_v35 = vmul.f32 -1.442695, %v9549_v40 }
 0xf44   :  { %v7022_v29 = vpop.eup %7021  ;;  %7041 = vrcp.f32 %v5208_v12  ;;  %v5214_v20 = vadd.f32 1.0, %v7020_v32  ;;  %v9672_v47 = vrot.slane %v9669_v58, %v4055_v5  ;;  %v4670_v12 = vpop.f32.mrb[166].mxu0 }
 0xf45   :  { %v7024_v39 = vpop.eup %7023  ;;  %7043 = vrcp.f32 %v5212_v46  ;;  %v5213_v23 = vadd.f32 1.0, %v7022_v29  ;;  %v9676_v48 = vadd.f32 %v4670_v12, %v9634_v41  ;;  %v4672_v46 = vpop.f32.mrb[167].mxu0 }
 0xf46   :  { %v7026_v54 = vpop.eup %7025  ;;  %7045 = vrcp.f32 %v5214_v20  ;;  %v5215_v18 = vadd.f32 1.0, %v7024_v39  ;;  %v9680_v39 = vadd.f32 %v4672_v46, %v9672_v47  ;;  %v5919_v20 = vmul.f32 -1.442695, %v9539_v37 }
 0xf47   :  { %v7028_v32 = vpop.eup %7027  ;;  %5530 = vst [vmem:[#allocation56 + $0x210] sm:$0xff] %v7026_v54  ;;  %7047 = vrcp.f32 %v5213_v23  ;;  %v5926_v37 = vmul.f32 -1.442695, %v9554_v11  ;;  %v5927_v11 = vmul.f32 -1.442695, %v9564_v59 }
 0xf48   :  { %v7030_v29 = vpop.eup %7029  ;;  %5534 = vst [vmem:[#allocation56 + $0x230] sm:$0xff] %v7028_v32  ;;  %7049 = vrcp.f32 %v5215_v18  ;;  %v5920_v18 = vmul.f32 -1.442695, %v9546_v56  ;;  %v5928_v56 = vmul.f32 -1.442695, %v9559_v53 }
 0xf49   :  { %v7032_v5 = vpop.eup %7031  ;;  %5536 = vst [vmem:[#allocation56 + $0x240] sm:$0xff] %v7030_v29  ;;  %7051 = vpow2.f32 %v5912_v2  ;;  %v4676_v32 = vpop.f32.mrb[168].mxu0  ;;  %v4617_v2 = vadd.f32 %v9569_v26, %v9634_v41 }
 0xf4a   :  { %v7034_v23 = vpop.eup %7033  ;;  %5535 = vst [vmem:[#allocation56 + $0x238] sm:$0xff] %v7032_v5  ;;  %7053 = vpow2.f32 %v5914_v15  ;;  %v9690_v17 = vadd.f32 %v4676_v32, %v9634_v41  ;;  %v4678_v15 = vpop.f32.mrb[169].mxu0 }
 0xf4b   :  { %v7036_v54 = vpop.eup %7035  ;;  %5537 = vst [vmem:[#allocation56 + $0x248] sm:$0xff] %v7034_v23  ;;  %7055 = vpow2.f32 %v5913_v16  ;;  %v9694_v40 = vadd.f32 %v4678_v15, %v9672_v47  ;;  %v4680_v29 = vpop.f32.mrb[170].mxu0  ;;  %v5929_v23 = vmul.f32 -1.442695, %v9567_v33 }
 0xf4c   :  { %v7038_v12 = vpop.eup %7037  ;;  %5541 = vst [vmem:[#allocation56 + $0x268] sm:$0xff] %v7036_v54  ;;  %7057 = vpow2.f32 %v5915_v57  ;;  %v9698_v26 = vadd.f32 %v4680_v29, %v9634_v41  ;;  %v4682_v5 = vpop.f32.mrb[171].mxu0  ;;  %v5825_v54 = vmul.f32 -1.442695, %v4617_v2 }
 0xf4d   :  { %v7040_v46 = vpop.eup %7039  ;;  %5543 = vst [vmem:[#allocation56 + $0x278] sm:$0xff] %v7038_v12  ;;  %7059 = vpow2.f32 %v5919_v20  ;;  %v9702_v53 = vadd.f32 %v4682_v5, %v9672_v47 }
 0xf4e   :  { %v7042_v16 = vpop.eup %7041  ;;  %5542 = vst [vmem:[#allocation56 + $0x270] sm:$0xff] %v7040_v46  ;;  %7061 = vpow2.f32 %v5921_v27 }
 0xf4f   :  { %v7044_v57 = vpop.eup %7043  ;;  %5544 = vst [vmem:[#allocation56 + $0x280] sm:$0xff] %v7042_v16  ;;  %7063 = vpow2.f32 %v5920_v18  ;;  %v4059_v18 = vsub.s32 6, %v8700_v49 }
 0xf50   :  { %v7046_v20 = vpop.eup %7045  ;;  %5548 = vst [vmem:[#allocation56 + $0x2a0] sm:$0xff] %v7044_v57  ;;  %7065 = vpow2.f32 %v5922_v35 }
 0xf51   :  { %v7048_v27 = vpop.eup %7047  ;;  %5550 = vst [vmem:[#allocation56 + $0x2b0] sm:$0xff] %v7046_v20  ;;  %7067 = vpow2.f32 %v5926_v37  ;;  %v4686_v35 = vpop.f32.mrb[172].mxu0  ;;  %v9712_v5 = vrot.slane %v9669_v58, %v4059_v18 }
 0xf52   :  { %v7050_v12 = vpop.eup %7049  ;;  %5549 = vst [vmem:[#allocation56 + $0x2a8] sm:$0xff] %v7048_v27  ;;  %7069 = vpow2.f32 %v5928_v56  ;;  %v9706_v16 = vadd.f32 %v4686_v35, %v9634_v41  ;;  %v4688_v37 = vpop.f32.mrb[173].mxu0 }
 0xf53   :  { %v7052_v59 = vpop.eup %7051  ;;  %5551 = vst [vmem:[#allocation56 + $0x2b8] sm:$0xff] %v7050_v12  ;;  %7071 = vpow2.f32 %v5927_v11  ;;  %v9709_v56 = vadd.f32 %v4688_v37, %v9672_v47  ;;  %v4690_v57 = vpop.f32.mrb[174].mxu0  ;;  %v4738_v18 = vadd.f32 %v9571_v62, %v9712_v5 }
 0xf54   :  { %v7054_v32 = vpop.eup %7053  ;;  %v5219_v46 = vadd.f32 1.0, %v7052_v59  ;;  %7073 = vpow2.f32 %v5929_v23  ;;  %v9715_v20 = vadd.f32 %v4690_v57, %v9634_v41  ;;  %v4692_v23 = vpop.f32.mrb[175].mxu0 }
 0xf55   :  { %v7056_v33 = vpop.eup %7055  ;;  %v5221_v15 = vadd.f32 1.0, %v7054_v32  ;;  %7075 = vpow2.f32 %v5825_v54  ;;  %v9718_v12 = vadd.f32 %v4692_v23, %v9672_v47 }
 0xf56   :  { %v7058_v2 = vpop.eup %7057  ;;  %7077 = vrcp.f32 %v5219_v46  ;;  %v5220_v29 = vadd.f32 1.0, %v7056_v33 }
 0xf57   :  { %v7060_v11 = vpop.eup %7059  ;;  %7079 = vrcp.f32 %v5221_v15  ;;  %v5222_v49 = vadd.f32 1.0, %v7058_v2  ;;  %v4619_v2 = vadd.f32 %v9573_v24, %v9672_v47 }
 0xf58   :  { %v7062_v27 = vpop.eup %7061  ;;  %7081 = vrcp.f32 %v5220_v29  ;;  %v5226_v54 = vadd.f32 1.0, %v7060_v11  ;;  %v4730_v11 = vadd.f32 %v9575_v63, %v9712_v5  ;;  %v4623_v63 = vadd.f32 %v9581_v61, %v9672_v47 }
 0xf59   :  { %v7064_v59 = vpop.eup %7063  ;;  %7083 = vrcp.f32 %v5222_v49  ;;  %v5228_v32 = vadd.f32 1.0, %v7062_v27  ;;  %v4621_v27 = vadd.f32 %v9577_v3, %v9634_v41  ;;  %v4733_v3 = vadd.f32 %v9583_v22, %v9712_v5 }
 0xf5a   :  { %v7066_v46 = vpop.eup %7065  ;;  %7085 = vrcp.f32 %v5226_v54  ;;  %v5227_v35 = vadd.f32 1.0, %v7064_v59  ;;  %v5841_v59 = vmul.f32 -1.442695, %v4738_v18  ;;  %v4754_v61 = vadd.f32 %v9587_v6, %v9712_v5 }
 0xf5b   :  { %v7068_v33 = vpop.eup %7067  ;;  %7087 = vrcp.f32 %v5228_v32  ;;  %v5229_v58 = vadd.f32 1.0, %v7066_v46  ;;  %v4741_v32 = vadd.f32 %v9579_v34, %v9712_v5  ;;  %v5832_v18 = vmul.f32 -1.442695, %v4621_v27 }
 0xf5c   :  { %v7070_v15 = vpop.eup %7069  ;;  %7089 = vrcp.f32 %v5227_v35  ;;  %v5233_v37 = vadd.f32 1.0, %v7068_v33  ;;  %v5826_v35 = vmul.f32 -1.442695, %v4619_v2  ;;  %v4627_v34 = vadd.f32 %v9585_v43, %v9634_v41 }
 0xf5d   :  { %v7072_v29 = vpop.eup %7071  ;;  %7091 = vrcp.f32 %v5229_v58  ;;  %v5235_v57 = vadd.f32 1.0, %v7070_v15  ;;  %v5827_v58 = vmul.f32 -1.442695, %v4730_v11  ;;  %v5848_v2 = vmul.f32 -1.442695, %v4741_v32 }
 0xf5e   :  { %v7074_v49 = vpop.eup %7073  ;;  %7093 = vrcp.f32 %v5233_v37  ;;  %v5234_v23 = vadd.f32 1.0, %v7072_v29  ;;  %v4629_v22 = vadd.f32 %v9589_v9, %v9672_v47  ;;  %v4746_v43 = vadd.f32 %v9591_v36, %v9712_v5 }
 0xf5f   :  { %v7076_v54 = vpop.eup %7075  ;;  %7095 = vrcp.f32 %v5235_v57  ;;  %v5236_v62 = vadd.f32 1.0, %v7074_v49  ;;  %v5833_v57 = vmul.f32 -1.442695, %v4623_v63  ;;  %v5834_v49 = vmul.f32 -1.442695, %v4733_v3 }
 0xf60   :  { %v7078_v24 = vpop.eup %7077  ;;  %7097 = vrcp.f32 %v5234_v23  ;;  %v5132_v46 = vadd.f32 1.0, %v7076_v54  ;;  %v5839_v27 = vmul.f32 -1.442695, %v4627_v34  ;;  %v4631_v6 = vadd.f32 %v9593_v19, %v9634_v41 }
 0xf61   :  { %v7080_v33 = vpop.eup %7079  ;;  %5555 = vst [vmem:[#allocation56 + $0x2d8] sm:$0xff] %v7078_v24  ;;  %7099 = vrcp.f32 %v5236_v62  ;;  %v5869_v62 = vmul.f32 -1.442695, %v4754_v61  ;;  %v4757_v9 = vadd.f32 %v9595_v13, %v9712_v5  ;;  %v5840_v32 = vmul.f32 -1.442695, %v4629_v22 }
 0xf62   :  { %v7082_v15 = vpop.eup %7081  ;;  %5557 = vst [vmem:[#allocation56 + $0x2e8] sm:$0xff] %v7080_v33  ;;  %7101 = vrcp.f32 %v5132_v46  ;;  %v5855_v36 = vmul.f32 -1.442695, %v4746_v43 }
 0xf63   :  { %v7084_v37 = vpop.eup %7083  ;;  %5556 = vst [vmem:[#allocation56 + $0x2e0] sm:$0xff] %v7082_v15  ;;  %7103 = vpow2.f32 %v5841_v59  ;;  %v5876_v63 = vmul.f32 -1.442695, %v4757_v9  ;;  %v4749_v9 = vadd.f32 %v9599_v50, %v9712_v5 }
 0xf64   :  { %v7086_v29 = vpop.eup %7085  ;;  %5558 = vst [vmem:[#allocation56 + $0x2f0] sm:$0xff] %v7084_v37  ;;  %7105 = vpow2.f32 %v5826_v35  ;;  %v5846_v35 = vmul.f32 -1.442695, %v4631_v6  ;;  %v4633_v6 = vadd.f32 %v9597_v52, %v9672_v47 }
 0xf65   :  { %v7088_v11 = vpop.eup %7087  ;;  %5562 = vst [vmem:[#allocation56 + $0x310] sm:$0xff] %v7086_v29  ;;  %7107 = vpow2.f32 %v5827_v58 }
 0xf66   :  { %v7090_v23 = vpop.eup %7089  ;;  %5564 = vst [vmem:[#allocation56 + $0x320] sm:$0xff] %v7088_v11  ;;  %7109 = vpow2.f32 %v5832_v18 }
 0xf67   :  { %v7092_v54 = vpop.eup %7091  ;;  %5563 = vst [vmem:[#allocation56 + $0x318] sm:$0xff] %v7090_v23  ;;  %7111 = vpow2.f32 %v5848_v2 }
 0xf68   :  { %v7094_v59 = vpop.eup %7093  ;;  %5565 = vst [vmem:[#allocation56 + $0x328] sm:$0xff] %v7092_v54  ;;  %7113 = vpow2.f32 %v5833_v57 }
 0xf69   :  { %v7096_v24 = vpop.eup %7095  ;;  %5569 = vst [vmem:[#allocation56 + $0x348] sm:$0xff] %v7094_v59  ;;  %7115 = vpow2.f32 %v5834_v49 }
 0xf6a   :  { %v7098_v46 = vpop.eup %7097  ;;  %5571 = vst [vmem:[#allocation56 + $0x358] sm:$0xff] %v7096_v24  ;;  %7117 = vpow2.f32 %v5839_v27  ;;  %v4637_v24 = vadd.f32 %v9603_v31, %v9634_v41  ;;  %v4762_v31 = vadd.f32 %v9611_v4, %v9712_v5  ;;  %v4643_v4 = vadd.f32 %v9618_v1, %v9672_v47 }
 0xf6b   :  { %v7100_v19 = vpop.eup %7099  ;;  %5570 = vst [vmem:[#allocation56 + $0x350] sm:$0xff] %v7098_v46  ;;  %7119 = vpow2.f32 %v5869_v62  ;;  %v4786_v1 = vadd.f32 %v9630_v44, %v9712_v5 }
 0xf6c   :  { %v7102_v33 = vpop.eup %7101  ;;  %5572 = vst [vmem:[#allocation56 + $0x360] sm:$0xff] %v7100_v19  ;;  %7121 = vpow2.f32 %v5840_v32 }
 0xf6d   :  { %v7104_v13 = vpop.eup %7103  ;;  %5468 = vst [vmem:[#allocation56 + $0x20] sm:$0xff] %v7102_v33  ;;  %7123 = vpow2.f32 %v5855_v36  ;;  %v4639_v33 = vadd.f32 %v9608_v25, %v9672_v47  ;;  %v4773_v25 = vadd.f32 %v9616_v0, %v9712_v5  ;;  %v4647_v0 = vadd.f32 %v9628_v30, %v9634_v41 }
 0xf6e   :  { %v7106_v58 = vpop.eup %7105  ;;  %v5148_v3 = vadd.f32 1.0, %v7104_v13  ;;  %7125 = vpow2.f32 %v5846_v35  ;;  %v4770_v35 = vadd.f32 %v9606_v10, %v9712_v5  ;;  %v4641_v10 = vadd.f32 %v9613_v55, %v9634_v41 }
 0xf6f   :  { %v7108_v15 = vpop.eup %7107  ;;  %v5133_v18 = vadd.f32 1.0, %v7106_v58  ;;  %7127 = vpow2.f32 %v5876_v63  ;;  %v5847_v63 = vmul.f32 -1.442695, %v4633_v6  ;;  %v5862_v58 = vmul.f32 -1.442695, %v4749_v9 }
 0xf70   :  { %v7110_v34 = vpop.eup %7109  ;;  %7129 = vrcp.f32 %v5148_v3  ;;  %v5134_v37 = vadd.f32 1.0, %v7108_v15  ;;  %v5853_v15 = vmul.f32 -1.442695, %v4637_v24  ;;  %v4765_v55 = vadd.f32 %v9621_v28, %v9712_v5 }
 0xf71   :  { %v7112_v2 = vpop.eup %7111  ;;  %7131 = vrcp.f32 %v5133_v18  ;;  %v5139_v61 = vadd.f32 1.0, %v7110_v34  ;;  %v5897_v34 = vmul.f32 -1.442695, %v4770_v35  ;;  %v4649_v28 = vadd.f32 %v9636_v7, %v9672_v47 }
 0xf72   :  { %v7114_v29 = vpop.eup %7113  ;;  %7133 = vrcp.f32 %v5134_v37  ;;  %v5155_v57 = vadd.f32 1.0, %v7112_v2  ;;  %v5854_v2 = vmul.f32 -1.442695, %v4639_v33  ;;  %v5890_v6 = vmul.f32 -1.442695, %v4765_v55 }
 0xf73   :  { %v7116_v22 = vpop.eup %7115  ;;  %7135 = vrcp.f32 %v5139_v61  ;;  %v5140_v11 = vadd.f32 1.0, %v7114_v29  ;;  %v5883_v29 = vmul.f32 -1.442695, %v4762_v31  ;;  %v5867_v30 = vmul.f32 -1.442695, %v4647_v0 }
 0xf74   :  { %v7118_v49 = vpop.eup %7117  ;;  %7137 = vrcp.f32 %v5155_v57  ;;  %v5141_v43 = vadd.f32 1.0, %v7116_v22  ;;  %v5860_v22 = vmul.f32 -1.442695, %v4641_v10  ;;  %v5868_v9 = vmul.f32 -1.442695, %v4649_v28 }
 0xf75   :  { %v7120_v23 = vpop.eup %7119  ;;  %7139 = vrcp.f32 %v5140_v11  ;;  %v5146_v27 = vadd.f32 1.0, %v7118_v49  ;;  %v5904_v49 = vmul.f32 -1.442695, %v4773_v25  ;;  %v4653_v55 = vadd.f32 %v9647_v42, %v9672_v47 }
 0xf76   :  { %v7122_v54 = vpop.eup %7121  ;;  %7141 = vrcp.f32 %v5141_v43  ;;  %v5176_v62 = vadd.f32 1.0, %v7120_v23  ;;  %v5861_v23 = vmul.f32 -1.442695, %v4643_v4  ;;  %v4789_v4 = vadd.f32 %v9641_v45, %v9712_v5 }
 0xf77   :  { %v7124_v59 = vpop.eup %7123  ;;  %7143 = vrcp.f32 %v5146_v27  ;;  %v5147_v32 = vadd.f32 1.0, %v7122_v54  ;;  %v5875_v28 = vmul.f32 -1.442695, %v4653_v55 }
 0xf78   :  { %v7126_v36 = vpop.eup %7125  ;;  %7145 = vrcp.f32 %v5176_v62  ;;  %v5162_v46 = vadd.f32 1.0, %v7124_v59  ;;  %v5925_v62 = vmul.f32 -1.442695, %v4786_v1  ;;  %v5874_v1 = vmul.f32 -1.442695, %v9645_v38  ;;  %v9866_v38 = vld [vmem:[#allocation94_spill] sm:$0xff] }
 0xf79   :  { %v7128_v19 = vpop.eup %7127  ;;  %7147 = vrcp.f32 %v5147_v32  ;;  %v5153_v52 = vadd.f32 1.0, %v7126_v36  ;;  %v5932_v45 = vmul.f32 -1.442695, %v4789_v4 }
 0xf7a   :  { %v7130_v50 = vpop.eup %7129  ;;  %7149 = vrcp.f32 %v5162_v46  ;;  %v5183_v13 = vadd.f32 1.0, %v7128_v19 }
 0xf7b   :  { %v7132_v3 = vpop.eup %7131  ;;  %5484 = vst [vmem:[#allocation56 + $0xa0] sm:$0xff] %v7130_v50  ;;  %7151 = vrcp.f32 %v5153_v52 }
 0xf7c   :  { %v7134_v18 = vpop.eup %7133  ;;  %5469 = vst [vmem:[#allocation56 + $0x28] sm:$0xff] %v7132_v3  ;;  %7153 = vrcp.f32 %v5183_v13 }
 0xf7d   :  { %v7136_v37 = vpop.eup %7135  ;;  %5470 = vst [vmem:[#allocation56 + $0x30] sm:$0xff] %v7134_v18  ;;  %7155 = vpow2.f32 %v5847_v63  ;;  %v4778_v18 = vadd.f32 %v9638_v8, %v9712_v5  ;;  %v4781_v8 = vadd.f32 %v9649_v51, %v9712_v5  ;;  %v9865_v5 = vld [vmem:[#allocation96_spill] sm:$0xff] }
 0xf7e   :  { %v7138_v61 = vpop.eup %7137  ;;  %5475 = vst [vmem:[#allocation56 + $0x58] sm:$0xff] %v7136_v37  ;;  %7157 = vpow2.f32 %v5862_v58 }
 0xf7f   :  { %v7140_v57 = vpop.eup %7139  ;;  %5491 = vst [vmem:[#allocation56 + $0xd8] sm:$0xff] %v7138_v61  ;;  %7159 = vpow2.f32 %v5853_v15  ;;  %v5911_v0 = vmul.f32 -1.442695, %v4778_v18  ;;  %v5918_v51 = vmul.f32 -1.442695, %v4781_v8 }
 0xf80   :  { %v7142_v11 = vpop.eup %7141  ;;  %5476 = vst [vmem:[#allocation56 + $0x60] sm:$0xff] %v7140_v57  ;;  %7161 = vpow2.f32 %v5897_v34 }
 0xf81   :  { %v7144_v43 = vpop.eup %7143  ;;  %5477 = vst [vmem:[#allocation56 + $0x68] sm:$0xff] %v7142_v11  ;;  %7163 = vpow2.f32 %v5854_v2 }
 0xf82   :  { %v7146_v27 = vpop.eup %7145  ;;  %5482 = vst [vmem:[#allocation56 + $0x90] sm:$0xff] %v7144_v43  ;;  %7165 = vpow2.f32 %v5883_v29 }
 0xf83   :  { %v7148_v54 = vpop.eup %7147  ;;  %5512 = vst [vmem:[#allocation56 + $0x180] sm:$0xff] %v7146_v27  ;;  %7167 = vpow2.f32 %v5860_v22 }
 0xf84   :  { %v7150_v41 = vpop.eup %7149  ;;  %5483 = vst [vmem:[#allocation56 + $0x98] sm:$0xff] %v7148_v54  ;;  %7169 = vpow2.f32 %v5904_v49 }
 0xf85   :  { %v7152_v44 = vpop.eup %7151  ;;  %5498 = vst [vmem:[#allocation56 + $0x110] sm:$0xff] %v7150_v41  ;;  %7171 = vpow2.f32 %v5861_v23  ;;  %v4659_v23 = vadd.f32 %v9654_v21, %v9672_v47 }
 0xf86   :  { %v7154_v59 = vpop.eup %7153  ;;  %5489 = vst [vmem:[#allocation56 + $0xc8] sm:$0xff] %v7152_v44  ;;  %7173 = vpow2.f32 %v5890_v6  ;;  %v4663_v6 = vadd.f32 %v9865_v5, %v9672_v47 }
 0xf87   :  { %v7156_v7 = vpop.eup %7155  ;;  %5519 = vst [vmem:[#allocation56 + $0x1b8] sm:$0xff] %v7154_v59  ;;  %7175 = vpow2.f32 %v5867_v30  ;;  %v5881_v30 = vmul.f32 -1.442695, %v9866_v38  ;;  %v5882_v21 = vmul.f32 -1.442695, %v4659_v23 }
 0xf88   :  { %v7158_v32 = vpop.eup %7157  ;;  %v5154_v24 = vadd.f32 1.0, %v7156_v7  ;;  %7177 = vpow2.f32 %v5925_v62  ;;  %v4669_v62 = vadd.f32 %v9666_v60, %v9672_v47  ;;  %v5902_v60 = vmul.f32 -1.442695, %v9676_v48 }
 0xf89   :  { %v7160_v36 = vpop.eup %7159  ;;  %v5169_v46 = vadd.f32 1.0, %v7158_v32  ;;  %7179 = vpow2.f32 %v5868_v9  ;;  %v9867_v9 = vld [vmem:[#allocation95_spill] sm:$0xff]  ;;  %v5889_v32 = vmul.f32 -1.442695, %v4663_v6 }
 0xf8a   :  { %v7162_v35 = vpop.eup %7161  ;;  %7181 = vrcp.f32 %v5154_v24  ;;  %v5160_v19 = vadd.f32 1.0, %v7160_v36  ;;  %v5888_v59 = vmul.f32 -1.442695, %v9867_v9  ;;  %v5895_v36 = vmul.f32 -1.442695, %v9664_v14 }
 0xf8b   :  { %v7164_v52 = vpop.eup %7163  ;;  %7183 = vrcp.f32 %v5169_v46  ;;  %v5204_v63 = vadd.f32 1.0, %v7162_v35  ;;  %v5896_v35 = vmul.f32 -1.442695, %v4669_v62 }
 0xf8c   :  { %v7166_v33 = vpop.eup %7165  ;;  %7185 = vrcp.f32 %v5160_v19  ;;  %v5161_v50 = vadd.f32 1.0, %v7164_v52  ;;  %v5903_v52 = vmul.f32 -1.442695, %v9680_v39 }
 0xf8d   :  { %v7168_v13 = vpop.eup %7167  ;;  %7187 = vrcp.f32 %v5204_v63  ;;  %v5190_v58 = vadd.f32 1.0, %v7166_v33 }
 0xf8e   :  { %v7170_v31 = vpop.eup %7169  ;;  %7189 = vrcp.f32 %v5161_v50  ;;  %v5167_v3 = vadd.f32 1.0, %v7168_v13 }
 0xf8f   :  { %v7172_v15 = vpop.eup %7171  ;;  %7191 = vrcp.f32 %v5190_v58  ;;  %v5211_v10 = vadd.f32 1.0, %v7170_v31 }
 0xf90   :  { %v7174_v34 = vpop.eup %7173  ;;  %7193 = vrcp.f32 %v5167_v3  ;;  %v5168_v25 = vadd.f32 1.0, %v7172_v15 }
 0xf91   :  { %v7176_v37 = vpop.eup %7175  ;;  %7195 = vrcp.f32 %v5211_v10  ;;  %v5197_v2 = vadd.f32 1.0, %v7174_v34 }
 0xf92   :  { %v7178_v61 = vpop.eup %7177  ;;  %7197 = vrcp.f32 %v5168_v25  ;;  %v5174_v29 = vadd.f32 1.0, %v7176_v37 }
 0xf93   :  { %v7180_v57 = vpop.eup %7179  ;;  %7199 = vrcp.f32 %v5197_v2  ;;  %v5232_v22 = vadd.f32 1.0, %v7178_v61 }
 0xf94   :  { %v7182_v11 = vpop.eup %7181  ;;  %7201 = vrcp.f32 %v5174_v29  ;;  %v5175_v49 = vadd.f32 1.0, %v7180_v57 }
 0xf95   :  { %v7184_v43 = vpop.eup %7183  ;;  %5490 = vst [vmem:[#allocation56 + $0xd0] sm:$0xff] %v7182_v11  ;;  %7203 = vrcp.f32 %v5232_v22 }
 0xf96   :  { %v7186_v42 = vpop.eup %7185  ;;  %5505 = vst [vmem:[#allocation56 + $0x148] sm:$0xff] %v7184_v43  ;;  %7205 = vrcp.f32 %v5175_v49  ;;  %v5909_v49 = vmul.f32 -1.442695, %v9690_v17  ;;  %v5923_v17 = vmul.f32 -1.442695, %v9706_v16 }
 0xf97   :  { %v7188_v27 = vpop.eup %7187  ;;  %5496 = vst [vmem:[#allocation56 + $0x100] sm:$0xff] %v7186_v42  ;;  %7207 = vpow2.f32 %v5911_v0  ;;  %v5916_v42 = vmul.f32 -1.442695, %v9698_v26  ;;  %v5930_v26 = vmul.f32 -1.442695, %v9715_v20 }
 0xf98   :  { %v7190_v54 = vpop.eup %7189  ;;  %5540 = vst [vmem:[#allocation56 + $0x260] sm:$0xff] %v7188_v27  ;;  %7209 = vpow2.f32 %v5874_v1  ;;  %v5917_v27 = vmul.f32 -1.442695, %v9702_v53  ;;  %v5931_v53 = vmul.f32 -1.442695, %v9718_v12 }
 0xf99   :  { %v7192_v41 = vpop.eup %7191  ;;  %5497 = vst [vmem:[#allocation56 + $0x108] sm:$0xff] %v7190_v54  ;;  %7211 = vpow2.f32 %v5932_v45  ;;  %v5910_v45 = vmul.f32 -1.442695, %v9694_v40  ;;  %v5924_v40 = vmul.f32 -1.442695, %v9709_v56 }
 0xf9a   :  { %v7194_v44 = vpop.eup %7193  ;;  %5526 = vst [vmem:[#allocation56 + $0x1f0] sm:$0xff] %v7192_v41  ;;  %7213 = vpow2.f32 %v5875_v28 }
 0xf9b   :  { %v7196_v7 = vpop.eup %7195  ;;  %5503 = vst [vmem:[#allocation56 + $0x138] sm:$0xff] %v7194_v44  ;;  %7215 = vpow2.f32 %v5918_v51 }
 0xf9c   :  { %v7198_v24 = vpop.eup %7197  ;;  %5547 = vst [vmem:[#allocation56 + $0x298] sm:$0xff] %v7196_v7  ;;  %7217 = vpow2.f32 %v5881_v30 }
 0xf9d   :  { %v7200_v46 = vpop.eup %7199  ;;  %5504 = vst [vmem:[#allocation56 + $0x140] sm:$0xff] %v7198_v24  ;;  %7219 = vpow2.f32 %v5882_v21 }
 0xf9e   :  { %v7202_v19 = vpop.eup %7201  ;;  %5533 = vst [vmem:[#allocation56 + $0x228] sm:$0xff] %v7200_v46  ;;  %7221 = vpow2.f32 %v5888_v59 }
 0xf9f   :  { %v7204_v47 = vpop.eup %7203  ;;  %5510 = vst [vmem:[#allocation56 + $0x170] sm:$0xff] %v7202_v19  ;;  %7223 = vpow2.f32 %v5889_v32 }
 0xfa0   :  { %v7206_v63 = vpop.eup %7205  ;;  %5568 = vst [vmem:[#allocation56 + $0x340] sm:$0xff] %v7204_v47  ;;  %7225 = vpow2.f32 %v5895_v36 }
 0xfa1   :  { %v7208_v33 = vpop.eup %7207  ;;  %5511 = vst [vmem:[#allocation56 + $0x178] sm:$0xff] %v7206_v63  ;;  %7227 = vpow2.f32 %v5896_v35 }
 0xfa2   :  { %v7210_v14 = vpop.eup %7209  ;;  %v5218_v50 = vadd.f32 1.0, %v7208_v33  ;;  %7229 = vpow2.f32 %v5902_v60 }
 0xfa3   :  { %v7212_v13 = vpop.eup %7211  ;;  %v5181_v58 = vadd.f32 1.0, %v7210_v14  ;;  %7231 = vpow2.f32 %v5903_v52 }
 0xfa4   :  { %v7214_v31 = vpop.eup %7213  ;;  %7233 = vrcp.f32 %v5218_v50  ;;  %v5239_v48 = vadd.f32 1.0, %v7212_v13 }
 0xfa5   :  { %v7216_v3 = vpop.eup %7215  ;;  %7235 = vrcp.f32 %v5181_v58  ;;  %v5182_v15 = vadd.f32 1.0, %v7214_v31 }
 0xfa6   :  { %v7218_v10 = vpop.eup %7217  ;;  %7237 = vrcp.f32 %v5239_v48  ;;  %v5225_v39 = vadd.f32 1.0, %v7216_v3 }
 0xfa7   :  { %v7220_v18 = vpop.eup %7219  ;;  %7239 = vrcp.f32 %v5182_v15  ;;  %v5188_v34 = vadd.f32 1.0, %v7218_v10 }
 0xfa8   :  { %v7222_v25 = vpop.eup %7221  ;;  %7241 = vrcp.f32 %v5225_v39  ;;  %v5189_v37 = vadd.f32 1.0, %v7220_v18 }
 0xfa9   :  { %v7224_v2 = vpop.eup %7223  ;;  %7243 = vrcp.f32 %v5188_v34  ;;  %v5195_v4 = vadd.f32 1.0, %v7222_v25 }
 0xfaa   :  { %v7226_v61 = vpop.eup %7225  ;;  %7245 = vrcp.f32 %v5189_v37  ;;  %v5196_v29 = vadd.f32 1.0, %v7224_v2 }
 0xfab   :  { %v7228_v55 = vpop.eup %7227  ;;  %7247 = vrcp.f32 %v5195_v4  ;;  %v5202_v57 = vadd.f32 1.0, %v7226_v61 }
 0xfac   :  { %v7230_v22 = vpop.eup %7229  ;;  %7249 = vrcp.f32 %v5196_v29  ;;  %v5203_v0 = vadd.f32 1.0, %v7228_v55 }
 0xfad   :  { %v7232_v8 = vpop.eup %7231  ;;  %7251 = vrcp.f32 %v5202_v57  ;;  %v5209_v11 = vadd.f32 1.0, %v7230_v22 }
 0xfae   :  { %v7234_v1 = vpop.eup %7233  ;;  %7253 = vrcp.f32 %v5203_v0  ;;  %v5210_v43 = vadd.f32 1.0, %v7232_v8 }
 0xfaf   :  { %v7236_v23 = vpop.eup %7235  ;;  %5554 = vst [vmem:[#allocation56 + $0x2d0] sm:$0xff] %v7234_v1  ;;  %7255 = vrcp.f32 %v5209_v11 }
 0xfb0   :  { %v7238_v28 = vpop.eup %7237  ;;  %5517 = vst [vmem:[#allocation56 + $0x1a8] sm:$0xff] %v7236_v23  ;;  %7257 = vrcp.f32 %v5210_v43 }
 0xfb1   :  { %v7240_v51 = vpop.eup %7239  ;;  %5575 = vst [vmem:[#allocation56 + $0x378] sm:$0xff] %v7238_v28  ;;  %7259 = vpow2.f32 %v5909_v49 }
 0xfb2   :  { %v7242_v5 = vpop.eup %7241  ;;  %5518 = vst [vmem:[#allocation56 + $0x1b0] sm:$0xff] %v7240_v51  ;;  %7261 = vpow2.f32 %v5910_v45 }
 0xfb3   :  { %v7244_v6 = vpop.eup %7243  ;;  %5561 = vst [vmem:[#allocation56 + $0x308] sm:$0xff] %v7242_v5  ;;  %7263 = vpow2.f32 %v5916_v42 }
 0xfb4   :  { %v7246_v54 = vpop.eup %7245  ;;  %5524 = vst [vmem:[#allocation56 + $0x1e0] sm:$0xff] %v7244_v6  ;;  %7265 = vpow2.f32 %v5917_v27 }
 0xfb5   :  { %v7248_v38 = vpop.eup %7247  ;;  %5525 = vst [vmem:[#allocation56 + $0x1e8] sm:$0xff] %v7246_v54  ;;  %7267 = vpow2.f32 %v5923_v17 }
 0xfb6   :  { %v7250_v30 = vpop.eup %7249  ;;  %5531 = vst [vmem:[#allocation56 + $0x218] sm:$0xff] %v7248_v38  ;;  %7269 = vpow2.f32 %v5924_v40 }
 0xfb7   :  { %v7252_v16 = vpop.eup %7251  ;;  %5532 = vst [vmem:[#allocation56 + $0x220] sm:$0xff] %v7250_v30  ;;  %7271 = vpow2.f32 %v5930_v26 }
 0xfb8   :  { %v7254_v56 = vpop.eup %7253  ;;  %5538 = vst [vmem:[#allocation56 + $0x250] sm:$0xff] %v7252_v16  ;;  %7273 = vpow2.f32 %v5931_v53 }
 0xfb9   :  { %v7256_v41 = vpop.eup %7255  ;;  %5539 = vst [vmem:[#allocation56 + $0x258] sm:$0xff] %v7254_v56 }
 0xfba   :  { %v7258_v20 = vpop.eup %7257  ;;  %5545 = vst [vmem:[#allocation56 + $0x288] sm:$0xff] %v7256_v41 }
 0xfbb   :  { %v7260_v21 = vpop.eup %7259  ;;  %5546 = vst [vmem:[#allocation56 + $0x290] sm:$0xff] %v7258_v20 }
 0xfbc   :  { %v7262_v62 = vpop.eup %7261  ;;  %v5216_v12 = vadd.f32 1.0, %v7260_v21 }
 0xfbd   :  { %v7264_v44 = vpop.eup %7263  ;;  %v5217_v9 = vadd.f32 1.0, %v7262_v62 }
 0xfbe   :  { %v7266_v59 = vpop.eup %7265  ;;  %7275 = vrcp.f32 %v5216_v12  ;;  %v5223_v7 = vadd.f32 1.0, %v7264_v44 }
 0xfbf   :  { %v7268_v32 = vpop.eup %7267  ;;  %7277 = vrcp.f32 %v5217_v9  ;;  %v5224_v24 = vadd.f32 1.0, %v7266_v59 }
 0xfc0   :  { %v7270_v36 = vpop.eup %7269  ;;  %7279 = vrcp.f32 %v5223_v7  ;;  %v5230_v46 = vadd.f32 1.0, %v7268_v32 }
 0xfc1   :  { %v7272_v35 = vpop.eup %7271  ;;  %7281 = vrcp.f32 %v5224_v24  ;;  %v5231_v19 = vadd.f32 1.0, %v7270_v36 }
 0xfc2   :  { %v7274_v60 = vpop.eup %7273  ;;  %7283 = vrcp.f32 %v5230_v46  ;;  %v5237_v47 = vadd.f32 1.0, %v7272_v35 }
 0xfc3   :  { %7285 = vrcp.f32 %v5231_v19  ;;  %v5238_v52 = vadd.f32 1.0, %v7274_v60 }
 0xfc4   :  { %7287 = vrcp.f32 %v5237_v47 }
 0xfc5   :  { %7289 = vrcp.f32 %v5238_v52 }
 0xfc8   :  { %v7276_v63 = vpop.eup %7275 }
 0xfc9   :  { %v7278_v33 = vpop.eup %7277  ;;  %5552 = vst [vmem:[#allocation56 + $0x2c0] sm:$0xff] %v7276_v63 }
 0xfca   :  { %v7280_v14 = vpop.eup %7279  ;;  %5553 = vst [vmem:[#allocation56 + $0x2c8] sm:$0xff] %v7278_v33 }
 0xfcb   :  { %v7282_v50 = vpop.eup %7281  ;;  %5559 = vst [vmem:[#allocation56 + $0x2f8] sm:$0xff] %v7280_v14 }
 0xfcc   :  { %v7284_v13 = vpop.eup %7283  ;;  %5560 = vst [vmem:[#allocation56 + $0x300] sm:$0xff] %v7282_v50 }
 0xfcd   :  { %v7286_v58 = vpop.eup %7285  ;;  %5566 = vst [vmem:[#allocation56 + $0x330] sm:$0xff] %v7284_v13 }
 0xfce   :  { %v7288_v31 = vpop.eup %7287  ;;  %5567 = vst [vmem:[#allocation56 + $0x338] sm:$0xff] %v7286_v58 }
 0xfcf   :  { %v7290_v48 = vpop.eup %7289  ;;  %5573 = vst [vmem:[#allocation56 + $0x368] sm:$0xff] %v7288_v31 }
 0xfd0   :  { %5574 = vst [vmem:[#allocation56 + $0x370] sm:$0xff] %v7290_v48 }
 0xfd1   :  { %8073 = shalt.err (!%p8070_p4)
}
 0xfd2   :  { %s8074_s2 = scalar_lea.hbm %s8383_s5, 14336 }
 0xfd3   :  { %p8075_p5 = scmp.ne.s32.totalorder %s8383_s5, %s8074_s2  ;;  %p8078_p6 = scmp.lt.u32.totalorder %s8074_s2, %s8383_s5 }
 0xfd5   :  { %p8080_p7 = pnand %p8078_p6, %p8075_p5 }
 0xfd7   :  { %8083 = shalt.err (!%p8080_p7)
}
 0xfd8   :  { %5587 = dma.vmem_to_hbm [thread:$0]  %s5582_s27, 14336, %s8383_s5, [#allocation4], %s8179_s8, %s8179_s8, %s8180_s13  }
 0xfd9   :  { %8120 = dma.done.wait [#allocation4], 14336  }
 0xfda   :  { %8121 = vsyncadd [#allocation4], 4294952960 }
 0xfdb   :  { %5591 = vsyncpa [#allocation3], 1 }
 0xfdc   :  { %5592 = vsyncpa [#allocation6], 1 }
 0xfdd   :  { %5593 = vsyncpa [#allocation9], 1 }
 0xfde   :  { %5594 = vsyncpa [#allocation12], 1 }
 0xfdf   :  { %5595 = vsyncpa [#allocation15], 1 }
 0xfe0   :  { %5596 = vsyncpa [#allocation18], 1 }
 0xfe1   :  { %5597 = vsyncpa [#allocation21], 1 }
 0xfe2   :  { %5598 = vsyncpa [#allocation24], 1 }
 0xfe3   :  { %5599 = vsyncpa [#allocation27], 1 }
 0xfe4   :  { %5600 = vsyncpa [#allocation30], 1 }
 0xfe5   :  { %5601 = vsyncpa [#allocation33], 1 }
 0xfe6   :  { %5602 = vsyncpa [#allocation36], 1 }
 0xfe7   :  { %5603 = vsyncpa [#allocation39], 1 }
 0xfe8   :  { %5604 = vsyncpa [#allocation42], 1 }
 0xfe9   :  { %5605 = vsyncpa [#allocation45], 1 }
 0xfea   :  { %5606 = vsyncpa [#allocation48], 1 }
 0xfeb   :  { %5607 = vsyncpa [#allocation51], 1 }
 0xfec   :  { %5608 = vsyncpa [#allocation54], 1 }
 0xfed   :  { %5609 = vsyncpa [#allocation4], 1 }

</bundles_post_ra>
